<compile_context>
chip_gen: v5e
topology: v5e:2x2
jax: 0.10.0
libtpu: 0.0.40
codegen_flags: <defaults>
</compile_context>

<pallas_src>
import math
from functools import partial

import jax
import jax.numpy as jnp
from jax import lax
from jax.experimental import pallas as pl
from jax.experimental.pallas import tpu as pltpu  # noqa: F401  (kept for convention)

# ---- small GANConfig analogue (lane-friendly shapes) ----
VOCAB = 128          # vocab_size (kept = 128 so logits stay lane-dense)
EMB = 32             # embedding_dim
HID = 32             # hidden_dim
LATENT = 16          # latent_dim
LAYERS = 3           # num_layers
SEQ = 8              # max_seq_length
BATCH = 2
N_ATTACK_TYPES = 10
LN_EPS = 1e-5

# ---- row offsets inside the single packed weight bundle [WB_ROWS, WB_COLS] ----
WB_COLS = 3 * HID + VOCAB          # 224 (width of the fused qkv|vocab projection)
R_EMBP  = 0                        # [V, 4H]  emb_table @ wih0[:E]  (precomputed)
R_WHH0  = R_EMBP + VOCAB           # 128  [H, 4H] recurrent weights, layer 0
R_WHH1  = R_WHH0 + HID             # 160  layer 1
R_WHH2  = R_WHH1 + HID             # 192  layer 2
R_WIH1  = R_WHH2 + HID             # 224  [H, 4H] layer-1 input weights
R_WIH2  = R_WIH1 + HID             # 256  layer-2 input weights
R_WIH0  = R_WIH2 + HID             # 288  [E+H, 4H] layer-0 input weights (for const0)
R_WNP   = R_WIH0 + EMB + HID       # 352  [LATENT, H] noise projection
R_WPROJ = R_WNP + LATENT           # 368  [H, 224] = [wout | wq | wk | wv]
R_BIAS  = R_WPROJ + HID            # 400  row: bnp(0:32) | gamma(32:64) | beta(64:96)
R_B0    = R_BIAS + 1               # 401  layer-0 gate bias (b_ih + b_hh)
R_B1    = R_B0 + 1                 # 402  layer-1
R_B2    = R_B1 + 1                 # 403  layer-2
R_BPROJ = R_B2 + 1                 # 404  row: bout(0:128) | bq | bk | bv
WB_ROWS = 408                      # padded to a multiple of 8


# ---------------------------------------------------------------------------
# Fused generator kernel
# ---------------------------------------------------------------------------
def attack_generator_kernel(noise_ref, attack_emb_ref, gumbel_ref, wb_ref, out_ref,
                            *, inv_temp):
    S, B, V = out_ref.shape
    H, E = HID, EMB
    f32 = jnp.float32

    # ---------------- one-time precompute (off the serial recurrence) --------
    bnp    = wb_ref[R_BIAS:R_BIAS + 1, 0:H]
    gamma  = wb_ref[R_BIAS:R_BIAS + 1, H:2 * H]
    beta   = wb_ref[R_BIAS:R_BIAS + 1, 2 * H:3 * H]
    b0     = wb_ref[R_B0:R_B0 + 1, 0:4 * H]
    b1     = wb_ref[R_B1:R_B1 + 1, 0:4 * H]
    b2     = wb_ref[R_B2:R_B2 + 1, 0:4 * H]
    b_proj = wb_ref[R_BPROJ:R_BPROJ + 1, 0:WB_COLS]

    # noise projection h = ReLU(noise @ Wnp + bnp); Dropout == identity (inference)
    h_init = jnp.maximum(
        jnp.dot(noise_ref[...], wb_ref[R_WNP:R_WNP + LATENT, 0:H],
                preferred_element_type=f32) + bnp, 0.0)                  # [B, H]

    # constant part of the layer-0 gate pre-activation:
    #   attack_embed @ Wtok + h_init @ Whfix + b0   (token part handled per step)
    const0 = (jnp.dot(attack_emb_ref[...], wb_ref[R_WIH0:R_WIH0 + E, 0:4 * H],
                      preferred_element_type=f32)
              + jnp.dot(h_init, wb_ref[R_WIH0 + E:R_WIH0 + E + H, 0:4 * H],
                        preferred_element_type=f32)
              + b0)                                                      # [B, 4H]

    inv_scale = 1.0 / math.sqrt(H)
    col = lax.broadcasted_iota(jnp.int32, (B, V), 1)
    onehot = (col == 1).astype(f32)            # input_seq starts as token id 1

    # initial hidden: every layer starts from the noise projection h; c = 0
    h0 = h1 = h2 = h_init
    c0 = c1 = c2 = jnp.zeros((B, H), f32)
    q_prev = jnp.zeros((B, H), f32)
    k_list, v_list = [], []                    # attention K/V cache kept in vregs

    def lstm_cell(gates, c_prev):
        # one EUP sigmoid over the whole [B,4H] vreg; slice i/f/o from the result
        sg = jax.nn.sigmoid(gates)
        i_g, f_g, o_g = sg[:, 0:H], sg[:, H:2 * H], sg[:, 3 * H:4 * H]
        g_g = jnp.tanh(gates[:, 2 * H:3 * H])
        c = f_g * c_prev + i_g * g_g
        h = o_g * jnp.tanh(c)
        return h, c

    # Fully-unrolled generation loop.  Weights are re-read from the VMEM bundle at
    # the point of use so they are never held live across iterations (no spills).
    for t in range(S):
        # ---- stacked LSTM, one time step -----------------------------------
        # These four matmuls are mutually independent -> they pipeline through
        # the MXU back-to-back.  (A single block-diagonal fused matmul per the
        # review needs an unaligned lane concat; kept separate for safe lowering.)
        g_tok = jnp.dot(onehot, wb_ref[R_EMBP:R_EMBP + V, 0:4 * H],
                        preferred_element_type=f32)
        r0 = jnp.dot(h0, wb_ref[R_WHH0:R_WHH0 + H, 0:4 * H], preferred_element_type=f32)
        r1 = jnp.dot(h1, wb_ref[R_WHH1:R_WHH1 + H, 0:4 * H], preferred_element_type=f32)
        r2 = jnp.dot(h2, wb_ref[R_WHH2:R_WHH2 + H, 0:4 * H], preferred_element_type=f32)

        h0, c0 = lstm_cell(g_tok + r0 + const0, c0)
        gates1 = jnp.dot(h0, wb_ref[R_WIH1:R_WIH1 + H, 0:4 * H],
                         preferred_element_type=f32) + r1 + b1
        h1, c1 = lstm_cell(gates1, c1)
        gates2 = jnp.dot(h1, wb_ref[R_WIH2:R_WIH2 + H, 0:4 * H],
                         preferred_element_type=f32) + r2 + b2
        h2, c2 = lstm_cell(gates2, c2)                                   # LSTM top

        # ---- self-attention over previously emitted outputs (query = last) --
        if t == 0:
            attn = jnp.zeros((B, H), f32)      # reference adds attention only if t>0
        else:
            k_all = jnp.stack(k_list, axis=0)                            # [t, B, H]
            v_all = jnp.stack(v_list, axis=0)
            s = jnp.sum(k_all * q_prev[None, :, :], axis=-1,
                        keepdims=True) * inv_scale                       # [t, B, 1]
            m = jnp.max(s, axis=0, keepdims=True)
            e = jnp.exp(s - m)
            w = e * pl.reciprocal(jnp.sum(e, axis=0, keepdims=True), approx=True)
            attn = jnp.sum(w * v_all, axis=0)                            # [B, H]

        # ---- residual add + LayerNorm ----
        x = h2 + attn
        mu = jnp.mean(x, axis=-1, keepdims=True)
        xc = x - mu
        var = jnp.mean(xc * xc, axis=-1, keepdims=True)
        o_t = xc * lax.rsqrt(var + LN_EPS) * gamma + beta                # [B, H]

        # ---- fused vocab + QKV projection: one [H, 3H+V] matmul -------------
        proj = jnp.dot(o_t, wb_ref[R_WPROJ:R_WPROJ + H, 0:WB_COLS],
                       preferred_element_type=f32) + b_proj              # [B, 224]
        logits = proj[:, 0:V]            # == output_projection(o_t), no temperature
        q_prev = proj[:, V:V + H]        # query feeds the *next* step's attention
        k_list.append(proj[:, V + H:V + 2 * H])
        v_list.append(proj[:, V + 2 * H:V + 3 * H])

        out_ref[t] = logits              # final_logits = output_projection(all_outputs)

        # ---- Gumbel-max sampling == multinomial(softmax(logits / temperature)) ----
        z = logits * inv_temp + gumbel_ref[t]
        zmax = jnp.max(z, axis=-1, keepdims=True)
        next_tok = jnp.min(jnp.where(z >= zmax, col, V), axis=-1, keepdims=True)
        onehot = (col == next_tok).astype(f32)
        # TODO(synk): data-dependent early break when (next_token == 2).all() is not
        # implemented; the kernel always emits max_seq_length steps.


# ---------------------------------------------------------------------------
# Host-side, parameter-only packing (done once, not per call)
# ---------------------------------------------------------------------------
def prepare_fused(p):
    E, H, V = EMB, HID, VOCAB
    emb_proj = p['emb'] @ p['wih0'][:E]                                  # [V, 4H]
    wb = jnp.zeros((WB_ROWS, WB_COLS), jnp.float32)
    wb = wb.at[R_EMBP:R_EMBP + V, 0:4 * H].set(emb_proj)
    wb = wb.at[R_WHH0:R_WHH0 + H, 0:4 * H].set(p['whh'][0])
    wb = wb.at[R_WHH1:R_WHH1 + H, 0:4 * H].set(p['whh'][1])
    wb = wb.at[R_WHH2:R_WHH2 + H, 0:4 * H].set(p['whh'][2])
    wb = wb.at[R_WIH1:R_WIH1 + H, 0:4 * H].set(p['wih_rest'][0])
    wb = wb.at[R_WIH2:R_WIH2 + H, 0:4 * H].set(p['wih_rest'][1])
    wb = wb.at[R_WIH0:R_WIH0 + E + H, 0:4 * H].set(p['wih0'])
    wb = wb.at[R_WNP:R_WNP + LATENT, 0:H].set(p['wnp'])
    w_proj = jnp.concatenate([p['wout'], p['wqkv']], axis=1)            # [H, V+3H]
    wb = wb.at[R_WPROJ:R_WPROJ + H, 0:WB_COLS].set(w_proj)
    wb = wb.at[R_BIAS, 0:H].set(p['bnp'][0])
    wb = wb.at[R_BIAS, H:2 * H].set(p['gamma'][0])
    wb = wb.at[R_BIAS, 2 * H:3 * H].set(p['beta'][0])
    wb = wb.at[R_B0, 0:4 * H].set(p['b'][0, 0])
    wb = wb.at[R_B1, 0:4 * H].set(p['b'][1, 0])
    wb = wb.at[R_B2, 0:4 * H].set(p['b'][2, 0])
    wb = wb.at[R_BPROJ, 0:WB_COLS].set(
        jnp.concatenate([p['bout'][0], p['bqkv'][0]], axis=0))
    return {'wb': wb, 'attack_emb': p['attack_emb']}


# ---------------------------------------------------------------------------
# Wrapper
# ---------------------------------------------------------------------------
@partial(jax.jit, static_argnames=('temperature',))
def attack_generator_forward(fused, noise, attack_type, key, temperature=1.0):
    B = noise.shape[0]
    attack_embed = fused['attack_emb'][attack_type]                # [B, E] gather glue
    gumbel = jax.random.gumbel(key, (SEQ, B, VOCAB), jnp.float32)  # pre-drawn noise

    kernel = partial(attack_generator_kernel, inv_temp=1.0 / float(temperature))
    logits_sbv = pl.pallas_call(
        kernel,
        out_shape=jax.ShapeDtypeStruct((SEQ, B, VOCAB), jnp.float32),
    )(noise, attack_embed, gumbel, fused['wb'])
    return jnp.transpose(logits_sbv, (1, 0, 2))                    # [B, S, V]


# ---------------------------------------------------------------------------
# Deterministic parameter init (PyTorch-style uniform fan-in bounds)
# ---------------------------------------------------------------------------
def init_params(key):
    keys = iter(jax.random.split(key, 32))

    def u(shape, bound):
        return jax.random.uniform(next(keys), shape, jnp.float32, -bound, bound)

    hb = 1.0 / math.sqrt(HID)
    nb = 1.0 / math.sqrt(LATENT)
    p = {}
    p['wnp'] = u((LATENT, HID), nb)
    p['bnp'] = u((1, HID), nb)
    p['emb'] = u((VOCAB, EMB), 1.0)
    p['attack_emb'] = u((N_ATTACK_TYPES, EMB), 1.0)
    p['wih0'] = u((EMB + HID, 4 * HID), hb)              # layer-0 [E+H, 4H]
    p['wih_rest'] = u((LAYERS - 1, HID, 4 * HID), hb)    # layers 1.. [H, 4H]
    p['whh'] = u((LAYERS, HID, 4 * HID), hb)
    p['b'] = u((LAYERS, 1, 4 * HID), hb)                 # b_ih + b_hh summed
    p['wqkv'] = u((HID, 3 * HID), hb)                    # fused Wq|Wk|Wv
    p['bqkv'] = u((1, 3 * HID), hb)
    p['gamma'] = jnp.ones((1, HID), jnp.float32)         # LayerNorm weight
    p['beta'] = jnp.zeros((1, HID), jnp.float32)         # LayerNorm bias
    p['wout'] = u((HID, VOCAB), hb)
    p['bout'] = u((1, VOCAB), hb)
    return p


if __name__ == "__main__":
    key = jax.random.PRNGKey(0)
    pkey, nkey, akey, skey = jax.random.split(key, 4)
    params = init_params(pkey)
    fused = prepare_fused(params)      # parameter-only packing, done once
    noise = jax.random.normal(nkey, (BATCH, LATENT), jnp.float32)
    attack_type = jax.random.randint(akey, (BATCH,), 0, N_ATTACK_TYPES, dtype=jnp.int32)

    logits = attack_generator_forward(fused, noise, attack_type, skey, temperature=1.0)
    logits = jax.block_until_ready(logits)
    assert logits.shape == (BATCH, SEQ, VOCAB)
    assert bool(jnp.all(jnp.isfinite(logits)))
    print("KERNEL_OK")
</pallas_src>

<mosaic_0001>
module attributes {stable_mosaic.version = 11 : i64} {
  func.func @attack_generator_kernel(%arg0: memref<2x16xf32, #tpu.memory_space<vmem>>, %arg1: memref<2x32xf32, #tpu.memory_space<vmem>>, %arg2: memref<8x2x128xf32, #tpu.memory_space<vmem>>, %arg3: memref<408x224xf32, #tpu.memory_space<vmem>>, %arg4: memref<8x2x128xf32, #tpu.memory_space<vmem>>) attributes {dimension_semantics = [], scalar_prefetch = 0 : i64, scratch_operands = 0 : i64, tpu.core_type = #tpu.core_type<tc>} {
    %c400 = arith.constant 400 : index
    %c0 = arith.constant 0 : index
    %0 = vector.load %arg3[%c400, %c0] : memref<408x224xf32, #tpu.memory_space<vmem>>, vector<1x32xf32>
    %c400_0 = arith.constant 400 : index
    %c32 = arith.constant 32 : index
    %1 = vector.load %arg3[%c400_0, %c32] : memref<408x224xf32, #tpu.memory_space<vmem>>, vector<1x32xf32>
    %c400_1 = arith.constant 400 : index
    %c64 = arith.constant 64 : index
    %2 = vector.load %arg3[%c400_1, %c64] : memref<408x224xf32, #tpu.memory_space<vmem>>, vector<1x32xf32>
    %c401 = arith.constant 401 : index
    %c0_2 = arith.constant 0 : index
    %3 = vector.load %arg3[%c401, %c0_2] : memref<408x224xf32, #tpu.memory_space<vmem>>, vector<1x128xf32>
    %c402 = arith.constant 402 : index
    %c0_3 = arith.constant 0 : index
    %4 = vector.load %arg3[%c402, %c0_3] : memref<408x224xf32, #tpu.memory_space<vmem>>, vector<1x128xf32>
    %c403 = arith.constant 403 : index
    %c0_4 = arith.constant 0 : index
    %5 = vector.load %arg3[%c403, %c0_4] : memref<408x224xf32, #tpu.memory_space<vmem>>, vector<1x128xf32>
    %c404 = arith.constant 404 : index
    %c0_5 = arith.constant 0 : index
    %6 = vector.load %arg3[%c404, %c0_5] : memref<408x224xf32, #tpu.memory_space<vmem>>, vector<1x224xf32>
    %c0_6 = arith.constant 0 : index
    %c0_7 = arith.constant 0 : index
    %7 = vector.load %arg0[%c0_6, %c0_7] : memref<2x16xf32, #tpu.memory_space<vmem>>, vector<2x16xf32>
    %c352 = arith.constant 352 : index
    %c0_8 = arith.constant 0 : index
    %8 = vector.load %arg3[%c352, %c0_8] : memref<408x224xf32, #tpu.memory_space<vmem>>, vector<16x32xf32>
    %cst = arith.constant dense<0.000000e+00> : vector<2x32xf32>
    %9 = tpu.matmul %7, %8, %cst {dimension_numbers = #tpu.dot_dimension_numbers<[1], [0], [0], [1], [0, 0, 1, 1], [], []>} : vector<2x16xf32>, vector<16x32xf32>, vector<2x32xf32> -> vector<2x32xf32>
    %10 = vector.broadcast %0 : vector<1x32xf32> to vector<2x32xf32>
    %11 = arith.addf %9, %10 : vector<2x32xf32>
    %cst_9 = arith.constant 0.000000e+00 : f32
    %12 = vector.broadcast %cst_9 : f32 to vector<2x32xf32>
    %13 = arith.maximumf %11, %12 : vector<2x32xf32>
    %c0_10 = arith.constant 0 : index
    %c0_11 = arith.constant 0 : index
    %14 = vector.load %arg1[%c0_10, %c0_11] : memref<2x32xf32, #tpu.memory_space<vmem>>, vector<2x32xf32>
    %c288 = arith.constant 288 : index
    %c0_12 = arith.constant 0 : index
    %15 = vector.load %arg3[%c288, %c0_12] : memref<408x224xf32, #tpu.memory_space<vmem>>, vector<32x128xf32>
    %cst_13 = arith.constant dense<0.000000e+00> : vector<2x128xf32>
    %16 = tpu.matmul %14, %15, %cst_13 {dimension_numbers = #tpu.dot_dimension_numbers<[1], [0], [0], [1], [0, 0, 1, 1], [], []>} : vector<2x32xf32>, vector<32x128xf32>, vector<2x128xf32> -> vector<2x128xf32>
    %c320 = arith.constant 320 : index
    %c0_14 = arith.constant 0 : index
    %17 = vector.load %arg3[%c320, %c0_14] : memref<408x224xf32, #tpu.memory_space<vmem>>, vector<32x128xf32>
    %cst_15 = arith.constant dense<0.000000e+00> : vector<2x128xf32>
    %18 = tpu.matmul %13, %17, %cst_15 {dimension_numbers = #tpu.dot_dimension_numbers<[1], [0], [0], [1], [0, 0, 1, 1], [], []>} : vector<2x32xf32>, vector<32x128xf32>, vector<2x128xf32> -> vector<2x128xf32>
    %19 = arith.addf %16, %18 : vector<2x128xf32>
    %20 = vector.broadcast %3 : vector<1x128xf32> to vector<2x128xf32>
    %21 = arith.addf %19, %20 : vector<2x128xf32>
    %22 = tpu.iota {dimensions = array<i32: 1>} : vector<2x128xi32>
    %c1_i32 = arith.constant 1 : i32
    %23 = vector.broadcast %c1_i32 : i32 to vector<2x128xi32>
    %24 = arith.cmpi eq, %22, %23 : vector<2x128xi32>
    %25 = arith.extui %24 : vector<2x128xi1> to vector<2x128xi32>
    %26 = arith.sitofp %25 : vector<2x128xi32> to vector<2x128xf32>
    %cst_16 = arith.constant 0.000000e+00 : f32
    %27 = vector.broadcast %cst_16 : f32 to vector<2x32xf32>
    %c0_17 = arith.constant 0 : index
    %c0_18 = arith.constant 0 : index
    %28 = vector.load %arg3[%c0_17, %c0_18] : memref<408x224xf32, #tpu.memory_space<vmem>>, vector<128x128xf32>
    %cst_19 = arith.constant dense<0.000000e+00> : vector<2x128xf32>
    %29 = tpu.matmul %26, %28, %cst_19 {dimension_numbers = #tpu.dot_dimension_numbers<[1], [0], [0], [1], [0, 0, 1, 1], [], []>} : vector<2x128xf32>, vector<128x128xf32>, vector<2x128xf32> -> vector<2x128xf32>
    %c128 = arith.constant 128 : index
    %c0_20 = arith.constant 0 : index
    %30 = vector.load %arg3[%c128, %c0_20] : memref<408x224xf32, #tpu.memory_space<vmem>>, vector<32x128xf32>
    %cst_21 = arith.constant dense<0.000000e+00> : vector<2x128xf32>
    %31 = tpu.matmul %13, %30, %cst_21 {dimension_numbers = #tpu.dot_dimension_numbers<[1], [0], [0], [1], [0, 0, 1, 1], [], []>} : vector<2x32xf32>, vector<32x128xf32>, vector<2x128xf32> -> vector<2x128xf32>
    %c160 = arith.constant 160 : index
    %c0_22 = arith.constant 0 : index
    %32 = vector.load %arg3[%c160, %c0_22] : memref<408x224xf32, #tpu.memory_space<vmem>>, vector<32x128xf32>
    %cst_23 = arith.constant dense<0.000000e+00> : vector<2x128xf32>
    %33 = tpu.matmul %13, %32, %cst_23 {dimension_numbers = #tpu.dot_dimension_numbers<[1], [0], [0], [1], [0, 0, 1, 1], [], []>} : vector<2x32xf32>, vector<32x128xf32>, vector<2x128xf32> -> vector<2x128xf32>
    %c192 = arith.constant 192 : index
    %c0_24 = arith.constant 0 : index
    %34 = vector.load %arg3[%c192, %c0_24] : memref<408x224xf32, #tpu.memory_space<vmem>>, vector<32x128xf32>
    %cst_25 = arith.constant dense<0.000000e+00> : vector<2x128xf32>
    %35 = tpu.matmul %13, %34, %cst_25 {dimension_numbers = #tpu.dot_dimension_numbers<[1], [0], [0], [1], [0, 0, 1, 1], [], []>} : vector<2x32xf32>, vector<32x128xf32>, vector<2x128xf32> -> vector<2x128xf32>
    %36 = arith.addf %29, %31 : vector<2x128xf32>
    %37 = arith.addf %36, %21 : vector<2x128xf32>
    %38 = arith.negf %37 : vector<2x128xf32>
    %39 = math.exp %38 : vector<2x128xf32>
    %cst_26 = arith.constant 1.000000e+00 : f32
    %40 = vector.broadcast %cst_26 : f32 to vector<2x128xf32>
    %41 = arith.addf %40, %39 : vector<2x128xf32>
    %42 = arith.divf %40, %41 : vector<2x128xf32>
    %43 = vector.extract_strided_slice %42 {offsets = [0, 0], sizes = [2, 32], strides = [1, 1]} : vector<2x128xf32> to vector<2x32xf32>
    %44 = vector.extract_strided_slice %42 {offsets = [0, 32], sizes = [2, 32], strides = [1, 1]} : vector<2x128xf32> to vector<2x32xf32>
    %45 = vector.extract_strided_slice %42 {offsets = [0, 96], sizes = [2, 32], strides = [1, 1]} : vector<2x128xf32> to vector<2x32xf32>
    %46 = vector.extract_strided_slice %37 {offsets = [0, 64], sizes = [2, 32], strides = [1, 1]} : vector<2x128xf32> to vector<2x32xf32>
    %47 = math.tanh %46 : vector<2x32xf32>
    %48 = arith.mulf %44, %27 : vector<2x32xf32>
    %49 = arith.mulf %43, %47 : vector<2x32xf32>
    %50 = arith.addf %48, %49 : vector<2x32xf32>
    %51 = math.tanh %50 : vector<2x32xf32>
    %52 = arith.mulf %45, %51 : vector<2x32xf32>
    %c224 = arith.constant 224 : index
    %c0_27 = arith.constant 0 : index
    %53 = vector.load %arg3[%c224, %c0_27] : memref<408x224xf32, #tpu.memory_space<vmem>>, vector<32x128xf32>
    %cst_28 = arith.constant dense<0.000000e+00> : vector<2x128xf32>
    %54 = tpu.matmul %52, %53, %cst_28 {dimension_numbers = #tpu.dot_dimension_numbers<[1], [0], [0], [1], [0, 0, 1, 1], [], []>} : vector<2x32xf32>, vector<32x128xf32>, vector<2x128xf32> -> vector<2x128xf32>
    %55 = arith.addf %54, %33 : vector<2x128xf32>
    %56 = vector.broadcast %4 : vector<1x128xf32> to vector<2x128xf32>
    %57 = arith.addf %55, %56 : vector<2x128xf32>
    %58 = arith.negf %57 : vector<2x128xf32>
    %59 = math.exp %58 : vector<2x128xf32>
    %cst_29 = arith.constant 1.000000e+00 : f32
    %60 = vector.broadcast %cst_29 : f32 to vector<2x128xf32>
    %61 = arith.addf %60, %59 : vector<2x128xf32>
    %62 = arith.divf %60, %61 : vector<2x128xf32>
    %63 = vector.extract_strided_slice %62 {offsets = [0, 0], sizes = [2, 32], strides = [1, 1]} : vector<2x128xf32> to vector<2x32xf32>
    %64 = vector.extract_strided_slice %62 {offsets = [0, 32], sizes = [2, 32], strides = [1, 1]} : vector<2x128xf32> to vector<2x32xf32>
    %65 = vector.extract_strided_slice %62 {offsets = [0, 96], sizes = [2, 32], strides = [1, 1]} : vector<2x128xf32> to vector<2x32xf32>
    %66 = vector.extract_strided_slice %57 {offsets = [0, 64], sizes = [2, 32], strides = [1, 1]} : vector<2x128xf32> to vector<2x32xf32>
    %67 = math.tanh %66 : vector<2x32xf32>
    %68 = arith.mulf %64, %27 : vector<2x32xf32>
    %69 = arith.mulf %63, %67 : vector<2x32xf32>
    %70 = arith.addf %68, %69 : vector<2x32xf32>
    %71 = math.tanh %70 : vector<2x32xf32>
    %72 = arith.mulf %65, %71 : vector<2x32xf32>
    %c256 = arith.constant 256 : index
    %c0_30 = arith.constant 0 : index
    %73 = vector.load %arg3[%c256, %c0_30] : memref<408x224xf32, #tpu.memory_space<vmem>>, vector<32x128xf32>
    %cst_31 = arith.constant dense<0.000000e+00> : vector<2x128xf32>
    %74 = tpu.matmul %72, %73, %cst_31 {dimension_numbers = #tpu.dot_dimension_numbers<[1], [0], [0], [1], [0, 0, 1, 1], [], []>} : vector<2x32xf32>, vector<32x128xf32>, vector<2x128xf32> -> vector<2x128xf32>
    %75 = arith.addf %74, %35 : vector<2x128xf32>
    %76 = vector.broadcast %5 : vector<1x128xf32> to vector<2x128xf32>
    %77 = arith.addf %75, %76 : vector<2x128xf32>
    %78 = arith.negf %77 : vector<2x128xf32>
    %79 = math.exp %78 : vector<2x128xf32>
    %cst_32 = arith.constant 1.000000e+00 : f32
    %80 = vector.broadcast %cst_32 : f32 to vector<2x128xf32>
    %81 = arith.addf %80, %79 : vector<2x128xf32>
    %82 = arith.divf %80, %81 : vector<2x128xf32>
    %83 = vector.extract_strided_slice %82 {offsets = [0, 0], sizes = [2, 32], strides = [1, 1]} : vector<2x128xf32> to vector<2x32xf32>
    %84 = vector.extract_strided_slice %82 {offsets = [0, 32], sizes = [2, 32], strides = [1, 1]} : vector<2x128xf32> to vector<2x32xf32>
    %85 = vector.extract_strided_slice %82 {offsets = [0, 96], sizes = [2, 32], strides = [1, 1]} : vector<2x128xf32> to vector<2x32xf32>
    %86 = vector.extract_strided_slice %77 {offsets = [0, 64], sizes = [2, 32], strides = [1, 1]} : vector<2x128xf32> to vector<2x32xf32>
    %87 = math.tanh %86 : vector<2x32xf32>
    %88 = arith.mulf %84, %27 : vector<2x32xf32>
    %89 = arith.mulf %83, %87 : vector<2x32xf32>
    %90 = arith.addf %88, %89 : vector<2x32xf32>
    %91 = math.tanh %90 : vector<2x32xf32>
    %92 = arith.mulf %85, %91 : vector<2x32xf32>
    %cst_33 = arith.constant 0.000000e+00 : f32
    %93 = vector.broadcast %cst_33 : f32 to vector<2x32xf32>
    %94 = arith.addf %92, %93 : vector<2x32xf32>
    %cst_34 = arith.constant dense<0.000000e+00> : vector<2xf32>
    %95 = vector.multi_reduction <add>, %94, %cst_34 [1] : vector<2x32xf32> to vector<2xf32>
    %96 = vector.shape_cast %95 : vector<2xf32> to vector<2x1xf32>
    %cst_35 = arith.constant 3.200000e+01 : f32
    %97 = vector.broadcast %cst_35 : f32 to vector<2x1xf32>
    %98 = arith.divf %96, %97 : vector<2x1xf32>
    %99 = vector.broadcast %98 : vector<2x1xf32> to vector<2x32xf32>
    %100 = arith.subf %94, %99 : vector<2x32xf32>
    %101 = arith.mulf %100, %100 : vector<2x32xf32>
    %cst_36 = arith.constant dense<0.000000e+00> : vector<2xf32>
    %102 = vector.multi_reduction <add>, %101, %cst_36 [1] : vector<2x32xf32> to vector<2xf32>
    %103 = vector.shape_cast %102 : vector<2xf32> to vector<2x1xf32>
    %cst_37 = arith.constant 3.200000e+01 : f32
    %104 = vector.broadcast %cst_37 : f32 to vector<2x1xf32>
    %105 = arith.divf %103, %104 : vector<2x1xf32>
    %cst_38 = arith.constant 9.99999974E-6 : f32
    %106 = vector.broadcast %cst_38 : f32 to vector<2x1xf32>
    %107 = arith.addf %105, %106 : vector<2x1xf32>
    %108 = math.rsqrt %107 : vector<2x1xf32>
    %109 = vector.broadcast %108 : vector<2x1xf32> to vector<2x32xf32>
    %110 = arith.mulf %100, %109 : vector<2x32xf32>
    %111 = vector.broadcast %1 : vector<1x32xf32> to vector<2x32xf32>
    %112 = arith.mulf %110, %111 : vector<2x32xf32>
    %113 = vector.broadcast %2 : vector<1x32xf32> to vector<2x32xf32>
    %114 = arith.addf %112, %113 : vector<2x32xf32>
    %c368 = arith.constant 368 : index
    %c0_39 = arith.constant 0 : index
    %115 = vector.load %arg3[%c368, %c0_39] : memref<408x224xf32, #tpu.memory_space<vmem>>, vector<32x224xf32>
    %cst_40 = arith.constant dense<0.000000e+00> : vector<2x224xf32>
    %116 = tpu.matmul %114, %115, %cst_40 {dimension_numbers = #tpu.dot_dimension_numbers<[1], [0], [0], [1], [0, 0, 1, 1], [], []>} : vector<2x32xf32>, vector<32x224xf32>, vector<2x224xf32> -> vector<2x224xf32>
    %117 = vector.broadcast %6 : vector<1x224xf32> to vector<2x224xf32>
    %118 = arith.addf %116, %117 : vector<2x224xf32>
    %119 = vector.extract_strided_slice %118 {offsets = [0, 0], sizes = [2, 128], strides = [1, 1]} : vector<2x224xf32> to vector<2x128xf32>
    %120 = vector.extract_strided_slice %118 {offsets = [0, 128], sizes = [2, 32], strides = [1, 1]} : vector<2x224xf32> to vector<2x32xf32>
    %121 = vector.extract_strided_slice %118 {offsets = [0, 160], sizes = [2, 32], strides = [1, 1]} : vector<2x224xf32> to vector<2x32xf32>
    %122 = vector.extract_strided_slice %118 {offsets = [0, 192], sizes = [2, 32], strides = [1, 1]} : vector<2x224xf32> to vector<2x32xf32>
    %c0_41 = arith.constant 0 : index
    %c0_42 = arith.constant 0 : index
    %c0_43 = arith.constant 0 : index
    %123 = vector.load %arg4[%c0_41, %c0_42, %c0_43] : memref<8x2x128xf32, #tpu.memory_space<vmem>>, vector<1x2x128xf32>
    %124 = vector.shape_cast %123 : vector<1x2x128xf32> to vector<2x128xf32>
    %125 = vector.shape_cast %119 : vector<2x128xf32> to vector<1x2x128xf32>
    tpu.vector_store %arg4[%c0_41, %c0_42, %c0_43], %125 {strides = array<i32>} : memref<8x2x128xf32, #tpu.memory_space<vmem>>, vector<1x2x128xf32>,
    %cst_44 = arith.constant 1.000000e+00 : f32
    %126 = vector.broadcast %cst_44 : f32 to vector<2x128xf32>
    %127 = arith.mulf %119, %126 : vector<2x128xf32>
    %c0_45 = arith.constant 0 : index
    %c0_46 = arith.constant 0 : index
    %c0_47 = arith.constant 0 : index
    %128 = vector.load %arg2[%c0_45, %c0_46, %c0_47] : memref<8x2x128xf32, #tpu.memory_space<vmem>>, vector<1x2x128xf32>
    %129 = vector.shape_cast %128 : vector<1x2x128xf32> to vector<2x128xf32>
    %130 = arith.addf %127, %129 : vector<2x128xf32>
    %cst_48 = arith.constant dense<0xFF800000> : vector<2xf32>
    %131 = vector.multi_reduction <maximumf>, %130, %cst_48 [1] : vector<2x128xf32> to vector<2xf32>
    %132 = vector.shape_cast %131 : vector<2xf32> to vector<2x1xf32>
    %133 = vector.broadcast %132 : vector<2x1xf32> to vector<2x128xf32>
    %134 = arith.cmpf oge, %130, %133 : vector<2x128xf32>
    %c128_i32 = arith.constant 128 : i32
    %135 = vector.broadcast %c128_i32 : i32 to vector<2x128xi32>
    %136 = arith.select %134, %22, %135 : vector<2x128xi1>, vector<2x128xi32>
    %cst_49 = arith.constant dense<2147483647> : vector<2xi32>
    %137 = vector.multi_reduction <minsi>, %136, %cst_49 [1] : vector<2x128xi32> to vector<2xi32>
    %138 = vector.shape_cast %137 : vector<2xi32> to vector<2x1xi32>
    %139 = vector.broadcast %138 : vector<2x1xi32> to vector<2x128xi32>
    %140 = arith.cmpi eq, %22, %139 : vector<2x128xi32>
    %141 = arith.extui %140 : vector<2x128xi1> to vector<2x128xi32>
    %142 = arith.sitofp %141 : vector<2x128xi32> to vector<2x128xf32>
    %c0_50 = arith.constant 0 : index
    %c0_51 = arith.constant 0 : index
    %143 = vector.load %arg3[%c0_50, %c0_51] : memref<408x224xf32, #tpu.memory_space<vmem>>, vector<128x128xf32>
    %cst_52 = arith.constant dense<0.000000e+00> : vector<2x128xf32>
    %144 = tpu.matmul %142, %143, %cst_52 {dimension_numbers = #tpu.dot_dimension_numbers<[1], [0], [0], [1], [0, 0, 1, 1], [], []>} : vector<2x128xf32>, vector<128x128xf32>, vector<2x128xf32> -> vector<2x128xf32>
    %c128_53 = arith.constant 128 : index
    %c0_54 = arith.constant 0 : index
    %145 = vector.load %arg3[%c128_53, %c0_54] : memref<408x224xf32, #tpu.memory_space<vmem>>, vector<32x128xf32>
    %cst_55 = arith.constant dense<0.000000e+00> : vector<2x128xf32>
    %146 = tpu.matmul %52, %145, %cst_55 {dimension_numbers = #tpu.dot_dimension_numbers<[1], [0], [0], [1], [0, 0, 1, 1], [], []>} : vector<2x32xf32>, vector<32x128xf32>, vector<2x128xf32> -> vector<2x128xf32>
    %c160_56 = arith.constant 160 : index
    %c0_57 = arith.constant 0 : index
    %147 = vector.load %arg3[%c160_56, %c0_57] : memref<408x224xf32, #tpu.memory_space<vmem>>, vector<32x128xf32>
    %cst_58 = arith.constant dense<0.000000e+00> : vector<2x128xf32>
    %148 = tpu.matmul %72, %147, %cst_58 {dimension_numbers = #tpu.dot_dimension_numbers<[1], [0], [0], [1], [0, 0, 1, 1], [], []>} : vector<2x32xf32>, vector<32x128xf32>, vector<2x128xf32> -> vector<2x128xf32>
    %c192_59 = arith.constant 192 : index
    %c0_60 = arith.constant 0 : index
    %149 = vector.load %arg3[%c192_59, %c0_60] : memref<408x224xf32, #tpu.memory_space<vmem>>, vector<32x128xf32>
    %cst_61 = arith.constant dense<0.000000e+00> : vector<2x128xf32>
    %150 = tpu.matmul %92, %149, %cst_61 {dimension_numbers = #tpu.dot_dimension_numbers<[1], [0], [0], [1], [0, 0, 1, 1], [], []>} : vector<2x32xf32>, vector<32x128xf32>, vector<2x128xf32> -> vector<2x128xf32>
    %151 = arith.addf %144, %146 : vector<2x128xf32>
    %152 = arith.addf %151, %21 : vector<2x128xf32>
    %153 = arith.negf %152 : vector<2x128xf32>
    %154 = math.exp %153 : vector<2x128xf32>
    %cst_62 = arith.constant 1.000000e+00 : f32
    %155 = vector.broadcast %cst_62 : f32 to vector<2x128xf32>
    %156 = arith.addf %155, %154 : vector<2x128xf32>
    %157 = arith.divf %155, %156 : vector<2x128xf32>
    %158 = vector.extract_strided_slice %157 {offsets = [0, 0], sizes = [2, 32], strides = [1, 1]} : vector<2x128xf32> to vector<2x32xf32>
    %159 = vector.extract_strided_slice %157 {offsets = [0, 32], sizes = [2, 32], strides = [1, 1]} : vector<2x128xf32> to vector<2x32xf32>
    %160 = vector.extract_strided_slice %157 {offsets = [0, 96], sizes = [2, 32], strides = [1, 1]} : vector<2x128xf32> to vector<2x32xf32>
    %161 = vector.extract_strided_slice %152 {offsets = [0, 64], sizes = [2, 32], strides = [1, 1]} : vector<2x128xf32> to vector<2x32xf32>
    %162 = math.tanh %161 : vector<2x32xf32>
    %163 = arith.mulf %159, %50 : vector<2x32xf32>
    %164 = arith.mulf %158, %162 : vector<2x32xf32>
    %165 = arith.addf %163, %164 : vector<2x32xf32>
    %166 = math.tanh %165 : vector<2x32xf32>
    %167 = arith.mulf %160, %166 : vector<2x32xf32>
    %c224_63 = arith.constant 224 : index
    %c0_64 = arith.constant 0 : index
    %168 = vector.load %arg3[%c224_63, %c0_64] : memref<408x224xf32, #tpu.memory_space<vmem>>, vector<32x128xf32>
    %cst_65 = arith.constant dense<0.000000e+00> : vector<2x128xf32>
    %169 = tpu.matmul %167, %168, %cst_65 {dimension_numbers = #tpu.dot_dimension_numbers<[1], [0], [0], [1], [0, 0, 1, 1], [], []>} : vector<2x32xf32>, vector<32x128xf32>, vector<2x128xf32> -> vector<2x128xf32>
    %170 = arith.addf %169, %148 : vector<2x128xf32>
    %171 = vector.broadcast %4 : vector<1x128xf32> to vector<2x128xf32>
    %172 = arith.addf %170, %171 : vector<2x128xf32>
    %173 = arith.negf %172 : vector<2x128xf32>
    %174 = math.exp %173 : vector<2x128xf32>
    %cst_66 = arith.constant 1.000000e+00 : f32
    %175 = vector.broadcast %cst_66 : f32 to vector<2x128xf32>
    %176 = arith.addf %175, %174 : vector<2x128xf32>
    %177 = arith.divf %175, %176 : vector<2x128xf32>
    %178 = vector.extract_strided_slice %177 {offsets = [0, 0], sizes = [2, 32], strides = [1, 1]} : vector<2x128xf32> to vector<2x32xf32>
    %179 = vector.extract_strided_slice %177 {offsets = [0, 32], sizes = [2, 32], strides = [1, 1]} : vector<2x128xf32> to vector<2x32xf32>
    %180 = vector.extract_strided_slice %177 {offsets = [0, 96], sizes = [2, 32], strides = [1, 1]} : vector<2x128xf32> to vector<2x32xf32>
    %181 = vector.extract_strided_slice %172 {offsets = [0, 64], sizes = [2, 32], strides = [1, 1]} : vector<2x128xf32> to vector<2x32xf32>
    %182 = math.tanh %181 : vector<2x32xf32>
    %183 = arith.mulf %179, %70 : vector<2x32xf32>
    %184 = arith.mulf %178, %182 : vector<2x32xf32>
    %185 = arith.addf %183, %184 : vector<2x32xf32>
    %186 = math.tanh %185 : vector<2x32xf32>
    %187 = arith.mulf %180, %186 : vector<2x32xf32>
    %c256_67 = arith.constant 256 : index
    %c0_68 = arith.constant 0 : index
    %188 = vector.load %arg3[%c256_67, %c0_68] : memref<408x224xf32, #tpu.memory_space<vmem>>, vector<32x128xf32>
    %cst_69 = arith.constant dense<0.000000e+00> : vector<2x128xf32>
    %189 = tpu.matmul %187, %188, %cst_69 {dimension_numbers = #tpu.dot_dimension_numbers<[1], [0], [0], [1], [0, 0, 1, 1], [], []>} : vector<2x32xf32>, vector<32x128xf32>, vector<2x128xf32> -> vector<2x128xf32>
    %190 = arith.addf %189, %150 : vector<2x128xf32>
    %191 = vector.broadcast %5 : vector<1x128xf32> to vector<2x128xf32>
    %192 = arith.addf %190, %191 : vector<2x128xf32>
    %193 = arith.negf %192 : vector<2x128xf32>
    %194 = math.exp %193 : vector<2x128xf32>
    %cst_70 = arith.constant 1.000000e+00 : f32
    %195 = vector.broadcast %cst_70 : f32 to vector<2x128xf32>
    %196 = arith.addf %195, %194 : vector<2x128xf32>
    %197 = arith.divf %195, %196 : vector<2x128xf32>
    %198 = vector.extract_strided_slice %197 {offsets = [0, 0], sizes = [2, 32], strides = [1, 1]} : vector<2x128xf32> to vector<2x32xf32>
    %199 = vector.extract_strided_slice %197 {offsets = [0, 32], sizes = [2, 32], strides = [1, 1]} : vector<2x128xf32> to vector<2x32xf32>
    %200 = vector.extract_strided_slice %197 {offsets = [0, 96], sizes = [2, 32], strides = [1, 1]} : vector<2x128xf32> to vector<2x32xf32>
    %201 = vector.extract_strided_slice %192 {offsets = [0, 64], sizes = [2, 32], strides = [1, 1]} : vector<2x128xf32> to vector<2x32xf32>
    %202 = math.tanh %201 : vector<2x32xf32>
    %203 = arith.mulf %199, %90 : vector<2x32xf32>
    %204 = arith.mulf %198, %202 : vector<2x32xf32>
    %205 = arith.addf %203, %204 : vector<2x32xf32>
    %206 = math.tanh %205 : vector<2x32xf32>
    %207 = arith.mulf %200, %206 : vector<2x32xf32>
    %208 = vector.shape_cast %121 : vector<2x32xf32> to vector<1x2x32xf32>
    %209 = vector.shape_cast %122 : vector<2x32xf32> to vector<1x2x32xf32>
    %210 = vector.shape_cast %120 : vector<2x32xf32> to vector<1x2x32xf32>
    %211 = arith.mulf %208, %210 : vector<1x2x32xf32>
    %cst_71 = arith.constant dense<0.000000e+00> : vector<1x2xf32>
    %212 = vector.multi_reduction <add>, %211, %cst_71 [2] : vector<1x2x32xf32> to vector<1x2xf32>
    %213 = vector.shape_cast %212 : vector<1x2xf32> to vector<1x2x1xf32>
    %cst_72 = arith.constant 0.176776692 : f32
    %214 = vector.broadcast %cst_72 : f32 to vector<1x2x1xf32>
    %215 = arith.mulf %213, %214 : vector<1x2x1xf32>
    %cst_73 = arith.constant dense<0xFF800000> : vector<2x1xf32>
    %216 = vector.multi_reduction <maximumf>, %215, %cst_73 [0] : vector<1x2x1xf32> to vector<2x1xf32>
    %217 = vector.shape_cast %216 : vector<2x1xf32> to vector<1x2x1xf32>
    %218 = arith.subf %215, %217 : vector<1x2x1xf32>
    %219 = math.exp %218 : vector<1x2x1xf32>
    %cst_74 = arith.constant dense<0.000000e+00> : vector<2x1xf32>
    %220 = vector.multi_reduction <add>, %219, %cst_74 [0] : vector<1x2x1xf32> to vector<2x1xf32>
    %221 = vector.shape_cast %220 : vector<2x1xf32> to vector<1x2x1xf32>
    %222 = tpu.reciprocal %221 {approx = true} : vector<1x2x1xf32> -> vector<1x2x1xf32>
    %223 = arith.mulf %219, %222 : vector<1x2x1xf32>
    %224 = vector.broadcast %223 : vector<1x2x1xf32> to vector<1x2x32xf32>
    %225 = arith.mulf %224, %209 : vector<1x2x32xf32>
    %cst_75 = arith.constant dense<0.000000e+00> : vector<2x32xf32>
    %226 = vector.multi_reduction <add>, %225, %cst_75 [0] : vector<1x2x32xf32> to vector<2x32xf32>
    %227 = arith.addf %207, %226 : vector<2x32xf32>
    %cst_76 = arith.constant dense<0.000000e+00> : vector<2xf32>
    %228 = vector.multi_reduction <add>, %227, %cst_76 [1] : vector<2x32xf32> to vector<2xf32>
    %229 = vector.shape_cast %228 : vector<2xf32> to vector<2x1xf32>
    %cst_77 = arith.constant 3.200000e+01 : f32
    %230 = vector.broadcast %cst_77 : f32 to vector<2x1xf32>
    %231 = arith.divf %229, %230 : vector<2x1xf32>
    %232 = vector.broadcast %231 : vector<2x1xf32> to vector<2x32xf32>
    %233 = arith.subf %227, %232 : vector<2x32xf32>
    %234 = arith.mulf %233, %233 : vector<2x32xf32>
    %cst_78 = arith.constant dense<0.000000e+00> : vector<2xf32>
    %235 = vector.multi_reduction <add>, %234, %cst_78 [1] : vector<2x32xf32> to vector<2xf32>
    %236 = vector.shape_cast %235 : vector<2xf32> to vector<2x1xf32>
    %cst_79 = arith.constant 3.200000e+01 : f32
    %237 = vector.broadcast %cst_79 : f32 to vector<2x1xf32>
    %238 = arith.divf %236, %237 : vector<2x1xf32>
    %cst_80 = arith.constant 9.99999974E-6 : f32
    %239 = vector.broadcast %cst_80 : f32 to vector<2x1xf32>
    %240 = arith.addf %238, %239 : vector<2x1xf32>
    %241 = math.rsqrt %240 : vector<2x1xf32>
    %242 = vector.broadcast %241 : vector<2x1xf32> to vector<2x32xf32>
    %243 = arith.mulf %233, %242 : vector<2x32xf32>
    %244 = vector.broadcast %1 : vector<1x32xf32> to vector<2x32xf32>
    %245 = arith.mulf %243, %244 : vector<2x32xf32>
    %246 = vector.broadcast %2 : vector<1x32xf32> to vector<2x32xf32>
    %247 = arith.addf %245, %246 : vector<2x32xf32>
    %c368_81 = arith.constant 368 : index
    %c0_82 = arith.constant 0 : index
    %248 = vector.load %arg3[%c368_81, %c0_82] : memref<408x224xf32, #tpu.memory_space<vmem>>, vector<32x224xf32>
    %cst_83 = arith.constant dense<0.000000e+00> : vector<2x224xf32>
    %249 = tpu.matmul %247, %248, %cst_83 {dimension_numbers = #tpu.dot_dimension_numbers<[1], [0], [0], [1], [0, 0, 1, 1], [], []>} : vector<2x32xf32>, vector<32x224xf32>, vector<2x224xf32> -> vector<2x224xf32>
    %250 = vector.broadcast %6 : vector<1x224xf32> to vector<2x224xf32>
    %251 = arith.addf %249, %250 : vector<2x224xf32>
    %252 = vector.extract_strided_slice %251 {offsets = [0, 0], sizes = [2, 128], strides = [1, 1]} : vector<2x224xf32> to vector<2x128xf32>
    %253 = vector.extract_strided_slice %251 {offsets = [0, 128], sizes = [2, 32], strides = [1, 1]} : vector<2x224xf32> to vector<2x32xf32>
    %254 = vector.extract_strided_slice %251 {offsets = [0, 160], sizes = [2, 32], strides = [1, 1]} : vector<2x224xf32> to vector<2x32xf32>
    %255 = vector.extract_strided_slice %251 {offsets = [0, 192], sizes = [2, 32], strides = [1, 1]} : vector<2x224xf32> to vector<2x32xf32>
    %c1 = arith.constant 1 : index
    %c0_84 = arith.constant 0 : index
    %c0_85 = arith.constant 0 : index
    %256 = vector.load %arg4[%c1, %c0_84, %c0_85] : memref<8x2x128xf32, #tpu.memory_space<vmem>>, vector<1x2x128xf32>
    %257 = vector.shape_cast %256 : vector<1x2x128xf32> to vector<2x128xf32>
    %258 = vector.shape_cast %252 : vector<2x128xf32> to vector<1x2x128xf32>
    tpu.vector_store %arg4[%c1, %c0_84, %c0_85], %258 {strides = array<i32>} : memref<8x2x128xf32, #tpu.memory_space<vmem>>, vector<1x2x128xf32>,
    %cst_86 = arith.constant 1.000000e+00 : f32
    %259 = vector.broadcast %cst_86 : f32 to vector<2x128xf32>
    %260 = arith.mulf %252, %259 : vector<2x128xf32>
    %c1_87 = arith.constant 1 : index
    %c0_88 = arith.constant 0 : index
    %c0_89 = arith.constant 0 : index
    %261 = vector.load %arg2[%c1_87, %c0_88, %c0_89] : memref<8x2x128xf32, #tpu.memory_space<vmem>>, vector<1x2x128xf32>
    %262 = vector.shape_cast %261 : vector<1x2x128xf32> to vector<2x128xf32>
    %263 = arith.addf %260, %262 : vector<2x128xf32>
    %cst_90 = arith.constant dense<0xFF800000> : vector<2xf32>
    %264 = vector.multi_reduction <maximumf>, %263, %cst_90 [1] : vector<2x128xf32> to vector<2xf32>
    %265 = vector.shape_cast %264 : vector<2xf32> to vector<2x1xf32>
    %266 = vector.broadcast %265 : vector<2x1xf32> to vector<2x128xf32>
    %267 = arith.cmpf oge, %263, %266 : vector<2x128xf32>
    %c128_i32_91 = arith.constant 128 : i32
    %268 = vector.broadcast %c128_i32_91 : i32 to vector<2x128xi32>
    %269 = arith.select %267, %22, %268 : vector<2x128xi1>, vector<2x128xi32>
    %cst_92 = arith.constant dense<2147483647> : vector<2xi32>
    %270 = vector.multi_reduction <minsi>, %269, %cst_92 [1] : vector<2x128xi32> to vector<2xi32>
    %271 = vector.shape_cast %270 : vector<2xi32> to vector<2x1xi32>
    %272 = vector.broadcast %271 : vector<2x1xi32> to vector<2x128xi32>
    %273 = arith.cmpi eq, %22, %272 : vector<2x128xi32>
    %274 = arith.extui %273 : vector<2x128xi1> to vector<2x128xi32>
    %275 = arith.sitofp %274 : vector<2x128xi32> to vector<2x128xf32>
    %c0_93 = arith.constant 0 : index
    %c0_94 = arith.constant 0 : index
    %276 = vector.load %arg3[%c0_93, %c0_94] : memref<408x224xf32, #tpu.memory_space<vmem>>, vector<128x128xf32>
    %cst_95 = arith.constant dense<0.000000e+00> : vector<2x128xf32>
    %277 = tpu.matmul %275, %276, %cst_95 {dimension_numbers = #tpu.dot_dimension_numbers<[1], [0], [0], [1], [0, 0, 1, 1], [], []>} : vector<2x128xf32>, vector<128x128xf32>, vector<2x128xf32> -> vector<2x128xf32>
    %c128_96 = arith.constant 128 : index
    %c0_97 = arith.constant 0 : index
    %278 = vector.load %arg3[%c128_96, %c0_97] : memref<408x224xf32, #tpu.memory_space<vmem>>, vector<32x128xf32>
    %cst_98 = arith.constant dense<0.000000e+00> : vector<2x128xf32>
    %279 = tpu.matmul %167, %278, %cst_98 {dimension_numbers = #tpu.dot_dimension_numbers<[1], [0], [0], [1], [0, 0, 1, 1], [], []>} : vector<2x32xf32>, vector<32x128xf32>, vector<2x128xf32> -> vector<2x128xf32>
    %c160_99 = arith.constant 160 : index
    %c0_100 = arith.constant 0 : index
    %280 = vector.load %arg3[%c160_99, %c0_100] : memref<408x224xf32, #tpu.memory_space<vmem>>, vector<32x128xf32>
    %cst_101 = arith.constant dense<0.000000e+00> : vector<2x128xf32>
    %281 = tpu.matmul %187, %280, %cst_101 {dimension_numbers = #tpu.dot_dimension_numbers<[1], [0], [0], [1], [0, 0, 1, 1], [], []>} : vector<2x32xf32>, vector<32x128xf32>, vector<2x128xf32> -> vector<2x128xf32>
    %c192_102 = arith.constant 192 : index
    %c0_103 = arith.constant 0 : index
    %282 = vector.load %arg3[%c192_102, %c0_103] : memref<408x224xf32, #tpu.memory_space<vmem>>, vector<32x128xf32>
    %cst_104 = arith.constant dense<0.000000e+00> : vector<2x128xf32>
    %283 = tpu.matmul %207, %282, %cst_104 {dimension_numbers = #tpu.dot_dimension_numbers<[1], [0], [0], [1], [0, 0, 1, 1], [], []>} : vector<2x32xf32>, vector<32x128xf32>, vector<2x128xf32> -> vector<2x128xf32>
    %284 = arith.addf %277, %279 : vector<2x128xf32>
    %285 = arith.addf %284, %21 : vector<2x128xf32>
    %286 = arith.negf %285 : vector<2x128xf32>
    %287 = math.exp %286 : vector<2x128xf32>
    %cst_105 = arith.constant 1.000000e+00 : f32
    %288 = vector.broadcast %cst_105 : f32 to vector<2x128xf32>
    %289 = arith.addf %288, %287 : vector<2x128xf32>
    %290 = arith.divf %288, %289 : vector<2x128xf32>
    %291 = vector.extract_strided_slice %290 {offsets = [0, 0], sizes = [2, 32], strides = [1, 1]} : vector<2x128xf32> to vector<2x32xf32>
    %292 = vector.extract_strided_slice %290 {offsets = [0, 32], sizes = [2, 32], strides = [1, 1]} : vector<2x128xf32> to vector<2x32xf32>
    %293 = vector.extract_strided_slice %290 {offsets = [0, 96], sizes = [2, 32], strides = [1, 1]} : vector<2x128xf32> to vector<2x32xf32>
    %294 = vector.extract_strided_slice %285 {offsets = [0, 64], sizes = [2, 32], strides = [1, 1]} : vector<2x128xf32> to vector<2x32xf32>
    %295 = math.tanh %294 : vector<2x32xf32>
    %296 = arith.mulf %292, %165 : vector<2x32xf32>
    %297 = arith.mulf %291, %295 : vector<2x32xf32>
    %298 = arith.addf %296, %297 : vector<2x32xf32>
    %299 = math.tanh %298 : vector<2x32xf32>
    %300 = arith.mulf %293, %299 : vector<2x32xf32>
    %c224_106 = arith.constant 224 : index
    %c0_107 = arith.constant 0 : index
    %301 = vector.load %arg3[%c224_106, %c0_107] : memref<408x224xf32, #tpu.memory_space<vmem>>, vector<32x128xf32>
    %cst_108 = arith.constant dense<0.000000e+00> : vector<2x128xf32>
    %302 = tpu.matmul %300, %301, %cst_108 {dimension_numbers = #tpu.dot_dimension_numbers<[1], [0], [0], [1], [0, 0, 1, 1], [], []>} : vector<2x32xf32>, vector<32x128xf32>, vector<2x128xf32> -> vector<2x128xf32>
    %303 = arith.addf %302, %281 : vector<2x128xf32>
    %304 = vector.broadcast %4 : vector<1x128xf32> to vector<2x128xf32>
    %305 = arith.addf %303, %304 : vector<2x128xf32>
    %306 = arith.negf %305 : vector<2x128xf32>
    %307 = math.exp %306 : vector<2x128xf32>
    %cst_109 = arith.constant 1.000000e+00 : f32
    %308 = vector.broadcast %cst_109 : f32 to vector<2x128xf32>
    %309 = arith.addf %308, %307 : vector<2x128xf32>
    %310 = arith.divf %308, %309 : vector<2x128xf32>
    %311 = vector.extract_strided_slice %310 {offsets = [0, 0], sizes = [2, 32], strides = [1, 1]} : vector<2x128xf32> to vector<2x32xf32>
    %312 = vector.extract_strided_slice %310 {offsets = [0, 32], sizes = [2, 32], strides = [1, 1]} : vector<2x128xf32> to vector<2x32xf32>
    %313 = vector.extract_strided_slice %310 {offsets = [0, 96], sizes = [2, 32], strides = [1, 1]} : vector<2x128xf32> to vector<2x32xf32>
    %314 = vector.extract_strided_slice %305 {offsets = [0, 64], sizes = [2, 32], strides = [1, 1]} : vector<2x128xf32> to vector<2x32xf32>
    %315 = math.tanh %314 : vector<2x32xf32>
    %316 = arith.mulf %312, %185 : vector<2x32xf32>
    %317 = arith.mulf %311, %315 : vector<2x32xf32>
    %318 = arith.addf %316, %317 : vector<2x32xf32>
    %319 = math.tanh %318 : vector<2x32xf32>
    %320 = arith.mulf %313, %319 : vector<2x32xf32>
    %c256_110 = arith.constant 256 : index
    %c0_111 = arith.constant 0 : index
    %321 = vector.load %arg3[%c256_110, %c0_111] : memref<408x224xf32, #tpu.memory_space<vmem>>, vector<32x128xf32>
    %cst_112 = arith.constant dense<0.000000e+00> : vector<2x128xf32>
    %322 = tpu.matmul %320, %321, %cst_112 {dimension_numbers = #tpu.dot_dimension_numbers<[1], [0], [0], [1], [0, 0, 1, 1], [], []>} : vector<2x32xf32>, vector<32x128xf32>, vector<2x128xf32> -> vector<2x128xf32>
    %323 = arith.addf %322, %283 : vector<2x128xf32>
    %324 = vector.broadcast %5 : vector<1x128xf32> to vector<2x128xf32>
    %325 = arith.addf %323, %324 : vector<2x128xf32>
    %326 = arith.negf %325 : vector<2x128xf32>
    %327 = math.exp %326 : vector<2x128xf32>
    %cst_113 = arith.constant 1.000000e+00 : f32
    %328 = vector.broadcast %cst_113 : f32 to vector<2x128xf32>
    %329 = arith.addf %328, %327 : vector<2x128xf32>
    %330 = arith.divf %328, %329 : vector<2x128xf32>
    %331 = vector.extract_strided_slice %330 {offsets = [0, 0], sizes = [2, 32], strides = [1, 1]} : vector<2x128xf32> to vector<2x32xf32>
    %332 = vector.extract_strided_slice %330 {offsets = [0, 32], sizes = [2, 32], strides = [1, 1]} : vector<2x128xf32> to vector<2x32xf32>
    %333 = vector.extract_strided_slice %330 {offsets = [0, 96], sizes = [2, 32], strides = [1, 1]} : vector<2x128xf32> to vector<2x32xf32>
    %334 = vector.extract_strided_slice %325 {offsets = [0, 64], sizes = [2, 32], strides = [1, 1]} : vector<2x128xf32> to vector<2x32xf32>
    %335 = math.tanh %334 : vector<2x32xf32>
    %336 = arith.mulf %332, %205 : vector<2x32xf32>
    %337 = arith.mulf %331, %335 : vector<2x32xf32>
    %338 = arith.addf %336, %337 : vector<2x32xf32>
    %339 = math.tanh %338 : vector<2x32xf32>
    %340 = arith.mulf %333, %339 : vector<2x32xf32>
    %341 = vector.shape_cast %121 : vector<2x32xf32> to vector<1x2x32xf32>
    %342 = vector.shape_cast %254 : vector<2x32xf32> to vector<1x2x32xf32>
    %343 = tpu.concatenate %341, %342 in 0 : vector<1x2x32xf32>, vector<1x2x32xf32> -> vector<2x2x32xf32>
    %344 = vector.shape_cast %122 : vector<2x32xf32> to vector<1x2x32xf32>
    %345 = vector.shape_cast %255 : vector<2x32xf32> to vector<1x2x32xf32>
    %346 = tpu.concatenate %344, %345 in 0 : vector<1x2x32xf32>, vector<1x2x32xf32> -> vector<2x2x32xf32>
    %347 = vector.shape_cast %253 : vector<2x32xf32> to vector<1x2x32xf32>
    %348 = vector.broadcast %347 : vector<1x2x32xf32> to vector<2x2x32xf32>
    %349 = arith.mulf %343, %348 : vector<2x2x32xf32>
    %cst_114 = arith.constant dense<0.000000e+00> : vector<2x2xf32>
    %350 = vector.multi_reduction <add>, %349, %cst_114 [2] : vector<2x2x32xf32> to vector<2x2xf32>
    %351 = vector.shape_cast %350 : vector<2x2xf32> to vector<2x2x1xf32>
    %cst_115 = arith.constant 0.176776692 : f32
    %352 = vector.broadcast %cst_115 : f32 to vector<2x2x1xf32>
    %353 = arith.mulf %351, %352 : vector<2x2x1xf32>
    %cst_116 = arith.constant dense<0xFF800000> : vector<2x1xf32>
    %354 = vector.multi_reduction <maximumf>, %353, %cst_116 [0] : vector<2x2x1xf32> to vector<2x1xf32>
    %355 = vector.shape_cast %354 : vector<2x1xf32> to vector<1x2x1xf32>
    %356 = vector.broadcast %355 : vector<1x2x1xf32> to vector<2x2x1xf32>
    %357 = arith.subf %353, %356 : vector<2x2x1xf32>
    %358 = math.exp %357 : vector<2x2x1xf32>
    %cst_117 = arith.constant dense<0.000000e+00> : vector<2x1xf32>
    %359 = vector.multi_reduction <add>, %358, %cst_117 [0] : vector<2x2x1xf32> to vector<2x1xf32>
    %360 = vector.shape_cast %359 : vector<2x1xf32> to vector<1x2x1xf32>
    %361 = tpu.reciprocal %360 {approx = true} : vector<1x2x1xf32> -> vector<1x2x1xf32>
    %362 = vector.broadcast %361 : vector<1x2x1xf32> to vector<2x2x1xf32>
    %363 = arith.mulf %358, %362 : vector<2x2x1xf32>
    %364 = vector.broadcast %363 : vector<2x2x1xf32> to vector<2x2x32xf32>
    %365 = arith.mulf %364, %346 : vector<2x2x32xf32>
    %cst_118 = arith.constant dense<0.000000e+00> : vector<2x32xf32>
    %366 = vector.multi_reduction <add>, %365, %cst_118 [0] : vector<2x2x32xf32> to vector<2x32xf32>
    %367 = arith.addf %340, %366 : vector<2x32xf32>
    %cst_119 = arith.constant dense<0.000000e+00> : vector<2xf32>
    %368 = vector.multi_reduction <add>, %367, %cst_119 [1] : vector<2x32xf32> to vector<2xf32>
    %369 = vector.shape_cast %368 : vector<2xf32> to vector<2x1xf32>
    %cst_120 = arith.constant 3.200000e+01 : f32
    %370 = vector.broadcast %cst_120 : f32 to vector<2x1xf32>
    %371 = arith.divf %369, %370 : vector<2x1xf32>
    %372 = vector.broadcast %371 : vector<2x1xf32> to vector<2x32xf32>
    %373 = arith.subf %367, %372 : vector<2x32xf32>
    %374 = arith.mulf %373, %373 : vector<2x32xf32>
    %cst_121 = arith.constant dense<0.000000e+00> : vector<2xf32>
    %375 = vector.multi_reduction <add>, %374, %cst_121 [1] : vector<2x32xf32> to vector<2xf32>
    %376 = vector.shape_cast %375 : vector<2xf32> to vector<2x1xf32>
    %cst_122 = arith.constant 3.200000e+01 : f32
    %377 = vector.broadcast %cst_122 : f32 to vector<2x1xf32>
    %378 = arith.divf %376, %377 : vector<2x1xf32>
    %cst_123 = arith.constant 9.99999974E-6 : f32
    %379 = vector.broadcast %cst_123 : f32 to vector<2x1xf32>
    %380 = arith.addf %378, %379 : vector<2x1xf32>
    %381 = math.rsqrt %380 : vector<2x1xf32>
    %382 = vector.broadcast %381 : vector<2x1xf32> to vector<2x32xf32>
    %383 = arith.mulf %373, %382 : vector<2x32xf32>
    %384 = vector.broadcast %1 : vector<1x32xf32> to vector<2x32xf32>
    %385 = arith.mulf %383, %384 : vector<2x32xf32>
    %386 = vector.broadcast %2 : vector<1x32xf32> to vector<2x32xf32>
    %387 = arith.addf %385, %386 : vector<2x32xf32>
    %c368_124 = arith.constant 368 : index
    %c0_125 = arith.constant 0 : index
    %388 = vector.load %arg3[%c368_124, %c0_125] : memref<408x224xf32, #tpu.memory_space<vmem>>, vector<32x224xf32>
    %cst_126 = arith.constant dense<0.000000e+00> : vector<2x224xf32>
    %389 = tpu.matmul %387, %388, %cst_126 {dimension_numbers = #tpu.dot_dimension_numbers<[1], [0], [0], [1], [0, 0, 1, 1], [], []>} : vector<2x32xf32>, vector<32x224xf32>, vector<2x224xf32> -> vector<2x224xf32>
    %390 = vector.broadcast %6 : vector<1x224xf32> to vector<2x224xf32>
    %391 = arith.addf %389, %390 : vector<2x224xf32>
    %392 = vector.extract_strided_slice %391 {offsets = [0, 0], sizes = [2, 128], strides = [1, 1]} : vector<2x224xf32> to vector<2x128xf32>
    %393 = vector.extract_strided_slice %391 {offsets = [0, 128], sizes = [2, 32], strides = [1, 1]} : vector<2x224xf32> to vector<2x32xf32>
    %394 = vector.extract_strided_slice %391 {offsets = [0, 160], sizes = [2, 32], strides = [1, 1]} : vector<2x224xf32> to vector<2x32xf32>
    %395 = vector.extract_strided_slice %391 {offsets = [0, 192], sizes = [2, 32], strides = [1, 1]} : vector<2x224xf32> to vector<2x32xf32>
    %c2 = arith.constant 2 : index
    %c0_127 = arith.constant 0 : index
    %c0_128 = arith.constant 0 : index
    %396 = vector.load %arg4[%c2, %c0_127, %c0_128] : memref<8x2x128xf32, #tpu.memory_space<vmem>>, vector<1x2x128xf32>
    %397 = vector.shape_cast %396 : vector<1x2x128xf32> to vector<2x128xf32>
    %398 = vector.shape_cast %392 : vector<2x128xf32> to vector<1x2x128xf32>
    tpu.vector_store %arg4[%c2, %c0_127, %c0_128], %398 {strides = array<i32>} : memref<8x2x128xf32, #tpu.memory_space<vmem>>, vector<1x2x128xf32>,
    %cst_129 = arith.constant 1.000000e+00 : f32
    %399 = vector.broadcast %cst_129 : f32 to vector<2x128xf32>
    %400 = arith.mulf %392, %399 : vector<2x128xf32>
    %c2_130 = arith.constant 2 : index
    %c0_131 = arith.constant 0 : index
    %c0_132 = arith.constant 0 : index
    %401 = vector.load %arg2[%c2_130, %c0_131, %c0_132] : memref<8x2x128xf32, #tpu.memory_space<vmem>>, vector<1x2x128xf32>
    %402 = vector.shape_cast %401 : vector<1x2x128xf32> to vector<2x128xf32>
    %403 = arith.addf %400, %402 : vector<2x128xf32>
    %cst_133 = arith.constant dense<0xFF800000> : vector<2xf32>
    %404 = vector.multi_reduction <maximumf>, %403, %cst_133 [1] : vector<2x128xf32> to vector<2xf32>
    %405 = vector.shape_cast %404 : vector<2xf32> to vector<2x1xf32>
    %406 = vector.broadcast %405 : vector<2x1xf32> to vector<2x128xf32>
    %407 = arith.cmpf oge, %403, %406 : vector<2x128xf32>
    %c128_i32_134 = arith.constant 128 : i32
    %408 = vector.broadcast %c128_i32_134 : i32 to vector<2x128xi32>
    %409 = arith.select %407, %22, %408 : vector<2x128xi1>, vector<2x128xi32>
    %cst_135 = arith.constant dense<2147483647> : vector<2xi32>
    %410 = vector.multi_reduction <minsi>, %409, %cst_135 [1] : vector<2x128xi32> to vector<2xi32>
    %411 = vector.shape_cast %410 : vector<2xi32> to vector<2x1xi32>
    %412 = vector.broadcast %411 : vector<2x1xi32> to vector<2x128xi32>
    %413 = arith.cmpi eq, %22, %412 : vector<2x128xi32>
    %414 = arith.extui %413 : vector<2x128xi1> to vector<2x128xi32>
    %415 = arith.sitofp %414 : vector<2x128xi32> to vector<2x128xf32>
    %c0_136 = arith.constant 0 : index
    %c0_137 = arith.constant 0 : index
    %416 = vector.load %arg3[%c0_136, %c0_137] : memref<408x224xf32, #tpu.memory_space<vmem>>, vector<128x128xf32>
    %cst_138 = arith.constant dense<0.000000e+00> : vector<2x128xf32>
    %417 = tpu.matmul %415, %416, %cst_138 {dimension_numbers = #tpu.dot_dimension_numbers<[1], [0], [0], [1], [0, 0, 1, 1], [], []>} : vector<2x128xf32>, vector<128x128xf32>, vector<2x128xf32> -> vector<2x128xf32>
    %c128_139 = arith.constant 128 : index
    %c0_140 = arith.constant 0 : index
    %418 = vector.load %arg3[%c128_139, %c0_140] : memref<408x224xf32, #tpu.memory_space<vmem>>, vector<32x128xf32>
    %cst_141 = arith.constant dense<0.000000e+00> : vector<2x128xf32>
    %419 = tpu.matmul %300, %418, %cst_141 {dimension_numbers = #tpu.dot_dimension_numbers<[1], [0], [0], [1], [0, 0, 1, 1], [], []>} : vector<2x32xf32>, vector<32x128xf32>, vector<2x128xf32> -> vector<2x128xf32>
    %c160_142 = arith.constant 160 : index
    %c0_143 = arith.constant 0 : index
    %420 = vector.load %arg3[%c160_142, %c0_143] : memref<408x224xf32, #tpu.memory_space<vmem>>, vector<32x128xf32>
    %cst_144 = arith.constant dense<0.000000e+00> : vector<2x128xf32>
    %421 = tpu.matmul %320, %420, %cst_144 {dimension_numbers = #tpu.dot_dimension_numbers<[1], [0], [0], [1], [0, 0, 1, 1], [], []>} : vector<2x32xf32>, vector<32x128xf32>, vector<2x128xf32> -> vector<2x128xf32>
    %c192_145 = arith.constant 192 : index
    %c0_146 = arith.constant 0 : index
    %422 = vector.load %arg3[%c192_145, %c0_146] : memref<408x224xf32, #tpu.memory_space<vmem>>, vector<32x128xf32>
    %cst_147 = arith.constant dense<0.000000e+00> : vector<2x128xf32>
    %423 = tpu.matmul %340, %422, %cst_147 {dimension_numbers = #tpu.dot_dimension_numbers<[1], [0], [0], [1], [0, 0, 1, 1], [], []>} : vector<2x32xf32>, vector<32x128xf32>, vector<2x128xf32> -> vector<2x128xf32>
    %424 = arith.addf %417, %419 : vector<2x128xf32>
    %425 = arith.addf %424, %21 : vector<2x128xf32>
    %426 = arith.negf %425 : vector<2x128xf32>
    %427 = math.exp %426 : vector<2x128xf32>
    %cst_148 = arith.constant 1.000000e+00 : f32
    %428 = vector.broadcast %cst_148 : f32 to vector<2x128xf32>
    %429 = arith.addf %428, %427 : vector<2x128xf32>
    %430 = arith.divf %428, %429 : vector<2x128xf32>
    %431 = vector.extract_strided_slice %430 {offsets = [0, 0], sizes = [2, 32], strides = [1, 1]} : vector<2x128xf32> to vector<2x32xf32>
    %432 = vector.extract_strided_slice %430 {offsets = [0, 32], sizes = [2, 32], strides = [1, 1]} : vector<2x128xf32> to vector<2x32xf32>
    %433 = vector.extract_strided_slice %430 {offsets = [0, 96], sizes = [2, 32], strides = [1, 1]} : vector<2x128xf32> to vector<2x32xf32>
    %434 = vector.extract_strided_slice %425 {offsets = [0, 64], sizes = [2, 32], strides = [1, 1]} : vector<2x128xf32> to vector<2x32xf32>
    %435 = math.tanh %434 : vector<2x32xf32>
    %436 = arith.mulf %432, %298 : vector<2x32xf32>
    %437 = arith.mulf %431, %435 : vector<2x32xf32>
    %438 = arith.addf %436, %437 : vector<2x32xf32>
    %439 = math.tanh %438 : vector<2x32xf32>
    %440 = arith.mulf %433, %439 : vector<2x32xf32>
    %c224_149 = arith.constant 224 : index
    %c0_150 = arith.constant 0 : index
    %441 = vector.load %arg3[%c224_149, %c0_150] : memref<408x224xf32, #tpu.memory_space<vmem>>, vector<32x128xf32>
    %cst_151 = arith.constant dense<0.000000e+00> : vector<2x128xf32>
    %442 = tpu.matmul %440, %441, %cst_151 {dimension_numbers = #tpu.dot_dimension_numbers<[1], [0], [0], [1], [0, 0, 1, 1], [], []>} : vector<2x32xf32>, vector<32x128xf32>, vector<2x128xf32> -> vector<2x128xf32>
    %443 = arith.addf %442, %421 : vector<2x128xf32>
    %444 = vector.broadcast %4 : vector<1x128xf32> to vector<2x128xf32>
    %445 = arith.addf %443, %444 : vector<2x128xf32>
    %446 = arith.negf %445 : vector<2x128xf32>
    %447 = math.exp %446 : vector<2x128xf32>
    %cst_152 = arith.constant 1.000000e+00 : f32
    %448 = vector.broadcast %cst_152 : f32 to vector<2x128xf32>
    %449 = arith.addf %448, %447 : vector<2x128xf32>
    %450 = arith.divf %448, %449 : vector<2x128xf32>
    %451 = vector.extract_strided_slice %450 {offsets = [0, 0], sizes = [2, 32], strides = [1, 1]} : vector<2x128xf32> to vector<2x32xf32>
    %452 = vector.extract_strided_slice %450 {offsets = [0, 32], sizes = [2, 32], strides = [1, 1]} : vector<2x128xf32> to vector<2x32xf32>
    %453 = vector.extract_strided_slice %450 {offsets = [0, 96], sizes = [2, 32], strides = [1, 1]} : vector<2x128xf32> to vector<2x32xf32>
    %454 = vector.extract_strided_slice %445 {offsets = [0, 64], sizes = [2, 32], strides = [1, 1]} : vector<2x128xf32> to vector<2x32xf32>
    %455 = math.tanh %454 : vector<2x32xf32>
    %456 = arith.mulf %452, %318 : vector<2x32xf32>
    %457 = arith.mulf %451, %455 : vector<2x32xf32>
    %458 = arith.addf %456, %457 : vector<2x32xf32>
    %459 = math.tanh %458 : vector<2x32xf32>
    %460 = arith.mulf %453, %459 : vector<2x32xf32>
    %c256_153 = arith.constant 256 : index
    %c0_154 = arith.constant 0 : index
    %461 = vector.load %arg3[%c256_153, %c0_154] : memref<408x224xf32, #tpu.memory_space<vmem>>, vector<32x128xf32>
    %cst_155 = arith.constant dense<0.000000e+00> : vector<2x128xf32>
    %462 = tpu.matmul %460, %461, %cst_155 {dimension_numbers = #tpu.dot_dimension_numbers<[1], [0], [0], [1], [0, 0, 1, 1], [], []>} : vector<2x32xf32>, vector<32x128xf32>, vector<2x128xf32> -> vector<2x128xf32>
    %463 = arith.addf %462, %423 : vector<2x128xf32>
    %464 = vector.broadcast %5 : vector<1x128xf32> to vector<2x128xf32>
    %465 = arith.addf %463, %464 : vector<2x128xf32>
    %466 = arith.negf %465 : vector<2x128xf32>
    %467 = math.exp %466 : vector<2x128xf32>
    %cst_156 = arith.constant 1.000000e+00 : f32
    %468 = vector.broadcast %cst_156 : f32 to vector<2x128xf32>
    %469 = arith.addf %468, %467 : vector<2x128xf32>
    %470 = arith.divf %468, %469 : vector<2x128xf32>
    %471 = vector.extract_strided_slice %470 {offsets = [0, 0], sizes = [2, 32], strides = [1, 1]} : vector<2x128xf32> to vector<2x32xf32>
    %472 = vector.extract_strided_slice %470 {offsets = [0, 32], sizes = [2, 32], strides = [1, 1]} : vector<2x128xf32> to vector<2x32xf32>
    %473 = vector.extract_strided_slice %470 {offsets = [0, 96], sizes = [2, 32], strides = [1, 1]} : vector<2x128xf32> to vector<2x32xf32>
    %474 = vector.extract_strided_slice %465 {offsets = [0, 64], sizes = [2, 32], strides = [1, 1]} : vector<2x128xf32> to vector<2x32xf32>
    %475 = math.tanh %474 : vector<2x32xf32>
    %476 = arith.mulf %472, %338 : vector<2x32xf32>
    %477 = arith.mulf %471, %475 : vector<2x32xf32>
    %478 = arith.addf %476, %477 : vector<2x32xf32>
    %479 = math.tanh %478 : vector<2x32xf32>
    %480 = arith.mulf %473, %479 : vector<2x32xf32>
    %481 = vector.shape_cast %121 : vector<2x32xf32> to vector<1x2x32xf32>
    %482 = vector.shape_cast %254 : vector<2x32xf32> to vector<1x2x32xf32>
    %483 = vector.shape_cast %394 : vector<2x32xf32> to vector<1x2x32xf32>
    %484 = tpu.concatenate %481, %482, %483 in 0 : vector<1x2x32xf32>, vector<1x2x32xf32>, vector<1x2x32xf32> -> vector<3x2x32xf32>
    %485 = vector.shape_cast %122 : vector<2x32xf32> to vector<1x2x32xf32>
    %486 = vector.shape_cast %255 : vector<2x32xf32> to vector<1x2x32xf32>
    %487 = vector.shape_cast %395 : vector<2x32xf32> to vector<1x2x32xf32>
    %488 = tpu.concatenate %485, %486, %487 in 0 : vector<1x2x32xf32>, vector<1x2x32xf32>, vector<1x2x32xf32> -> vector<3x2x32xf32>
    %489 = vector.shape_cast %393 : vector<2x32xf32> to vector<1x2x32xf32>
    %490 = vector.broadcast %489 : vector<1x2x32xf32> to vector<3x2x32xf32>
    %491 = arith.mulf %484, %490 : vector<3x2x32xf32>
    %cst_157 = arith.constant dense<0.000000e+00> : vector<3x2xf32>
    %492 = vector.multi_reduction <add>, %491, %cst_157 [2] : vector<3x2x32xf32> to vector<3x2xf32>
    %493 = vector.shape_cast %492 : vector<3x2xf32> to vector<3x2x1xf32>
    %cst_158 = arith.constant 0.176776692 : f32
    %494 = vector.broadcast %cst_158 : f32 to vector<3x2x1xf32>
    %495 = arith.mulf %493, %494 : vector<3x2x1xf32>
    %cst_159 = arith.constant dense<0xFF800000> : vector<2x1xf32>
    %496 = vector.multi_reduction <maximumf>, %495, %cst_159 [0] : vector<3x2x1xf32> to vector<2x1xf32>
    %497 = vector.shape_cast %496 : vector<2x1xf32> to vector<1x2x1xf32>
    %498 = vector.broadcast %497 : vector<1x2x1xf32> to vector<3x2x1xf32>
    %499 = arith.subf %495, %498 : vector<3x2x1xf32>
    %500 = math.exp %499 : vector<3x2x1xf32>
    %cst_160 = arith.constant dense<0.000000e+00> : vector<2x1xf32>
    %501 = vector.multi_reduction <add>, %500, %cst_160 [0] : vector<3x2x1xf32> to vector<2x1xf32>
    %502 = vector.shape_cast %501 : vector<2x1xf32> to vector<1x2x1xf32>
    %503 = tpu.reciprocal %502 {approx = true} : vector<1x2x1xf32> -> vector<1x2x1xf32>
    %504 = vector.broadcast %503 : vector<1x2x1xf32> to vector<3x2x1xf32>
    %505 = arith.mulf %500, %504 : vector<3x2x1xf32>
    %506 = vector.broadcast %505 : vector<3x2x1xf32> to vector<3x2x32xf32>
    %507 = arith.mulf %506, %488 : vector<3x2x32xf32>
    %cst_161 = arith.constant dense<0.000000e+00> : vector<2x32xf32>
    %508 = vector.multi_reduction <add>, %507, %cst_161 [0] : vector<3x2x32xf32> to vector<2x32xf32>
    %509 = arith.addf %480, %508 : vector<2x32xf32>
    %cst_162 = arith.constant dense<0.000000e+00> : vector<2xf32>
    %510 = vector.multi_reduction <add>, %509, %cst_162 [1] : vector<2x32xf32> to vector<2xf32>
    %511 = vector.shape_cast %510 : vector<2xf32> to vector<2x1xf32>
    %cst_163 = arith.constant 3.200000e+01 : f32
    %512 = vector.broadcast %cst_163 : f32 to vector<2x1xf32>
    %513 = arith.divf %511, %512 : vector<2x1xf32>
    %514 = vector.broadcast %513 : vector<2x1xf32> to vector<2x32xf32>
    %515 = arith.subf %509, %514 : vector<2x32xf32>
    %516 = arith.mulf %515, %515 : vector<2x32xf32>
    %cst_164 = arith.constant dense<0.000000e+00> : vector<2xf32>
    %517 = vector.multi_reduction <add>, %516, %cst_164 [1] : vector<2x32xf32> to vector<2xf32>
    %518 = vector.shape_cast %517 : vector<2xf32> to vector<2x1xf32>
    %cst_165 = arith.constant 3.200000e+01 : f32
    %519 = vector.broadcast %cst_165 : f32 to vector<2x1xf32>
    %520 = arith.divf %518, %519 : vector<2x1xf32>
    %cst_166 = arith.constant 9.99999974E-6 : f32
    %521 = vector.broadcast %cst_166 : f32 to vector<2x1xf32>
    %522 = arith.addf %520, %521 : vector<2x1xf32>
    %523 = math.rsqrt %522 : vector<2x1xf32>
    %524 = vector.broadcast %523 : vector<2x1xf32> to vector<2x32xf32>
    %525 = arith.mulf %515, %524 : vector<2x32xf32>
    %526 = vector.broadcast %1 : vector<1x32xf32> to vector<2x32xf32>
    %527 = arith.mulf %525, %526 : vector<2x32xf32>
    %528 = vector.broadcast %2 : vector<1x32xf32> to vector<2x32xf32>
    %529 = arith.addf %527, %528 : vector<2x32xf32>
    %c368_167 = arith.constant 368 : index
    %c0_168 = arith.constant 0 : index
    %530 = vector.load %arg3[%c368_167, %c0_168] : memref<408x224xf32, #tpu.memory_space<vmem>>, vector<32x224xf32>
    %cst_169 = arith.constant dense<0.000000e+00> : vector<2x224xf32>
    %531 = tpu.matmul %529, %530, %cst_169 {dimension_numbers = #tpu.dot_dimension_numbers<[1], [0], [0], [1], [0, 0, 1, 1], [], []>} : vector<2x32xf32>, vector<32x224xf32>, vector<2x224xf32> -> vector<2x224xf32>
    %532 = vector.broadcast %6 : vector<1x224xf32> to vector<2x224xf32>
    %533 = arith.addf %531, %532 : vector<2x224xf32>
    %534 = vector.extract_strided_slice %533 {offsets = [0, 0], sizes = [2, 128], strides = [1, 1]} : vector<2x224xf32> to vector<2x128xf32>
    %535 = vector.extract_strided_slice %533 {offsets = [0, 128], sizes = [2, 32], strides = [1, 1]} : vector<2x224xf32> to vector<2x32xf32>
    %536 = vector.extract_strided_slice %533 {offsets = [0, 160], sizes = [2, 32], strides = [1, 1]} : vector<2x224xf32> to vector<2x32xf32>
    %537 = vector.extract_strided_slice %533 {offsets = [0, 192], sizes = [2, 32], strides = [1, 1]} : vector<2x224xf32> to vector<2x32xf32>
    %c3 = arith.constant 3 : index
    %c0_170 = arith.constant 0 : index
    %c0_171 = arith.constant 0 : index
    %538 = vector.load %arg4[%c3, %c0_170, %c0_171] : memref<8x2x128xf32, #tpu.memory_space<vmem>>, vector<1x2x128xf32>
    %539 = vector.shape_cast %538 : vector<1x2x128xf32> to vector<2x128xf32>
    %540 = vector.shape_cast %534 : vector<2x128xf32> to vector<1x2x128xf32>
    tpu.vector_store %arg4[%c3, %c0_170, %c0_171], %540 {strides = array<i32>} : memref<8x2x128xf32, #tpu.memory_space<vmem>>, vector<1x2x128xf32>,
    %cst_172 = arith.constant 1.000000e+00 : f32
    %541 = vector.broadcast %cst_172 : f32 to vector<2x128xf32>
    %542 = arith.mulf %534, %541 : vector<2x128xf32>
    %c3_173 = arith.constant 3 : index
    %c0_174 = arith.constant 0 : index
    %c0_175 = arith.constant 0 : index
    %543 = vector.load %arg2[%c3_173, %c0_174, %c0_175] : memref<8x2x128xf32, #tpu.memory_space<vmem>>, vector<1x2x128xf32>
    %544 = vector.shape_cast %543 : vector<1x2x128xf32> to vector<2x128xf32>
    %545 = arith.addf %542, %544 : vector<2x128xf32>
    %cst_176 = arith.constant dense<0xFF800000> : vector<2xf32>
    %546 = vector.multi_reduction <maximumf>, %545, %cst_176 [1] : vector<2x128xf32> to vector<2xf32>
    %547 = vector.shape_cast %546 : vector<2xf32> to vector<2x1xf32>
    %548 = vector.broadcast %547 : vector<2x1xf32> to vector<2x128xf32>
    %549 = arith.cmpf oge, %545, %548 : vector<2x128xf32>
    %c128_i32_177 = arith.constant 128 : i32
    %550 = vector.broadcast %c128_i32_177 : i32 to vector<2x128xi32>
    %551 = arith.select %549, %22, %550 : vector<2x128xi1>, vector<2x128xi32>
    %cst_178 = arith.constant dense<2147483647> : vector<2xi32>
    %552 = vector.multi_reduction <minsi>, %551, %cst_178 [1] : vector<2x128xi32> to vector<2xi32>
    %553 = vector.shape_cast %552 : vector<2xi32> to vector<2x1xi32>
    %554 = vector.broadcast %553 : vector<2x1xi32> to vector<2x128xi32>
    %555 = arith.cmpi eq, %22, %554 : vector<2x128xi32>
    %556 = arith.extui %555 : vector<2x128xi1> to vector<2x128xi32>
    %557 = arith.sitofp %556 : vector<2x128xi32> to vector<2x128xf32>
    %c0_179 = arith.constant 0 : index
    %c0_180 = arith.constant 0 : index
    %558 = vector.load %arg3[%c0_179, %c0_180] : memref<408x224xf32, #tpu.memory_space<vmem>>, vector<128x128xf32>
    %cst_181 = arith.constant dense<0.000000e+00> : vector<2x128xf32>
    %559 = tpu.matmul %557, %558, %cst_181 {dimension_numbers = #tpu.dot_dimension_numbers<[1], [0], [0], [1], [0, 0, 1, 1], [], []>} : vector<2x128xf32>, vector<128x128xf32>, vector<2x128xf32> -> vector<2x128xf32>
    %c128_182 = arith.constant 128 : index
    %c0_183 = arith.constant 0 : index
    %560 = vector.load %arg3[%c128_182, %c0_183] : memref<408x224xf32, #tpu.memory_space<vmem>>, vector<32x128xf32>
    %cst_184 = arith.constant dense<0.000000e+00> : vector<2x128xf32>
    %561 = tpu.matmul %440, %560, %cst_184 {dimension_numbers = #tpu.dot_dimension_numbers<[1], [0], [0], [1], [0, 0, 1, 1], [], []>} : vector<2x32xf32>, vector<32x128xf32>, vector<2x128xf32> -> vector<2x128xf32>
    %c160_185 = arith.constant 160 : index
    %c0_186 = arith.constant 0 : index
    %562 = vector.load %arg3[%c160_185, %c0_186] : memref<408x224xf32, #tpu.memory_space<vmem>>, vector<32x128xf32>
    %cst_187 = arith.constant dense<0.000000e+00> : vector<2x128xf32>
    %563 = tpu.matmul %460, %562, %cst_187 {dimension_numbers = #tpu.dot_dimension_numbers<[1], [0], [0], [1], [0, 0, 1, 1], [], []>} : vector<2x32xf32>, vector<32x128xf32>, vector<2x128xf32> -> vector<2x128xf32>
    %c192_188 = arith.constant 192 : index
    %c0_189 = arith.constant 0 : index
    %564 = vector.load %arg3[%c192_188, %c0_189] : memref<408x224xf32, #tpu.memory_space<vmem>>, vector<32x128xf32>
    %cst_190 = arith.constant dense<0.000000e+00> : vector<2x128xf32>
    %565 = tpu.matmul %480, %564, %cst_190 {dimension_numbers = #tpu.dot_dimension_numbers<[1], [0], [0], [1], [0, 0, 1, 1], [], []>} : vector<2x32xf32>, vector<32x128xf32>, vector<2x128xf32> -> vector<2x128xf32>
    %566 = arith.addf %559, %561 : vector<2x128xf32>
    %567 = arith.addf %566, %21 : vector<2x128xf32>
    %568 = arith.negf %567 : vector<2x128xf32>
    %569 = math.exp %568 : vector<2x128xf32>
    %cst_191 = arith.constant 1.000000e+00 : f32
    %570 = vector.broadcast %cst_191 : f32 to vector<2x128xf32>
    %571 = arith.addf %570, %569 : vector<2x128xf32>
    %572 = arith.divf %570, %571 : vector<2x128xf32>
    %573 = vector.extract_strided_slice %572 {offsets = [0, 0], sizes = [2, 32], strides = [1, 1]} : vector<2x128xf32> to vector<2x32xf32>
    %574 = vector.extract_strided_slice %572 {offsets = [0, 32], sizes = [2, 32], strides = [1, 1]} : vector<2x128xf32> to vector<2x32xf32>
    %575 = vector.extract_strided_slice %572 {offsets = [0, 96], sizes = [2, 32], strides = [1, 1]} : vector<2x128xf32> to vector<2x32xf32>
    %576 = vector.extract_strided_slice %567 {offsets = [0, 64], sizes = [2, 32], strides = [1, 1]} : vector<2x128xf32> to vector<2x32xf32>
    %577 = math.tanh %576 : vector<2x32xf32>
    %578 = arith.mulf %574, %438 : vector<2x32xf32>
    %579 = arith.mulf %573, %577 : vector<2x32xf32>
    %580 = arith.addf %578, %579 : vector<2x32xf32>
    %581 = math.tanh %580 : vector<2x32xf32>
    %582 = arith.mulf %575, %581 : vector<2x32xf32>
    %c224_192 = arith.constant 224 : index
    %c0_193 = arith.constant 0 : index
    %583 = vector.load %arg3[%c224_192, %c0_193] : memref<408x224xf32, #tpu.memory_space<vmem>>, vector<32x128xf32>
    %cst_194 = arith.constant dense<0.000000e+00> : vector<2x128xf32>
    %584 = tpu.matmul %582, %583, %cst_194 {dimension_numbers = #tpu.dot_dimension_numbers<[1], [0], [0], [1], [0, 0, 1, 1], [], []>} : vector<2x32xf32>, vector<32x128xf32>, vector<2x128xf32> -> vector<2x128xf32>
    %585 = arith.addf %584, %563 : vector<2x128xf32>
    %586 = vector.broadcast %4 : vector<1x128xf32> to vector<2x128xf32>
    %587 = arith.addf %585, %586 : vector<2x128xf32>
    %588 = arith.negf %587 : vector<2x128xf32>
    %589 = math.exp %588 : vector<2x128xf32>
    %cst_195 = arith.constant 1.000000e+00 : f32
    %590 = vector.broadcast %cst_195 : f32 to vector<2x128xf32>
    %591 = arith.addf %590, %589 : vector<2x128xf32>
    %592 = arith.divf %590, %591 : vector<2x128xf32>
    %593 = vector.extract_strided_slice %592 {offsets = [0, 0], sizes = [2, 32], strides = [1, 1]} : vector<2x128xf32> to vector<2x32xf32>
    %594 = vector.extract_strided_slice %592 {offsets = [0, 32], sizes = [2, 32], strides = [1, 1]} : vector<2x128xf32> to vector<2x32xf32>
    %595 = vector.extract_strided_slice %592 {offsets = [0, 96], sizes = [2, 32], strides = [1, 1]} : vector<2x128xf32> to vector<2x32xf32>
    %596 = vector.extract_strided_slice %587 {offsets = [0, 64], sizes = [2, 32], strides = [1, 1]} : vector<2x128xf32> to vector<2x32xf32>
    %597 = math.tanh %596 : vector<2x32xf32>
    %598 = arith.mulf %594, %458 : vector<2x32xf32>
    %599 = arith.mulf %593, %597 : vector<2x32xf32>
    %600 = arith.addf %598, %599 : vector<2x32xf32>
    %601 = math.tanh %600 : vector<2x32xf32>
    %602 = arith.mulf %595, %601 : vector<2x32xf32>
    %c256_196 = arith.constant 256 : index
    %c0_197 = arith.constant 0 : index
    %603 = vector.load %arg3[%c256_196, %c0_197] : memref<408x224xf32, #tpu.memory_space<vmem>>, vector<32x128xf32>
    %cst_198 = arith.constant dense<0.000000e+00> : vector<2x128xf32>
    %604 = tpu.matmul %602, %603, %cst_198 {dimension_numbers = #tpu.dot_dimension_numbers<[1], [0], [0], [1], [0, 0, 1, 1], [], []>} : vector<2x32xf32>, vector<32x128xf32>, vector<2x128xf32> -> vector<2x128xf32>
    %605 = arith.addf %604, %565 : vector<2x128xf32>
    %606 = vector.broadcast %5 : vector<1x128xf32> to vector<2x128xf32>
    %607 = arith.addf %605, %606 : vector<2x128xf32>
    %608 = arith.negf %607 : vector<2x128xf32>
    %609 = math.exp %608 : vector<2x128xf32>
    %cst_199 = arith.constant 1.000000e+00 : f32
    %610 = vector.broadcast %cst_199 : f32 to vector<2x128xf32>
    %611 = arith.addf %610, %609 : vector<2x128xf32>
    %612 = arith.divf %610, %611 : vector<2x128xf32>
    %613 = vector.extract_strided_slice %612 {offsets = [0, 0], sizes = [2, 32], strides = [1, 1]} : vector<2x128xf32> to vector<2x32xf32>
    %614 = vector.extract_strided_slice %612 {offsets = [0, 32], sizes = [2, 32], strides = [1, 1]} : vector<2x128xf32> to vector<2x32xf32>
    %615 = vector.extract_strided_slice %612 {offsets = [0, 96], sizes = [2, 32], strides = [1, 1]} : vector<2x128xf32> to vector<2x32xf32>
    %616 = vector.extract_strided_slice %607 {offsets = [0, 64], sizes = [2, 32], strides = [1, 1]} : vector<2x128xf32> to vector<2x32xf32>
    %617 = math.tanh %616 : vector<2x32xf32>
    %618 = arith.mulf %614, %478 : vector<2x32xf32>
    %619 = arith.mulf %613, %617 : vector<2x32xf32>
    %620 = arith.addf %618, %619 : vector<2x32xf32>
    %621 = math.tanh %620 : vector<2x32xf32>
    %622 = arith.mulf %615, %621 : vector<2x32xf32>
    %623 = vector.shape_cast %121 : vector<2x32xf32> to vector<1x2x32xf32>
    %624 = vector.shape_cast %254 : vector<2x32xf32> to vector<1x2x32xf32>
    %625 = vector.shape_cast %394 : vector<2x32xf32> to vector<1x2x32xf32>
    %626 = vector.shape_cast %536 : vector<2x32xf32> to vector<1x2x32xf32>
    %627 = tpu.concatenate %623, %624, %625, %626 in 0 : vector<1x2x32xf32>, vector<1x2x32xf32>, vector<1x2x32xf32>, vector<1x2x32xf32> -> vector<4x2x32xf32>
    %628 = vector.shape_cast %122 : vector<2x32xf32> to vector<1x2x32xf32>
    %629 = vector.shape_cast %255 : vector<2x32xf32> to vector<1x2x32xf32>
    %630 = vector.shape_cast %395 : vector<2x32xf32> to vector<1x2x32xf32>
    %631 = vector.shape_cast %537 : vector<2x32xf32> to vector<1x2x32xf32>
    %632 = tpu.concatenate %628, %629, %630, %631 in 0 : vector<1x2x32xf32>, vector<1x2x32xf32>, vector<1x2x32xf32>, vector<1x2x32xf32> -> vector<4x2x32xf32>
    %633 = vector.shape_cast %535 : vector<2x32xf32> to vector<1x2x32xf32>
    %634 = vector.broadcast %633 : vector<1x2x32xf32> to vector<4x2x32xf32>
    %635 = arith.mulf %627, %634 : vector<4x2x32xf32>
    %cst_200 = arith.constant dense<0.000000e+00> : vector<4x2xf32>
    %636 = vector.multi_reduction <add>, %635, %cst_200 [2] : vector<4x2x32xf32> to vector<4x2xf32>
    %637 = vector.shape_cast %636 : vector<4x2xf32> to vector<4x2x1xf32>
    %cst_201 = arith.constant 0.176776692 : f32
    %638 = vector.broadcast %cst_201 : f32 to vector<4x2x1xf32>
    %639 = arith.mulf %637, %638 : vector<4x2x1xf32>
    %cst_202 = arith.constant dense<0xFF800000> : vector<2x1xf32>
    %640 = vector.multi_reduction <maximumf>, %639, %cst_202 [0] : vector<4x2x1xf32> to vector<2x1xf32>
    %641 = vector.shape_cast %640 : vector<2x1xf32> to vector<1x2x1xf32>
    %642 = vector.broadcast %641 : vector<1x2x1xf32> to vector<4x2x1xf32>
    %643 = arith.subf %639, %642 : vector<4x2x1xf32>
    %644 = math.exp %643 : vector<4x2x1xf32>
    %cst_203 = arith.constant dense<0.000000e+00> : vector<2x1xf32>
    %645 = vector.multi_reduction <add>, %644, %cst_203 [0] : vector<4x2x1xf32> to vector<2x1xf32>
    %646 = vector.shape_cast %645 : vector<2x1xf32> to vector<1x2x1xf32>
    %647 = tpu.reciprocal %646 {approx = true} : vector<1x2x1xf32> -> vector<1x2x1xf32>
    %648 = vector.broadcast %647 : vector<1x2x1xf32> to vector<4x2x1xf32>
    %649 = arith.mulf %644, %648 : vector<4x2x1xf32>
    %650 = vector.broadcast %649 : vector<4x2x1xf32> to vector<4x2x32xf32>
    %651 = arith.mulf %650, %632 : vector<4x2x32xf32>
    %cst_204 = arith.constant dense<0.000000e+00> : vector<2x32xf32>
    %652 = vector.multi_reduction <add>, %651, %cst_204 [0] : vector<4x2x32xf32> to vector<2x32xf32>
    %653 = arith.addf %622, %652 : vector<2x32xf32>
    %cst_205 = arith.constant dense<0.000000e+00> : vector<2xf32>
    %654 = vector.multi_reduction <add>, %653, %cst_205 [1] : vector<2x32xf32> to vector<2xf32>
    %655 = vector.shape_cast %654 : vector<2xf32> to vector<2x1xf32>
    %cst_206 = arith.constant 3.200000e+01 : f32
    %656 = vector.broadcast %cst_206 : f32 to vector<2x1xf32>
    %657 = arith.divf %655, %656 : vector<2x1xf32>
    %658 = vector.broadcast %657 : vector<2x1xf32> to vector<2x32xf32>
    %659 = arith.subf %653, %658 : vector<2x32xf32>
    %660 = arith.mulf %659, %659 : vector<2x32xf32>
    %cst_207 = arith.constant dense<0.000000e+00> : vector<2xf32>
    %661 = vector.multi_reduction <add>, %660, %cst_207 [1] : vector<2x32xf32> to vector<2xf32>
    %662 = vector.shape_cast %661 : vector<2xf32> to vector<2x1xf32>
    %cst_208 = arith.constant 3.200000e+01 : f32
    %663 = vector.broadcast %cst_208 : f32 to vector<2x1xf32>
    %664 = arith.divf %662, %663 : vector<2x1xf32>
    %cst_209 = arith.constant 9.99999974E-6 : f32
    %665 = vector.broadcast %cst_209 : f32 to vector<2x1xf32>
    %666 = arith.addf %664, %665 : vector<2x1xf32>
    %667 = math.rsqrt %666 : vector<2x1xf32>
    %668 = vector.broadcast %667 : vector<2x1xf32> to vector<2x32xf32>
    %669 = arith.mulf %659, %668 : vector<2x32xf32>
    %670 = vector.broadcast %1 : vector<1x32xf32> to vector<2x32xf32>
    %671 = arith.mulf %669, %670 : vector<2x32xf32>
    %672 = vector.broadcast %2 : vector<1x32xf32> to vector<2x32xf32>
    %673 = arith.addf %671, %672 : vector<2x32xf32>
    %c368_210 = arith.constant 368 : index
    %c0_211 = arith.constant 0 : index
    %674 = vector.load %arg3[%c368_210, %c0_211] : memref<408x224xf32, #tpu.memory_space<vmem>>, vector<32x224xf32>
    %cst_212 = arith.constant dense<0.000000e+00> : vector<2x224xf32>
    %675 = tpu.matmul %673, %674, %cst_212 {dimension_numbers = #tpu.dot_dimension_numbers<[1], [0], [0], [1], [0, 0, 1, 1], [], []>} : vector<2x32xf32>, vector<32x224xf32>, vector<2x224xf32> -> vector<2x224xf32>
    %676 = vector.broadcast %6 : vector<1x224xf32> to vector<2x224xf32>
    %677 = arith.addf %675, %676 : vector<2x224xf32>
    %678 = vector.extract_strided_slice %677 {offsets = [0, 0], sizes = [2, 128], strides = [1, 1]} : vector<2x224xf32> to vector<2x128xf32>
    %679 = vector.extract_strided_slice %677 {offsets = [0, 128], sizes = [2, 32], strides = [1, 1]} : vector<2x224xf32> to vector<2x32xf32>
    %680 = vector.extract_strided_slice %677 {offsets = [0, 160], sizes = [2, 32], strides = [1, 1]} : vector<2x224xf32> to vector<2x32xf32>
    %681 = vector.extract_strided_slice %677 {offsets = [0, 192], sizes = [2, 32], strides = [1, 1]} : vector<2x224xf32> to vector<2x32xf32>
    %c4 = arith.constant 4 : index
    %c0_213 = arith.constant 0 : index
    %c0_214 = arith.constant 0 : index
    %682 = vector.load %arg4[%c4, %c0_213, %c0_214] : memref<8x2x128xf32, #tpu.memory_space<vmem>>, vector<1x2x128xf32>
    %683 = vector.shape_cast %682 : vector<1x2x128xf32> to vector<2x128xf32>
    %684 = vector.shape_cast %678 : vector<2x128xf32> to vector<1x2x128xf32>
    tpu.vector_store %arg4[%c4, %c0_213, %c0_214], %684 {strides = array<i32>} : memref<8x2x128xf32, #tpu.memory_space<vmem>>, vector<1x2x128xf32>,
    %cst_215 = arith.constant 1.000000e+00 : f32
    %685 = vector.broadcast %cst_215 : f32 to vector<2x128xf32>
    %686 = arith.mulf %678, %685 : vector<2x128xf32>
    %c4_216 = arith.constant 4 : index
    %c0_217 = arith.constant 0 : index
    %c0_218 = arith.constant 0 : index
    %687 = vector.load %arg2[%c4_216, %c0_217, %c0_218] : memref<8x2x128xf32, #tpu.memory_space<vmem>>, vector<1x2x128xf32>
    %688 = vector.shape_cast %687 : vector<1x2x128xf32> to vector<2x128xf32>
    %689 = arith.addf %686, %688 : vector<2x128xf32>
    %cst_219 = arith.constant dense<0xFF800000> : vector<2xf32>
    %690 = vector.multi_reduction <maximumf>, %689, %cst_219 [1] : vector<2x128xf32> to vector<2xf32>
    %691 = vector.shape_cast %690 : vector<2xf32> to vector<2x1xf32>
    %692 = vector.broadcast %691 : vector<2x1xf32> to vector<2x128xf32>
    %693 = arith.cmpf oge, %689, %692 : vector<2x128xf32>
    %c128_i32_220 = arith.constant 128 : i32
    %694 = vector.broadcast %c128_i32_220 : i32 to vector<2x128xi32>
    %695 = arith.select %693, %22, %694 : vector<2x128xi1>, vector<2x128xi32>
    %cst_221 = arith.constant dense<2147483647> : vector<2xi32>
    %696 = vector.multi_reduction <minsi>, %695, %cst_221 [1] : vector<2x128xi32> to vector<2xi32>
    %697 = vector.shape_cast %696 : vector<2xi32> to vector<2x1xi32>
    %698 = vector.broadcast %697 : vector<2x1xi32> to vector<2x128xi32>
    %699 = arith.cmpi eq, %22, %698 : vector<2x128xi32>
    %700 = arith.extui %699 : vector<2x128xi1> to vector<2x128xi32>
    %701 = arith.sitofp %700 : vector<2x128xi32> to vector<2x128xf32>
    %c0_222 = arith.constant 0 : index
    %c0_223 = arith.constant 0 : index
    %702 = vector.load %arg3[%c0_222, %c0_223] : memref<408x224xf32, #tpu.memory_space<vmem>>, vector<128x128xf32>
    %cst_224 = arith.constant dense<0.000000e+00> : vector<2x128xf32>
    %703 = tpu.matmul %701, %702, %cst_224 {dimension_numbers = #tpu.dot_dimension_numbers<[1], [0], [0], [1], [0, 0, 1, 1], [], []>} : vector<2x128xf32>, vector<128x128xf32>, vector<2x128xf32> -> vector<2x128xf32>
    %c128_225 = arith.constant 128 : index
    %c0_226 = arith.constant 0 : index
    %704 = vector.load %arg3[%c128_225, %c0_226] : memref<408x224xf32, #tpu.memory_space<vmem>>, vector<32x128xf32>
    %cst_227 = arith.constant dense<0.000000e+00> : vector<2x128xf32>
    %705 = tpu.matmul %582, %704, %cst_227 {dimension_numbers = #tpu.dot_dimension_numbers<[1], [0], [0], [1], [0, 0, 1, 1], [], []>} : vector<2x32xf32>, vector<32x128xf32>, vector<2x128xf32> -> vector<2x128xf32>
    %c160_228 = arith.constant 160 : index
    %c0_229 = arith.constant 0 : index
    %706 = vector.load %arg3[%c160_228, %c0_229] : memref<408x224xf32, #tpu.memory_space<vmem>>, vector<32x128xf32>
    %cst_230 = arith.constant dense<0.000000e+00> : vector<2x128xf32>
    %707 = tpu.matmul %602, %706, %cst_230 {dimension_numbers = #tpu.dot_dimension_numbers<[1], [0], [0], [1], [0, 0, 1, 1], [], []>} : vector<2x32xf32>, vector<32x128xf32>, vector<2x128xf32> -> vector<2x128xf32>
    %c192_231 = arith.constant 192 : index
    %c0_232 = arith.constant 0 : index
    %708 = vector.load %arg3[%c192_231, %c0_232] : memref<408x224xf32, #tpu.memory_space<vmem>>, vector<32x128xf32>
    %cst_233 = arith.constant dense<0.000000e+00> : vector<2x128xf32>
    %709 = tpu.matmul %622, %708, %cst_233 {dimension_numbers = #tpu.dot_dimension_numbers<[1], [0], [0], [1], [0, 0, 1, 1], [], []>} : vector<2x32xf32>, vector<32x128xf32>, vector<2x128xf32> -> vector<2x128xf32>
    %710 = arith.addf %703, %705 : vector<2x128xf32>
    %711 = arith.addf %710, %21 : vector<2x128xf32>
    %712 = arith.negf %711 : vector<2x128xf32>
    %713 = math.exp %712 : vector<2x128xf32>
    %cst_234 = arith.constant 1.000000e+00 : f32
    %714 = vector.broadcast %cst_234 : f32 to vector<2x128xf32>
    %715 = arith.addf %714, %713 : vector<2x128xf32>
    %716 = arith.divf %714, %715 : vector<2x128xf32>
    %717 = vector.extract_strided_slice %716 {offsets = [0, 0], sizes = [2, 32], strides = [1, 1]} : vector<2x128xf32> to vector<2x32xf32>
    %718 = vector.extract_strided_slice %716 {offsets = [0, 32], sizes = [2, 32], strides = [1, 1]} : vector<2x128xf32> to vector<2x32xf32>
    %719 = vector.extract_strided_slice %716 {offsets = [0, 96], sizes = [2, 32], strides = [1, 1]} : vector<2x128xf32> to vector<2x32xf32>
    %720 = vector.extract_strided_slice %711 {offsets = [0, 64], sizes = [2, 32], strides = [1, 1]} : vector<2x128xf32> to vector<2x32xf32>
    %721 = math.tanh %720 : vector<2x32xf32>
    %722 = arith.mulf %718, %580 : vector<2x32xf32>
    %723 = arith.mulf %717, %721 : vector<2x32xf32>
    %724 = arith.addf %722, %723 : vector<2x32xf32>
    %725 = math.tanh %724 : vector<2x32xf32>
    %726 = arith.mulf %719, %725 : vector<2x32xf32>
    %c224_235 = arith.constant 224 : index
    %c0_236 = arith.constant 0 : index
    %727 = vector.load %arg3[%c224_235, %c0_236] : memref<408x224xf32, #tpu.memory_space<vmem>>, vector<32x128xf32>
    %cst_237 = arith.constant dense<0.000000e+00> : vector<2x128xf32>
    %728 = tpu.matmul %726, %727, %cst_237 {dimension_numbers = #tpu.dot_dimension_numbers<[1], [0], [0], [1], [0, 0, 1, 1], [], []>} : vector<2x32xf32>, vector<32x128xf32>, vector<2x128xf32> -> vector<2x128xf32>
    %729 = arith.addf %728, %707 : vector<2x128xf32>
    %730 = vector.broadcast %4 : vector<1x128xf32> to vector<2x128xf32>
    %731 = arith.addf %729, %730 : vector<2x128xf32>
    %732 = arith.negf %731 : vector<2x128xf32>
    %733 = math.exp %732 : vector<2x128xf32>
    %cst_238 = arith.constant 1.000000e+00 : f32
    %734 = vector.broadcast %cst_238 : f32 to vector<2x128xf32>
    %735 = arith.addf %734, %733 : vector<2x128xf32>
    %736 = arith.divf %734, %735 : vector<2x128xf32>
    %737 = vector.extract_strided_slice %736 {offsets = [0, 0], sizes = [2, 32], strides = [1, 1]} : vector<2x128xf32> to vector<2x32xf32>
    %738 = vector.extract_strided_slice %736 {offsets = [0, 32], sizes = [2, 32], strides = [1, 1]} : vector<2x128xf32> to vector<2x32xf32>
    %739 = vector.extract_strided_slice %736 {offsets = [0, 96], sizes = [2, 32], strides = [1, 1]} : vector<2x128xf32> to vector<2x32xf32>
    %740 = vector.extract_strided_slice %731 {offsets = [0, 64], sizes = [2, 32], strides = [1, 1]} : vector<2x128xf32> to vector<2x32xf32>
    %741 = math.tanh %740 : vector<2x32xf32>
    %742 = arith.mulf %738, %600 : vector<2x32xf32>
    %743 = arith.mulf %737, %741 : vector<2x32xf32>
    %744 = arith.addf %742, %743 : vector<2x32xf32>
    %745 = math.tanh %744 : vector<2x32xf32>
    %746 = arith.mulf %739, %745 : vector<2x32xf32>
    %c256_239 = arith.constant 256 : index
    %c0_240 = arith.constant 0 : index
    %747 = vector.load %arg3[%c256_239, %c0_240] : memref<408x224xf32, #tpu.memory_space<vmem>>, vector<32x128xf32>
    %cst_241 = arith.constant dense<0.000000e+00> : vector<2x128xf32>
    %748 = tpu.matmul %746, %747, %cst_241 {dimension_numbers = #tpu.dot_dimension_numbers<[1], [0], [0], [1], [0, 0, 1, 1], [], []>} : vector<2x32xf32>, vector<32x128xf32>, vector<2x128xf32> -> vector<2x128xf32>
    %749 = arith.addf %748, %709 : vector<2x128xf32>
    %750 = vector.broadcast %5 : vector<1x128xf32> to vector<2x128xf32>
    %751 = arith.addf %749, %750 : vector<2x128xf32>
    %752 = arith.negf %751 : vector<2x128xf32>
    %753 = math.exp %752 : vector<2x128xf32>
    %cst_242 = arith.constant 1.000000e+00 : f32
    %754 = vector.broadcast %cst_242 : f32 to vector<2x128xf32>
    %755 = arith.addf %754, %753 : vector<2x128xf32>
    %756 = arith.divf %754, %755 : vector<2x128xf32>
    %757 = vector.extract_strided_slice %756 {offsets = [0, 0], sizes = [2, 32], strides = [1, 1]} : vector<2x128xf32> to vector<2x32xf32>
    %758 = vector.extract_strided_slice %756 {offsets = [0, 32], sizes = [2, 32], strides = [1, 1]} : vector<2x128xf32> to vector<2x32xf32>
    %759 = vector.extract_strided_slice %756 {offsets = [0, 96], sizes = [2, 32], strides = [1, 1]} : vector<2x128xf32> to vector<2x32xf32>
    %760 = vector.extract_strided_slice %751 {offsets = [0, 64], sizes = [2, 32], strides = [1, 1]} : vector<2x128xf32> to vector<2x32xf32>
    %761 = math.tanh %760 : vector<2x32xf32>
    %762 = arith.mulf %758, %620 : vector<2x32xf32>
    %763 = arith.mulf %757, %761 : vector<2x32xf32>
    %764 = arith.addf %762, %763 : vector<2x32xf32>
    %765 = math.tanh %764 : vector<2x32xf32>
    %766 = arith.mulf %759, %765 : vector<2x32xf32>
    %767 = vector.shape_cast %121 : vector<2x32xf32> to vector<1x2x32xf32>
    %768 = vector.shape_cast %254 : vector<2x32xf32> to vector<1x2x32xf32>
    %769 = vector.shape_cast %394 : vector<2x32xf32> to vector<1x2x32xf32>
    %770 = vector.shape_cast %536 : vector<2x32xf32> to vector<1x2x32xf32>
    %771 = vector.shape_cast %680 : vector<2x32xf32> to vector<1x2x32xf32>
    %772 = tpu.concatenate %767, %768, %769, %770, %771 in 0 : vector<1x2x32xf32>, vector<1x2x32xf32>, vector<1x2x32xf32>, vector<1x2x32xf32>, vector<1x2x32xf32> -> vector<5x2x32xf32>
    %773 = vector.shape_cast %122 : vector<2x32xf32> to vector<1x2x32xf32>
    %774 = vector.shape_cast %255 : vector<2x32xf32> to vector<1x2x32xf32>
    %775 = vector.shape_cast %395 : vector<2x32xf32> to vector<1x2x32xf32>
    %776 = vector.shape_cast %537 : vector<2x32xf32> to vector<1x2x32xf32>
    %777 = vector.shape_cast %681 : vector<2x32xf32> to vector<1x2x32xf32>
    %778 = tpu.concatenate %773, %774, %775, %776, %777 in 0 : vector<1x2x32xf32>, vector<1x2x32xf32>, vector<1x2x32xf32>, vector<1x2x32xf32>, vector<1x2x32xf32> -> vector<5x2x32xf32>
    %779 = vector.shape_cast %679 : vector<2x32xf32> to vector<1x2x32xf32>
    %780 = vector.broadcast %779 : vector<1x2x32xf32> to vector<5x2x32xf32>
    %781 = arith.mulf %772, %780 : vector<5x2x32xf32>
    %cst_243 = arith.constant dense<0.000000e+00> : vector<5x2xf32>
    %782 = vector.multi_reduction <add>, %781, %cst_243 [2] : vector<5x2x32xf32> to vector<5x2xf32>
    %783 = vector.shape_cast %782 : vector<5x2xf32> to vector<5x2x1xf32>
    %cst_244 = arith.constant 0.176776692 : f32
    %784 = vector.broadcast %cst_244 : f32 to vector<5x2x1xf32>
    %785 = arith.mulf %783, %784 : vector<5x2x1xf32>
    %cst_245 = arith.constant dense<0xFF800000> : vector<2x1xf32>
    %786 = vector.multi_reduction <maximumf>, %785, %cst_245 [0] : vector<5x2x1xf32> to vector<2x1xf32>
    %787 = vector.shape_cast %786 : vector<2x1xf32> to vector<1x2x1xf32>
    %788 = vector.broadcast %787 : vector<1x2x1xf32> to vector<5x2x1xf32>
    %789 = arith.subf %785, %788 : vector<5x2x1xf32>
    %790 = math.exp %789 : vector<5x2x1xf32>
    %cst_246 = arith.constant dense<0.000000e+00> : vector<2x1xf32>
    %791 = vector.multi_reduction <add>, %790, %cst_246 [0] : vector<5x2x1xf32> to vector<2x1xf32>
    %792 = vector.shape_cast %791 : vector<2x1xf32> to vector<1x2x1xf32>
    %793 = tpu.reciprocal %792 {approx = true} : vector<1x2x1xf32> -> vector<1x2x1xf32>
    %794 = vector.broadcast %793 : vector<1x2x1xf32> to vector<5x2x1xf32>
    %795 = arith.mulf %790, %794 : vector<5x2x1xf32>
    %796 = vector.broadcast %795 : vector<5x2x1xf32> to vector<5x2x32xf32>
    %797 = arith.mulf %796, %778 : vector<5x2x32xf32>
    %cst_247 = arith.constant dense<0.000000e+00> : vector<2x32xf32>
    %798 = vector.multi_reduction <add>, %797, %cst_247 [0] : vector<5x2x32xf32> to vector<2x32xf32>
    %799 = arith.addf %766, %798 : vector<2x32xf32>
    %cst_248 = arith.constant dense<0.000000e+00> : vector<2xf32>
    %800 = vector.multi_reduction <add>, %799, %cst_248 [1] : vector<2x32xf32> to vector<2xf32>
    %801 = vector.shape_cast %800 : vector<2xf32> to vector<2x1xf32>
    %cst_249 = arith.constant 3.200000e+01 : f32
    %802 = vector.broadcast %cst_249 : f32 to vector<2x1xf32>
    %803 = arith.divf %801, %802 : vector<2x1xf32>
    %804 = vector.broadcast %803 : vector<2x1xf32> to vector<2x32xf32>
    %805 = arith.subf %799, %804 : vector<2x32xf32>
    %806 = arith.mulf %805, %805 : vector<2x32xf32>
    %cst_250 = arith.constant dense<0.000000e+00> : vector<2xf32>
    %807 = vector.multi_reduction <add>, %806, %cst_250 [1] : vector<2x32xf32> to vector<2xf32>
    %808 = vector.shape_cast %807 : vector<2xf32> to vector<2x1xf32>
    %cst_251 = arith.constant 3.200000e+01 : f32
    %809 = vector.broadcast %cst_251 : f32 to vector<2x1xf32>
    %810 = arith.divf %808, %809 : vector<2x1xf32>
    %cst_252 = arith.constant 9.99999974E-6 : f32
    %811 = vector.broadcast %cst_252 : f32 to vector<2x1xf32>
    %812 = arith.addf %810, %811 : vector<2x1xf32>
    %813 = math.rsqrt %812 : vector<2x1xf32>
    %814 = vector.broadcast %813 : vector<2x1xf32> to vector<2x32xf32>
    %815 = arith.mulf %805, %814 : vector<2x32xf32>
    %816 = vector.broadcast %1 : vector<1x32xf32> to vector<2x32xf32>
    %817 = arith.mulf %815, %816 : vector<2x32xf32>
    %818 = vector.broadcast %2 : vector<1x32xf32> to vector<2x32xf32>
    %819 = arith.addf %817, %818 : vector<2x32xf32>
    %c368_253 = arith.constant 368 : index
    %c0_254 = arith.constant 0 : index
    %820 = vector.load %arg3[%c368_253, %c0_254] : memref<408x224xf32, #tpu.memory_space<vmem>>, vector<32x224xf32>
    %cst_255 = arith.constant dense<0.000000e+00> : vector<2x224xf32>
    %821 = tpu.matmul %819, %820, %cst_255 {dimension_numbers = #tpu.dot_dimension_numbers<[1], [0], [0], [1], [0, 0, 1, 1], [], []>} : vector<2x32xf32>, vector<32x224xf32>, vector<2x224xf32> -> vector<2x224xf32>
    %822 = vector.broadcast %6 : vector<1x224xf32> to vector<2x224xf32>
    %823 = arith.addf %821, %822 : vector<2x224xf32>
    %824 = vector.extract_strided_slice %823 {offsets = [0, 0], sizes = [2, 128], strides = [1, 1]} : vector<2x224xf32> to vector<2x128xf32>
    %825 = vector.extract_strided_slice %823 {offsets = [0, 128], sizes = [2, 32], strides = [1, 1]} : vector<2x224xf32> to vector<2x32xf32>
    %826 = vector.extract_strided_slice %823 {offsets = [0, 160], sizes = [2, 32], strides = [1, 1]} : vector<2x224xf32> to vector<2x32xf32>
    %827 = vector.extract_strided_slice %823 {offsets = [0, 192], sizes = [2, 32], strides = [1, 1]} : vector<2x224xf32> to vector<2x32xf32>
    %c5 = arith.constant 5 : index
    %c0_256 = arith.constant 0 : index
    %c0_257 = arith.constant 0 : index
    %828 = vector.load %arg4[%c5, %c0_256, %c0_257] : memref<8x2x128xf32, #tpu.memory_space<vmem>>, vector<1x2x128xf32>
    %829 = vector.shape_cast %828 : vector<1x2x128xf32> to vector<2x128xf32>
    %830 = vector.shape_cast %824 : vector<2x128xf32> to vector<1x2x128xf32>
    tpu.vector_store %arg4[%c5, %c0_256, %c0_257], %830 {strides = array<i32>} : memref<8x2x128xf32, #tpu.memory_space<vmem>>, vector<1x2x128xf32>,
    %cst_258 = arith.constant 1.000000e+00 : f32
    %831 = vector.broadcast %cst_258 : f32 to vector<2x128xf32>
    %832 = arith.mulf %824, %831 : vector<2x128xf32>
    %c5_259 = arith.constant 5 : index
    %c0_260 = arith.constant 0 : index
    %c0_261 = arith.constant 0 : index
    %833 = vector.load %arg2[%c5_259, %c0_260, %c0_261] : memref<8x2x128xf32, #tpu.memory_space<vmem>>, vector<1x2x128xf32>
    %834 = vector.shape_cast %833 : vector<1x2x128xf32> to vector<2x128xf32>
    %835 = arith.addf %832, %834 : vector<2x128xf32>
    %cst_262 = arith.constant dense<0xFF800000> : vector<2xf32>
    %836 = vector.multi_reduction <maximumf>, %835, %cst_262 [1] : vector<2x128xf32> to vector<2xf32>
    %837 = vector.shape_cast %836 : vector<2xf32> to vector<2x1xf32>
    %838 = vector.broadcast %837 : vector<2x1xf32> to vector<2x128xf32>
    %839 = arith.cmpf oge, %835, %838 : vector<2x128xf32>
    %c128_i32_263 = arith.constant 128 : i32
    %840 = vector.broadcast %c128_i32_263 : i32 to vector<2x128xi32>
    %841 = arith.select %839, %22, %840 : vector<2x128xi1>, vector<2x128xi32>
    %cst_264 = arith.constant dense<2147483647> : vector<2xi32>
    %842 = vector.multi_reduction <minsi>, %841, %cst_264 [1] : vector<2x128xi32> to vector<2xi32>
    %843 = vector.shape_cast %842 : vector<2xi32> to vector<2x1xi32>
    %844 = vector.broadcast %843 : vector<2x1xi32> to vector<2x128xi32>
    %845 = arith.cmpi eq, %22, %844 : vector<2x128xi32>
    %846 = arith.extui %845 : vector<2x128xi1> to vector<2x128xi32>
    %847 = arith.sitofp %846 : vector<2x128xi32> to vector<2x128xf32>
    %c0_265 = arith.constant 0 : index
    %c0_266 = arith.constant 0 : index
    %848 = vector.load %arg3[%c0_265, %c0_266] : memref<408x224xf32, #tpu.memory_space<vmem>>, vector<128x128xf32>
    %cst_267 = arith.constant dense<0.000000e+00> : vector<2x128xf32>
    %849 = tpu.matmul %847, %848, %cst_267 {dimension_numbers = #tpu.dot_dimension_numbers<[1], [0], [0], [1], [0, 0, 1, 1], [], []>} : vector<2x128xf32>, vector<128x128xf32>, vector<2x128xf32> -> vector<2x128xf32>
    %c128_268 = arith.constant 128 : index
    %c0_269 = arith.constant 0 : index
    %850 = vector.load %arg3[%c128_268, %c0_269] : memref<408x224xf32, #tpu.memory_space<vmem>>, vector<32x128xf32>
    %cst_270 = arith.constant dense<0.000000e+00> : vector<2x128xf32>
    %851 = tpu.matmul %726, %850, %cst_270 {dimension_numbers = #tpu.dot_dimension_numbers<[1], [0], [0], [1], [0, 0, 1, 1], [], []>} : vector<2x32xf32>, vector<32x128xf32>, vector<2x128xf32> -> vector<2x128xf32>
    %c160_271 = arith.constant 160 : index
    %c0_272 = arith.constant 0 : index
    %852 = vector.load %arg3[%c160_271, %c0_272] : memref<408x224xf32, #tpu.memory_space<vmem>>, vector<32x128xf32>
    %cst_273 = arith.constant dense<0.000000e+00> : vector<2x128xf32>
    %853 = tpu.matmul %746, %852, %cst_273 {dimension_numbers = #tpu.dot_dimension_numbers<[1], [0], [0], [1], [0, 0, 1, 1], [], []>} : vector<2x32xf32>, vector<32x128xf32>, vector<2x128xf32> -> vector<2x128xf32>
    %c192_274 = arith.constant 192 : index
    %c0_275 = arith.constant 0 : index
    %854 = vector.load %arg3[%c192_274, %c0_275] : memref<408x224xf32, #tpu.memory_space<vmem>>, vector<32x128xf32>
    %cst_276 = arith.constant dense<0.000000e+00> : vector<2x128xf32>
    %855 = tpu.matmul %766, %854, %cst_276 {dimension_numbers = #tpu.dot_dimension_numbers<[1], [0], [0], [1], [0, 0, 1, 1], [], []>} : vector<2x32xf32>, vector<32x128xf32>, vector<2x128xf32> -> vector<2x128xf32>
    %856 = arith.addf %849, %851 : vector<2x128xf32>
    %857 = arith.addf %856, %21 : vector<2x128xf32>
    %858 = arith.negf %857 : vector<2x128xf32>
    %859 = math.exp %858 : vector<2x128xf32>
    %cst_277 = arith.constant 1.000000e+00 : f32
    %860 = vector.broadcast %cst_277 : f32 to vector<2x128xf32>
    %861 = arith.addf %860, %859 : vector<2x128xf32>
    %862 = arith.divf %860, %861 : vector<2x128xf32>
    %863 = vector.extract_strided_slice %862 {offsets = [0, 0], sizes = [2, 32], strides = [1, 1]} : vector<2x128xf32> to vector<2x32xf32>
    %864 = vector.extract_strided_slice %862 {offsets = [0, 32], sizes = [2, 32], strides = [1, 1]} : vector<2x128xf32> to vector<2x32xf32>
    %865 = vector.extract_strided_slice %862 {offsets = [0, 96], sizes = [2, 32], strides = [1, 1]} : vector<2x128xf32> to vector<2x32xf32>
    %866 = vector.extract_strided_slice %857 {offsets = [0, 64], sizes = [2, 32], strides = [1, 1]} : vector<2x128xf32> to vector<2x32xf32>
    %867 = math.tanh %866 : vector<2x32xf32>
    %868 = arith.mulf %864, %724 : vector<2x32xf32>
    %869 = arith.mulf %863, %867 : vector<2x32xf32>
    %870 = arith.addf %868, %869 : vector<2x32xf32>
    %871 = math.tanh %870 : vector<2x32xf32>
    %872 = arith.mulf %865, %871 : vector<2x32xf32>
    %c224_278 = arith.constant 224 : index
    %c0_279 = arith.constant 0 : index
    %873 = vector.load %arg3[%c224_278, %c0_279] : memref<408x224xf32, #tpu.memory_space<vmem>>, vector<32x128xf32>
    %cst_280 = arith.constant dense<0.000000e+00> : vector<2x128xf32>
    %874 = tpu.matmul %872, %873, %cst_280 {dimension_numbers = #tpu.dot_dimension_numbers<[1], [0], [0], [1], [0, 0, 1, 1], [], []>} : vector<2x32xf32>, vector<32x128xf32>, vector<2x128xf32> -> vector<2x128xf32>
    %875 = arith.addf %874, %853 : vector<2x128xf32>
    %876 = vector.broadcast %4 : vector<1x128xf32> to vector<2x128xf32>
    %877 = arith.addf %875, %876 : vector<2x128xf32>
    %878 = arith.negf %877 : vector<2x128xf32>
    %879 = math.exp %878 : vector<2x128xf32>
    %cst_281 = arith.constant 1.000000e+00 : f32
    %880 = vector.broadcast %cst_281 : f32 to vector<2x128xf32>
    %881 = arith.addf %880, %879 : vector<2x128xf32>
    %882 = arith.divf %880, %881 : vector<2x128xf32>
    %883 = vector.extract_strided_slice %882 {offsets = [0, 0], sizes = [2, 32], strides = [1, 1]} : vector<2x128xf32> to vector<2x32xf32>
    %884 = vector.extract_strided_slice %882 {offsets = [0, 32], sizes = [2, 32], strides = [1, 1]} : vector<2x128xf32> to vector<2x32xf32>
    %885 = vector.extract_strided_slice %882 {offsets = [0, 96], sizes = [2, 32], strides = [1, 1]} : vector<2x128xf32> to vector<2x32xf32>
    %886 = vector.extract_strided_slice %877 {offsets = [0, 64], sizes = [2, 32], strides = [1, 1]} : vector<2x128xf32> to vector<2x32xf32>
    %887 = math.tanh %886 : vector<2x32xf32>
    %888 = arith.mulf %884, %744 : vector<2x32xf32>
    %889 = arith.mulf %883, %887 : vector<2x32xf32>
    %890 = arith.addf %888, %889 : vector<2x32xf32>
    %891 = math.tanh %890 : vector<2x32xf32>
    %892 = arith.mulf %885, %891 : vector<2x32xf32>
    %c256_282 = arith.constant 256 : index
    %c0_283 = arith.constant 0 : index
    %893 = vector.load %arg3[%c256_282, %c0_283] : memref<408x224xf32, #tpu.memory_space<vmem>>, vector<32x128xf32>
    %cst_284 = arith.constant dense<0.000000e+00> : vector<2x128xf32>
    %894 = tpu.matmul %892, %893, %cst_284 {dimension_numbers = #tpu.dot_dimension_numbers<[1], [0], [0], [1], [0, 0, 1, 1], [], []>} : vector<2x32xf32>, vector<32x128xf32>, vector<2x128xf32> -> vector<2x128xf32>
    %895 = arith.addf %894, %855 : vector<2x128xf32>
    %896 = vector.broadcast %5 : vector<1x128xf32> to vector<2x128xf32>
    %897 = arith.addf %895, %896 : vector<2x128xf32>
    %898 = arith.negf %897 : vector<2x128xf32>
    %899 = math.exp %898 : vector<2x128xf32>
    %cst_285 = arith.constant 1.000000e+00 : f32
    %900 = vector.broadcast %cst_285 : f32 to vector<2x128xf32>
    %901 = arith.addf %900, %899 : vector<2x128xf32>
    %902 = arith.divf %900, %901 : vector<2x128xf32>
    %903 = vector.extract_strided_slice %902 {offsets = [0, 0], sizes = [2, 32], strides = [1, 1]} : vector<2x128xf32> to vector<2x32xf32>
    %904 = vector.extract_strided_slice %902 {offsets = [0, 32], sizes = [2, 32], strides = [1, 1]} : vector<2x128xf32> to vector<2x32xf32>
    %905 = vector.extract_strided_slice %902 {offsets = [0, 96], sizes = [2, 32], strides = [1, 1]} : vector<2x128xf32> to vector<2x32xf32>
    %906 = vector.extract_strided_slice %897 {offsets = [0, 64], sizes = [2, 32], strides = [1, 1]} : vector<2x128xf32> to vector<2x32xf32>
    %907 = math.tanh %906 : vector<2x32xf32>
    %908 = arith.mulf %904, %764 : vector<2x32xf32>
    %909 = arith.mulf %903, %907 : vector<2x32xf32>
    %910 = arith.addf %908, %909 : vector<2x32xf32>
    %911 = math.tanh %910 : vector<2x32xf32>
    %912 = arith.mulf %905, %911 : vector<2x32xf32>
    %913 = vector.shape_cast %121 : vector<2x32xf32> to vector<1x2x32xf32>
    %914 = vector.shape_cast %254 : vector<2x32xf32> to vector<1x2x32xf32>
    %915 = vector.shape_cast %394 : vector<2x32xf32> to vector<1x2x32xf32>
    %916 = vector.shape_cast %536 : vector<2x32xf32> to vector<1x2x32xf32>
    %917 = vector.shape_cast %680 : vector<2x32xf32> to vector<1x2x32xf32>
    %918 = vector.shape_cast %826 : vector<2x32xf32> to vector<1x2x32xf32>
    %919 = tpu.concatenate %913, %914, %915, %916, %917, %918 in 0 : vector<1x2x32xf32>, vector<1x2x32xf32>, vector<1x2x32xf32>, vector<1x2x32xf32>, vector<1x2x32xf32>, vector<1x2x32xf32> -> vector<6x2x32xf32>
    %920 = vector.shape_cast %122 : vector<2x32xf32> to vector<1x2x32xf32>
    %921 = vector.shape_cast %255 : vector<2x32xf32> to vector<1x2x32xf32>
    %922 = vector.shape_cast %395 : vector<2x32xf32> to vector<1x2x32xf32>
    %923 = vector.shape_cast %537 : vector<2x32xf32> to vector<1x2x32xf32>
    %924 = vector.shape_cast %681 : vector<2x32xf32> to vector<1x2x32xf32>
    %925 = vector.shape_cast %827 : vector<2x32xf32> to vector<1x2x32xf32>
    %926 = tpu.concatenate %920, %921, %922, %923, %924, %925 in 0 : vector<1x2x32xf32>, vector<1x2x32xf32>, vector<1x2x32xf32>, vector<1x2x32xf32>, vector<1x2x32xf32>, vector<1x2x32xf32> -> vector<6x2x32xf32>
    %927 = vector.shape_cast %825 : vector<2x32xf32> to vector<1x2x32xf32>
    %928 = vector.broadcast %927 : vector<1x2x32xf32> to vector<6x2x32xf32>
    %929 = arith.mulf %919, %928 : vector<6x2x32xf32>
    %cst_286 = arith.constant dense<0.000000e+00> : vector<6x2xf32>
    %930 = vector.multi_reduction <add>, %929, %cst_286 [2] : vector<6x2x32xf32> to vector<6x2xf32>
    %931 = vector.shape_cast %930 : vector<6x2xf32> to vector<6x2x1xf32>
    %cst_287 = arith.constant 0.176776692 : f32
    %932 = vector.broadcast %cst_287 : f32 to vector<6x2x1xf32>
    %933 = arith.mulf %931, %932 : vector<6x2x1xf32>
    %cst_288 = arith.constant dense<0xFF800000> : vector<2x1xf32>
    %934 = vector.multi_reduction <maximumf>, %933, %cst_288 [0] : vector<6x2x1xf32> to vector<2x1xf32>
    %935 = vector.shape_cast %934 : vector<2x1xf32> to vector<1x2x1xf32>
    %936 = vector.broadcast %935 : vector<1x2x1xf32> to vector<6x2x1xf32>
    %937 = arith.subf %933, %936 : vector<6x2x1xf32>
    %938 = math.exp %937 : vector<6x2x1xf32>
    %cst_289 = arith.constant dense<0.000000e+00> : vector<2x1xf32>
    %939 = vector.multi_reduction <add>, %938, %cst_289 [0] : vector<6x2x1xf32> to vector<2x1xf32>
    %940 = vector.shape_cast %939 : vector<2x1xf32> to vector<1x2x1xf32>
    %941 = tpu.reciprocal %940 {approx = true} : vector<1x2x1xf32> -> vector<1x2x1xf32>
    %942 = vector.broadcast %941 : vector<1x2x1xf32> to vector<6x2x1xf32>
    %943 = arith.mulf %938, %942 : vector<6x2x1xf32>
    %944 = vector.broadcast %943 : vector<6x2x1xf32> to vector<6x2x32xf32>
    %945 = arith.mulf %944, %926 : vector<6x2x32xf32>
    %cst_290 = arith.constant dense<0.000000e+00> : vector<2x32xf32>
    %946 = vector.multi_reduction <add>, %945, %cst_290 [0] : vector<6x2x32xf32> to vector<2x32xf32>
    %947 = arith.addf %912, %946 : vector<2x32xf32>
    %cst_291 = arith.constant dense<0.000000e+00> : vector<2xf32>
    %948 = vector.multi_reduction <add>, %947, %cst_291 [1] : vector<2x32xf32> to vector<2xf32>
    %949 = vector.shape_cast %948 : vector<2xf32> to vector<2x1xf32>
    %cst_292 = arith.constant 3.200000e+01 : f32
    %950 = vector.broadcast %cst_292 : f32 to vector<2x1xf32>
    %951 = arith.divf %949, %950 : vector<2x1xf32>
    %952 = vector.broadcast %951 : vector<2x1xf32> to vector<2x32xf32>
    %953 = arith.subf %947, %952 : vector<2x32xf32>
    %954 = arith.mulf %953, %953 : vector<2x32xf32>
    %cst_293 = arith.constant dense<0.000000e+00> : vector<2xf32>
    %955 = vector.multi_reduction <add>, %954, %cst_293 [1] : vector<2x32xf32> to vector<2xf32>
    %956 = vector.shape_cast %955 : vector<2xf32> to vector<2x1xf32>
    %cst_294 = arith.constant 3.200000e+01 : f32
    %957 = vector.broadcast %cst_294 : f32 to vector<2x1xf32>
    %958 = arith.divf %956, %957 : vector<2x1xf32>
    %cst_295 = arith.constant 9.99999974E-6 : f32
    %959 = vector.broadcast %cst_295 : f32 to vector<2x1xf32>
    %960 = arith.addf %958, %959 : vector<2x1xf32>
    %961 = math.rsqrt %960 : vector<2x1xf32>
    %962 = vector.broadcast %961 : vector<2x1xf32> to vector<2x32xf32>
    %963 = arith.mulf %953, %962 : vector<2x32xf32>
    %964 = vector.broadcast %1 : vector<1x32xf32> to vector<2x32xf32>
    %965 = arith.mulf %963, %964 : vector<2x32xf32>
    %966 = vector.broadcast %2 : vector<1x32xf32> to vector<2x32xf32>
    %967 = arith.addf %965, %966 : vector<2x32xf32>
    %c368_296 = arith.constant 368 : index
    %c0_297 = arith.constant 0 : index
    %968 = vector.load %arg3[%c368_296, %c0_297] : memref<408x224xf32, #tpu.memory_space<vmem>>, vector<32x224xf32>
    %cst_298 = arith.constant dense<0.000000e+00> : vector<2x224xf32>
    %969 = tpu.matmul %967, %968, %cst_298 {dimension_numbers = #tpu.dot_dimension_numbers<[1], [0], [0], [1], [0, 0, 1, 1], [], []>} : vector<2x32xf32>, vector<32x224xf32>, vector<2x224xf32> -> vector<2x224xf32>
    %970 = vector.broadcast %6 : vector<1x224xf32> to vector<2x224xf32>
    %971 = arith.addf %969, %970 : vector<2x224xf32>
    %972 = vector.extract_strided_slice %971 {offsets = [0, 0], sizes = [2, 128], strides = [1, 1]} : vector<2x224xf32> to vector<2x128xf32>
    %973 = vector.extract_strided_slice %971 {offsets = [0, 128], sizes = [2, 32], strides = [1, 1]} : vector<2x224xf32> to vector<2x32xf32>
    %974 = vector.extract_strided_slice %971 {offsets = [0, 160], sizes = [2, 32], strides = [1, 1]} : vector<2x224xf32> to vector<2x32xf32>
    %975 = vector.extract_strided_slice %971 {offsets = [0, 192], sizes = [2, 32], strides = [1, 1]} : vector<2x224xf32> to vector<2x32xf32>
    %c6 = arith.constant 6 : index
    %c0_299 = arith.constant 0 : index
    %c0_300 = arith.constant 0 : index
    %976 = vector.load %arg4[%c6, %c0_299, %c0_300] : memref<8x2x128xf32, #tpu.memory_space<vmem>>, vector<1x2x128xf32>
    %977 = vector.shape_cast %976 : vector<1x2x128xf32> to vector<2x128xf32>
    %978 = vector.shape_cast %972 : vector<2x128xf32> to vector<1x2x128xf32>
    tpu.vector_store %arg4[%c6, %c0_299, %c0_300], %978 {strides = array<i32>} : memref<8x2x128xf32, #tpu.memory_space<vmem>>, vector<1x2x128xf32>,
    %cst_301 = arith.constant 1.000000e+00 : f32
    %979 = vector.broadcast %cst_301 : f32 to vector<2x128xf32>
    %980 = arith.mulf %972, %979 : vector<2x128xf32>
    %c6_302 = arith.constant 6 : index
    %c0_303 = arith.constant 0 : index
    %c0_304 = arith.constant 0 : index
    %981 = vector.load %arg2[%c6_302, %c0_303, %c0_304] : memref<8x2x128xf32, #tpu.memory_space<vmem>>, vector<1x2x128xf32>
    %982 = vector.shape_cast %981 : vector<1x2x128xf32> to vector<2x128xf32>
    %983 = arith.addf %980, %982 : vector<2x128xf32>
    %cst_305 = arith.constant dense<0xFF800000> : vector<2xf32>
    %984 = vector.multi_reduction <maximumf>, %983, %cst_305 [1] : vector<2x128xf32> to vector<2xf32>
    %985 = vector.shape_cast %984 : vector<2xf32> to vector<2x1xf32>
    %986 = vector.broadcast %985 : vector<2x1xf32> to vector<2x128xf32>
    %987 = arith.cmpf oge, %983, %986 : vector<2x128xf32>
    %c128_i32_306 = arith.constant 128 : i32
    %988 = vector.broadcast %c128_i32_306 : i32 to vector<2x128xi32>
    %989 = arith.select %987, %22, %988 : vector<2x128xi1>, vector<2x128xi32>
    %cst_307 = arith.constant dense<2147483647> : vector<2xi32>
    %990 = vector.multi_reduction <minsi>, %989, %cst_307 [1] : vector<2x128xi32> to vector<2xi32>
    %991 = vector.shape_cast %990 : vector<2xi32> to vector<2x1xi32>
    %992 = vector.broadcast %991 : vector<2x1xi32> to vector<2x128xi32>
    %993 = arith.cmpi eq, %22, %992 : vector<2x128xi32>
    %994 = arith.extui %993 : vector<2x128xi1> to vector<2x128xi32>
    %995 = arith.sitofp %994 : vector<2x128xi32> to vector<2x128xf32>
    %c0_308 = arith.constant 0 : index
    %c0_309 = arith.constant 0 : index
    %996 = vector.load %arg3[%c0_308, %c0_309] : memref<408x224xf32, #tpu.memory_space<vmem>>, vector<128x128xf32>
    %cst_310 = arith.constant dense<0.000000e+00> : vector<2x128xf32>
    %997 = tpu.matmul %995, %996, %cst_310 {dimension_numbers = #tpu.dot_dimension_numbers<[1], [0], [0], [1], [0, 0, 1, 1], [], []>} : vector<2x128xf32>, vector<128x128xf32>, vector<2x128xf32> -> vector<2x128xf32>
    %c128_311 = arith.constant 128 : index
    %c0_312 = arith.constant 0 : index
    %998 = vector.load %arg3[%c128_311, %c0_312] : memref<408x224xf32, #tpu.memory_space<vmem>>, vector<32x128xf32>
    %cst_313 = arith.constant dense<0.000000e+00> : vector<2x128xf32>
    %999 = tpu.matmul %872, %998, %cst_313 {dimension_numbers = #tpu.dot_dimension_numbers<[1], [0], [0], [1], [0, 0, 1, 1], [], []>} : vector<2x32xf32>, vector<32x128xf32>, vector<2x128xf32> -> vector<2x128xf32>
    %c160_314 = arith.constant 160 : index
    %c0_315 = arith.constant 0 : index
    %1000 = vector.load %arg3[%c160_314, %c0_315] : memref<408x224xf32, #tpu.memory_space<vmem>>, vector<32x128xf32>
    %cst_316 = arith.constant dense<0.000000e+00> : vector<2x128xf32>
    %1001 = tpu.matmul %892, %1000, %cst_316 {dimension_numbers = #tpu.dot_dimension_numbers<[1], [0], [0], [1], [0, 0, 1, 1], [], []>} : vector<2x32xf32>, vector<32x128xf32>, vector<2x128xf32> -> vector<2x128xf32>
    %c192_317 = arith.constant 192 : index
    %c0_318 = arith.constant 0 : index
    %1002 = vector.load %arg3[%c192_317, %c0_318] : memref<408x224xf32, #tpu.memory_space<vmem>>, vector<32x128xf32>
    %cst_319 = arith.constant dense<0.000000e+00> : vector<2x128xf32>
    %1003 = tpu.matmul %912, %1002, %cst_319 {dimension_numbers = #tpu.dot_dimension_numbers<[1], [0], [0], [1], [0, 0, 1, 1], [], []>} : vector<2x32xf32>, vector<32x128xf32>, vector<2x128xf32> -> vector<2x128xf32>
    %1004 = arith.addf %997, %999 : vector<2x128xf32>
    %1005 = arith.addf %1004, %21 : vector<2x128xf32>
    %1006 = arith.negf %1005 : vector<2x128xf32>
    %1007 = math.exp %1006 : vector<2x128xf32>
    %cst_320 = arith.constant 1.000000e+00 : f32
    %1008 = vector.broadcast %cst_320 : f32 to vector<2x128xf32>
    %1009 = arith.addf %1008, %1007 : vector<2x128xf32>
    %1010 = arith.divf %1008, %1009 : vector<2x128xf32>
    %1011 = vector.extract_strided_slice %1010 {offsets = [0, 0], sizes = [2, 32], strides = [1, 1]} : vector<2x128xf32> to vector<2x32xf32>
    %1012 = vector.extract_strided_slice %1010 {offsets = [0, 32], sizes = [2, 32], strides = [1, 1]} : vector<2x128xf32> to vector<2x32xf32>
    %1013 = vector.extract_strided_slice %1010 {offsets = [0, 96], sizes = [2, 32], strides = [1, 1]} : vector<2x128xf32> to vector<2x32xf32>
    %1014 = vector.extract_strided_slice %1005 {offsets = [0, 64], sizes = [2, 32], strides = [1, 1]} : vector<2x128xf32> to vector<2x32xf32>
    %1015 = math.tanh %1014 : vector<2x32xf32>
    %1016 = arith.mulf %1012, %870 : vector<2x32xf32>
    %1017 = arith.mulf %1011, %1015 : vector<2x32xf32>
    %1018 = arith.addf %1016, %1017 : vector<2x32xf32>
    %1019 = math.tanh %1018 : vector<2x32xf32>
    %1020 = arith.mulf %1013, %1019 : vector<2x32xf32>
    %c224_321 = arith.constant 224 : index
    %c0_322 = arith.constant 0 : index
    %1021 = vector.load %arg3[%c224_321, %c0_322] : memref<408x224xf32, #tpu.memory_space<vmem>>, vector<32x128xf32>
    %cst_323 = arith.constant dense<0.000000e+00> : vector<2x128xf32>
    %1022 = tpu.matmul %1020, %1021, %cst_323 {dimension_numbers = #tpu.dot_dimension_numbers<[1], [0], [0], [1], [0, 0, 1, 1], [], []>} : vector<2x32xf32>, vector<32x128xf32>, vector<2x128xf32> -> vector<2x128xf32>
    %1023 = arith.addf %1022, %1001 : vector<2x128xf32>
    %1024 = vector.broadcast %4 : vector<1x128xf32> to vector<2x128xf32>
    %1025 = arith.addf %1023, %1024 : vector<2x128xf32>
    %1026 = arith.negf %1025 : vector<2x128xf32>
    %1027 = math.exp %1026 : vector<2x128xf32>
    %cst_324 = arith.constant 1.000000e+00 : f32
    %1028 = vector.broadcast %cst_324 : f32 to vector<2x128xf32>
    %1029 = arith.addf %1028, %1027 : vector<2x128xf32>
    %1030 = arith.divf %1028, %1029 : vector<2x128xf32>
    %1031 = vector.extract_strided_slice %1030 {offsets = [0, 0], sizes = [2, 32], strides = [1, 1]} : vector<2x128xf32> to vector<2x32xf32>
    %1032 = vector.extract_strided_slice %1030 {offsets = [0, 32], sizes = [2, 32], strides = [1, 1]} : vector<2x128xf32> to vector<2x32xf32>
    %1033 = vector.extract_strided_slice %1030 {offsets = [0, 96], sizes = [2, 32], strides = [1, 1]} : vector<2x128xf32> to vector<2x32xf32>
    %1034 = vector.extract_strided_slice %1025 {offsets = [0, 64], sizes = [2, 32], strides = [1, 1]} : vector<2x128xf32> to vector<2x32xf32>
    %1035 = math.tanh %1034 : vector<2x32xf32>
    %1036 = arith.mulf %1032, %890 : vector<2x32xf32>
    %1037 = arith.mulf %1031, %1035 : vector<2x32xf32>
    %1038 = arith.addf %1036, %1037 : vector<2x32xf32>
    %1039 = math.tanh %1038 : vector<2x32xf32>
    %1040 = arith.mulf %1033, %1039 : vector<2x32xf32>
    %c256_325 = arith.constant 256 : index
    %c0_326 = arith.constant 0 : index
    %1041 = vector.load %arg3[%c256_325, %c0_326] : memref<408x224xf32, #tpu.memory_space<vmem>>, vector<32x128xf32>
    %cst_327 = arith.constant dense<0.000000e+00> : vector<2x128xf32>
    %1042 = tpu.matmul %1040, %1041, %cst_327 {dimension_numbers = #tpu.dot_dimension_numbers<[1], [0], [0], [1], [0, 0, 1, 1], [], []>} : vector<2x32xf32>, vector<32x128xf32>, vector<2x128xf32> -> vector<2x128xf32>
    %1043 = arith.addf %1042, %1003 : vector<2x128xf32>
    %1044 = vector.broadcast %5 : vector<1x128xf32> to vector<2x128xf32>
    %1045 = arith.addf %1043, %1044 : vector<2x128xf32>
    %1046 = arith.negf %1045 : vector<2x128xf32>
    %1047 = math.exp %1046 : vector<2x128xf32>
    %cst_328 = arith.constant 1.000000e+00 : f32
    %1048 = vector.broadcast %cst_328 : f32 to vector<2x128xf32>
    %1049 = arith.addf %1048, %1047 : vector<2x128xf32>
    %1050 = arith.divf %1048, %1049 : vector<2x128xf32>
    %1051 = vector.extract_strided_slice %1050 {offsets = [0, 0], sizes = [2, 32], strides = [1, 1]} : vector<2x128xf32> to vector<2x32xf32>
    %1052 = vector.extract_strided_slice %1050 {offsets = [0, 32], sizes = [2, 32], strides = [1, 1]} : vector<2x128xf32> to vector<2x32xf32>
    %1053 = vector.extract_strided_slice %1050 {offsets = [0, 96], sizes = [2, 32], strides = [1, 1]} : vector<2x128xf32> to vector<2x32xf32>
    %1054 = vector.extract_strided_slice %1045 {offsets = [0, 64], sizes = [2, 32], strides = [1, 1]} : vector<2x128xf32> to vector<2x32xf32>
    %1055 = math.tanh %1054 : vector<2x32xf32>
    %1056 = arith.mulf %1052, %910 : vector<2x32xf32>
    %1057 = arith.mulf %1051, %1055 : vector<2x32xf32>
    %1058 = arith.addf %1056, %1057 : vector<2x32xf32>
    %1059 = math.tanh %1058 : vector<2x32xf32>
    %1060 = arith.mulf %1053, %1059 : vector<2x32xf32>
    %1061 = vector.shape_cast %121 : vector<2x32xf32> to vector<1x2x32xf32>
    %1062 = vector.shape_cast %254 : vector<2x32xf32> to vector<1x2x32xf32>
    %1063 = vector.shape_cast %394 : vector<2x32xf32> to vector<1x2x32xf32>
    %1064 = vector.shape_cast %536 : vector<2x32xf32> to vector<1x2x32xf32>
    %1065 = vector.shape_cast %680 : vector<2x32xf32> to vector<1x2x32xf32>
    %1066 = vector.shape_cast %826 : vector<2x32xf32> to vector<1x2x32xf32>
    %1067 = vector.shape_cast %974 : vector<2x32xf32> to vector<1x2x32xf32>
    %1068 = tpu.concatenate %1061, %1062, %1063, %1064, %1065, %1066, %1067 in 0 : vector<1x2x32xf32>, vector<1x2x32xf32>, vector<1x2x32xf32>, vector<1x2x32xf32>, vector<1x2x32xf32>, vector<1x2x32xf32>, vector<1x2x32xf32> -> vector<7x2x32xf32>
    %1069 = vector.shape_cast %122 : vector<2x32xf32> to vector<1x2x32xf32>
    %1070 = vector.shape_cast %255 : vector<2x32xf32> to vector<1x2x32xf32>
    %1071 = vector.shape_cast %395 : vector<2x32xf32> to vector<1x2x32xf32>
    %1072 = vector.shape_cast %537 : vector<2x32xf32> to vector<1x2x32xf32>
    %1073 = vector.shape_cast %681 : vector<2x32xf32> to vector<1x2x32xf32>
    %1074 = vector.shape_cast %827 : vector<2x32xf32> to vector<1x2x32xf32>
    %1075 = vector.shape_cast %975 : vector<2x32xf32> to vector<1x2x32xf32>
    %1076 = tpu.concatenate %1069, %1070, %1071, %1072, %1073, %1074, %1075 in 0 : vector<1x2x32xf32>, vector<1x2x32xf32>, vector<1x2x32xf32>, vector<1x2x32xf32>, vector<1x2x32xf32>, vector<1x2x32xf32>, vector<1x2x32xf32> -> vector<7x2x32xf32>
    %1077 = vector.shape_cast %973 : vector<2x32xf32> to vector<1x2x32xf32>
    %1078 = vector.broadcast %1077 : vector<1x2x32xf32> to vector<7x2x32xf32>
    %1079 = arith.mulf %1068, %1078 : vector<7x2x32xf32>
    %cst_329 = arith.constant dense<0.000000e+00> : vector<7x2xf32>
    %1080 = vector.multi_reduction <add>, %1079, %cst_329 [2] : vector<7x2x32xf32> to vector<7x2xf32>
    %1081 = vector.shape_cast %1080 : vector<7x2xf32> to vector<7x2x1xf32>
    %cst_330 = arith.constant 0.176776692 : f32
    %1082 = vector.broadcast %cst_330 : f32 to vector<7x2x1xf32>
    %1083 = arith.mulf %1081, %1082 : vector<7x2x1xf32>
    %cst_331 = arith.constant dense<0xFF800000> : vector<2x1xf32>
    %1084 = vector.multi_reduction <maximumf>, %1083, %cst_331 [0] : vector<7x2x1xf32> to vector<2x1xf32>
    %1085 = vector.shape_cast %1084 : vector<2x1xf32> to vector<1x2x1xf32>
    %1086 = vector.broadcast %1085 : vector<1x2x1xf32> to vector<7x2x1xf32>
    %1087 = arith.subf %1083, %1086 : vector<7x2x1xf32>
    %1088 = math.exp %1087 : vector<7x2x1xf32>
    %cst_332 = arith.constant dense<0.000000e+00> : vector<2x1xf32>
    %1089 = vector.multi_reduction <add>, %1088, %cst_332 [0] : vector<7x2x1xf32> to vector<2x1xf32>
    %1090 = vector.shape_cast %1089 : vector<2x1xf32> to vector<1x2x1xf32>
    %1091 = tpu.reciprocal %1090 {approx = true} : vector<1x2x1xf32> -> vector<1x2x1xf32>
    %1092 = vector.broadcast %1091 : vector<1x2x1xf32> to vector<7x2x1xf32>
    %1093 = arith.mulf %1088, %1092 : vector<7x2x1xf32>
    %1094 = vector.broadcast %1093 : vector<7x2x1xf32> to vector<7x2x32xf32>
    %1095 = arith.mulf %1094, %1076 : vector<7x2x32xf32>
    %cst_333 = arith.constant dense<0.000000e+00> : vector<2x32xf32>
    %1096 = vector.multi_reduction <add>, %1095, %cst_333 [0] : vector<7x2x32xf32> to vector<2x32xf32>
    %1097 = arith.addf %1060, %1096 : vector<2x32xf32>
    %cst_334 = arith.constant dense<0.000000e+00> : vector<2xf32>
    %1098 = vector.multi_reduction <add>, %1097, %cst_334 [1] : vector<2x32xf32> to vector<2xf32>
    %1099 = vector.shape_cast %1098 : vector<2xf32> to vector<2x1xf32>
    %cst_335 = arith.constant 3.200000e+01 : f32
    %1100 = vector.broadcast %cst_335 : f32 to vector<2x1xf32>
    %1101 = arith.divf %1099, %1100 : vector<2x1xf32>
    %1102 = vector.broadcast %1101 : vector<2x1xf32> to vector<2x32xf32>
    %1103 = arith.subf %1097, %1102 : vector<2x32xf32>
    %1104 = arith.mulf %1103, %1103 : vector<2x32xf32>
    %cst_336 = arith.constant dense<0.000000e+00> : vector<2xf32>
    %1105 = vector.multi_reduction <add>, %1104, %cst_336 [1] : vector<2x32xf32> to vector<2xf32>
    %1106 = vector.shape_cast %1105 : vector<2xf32> to vector<2x1xf32>
    %cst_337 = arith.constant 3.200000e+01 : f32
    %1107 = vector.broadcast %cst_337 : f32 to vector<2x1xf32>
    %1108 = arith.divf %1106, %1107 : vector<2x1xf32>
    %cst_338 = arith.constant 9.99999974E-6 : f32
    %1109 = vector.broadcast %cst_338 : f32 to vector<2x1xf32>
    %1110 = arith.addf %1108, %1109 : vector<2x1xf32>
    %1111 = math.rsqrt %1110 : vector<2x1xf32>
    %1112 = vector.broadcast %1111 : vector<2x1xf32> to vector<2x32xf32>
    %1113 = arith.mulf %1103, %1112 : vector<2x32xf32>
    %1114 = vector.broadcast %1 : vector<1x32xf32> to vector<2x32xf32>
    %1115 = arith.mulf %1113, %1114 : vector<2x32xf32>
    %1116 = vector.broadcast %2 : vector<1x32xf32> to vector<2x32xf32>
    %1117 = arith.addf %1115, %1116 : vector<2x32xf32>
    %c368_339 = arith.constant 368 : index
    %c0_340 = arith.constant 0 : index
    %1118 = vector.load %arg3[%c368_339, %c0_340] : memref<408x224xf32, #tpu.memory_space<vmem>>, vector<32x224xf32>
    %cst_341 = arith.constant dense<0.000000e+00> : vector<2x224xf32>
    %1119 = tpu.matmul %1117, %1118, %cst_341 {dimension_numbers = #tpu.dot_dimension_numbers<[1], [0], [0], [1], [0, 0, 1, 1], [], []>} : vector<2x32xf32>, vector<32x224xf32>, vector<2x224xf32> -> vector<2x224xf32>
    %1120 = vector.broadcast %6 : vector<1x224xf32> to vector<2x224xf32>
    %1121 = arith.addf %1119, %1120 : vector<2x224xf32>
    %1122 = vector.extract_strided_slice %1121 {offsets = [0, 0], sizes = [2, 128], strides = [1, 1]} : vector<2x224xf32> to vector<2x128xf32>
    %c7 = arith.constant 7 : index
    %c0_342 = arith.constant 0 : index
    %c0_343 = arith.constant 0 : index
    %1123 = vector.load %arg4[%c7, %c0_342, %c0_343] : memref<8x2x128xf32, #tpu.memory_space<vmem>>, vector<1x2x128xf32>
    %1124 = vector.shape_cast %1123 : vector<1x2x128xf32> to vector<2x128xf32>
    %1125 = vector.shape_cast %1122 : vector<2x128xf32> to vector<1x2x128xf32>
    tpu.vector_store %arg4[%c7, %c0_342, %c0_343], %1125 {strides = array<i32>} : memref<8x2x128xf32, #tpu.memory_space<vmem>>, vector<1x2x128xf32>,
    return
  }
}

</mosaic_0001>

<bundles_post_ra>
// kernel: attack_generator_forward.1
= control target key start
LH: loop header
LB: loop body
LE: loop exit
PB: predicated region body
PF: predicated region fallthrough
CT: control target
= control target key end

     0   :  { %9 = vsyncpa [#allocation3], 0  ;;  %s4323_s18 = smov [#allocation2]   ;;  %s4324_s20 = smov 256   ;;  %s5711_s0 = inlined_call_operand.vmem [shape: f32[2,16], index: 0, kind: input, shape index: {}]   ;;  %s5712_s1 = inlined_call_operand.vmem [shape: f32[2,32], index: 1, kind: input, shape index: {}]   ;;  %s5713_s2 = inlined_call_operand.vmem [shape: f32[8,2,128], index: 2, kind: input, shape index: {}]   ;;  %s5714_s3 = inlined_call_operand.hbm [shape: f32[408,224], index: 3, kind: input, shape index: {}]   ;;  %s5715_s4 = inlined_call_operand.vmem [shape: f32[8,2,128], index: 4, kind: output, shape index: {}]  }
   0x1   :  { %s20_s17 = sshll.u32 %s5714_s3, 4  ;;  %s22_s19 = sshll.u32 %s4323_s18, 4  ;;  %s21_s17 = int_to_ptr.hbm [resolvable:$true] %s20_s17  ;;  %s23_s19 = int_to_ptr.vmem [resolvable:$true] %s22_s19 }
   0x2   :  { %s4325_s21 = smov 16  }
   0x3   :  { %28 = dma.hbm_to_vmem [thread:$0]  %s21_s17, 13056, %s23_s19, [#allocation3], %s4324_s20, %s4324_s20, %s4325_s21  }
   0x4   :  { %4321 = dma.done.wait [#allocation3], 13056  }
   0x5   :  { %4322 = vsyncadd [#allocation3], 4294954240  ;;  %v41_v0 = vld [vmem:[#allocation2 + $0x2d0] sm:$0xff]  ;;  %v40_v1 = vld [vmem:[#allocation2 + $0x2c0] sm:$0xff]  ;;  %vm42_vm0 = vcmask 130048   ;;  %vm76_vm1 = vcmask 261120   ;;  %v124_v31 = vlaneseq }
   0x6   :  { %60 = vmatpush.msra.mxu0 %v41_v0  ;;  %v39_v2 = vld [vmem:[%s5711_s0] sm:$0x3]  ;;  %v4362_v3 = vld [vmem:[#allocation2 + $0xf0] sm:$0xff]  ;;  %v4326_v38 = vmov 1.0   ;;  %s4328_s24 = smov 32   ;;  %vm414_vm15 = vcmask 254976  }
   0x7   :  { %v4364_v4 = vld [vmem:[#allocation2 + $0xe0] sm:$0xff]  ;;  %217 = vmatpush.msra.mxu2 %v4362_v3  ;;  %v4367_v5 = vld [vmem:[#allocation2 + $0xd0] sm:$0xff]  ;;  %v4433_v36 = vand.u32 127, %v124_v31  ;;  %s4330_s29 = smov 96  }
   0x8   :  { %61 = vmatpush.msra.mxu0 %v40_v1  ;;  %v71_v6 = vld [vmem:[#allocation2 + $0x270] sm:$0xff]  ;;  %v70_v7 = vld [vmem:[#allocation2 + $0x260] sm:$0xff] }
   0x9   :  { %3892 = vmatmul.msk.f32.vlgmr.msra.gmra.mxu0 %vm42_vm0, %v39_v2  ;;  %218 = vmatpush.msra.mxu2 %v4364_v4  ;;  %v4370_v8 = vld [vmem:[#allocation2 + $0xc0] sm:$0xff]  ;;  %v69_v9 = vld [vmem:[#allocation2 + $0x250] sm:$0xff]  ;;  %vm126_vm2 = vcmp.eq.s32.totalorder %v4433_v36, 1 }
   0xa   :  { %115 = vmatpush.msrb.mxu0 %v71_v6  ;;  %v75_v10 = vld [vmem:[#allocation2 + $0x2b0] sm:$0xff]  ;;  %v68_v13 = vld [vmem:[#allocation2 + $0x240] sm:$0xff] }
   0xb   :  { %219 = vmatpush.msra.mxu2 %v4367_v5  ;;  %v4373_v11 = vld [vmem:[#allocation2 + $0xb0] sm:$0xff]  ;;  %92 = vmatpush.msra.mxu1 %v75_v10  ;;  %v4379_v14 = vld [vmem:[#allocation2 + $0xa0] sm:$0xff] }
   0xc   :  { %116 = vmatpush.msrb.mxu0 %v70_v7  ;;  %v4375_v12 = vld [vmem:[#allocation2 + $0x130] sm:$0xff]  ;;  %v67_v15 = vld [vmem:[%s5712_s1] sm:$0x3]  ;;  %s4327_s1 = smov 64  }
   0xd   :  { %220 = vmatpush.msra.mxu2 %v4370_v8  ;;  %161 = vmatpush.msra.mxu3 %v4375_v12  ;;  %v4385_v16 = vld [vmem:[#allocation2 + $0x170] sm:$0xff]  ;;  %v4391_v18 = vld [vmem:[#allocation2 + $0x80] sm:$0xff] }
   0xe   :  { %117 = vmatpush.msrb.mxu0 %v69_v9  ;;  %v4387_v17 = vld [vmem:[#allocation2 + $0x90] sm:$0xff]  ;;  %v4398_v20 = vld [vmem:[#allocation2 + $0x60] sm:$0xff] }
   0xf   :  { %221 = vmatpush.msra.mxu2 %v4373_v11  ;;  %v4395_v19 = vld [vmem:[#allocation2 + $0x70] sm:$0xff]  ;;  %v4404_v22 = vld [vmem:[#allocation2 + $0x40] sm:$0xff] }
  0x10   :  { %118 = vmatpush.msrb.mxu0 %v68_v13  ;;  %v4401_v21 = vld [vmem:[#allocation2 + $0x50] sm:$0xff]  ;;  %v74_v24 = vld [vmem:[#allocation2 + $0x2a0] sm:$0xff] }
  0x11   :  { %222 = vmatpush.msra.mxu2 %v4379_v14  ;;  %3894 = vmatmul.msk.f32.vlgmr.msrb.gmra.mxu0 %vm76_vm1, %v67_v15  ;;  %v4407_v23 = vld [vmem:[#allocation2 + $0x30] sm:$0xff]  ;;  %v4411_v25 = vld [vmem:[#allocation2 + $0x120] sm:$0xff] }
  0x12   :  { %185 = vmatpush.msra.mxu0 %v4385_v16  ;;  %v4413_v26 = vld [vmem:[#allocation2 + $0x160] sm:$0xff]  ;;  %93 = vmatpush.msra.mxu1 %v74_v24  ;;  %v73_v28 = vld [vmem:[#allocation2 + $0x290] sm:$0xff] }
  0x13   :  { %223 = vmatpush.msra.mxu2 %v4387_v17  ;;  %162 = vmatpush.msra.mxu3 %v4411_v25  ;;  %v4416_v27 = vld [vmem:[#allocation2 + $0x20] sm:$0xff]  ;;  %v4420_v29 = vld [vmem:[#allocation2 + $0x110] sm:$0xff] }
  0x14   :  { %186 = vmatpush.msra.mxu0 %v4413_v26  ;;  %v4422_v30 = vld [vmem:[#allocation2 + $0x150] sm:$0xff]  ;;  %94 = vmatpush.msra.mxu1 %v73_v28  ;;  %v72_v33 = vld [vmem:[#allocation2 + $0x280] sm:$0xff] }
  0x15   :  { %224 = vmatpush.msra.mxu2 %v4391_v18  ;;  %163 = vmatpush.msra.mxu3 %v4420_v29  ;;  %v4425_v32 = vld [vmem:[#allocation2 + $0x10] sm:$0xff]  ;;  %v4429_v34 = vld [vmem:[#allocation2 + $0x100] sm:$0xff] }
  0x16   :  { %187 = vmatpush.msra.mxu0 %v4422_v30  ;;  %v4431_v35 = vld [vmem:[#allocation2 + $0x140] sm:$0xff]  ;;  %95 = vmatpush.msra.mxu1 %v72_v33  ;;  %v4442_v39 = vld [vmem:[#allocation2 + $0x1b0] sm:$0xff] }
  0x17   :  { %225 = vmatpush.msra.mxu2 %v4395_v19  ;;  %164 = vmatpush.msra.mxu3 %v4429_v34  ;;  %v4436_v37 = vld [vmem:[#allocation2] sm:$0xff]  ;;  %v4447_v41 = vld [vmem:[#allocation2 + $0x190] sm:$0xff] }
  0x18   :  { %188 = vmatpush.msra.mxu0 %v4431_v35  ;;  %v4444_v40 = vld [vmem:[#allocation2 + $0x1a0] sm:$0xff]  ;;  %209 = vmatpush.msrb.mxu1 %v4442_v39  ;;  %v4470_v33 = vld [vmem:[#allocation2 + $0x1f0] sm:$0xff] }
  0x19   :  { %226 = vmatpush.msra.mxu2 %v4398_v20  ;;  %v4450_v42 = vld [vmem:[#allocation2 + $0x180] sm:$0xff]  ;;  %296 = vmatpush.msrb.mxu3 %v4470_v33 }
  0x1a   :  { %210 = vmatpush.msrb.mxu1 %v4444_v40  ;;  %v4454_v43 = vld [vmem:[#allocation2 + $0x320] ss:$0 sm:$0xff]  ;;  %v34_v50 = vld [vmem:[#allocation2 + $0x321] ss:$0 sm:$0xff] }
  0x1b   :  { %227 = vmatpush.msra.mxu2 %v4401_v21 }
  0x1c   :  { %211 = vmatpush.msrb.mxu1 %v4447_v41 }
  0x1d   :  { %228 = vmatpush.msra.mxu2 %v4404_v22 }
  0x1e   :  { %212 = vmatpush.msrb.mxu1 %v4450_v42 }
  0x1f   :  { %229 = vmatpush.msra.mxu2 %v4407_v23 }
  0x21   :  { %230 = vmatpush.msra.mxu2 %v4416_v27 }
  0x23   :  { %231 = vmatpush.msra.mxu2 %v4425_v32 }
  0x25   :  { %232 = vmatpush.msra.mxu2 %v4436_v37 }
  0x26   :  { %3899 = vmatmul.msk.f32.vlgmr.msra.gmra.mxu2 %vm126_vm2, %v4326_v38 }
  0x86   :  { %v63_v44 = vpop.f32.mrf.mxu0 }
  0x87   :  { %v64_v45 = vadd.f32 %v63_v44, %v4454_v43  ;;  %v4472_v44 = vld [vmem:[#allocation2 + $0x1e0] sm:$0xff] }
  0x88   :  { %297 = vmatpush.msrb.mxu3 %v4472_v44 }
  0x89   :  { %v66_v46 = vmax.f32 %v64_v45, 0.0  ;;  %v4475_v45 = vld [vmem:[#allocation2 + $0x1d0] sm:$0xff] }
  0x8a   :  { %298 = vmatpush.msrb.mxu3 %v4475_v45 }
  0x8b   :  { %3893 = vmatmul.msk.f32.vlgmr.msra.gmra.mxu1 %vm76_vm1, %v66_v46  ;;  %3896 = vmatmul.msk.f32.vlgmr.msra.gmra.mxu3 %vm76_vm1, %v66_v46 }
  0x8c   :  { %3897 = vmatmul.msk.f32.vlgmr.msra.gmra.mxu0 %vm76_vm1, %v66_v46 }
  0x8e   :  { %v120_v48 = vpop.f32.mrf.mxu0 }
  0x93   :  { %3898 = vmatmul.msk.f32.vlgmr.msrb.gmra.mxu1 %vm76_vm1, %v66_v46  ;;  %v4478_v46 = vld [vmem:[#allocation2 + $0x1c0] sm:$0xff] }
  0x94   :  { %299 = vmatpush.msrb.mxu3 %v4478_v46 }
  0xa9   :  { %v234_v51 = vpop.f32.mrf.mxu2 }
 0x108   :  { %v97_v47 = vpop.f32.mrf.mxu1 }
 0x109   :  { %v121_v49 = vadd.f32 %v120_v48, %v97_v47 }
 0x10b   :  { %v4461_v53 = vadd.f32 %v121_v49, %v34_v50  ;;  %v190_v50 = vpop.f32.mrf.mxu0 }
 0x10e   :  { %v166_v52 = vpop.f32.mrf.mxu3 }
 0x10f   :  { %v235_v54 = vadd.f32 %v234_v51, %v166_v52  ;;  %v4484_v51 = vld [vmem:[#allocation2 + $0x322] ss:$0 sm:$0xff] }
 0x111   :  { %v237_v55 = vadd.f32 %v235_v54, %v4461_v53 }
 0x113   :  { %4011 = vtanh.f32 %v237_v55  ;;  %v3900_v57 = vmul.f32 -1.442695, %v237_v55 }
 0x115   :  { %4013 = vpow2.f32 %v3900_v57 }
 0x119   :  { %v4012_v56 = vpop.eup %4011 }
 0x11a   :  { %260 = vrot.lane.b32.xlu0 %v4012_v56, %s4327_s1 }
 0x11b   :  { %v4014_v58 = vpop.eup %4013 }
 0x11c   :  { %v241_v59 = vadd.f32 1.0, %v4014_v58 }
 0x11e   :  { %4015 = vrcp.f32 %v241_v59  ;;  %v253_v1 = vand.u32 2147483648, %v241_v59  ;;  %vm247_vm4 = vweird.f32 %v241_v59  ;;  %v251_v2 = vand.u32 2147483647, %v241_v59 }
 0x120   :  { %v254_v7 = vor.u32 1.1754944e-38, %v253_v1  ;;  %vm252_vm6 = vcmp.eq.f32.partialorder %v251_v2, 8.507059e+37 }
 0x124   :  { %v4016_v60 = vpop.eup %4015 }
 0x125   :  { %v243_v61 = vmul.f32 %v4016_v60, %v241_v59  ;;  %vm248_vm3 = vweird.f32 %v4016_v60 }
 0x126   :  { %vm249_vm5 = vmor %vm247_vm4, %vm248_vm3 }
 0x127   :  { %v244_v62 = vsub.f32 1.0, %v243_v61 }
 0x129   :  { %v245_v63 = vmul.f32 %v4016_v60, %v244_v62 }
 0x12b   :  { %v246_v0 = vadd.f32 %v4016_v60, %v245_v63 }
 0x12d   :  { %v250_v6 = vsel %vm249_vm5, %v4016_v60, %v246_v0  ;;  %vm518_vm5 = vcmask 1041408  }
 0x12e   :  { %v255_v10 = vsel %vm252_vm6, %v254_v7, %v250_v6 }
 0x12f   :  { %v258_v15 = vmul.f32 0.0, %v255_v10 }
 0x18c   :  { %v261_v9 = vpop.permute.xlu0 %260 }
 0x18d   :  { %v263_v13 = vmul.f32 %v261_v9, %v255_v10 }
 0x18f   :  { %265 = vrot.lane.b32.xlu0 %v263_v13, %s4328_s24 }
 0x201   :  { %v266_v24 = vpop.permute.xlu0 %265 }
 0x202   :  { %v4466_v28 = vadd.f32 %v266_v24, %v258_v15 }
 0x204   :  { %4017 = vtanh.f32 %v4466_v28 }
 0x20a   :  { %v4018_v31 = vpop.eup %4017 }
 0x20b   :  { %271 = vrot.lane.b32.xlu1 %v4018_v31, %s4327_s1 }
 0x27d   :  { %v272_v47 = vpop.permute.xlu1 %271 }
 0x27e   :  { %v274_v48 = vmul.f32 %v272_v47, %v255_v10 }
 0x280   :  { %280 = vrot.lane.b32.xlu1 %v274_v48, %s4328_s24  ;;  %v4493_v48 = vld [vmem:[#allocation2 + $0x230] sm:$0xff] }
 0x281   :  { %363 = vmatpush.msrb.mxu0 %v4493_v48 }
 0x2f2   :  { %v281_v49 = vpop.permute.xlu1 %280 }
 0x2f3   :  { %3901 = vmatmul.msk.f32.vlgmr.msrb.gmra.mxu3 %vm76_vm1, %v281_v49 }
 0x376   :  { %v301_v52 = vpop.f32.mrf.mxu3 }
 0x377   :  { %v302_v54 = vadd.f32 %v301_v52, %v190_v50  ;;  %v4495_v50 = vld [vmem:[#allocation2 + $0x220] sm:$0xff]  ;;  %v4498_v52 = vld [vmem:[#allocation2 + $0x210] sm:$0xff] }
 0x378   :  { %364 = vmatpush.msrb.mxu0 %v4495_v50 }
 0x379   :  { %v304_v55 = vadd.f32 %v302_v54, %v4484_v51  ;;  %v4501_v54 = vld [vmem:[#allocation2 + $0x200] sm:$0xff] }
 0x37a   :  { %365 = vmatpush.msrb.mxu0 %v4498_v52 }
 0x37b   :  { %4019 = vtanh.f32 %v304_v55  ;;  %v3902_v57 = vmul.f32 -1.442695, %v304_v55 }
 0x37c   :  { %366 = vmatpush.msrb.mxu0 %v4501_v54 }
 0x37d   :  { %4021 = vpow2.f32 %v3902_v57 }
 0x37e   :  { %574 = vmatpush.msra.mxu0 %v4375_v12 }
 0x380   :  { %575 = vmatpush.msra.mxu0 %v4411_v25 }
 0x381   :  { %v4020_v56 = vpop.eup %4019 }
 0x382   :  { %327 = vrot.lane.b32.xlu2 %v4020_v56, %s4327_s1  ;;  %576 = vmatpush.msra.mxu0 %v4420_v29 }
 0x383   :  { %v4022_v58 = vpop.eup %4021 }
 0x384   :  { %v308_v59 = vadd.f32 1.0, %v4022_v58  ;;  %577 = vmatpush.msra.mxu0 %v4429_v34 }
 0x386   :  { %4023 = vrcp.f32 %v308_v59  ;;  %v320_v1 = vand.u32 2147483648, %v308_v59  ;;  %vm314_vm8 = vweird.f32 %v308_v59  ;;  %v318_v2 = vand.u32 2147483647, %v308_v59 }
 0x388   :  { %v321_v7 = vor.u32 1.1754944e-38, %v320_v1  ;;  %vm319_vm10 = vcmp.eq.f32.partialorder %v318_v2, 8.507059e+37 }
 0x38c   :  { %v4024_v60 = vpop.eup %4023 }
 0x38d   :  { %v310_v61 = vmul.f32 %v4024_v60, %v308_v59  ;;  %vm315_vm7 = vweird.f32 %v4024_v60 }
 0x38e   :  { %vm316_vm9 = vmor %vm314_vm8, %vm315_vm7 }
 0x38f   :  { %v311_v62 = vsub.f32 1.0, %v310_v61 }
 0x391   :  { %v312_v63 = vmul.f32 %v4024_v60, %v311_v62 }
 0x393   :  { %v313_v0 = vadd.f32 %v4024_v60, %v312_v63 }
 0x395   :  { %v317_v6 = vsel %vm316_vm9, %v4024_v60, %v313_v0 }
 0x396   :  { %v322_v10 = vsel %vm319_vm10, %v321_v7, %v317_v6 }
 0x397   :  { %v325_v15 = vmul.f32 0.0, %v322_v10 }
 0x3dc   :  { %v328_v9 = vpop.permute.xlu2 %327 }
 0x3dd   :  { %v330_v13 = vmul.f32 %v328_v9, %v322_v10 }
 0x3df   :  { %332 = vrot.lane.b32.xlu2 %v330_v13, %s4328_s24 }
 0x439   :  { %v333_v24 = vpop.permute.xlu2 %332 }
 0x43a   :  { %v4489_v31 = vadd.f32 %v333_v24, %v325_v15 }
 0x43c   :  { %4025 = vtanh.f32 %v4489_v31 }
 0x442   :  { %v4026_v47 = vpop.eup %4025 }
 0x443   :  { %338 = vrot.lane.b32.xlu0 %v4026_v47, %s4327_s1 }
 0x4b5   :  { %v339_v55 = vpop.permute.xlu0 %338 }
 0x4b6   :  { %v341_v56 = vmul.f32 %v339_v55, %v322_v10  ;;  %v4329_v10 = vmov 32.0  }
 0x4b8   :  { %347 = vrot.lane.b32.xlu1 %v341_v56, %s4328_s24 }
 0x52a   :  { %v4510_v57 = vpop.permute.xlu1 %347 }
 0x52b   :  { %3903 = vmatmul.msk.f32.vlgmr.msrb.gmra.mxu0 %vm76_vm1, %v4510_v57 }
 0x52c   :  { %635 = vmatpush.msrb.mxu0 %v4362_v3  ;;  %v214_v3 = vpop.f32.mrf.mxu1 }
 0x52e   :  { %636 = vmatpush.msrb.mxu0 %v4364_v4  ;;  %v4531_v4 = vld [vmem:[#allocation2 + $0x323] ss:$0 sm:$0xff] }
 0x530   :  { %637 = vmatpush.msrb.mxu0 %v4367_v5 }
 0x532   :  { %638 = vmatpush.msrb.mxu0 %v4370_v8 }
 0x533   :  { %3908 = vmatmul.msk.f32.vlgmr.msra.gmra.mxu0 %vm76_vm1, %v281_v49 }
 0x534   :  { %639 = vmatpush.msrb.mxu0 %v4373_v11 }
 0x536   :  { %640 = vmatpush.msrb.mxu0 %v4379_v14 }
 0x538   :  { %641 = vmatpush.msrb.mxu0 %v4387_v17 }
 0x53a   :  { %642 = vmatpush.msrb.mxu0 %v4391_v18 }
 0x53c   :  { %643 = vmatpush.msrb.mxu0 %v4395_v19 }
 0x53e   :  { %644 = vmatpush.msrb.mxu0 %v4398_v20 }
 0x540   :  { %645 = vmatpush.msrb.mxu0 %v4401_v21 }
 0x542   :  { %646 = vmatpush.msrb.mxu0 %v4404_v22 }
 0x544   :  { %647 = vmatpush.msrb.mxu0 %v4407_v23 }
 0x546   :  { %648 = vmatpush.msrb.mxu0 %v4416_v27 }
 0x548   :  { %649 = vmatpush.msrb.mxu0 %v4425_v32 }
 0x54a   :  { %650 = vmatpush.msrb.mxu0 %v4436_v37 }
 0x5a8   :  { %v368_v5 = vpop.f32.mrf.mxu0 }
 0x5a9   :  { %v369_v8 = vadd.f32 %v368_v5, %v214_v3 }
 0x5ab   :  { %v371_v11 = vadd.f32 %v369_v8, %v4531_v4 }
 0x5ad   :  { %4027 = vtanh.f32 %v371_v11  ;;  %v3904_v17 = vmul.f32 -1.442695, %v371_v11 }
 0x5af   :  { %4029 = vpow2.f32 %v3904_v17 }
 0x5b3   :  { %v4028_v14 = vpop.eup %4027 }
 0x5b4   :  { %394 = vrot.lane.b32.xlu2 %v4028_v14, %s4327_s1 }
 0x5b5   :  { %v4030_v18 = vpop.eup %4029 }
 0x5b6   :  { %v375_v19 = vadd.f32 1.0, %v4030_v18  ;;  %v463_v18 = vld [vmem:[#allocation2 + $0x310] sm:$0xff] }
 0x5b7   :  { %487 = vmatpush.msra.mxu1 %v463_v18 }
 0x5b8   :  { %4031 = vrcp.f32 %v375_v19  ;;  %v387_v32 = vand.u32 2147483648, %v375_v19  ;;  %vm381_vm12 = vweird.f32 %v375_v19  ;;  %v385_v37 = vand.u32 2147483647, %v375_v19 }
 0x5ba   :  { %v388_v58 = vor.u32 1.1754944e-38, %v387_v32  ;;  %vm386_vm14 = vcmp.eq.f32.partialorder %v385_v37, 8.507059e+37  ;;  %v457_v37 = vld [vmem:[#allocation2 + $0x2e0] sm:$0xff] }
 0x5be   :  { %v4032_v20 = vpop.eup %4031 }
 0x5bf   :  { %v377_v21 = vmul.f32 %v4032_v20, %v375_v19  ;;  %vm382_vm11 = vweird.f32 %v4032_v20  ;;  %v464_v19 = vld [vmem:[#allocation2 + $0x318] sm:$0xff] }
 0x5c0   :  { %vm383_vm13 = vmor %vm381_vm12, %vm382_vm11  ;;  %507 = vmatpush.msra.mxu3 %v464_v19  ;;  %930 = vmatpush.msrb.mxu2 %v464_v19 }
 0x5c1   :  { %v378_v22 = vsub.f32 1.0, %v377_v21  ;;  %v462_v21 = vld [vmem:[#allocation2 + $0x308] sm:$0xff] }
 0x5c2   :  { %508 = vmatpush.msra.mxu3 %v462_v21  ;;  %931 = vmatpush.msrb.mxu2 %v462_v21 }
 0x5c3   :  { %v379_v23 = vmul.f32 %v4032_v20, %v378_v22  ;;  %v459_v22 = vld [vmem:[#allocation2 + $0x2f0] sm:$0xff] }
 0x5c5   :  { %v380_v27 = vadd.f32 %v4032_v20, %v379_v23  ;;  %v460_v23 = vld [vmem:[#allocation2 + $0x2f8] sm:$0xff] }
 0x5c6   :  { %509 = vmatpush.msra.mxu3 %v460_v23  ;;  %932 = vmatpush.msrb.mxu2 %v460_v23 }
 0x5c7   :  { %v384_v49 = vsel %vm383_vm13, %v4032_v20, %v380_v27  ;;  %v461_v20 = vld [vmem:[#allocation2 + $0x300] sm:$0xff] }
 0x5c8   :  { %v389_v60 = vsel %vm386_vm14, %v388_v58, %v384_v49  ;;  %488 = vmatpush.msra.mxu1 %v461_v20 }
 0x5c9   :  { %v392_v62 = vmul.f32 0.0, %v389_v60 }
 0x5ca   :  { %489 = vmatpush.msra.mxu1 %v459_v22 }
 0x5cc   :  { %490 = vmatpush.msra.mxu1 %v457_v37 }
 0x5ce   :  { %598 = vmatpush.msrb.mxu1 %v4385_v16 }
 0x5d0   :  { %599 = vmatpush.msrb.mxu1 %v4413_v26 }
 0x5d2   :  { %600 = vmatpush.msrb.mxu1 %v4422_v30 }
 0x5d4   :  { %601 = vmatpush.msrb.mxu1 %v4431_v35 }
 0x60e   :  { %v395_v59 = vpop.permute.xlu2 %394 }
 0x60f   :  { %v397_v61 = vmul.f32 %v395_v59, %v389_v60 }
 0x611   :  { %399 = vrot.lane.b32.xlu0 %v397_v61, %s4328_s24 }
 0x683   :  { %v400_v63 = vpop.permute.xlu0 %399 }
 0x684   :  { %v4536_v0 = vadd.f32 %v400_v63, %v392_v62 }
 0x686   :  { %4033 = vtanh.f32 %v4536_v0 }
 0x687   :  { %4035 = vrcp.f32 %v4329_v10 }
 0x68c   :  { %v4034_v1 = vpop.eup %4033 }
 0x68d   :  { %405 = vrot.lane.b32.xlu1 %v4034_v1, %s4327_s1  ;;  %v4036_v13 = vpop.eup %4035 }
 0x68e   :  { %v419_v15 = vmul.f32 32.0, %v4036_v13  ;;  %vm423_vm0 = vweird.f32 %v4036_v13 }
 0x690   :  { %v420_v24 = vsub.f32 1.0, %v419_v15 }
 0x692   :  { %v421_v47 = vmul.f32 %v4036_v13, %v420_v24 }
 0x694   :  { %v422_v55 = vadd.f32 %v4036_v13, %v421_v47 }
 0x696   :  { %v4545_v56 = vsel %vm423_vm0, %v4036_v13, %v422_v55 }
 0x6ff   :  { %v406_v2 = vpop.permute.xlu1 %405 }
 0x700   :  { %v4540_v6 = vmul.f32 %v406_v2, %v389_v60 }
 0x702   :  { %411 = vrot.lane.b32.xlu2 %v4540_v6, %s4328_s24 }
 0x75c   :  { %v412_v7 = vpop.permute.xlu2 %411 }
 0x75d   :  { %v415_v9 = vsel %vm414_vm15, %v412_v7, 0.0 }
 0x75e   :  { %416 = vadd.xlane.f32.xlu0 %v415_v9 }
 0x7d1   :  { %v417_v3 = vpop.xlane.xlu0 %416 }
 0x7d2   :  { %v425_v5 = vmul.f32 %v4545_v56, %v417_v3 }
 0x7d4   :  { %v426_v8 = vsub.f32 %v4540_v6, %v425_v5 }
 0x7d6   :  { %v427_v11 = vmul.f32 %v426_v8, %v426_v8 }
 0x7d8   :  { %429 = vrot.lane.b32.xlu1 %v427_v11, %s4328_s24 }
 0x7e0   :  { %449 = vrot.lane.b32.xlu1 %v4454_v43, %s4327_s1 }
 0x7e8   :  { %453 = vrot.lane.b32.xlu1 %v4454_v43, %s4328_s24  ;;  %v458_v43 = vld [vmem:[#allocation2 + $0x2e8] sm:$0xff] }
 0x7e9   :  { %510 = vmatpush.msra.mxu3 %v458_v43  ;;  %933 = vmatpush.msrb.mxu2 %v458_v43 }
 0x7eb   :  { %627 = vmatpush.msrb.mxu3 %v4442_v39 }
 0x7ed   :  { %628 = vmatpush.msrb.mxu3 %v4444_v40 }
 0x7ef   :  { %629 = vmatpush.msrb.mxu3 %v4447_v41 }
 0x7f1   :  { %630 = vmatpush.msrb.mxu3 %v4450_v42 }
 0x84a   :  { %v430_v14 = vpop.permute.xlu1 %429 }
 0x84b   :  { %v432_v17 = vsel %vm414_vm15, %v430_v14, 0.0 }
 0x84c   :  { %433 = vadd.xlane.f32.xlu2 %v432_v17 }
 0x852   :  { %v4564_v61 = vpop.permute.xlu1 %449 }
 0x85a   :  { %v4566_v30 = vpop.permute.xlu1 %453 }
 0x8bf   :  { %v434_v27 = vpop.xlane.xlu2 %433 }
 0x8c0   :  { %v435_v32 = vmul.f32 %v434_v27, %v4545_v56 }
 0x8c2   :  { %v436_v49 = vadd.f32 1e-05, %v435_v32 }
 0x8c4   :  { %4037 = vrsqrt.f32 %v436_v49  ;;  %vm443_vm3 = vweird.f32 %v436_v49 }
 0x8ca   :  { %v4038_v58 = vpop.eup %4037 }
 0x8cb   :  { %v438_v59 = vmul.f32 %v4038_v58, %v436_v49  ;;  %vm444_vm2 = vweird.f32 %v4038_v58 }
 0x8cc   :  { %vm445_vm4 = vmor %vm443_vm3, %vm444_vm2 }
 0x8cd   :  { %v439_v60 = vmul.f32 %v4038_v58, %v438_v59 }
 0x8cf   :  { %v440_v16 = vmul.f32 0.5, %v439_v60 }
 0x8d1   :  { %v441_v39 = vsub.f32 1.5, %v440_v16 }
 0x8d3   :  { %v442_v62 = vmul.f32 %v4038_v58, %v441_v39 }
 0x8d5   :  { %v446_v26 = vsel %vm445_vm4, %v4038_v58, %v442_v62 }
 0x8d6   :  { %v447_v40 = vmul.f32 %v446_v26, %v426_v8  ;;  %v579_v8 = vpop.f32.mrf.mxu0 }
 0x8d8   :  { %v452_v41 = vmul.f32 %v4564_v61, %v447_v40 }
 0x8da   :  { %v456_v63 = vadd.f32 %v4566_v30, %v452_v41 }
 0x8dc   :  { %471 = vrot.lane.b32.xlu1 %v456_v63, %s4328_s24 }
 0x94e   :  { %v472_v42 = vpop.permute.xlu1 %471 }
 0x94f   :  { %3905 = vmatmul.msk.f32.vlgmr.msra.gmra.mxu1 %vm76_vm1, %v472_v42  ;;  %3906 = vmatmul.msk.f32.vlgmr.msra.gmra.mxu3 %vm76_vm1, %v472_v42 }
 0x950   :  { %714 = vmatpush.msra.mxu1 %v4470_v33  ;;  %781 = vmatpush.msra.mxu3 %v4493_v48  ;;  %v4583_v33 = vld [vmem:[#allocation2 + $0x324] ss:$8 sm:$0x3] }
 0x952   :  { %715 = vmatpush.msra.mxu1 %v4472_v44  ;;  %782 = vmatpush.msra.mxu3 %v4495_v50  ;;  %v4586_v44 = vperm.slane %v4583_v33, 0 }
 0x954   :  { %716 = vmatpush.msra.mxu1 %v4475_v45  ;;  %783 = vmatpush.msra.mxu3 %v4498_v52  ;;  %v516_v45 = vld [vmem:[%s5713_s2] sm:$0x3] }
 0x956   :  { %717 = vmatpush.msra.mxu1 %v4478_v46  ;;  %784 = vmatpush.msra.mxu3 %v4501_v54 }
 0x957   :  { %3909 = vmatmul.msk.f32.vlgmr.msrb.gmra.mxu1 %vm76_vm1, %v4510_v57 }
 0x958   :  { %910 = vmatpush.msrb.mxu1 %v463_v18 }
 0x95a   :  { %911 = vmatpush.msrb.mxu1 %v461_v20 }
 0x95c   :  { %912 = vmatpush.msrb.mxu1 %v459_v22 }
 0x95e   :  { %913 = vmatpush.msrb.mxu1 %v457_v37 }
 0x9cc   :  { %v492_v48 = vpop.f32.mrf.mxu1 }
 0x9cd   :  { %v493_v46 = vadd.f32 %v492_v48, %v4586_v44 }
 0x9cf   :  { %515 = vst [vmem:[%s5715_s4] sm:$0x3] %v493_v46  ;;  %v517_v50 = vadd.f32 %v516_v45, %v493_v46 }
 0x9d1   :  { %v519_v52 = vsel %vm518_vm5, %v517_v50, -inf }
 0x9d2   :  { %520 = vmax.xlane.f32.xlu1 %v519_v52 }
 0x9d4   :  { %v603_v45 = vpop.f32.mrf.mxu1 }
 0xa45   :  { %v521_v54 = vpop.xlane.xlu1 %520 }
 0xa46   :  { %vm522_vm6 = vcmp.ge.f32.partialorder %v517_v50, %v521_v54 }
 0xa47   :  { %v523_v57 = vsel %vm522_vm6, %v4433_v36, 128 }
 0xa48   :  { %v524_v1 = vsel %vm518_vm5, %v523_v57, 2147483647 }
 0xa49   :  { %v526_v2 = vshra.s32 %v524_v1, 16  ;;  %v525_v9 = vand.u32 65535, %v524_v1 }
 0xa4b   :  { %v528_v7 = vcvt.s32.f32 %v526_v2  ;;  %v527_v13 = vcvt.s32.f32 %v525_v9 }
 0xa4d   :  { %529 = vmin.xlane.f32.xlu2 %v528_v7 }
 0xac0   :  { %v530_v10 = vpop.xlane.xlu2 %529 }
 0xac1   :  { %vm531_vm7 = vcmp.eq.f32.partialorder %v528_v7, %v530_v10  ;;  %v536_v24 = vcvt.f32.s32 %v530_v10 }
 0xac2   :  { %v532_v15 = vsel %vm531_vm7, %v527_v13, inf }
 0xac3   :  { %533 = vmin.xlane.f32.xlu0 %v532_v15  ;;  %v537_v55 = vshll.u32 %v536_v24, 16 }
 0xb36   :  { %v534_v47 = vpop.xlane.xlu0 %533 }
 0xb37   :  { %v535_v3 = vcvt.f32.s32 %v534_v47 }
 0xb39   :  { %v538_v5 = vadd.s32 %v537_v55, %v535_v3 }
 0xb3b   :  { %vm539_vm8 = vcmp.eq.s32.totalorder %v4433_v36, %v538_v5 }
 0xb3c   :  { %3911 = vmatmul.msk.f32.vlgmr.msrb.gmra.mxu0 %vm539_vm8, %v4326_v38 }
 0xbb9   :  { %v652_v11 = vpop.f32.mrf.mxu0 }
 0xbba   :  { %v653_v14 = vadd.f32 %v652_v11, %v579_v8  ;;  %v4616_v8 = vperm.slane %v4583_v33, 1  ;;  %v512_v11 = vpop.f32.mrf.mxu3 }
 0xbbc   :  { %v655_v17 = vadd.f32 %v653_v14, %v4461_v53  ;;  %v4619_v14 = vadd.f32 %v512_v11, %v4616_v8 }
 0xbbe   :  { %4039 = vtanh.f32 %v655_v17  ;;  %v3912_v19 = vmul.f32 -1.442695, %v655_v17 }
 0xbc0   :  { %4041 = vpow2.f32 %v3912_v19 }
 0xbc4   :  { %v4040_v18 = vpop.eup %4039 }
 0xbc5   :  { %678 = vrot.lane.b32.xlu2 %v4040_v18, %s4327_s1 }
 0xbc6   :  { %v4042_v20 = vpop.eup %4041 }
 0xbc7   :  { %v659_v21 = vadd.f32 1.0, %v4042_v20 }
 0xbc9   :  { %4043 = vrcp.f32 %v659_v21  ;;  %v671_v43 = vand.u32 2147483648, %v659_v21  ;;  %vm665_vm10 = vweird.f32 %v659_v21  ;;  %v669_v49 = vand.u32 2147483647, %v659_v21 }
 0xbcb   :  { %v672_v59 = vor.u32 1.1754944e-38, %v671_v43  ;;  %vm670_vm12 = vcmp.eq.f32.partialorder %v669_v49, 8.507059e+37 }
 0xbcf   :  { %v4044_v22 = vpop.eup %4043 }
 0xbd0   :  { %v661_v23 = vmul.f32 %v4044_v22, %v659_v21  ;;  %vm666_vm9 = vweird.f32 %v4044_v22 }
 0xbd1   :  { %vm667_vm11 = vmor %vm665_vm10, %vm666_vm9 }
 0xbd2   :  { %v662_v27 = vsub.f32 1.0, %v661_v23 }
 0xbd4   :  { %v663_v32 = vmul.f32 %v4044_v22, %v662_v27 }
 0xbd6   :  { %v664_v37 = vadd.f32 %v4044_v22, %v663_v32 }
 0xbd8   :  { %v668_v58 = vsel %vm667_vm11, %v4044_v22, %v664_v37 }
 0xbd9   :  { %v673_v16 = vsel %vm670_vm12, %v672_v59, %v668_v58 }
 0xbda   :  { %v676_v62 = vmul.f32 %v673_v16, %v4466_v28 }
 0xc1f   :  { %v679_v60 = vpop.permute.xlu2 %678 }
 0xc20   :  { %v681_v39 = vmul.f32 %v679_v60, %v673_v16 }
 0xc22   :  { %683 = vrot.lane.b32.xlu0 %v681_v39, %s4328_s24 }
 0xc94   :  { %v684_v26 = vpop.permute.xlu0 %683 }
 0xc95   :  { %v4604_v40 = vadd.f32 %v684_v26, %v676_v62 }
 0xc97   :  { %4045 = vtanh.f32 %v4604_v40 }
 0xc9d   :  { %v4046_v41 = vpop.eup %4045 }
 0xc9e   :  { %689 = vrot.lane.b32.xlu0 %v4046_v41, %s4327_s1 }
 0xd10   :  { %v690_v63 = vpop.permute.xlu0 %689 }
 0xd11   :  { %v692_v42 = vmul.f32 %v690_v63, %v673_v16 }
 0xd13   :  { %698 = vrot.lane.b32.xlu2 %v692_v42, %s4328_s24 }
 0xd6d   :  { %v699_v48 = vpop.permute.xlu2 %698 }
 0xd6e   :  { %3913 = vmatmul.msk.f32.vlgmr.msra.gmra.mxu1 %vm76_vm1, %v699_v48 }
 0xdeb   :  { %v719_v46 = vpop.f32.mrf.mxu1 }
 0xdec   :  { %v720_v50 = vadd.f32 %v719_v46, %v603_v45 }
 0xdee   :  { %v722_v28 = vadd.f32 %v720_v50, %v4484_v51 }
 0xdf0   :  { %4047 = vtanh.f32 %v722_v28  ;;  %v3914_v54 = vmul.f32 -1.442695, %v722_v28 }
 0xdf2   :  { %4049 = vpow2.f32 %v3914_v54 }
 0xdf6   :  { %v4048_v52 = vpop.eup %4047 }
 0xdf7   :  { %745 = vrot.lane.b32.xlu1 %v4048_v52, %s4327_s1 }
 0xdf8   :  { %v4050_v57 = vpop.eup %4049 }
 0xdf9   :  { %v726_v1 = vadd.f32 1.0, %v4050_v57 }
 0xdfb   :  { %4051 = vrcp.f32 %v726_v1  ;;  %v738_v15 = vand.u32 2147483648, %v726_v1  ;;  %vm732_vm14 = vweird.f32 %v726_v1  ;;  %v736_v24 = vand.u32 2147483647, %v726_v1 }
 0xdfd   :  { %v739_v47 = vor.u32 1.1754944e-38, %v738_v15  ;;  %vm737_vm2 = vcmp.eq.f32.partialorder %v736_v24, 8.507059e+37 }
 0xe01   :  { %v4052_v2 = vpop.eup %4051 }
 0xe02   :  { %v728_v7 = vmul.f32 %v4052_v2, %v726_v1  ;;  %vm733_vm13 = vweird.f32 %v4052_v2 }
 0xe03   :  { %vm734_vm0 = vmor %vm732_vm14, %vm733_vm13 }
 0xe04   :  { %v729_v9 = vsub.f32 1.0, %v728_v7 }
 0xe06   :  { %v730_v10 = vmul.f32 %v4052_v2, %v729_v9 }
 0xe08   :  { %v731_v13 = vadd.f32 %v4052_v2, %v730_v10 }
 0xe0a   :  { %v735_v51 = vsel %vm734_vm0, %v4052_v2, %v731_v13 }
 0xe0b   :  { %v740_v3 = vsel %vm737_vm2, %v739_v47, %v735_v51 }
 0xe0c   :  { %v743_v17 = vmul.f32 %v740_v3, %v4489_v31 }
 0xe69   :  { %v746_v55 = vpop.permute.xlu1 %745 }
 0xe6a   :  { %v748_v5 = vmul.f32 %v746_v55, %v740_v3 }
 0xe6c   :  { %750 = vrot.lane.b32.xlu0 %v748_v5, %s4328_s24 }
 0xe74   :  { %611 = vrot.lane.b32.xlu0 %v4540_v6, %s4328_s24 }
 0xe7c   :  { %828 = vrot.lane.b32.xlu0 %v4619_v14, %s4328_s24 }
 0xede   :  { %v751_v18 = vpop.permute.xlu0 %750 }
 0xedf   :  { %v4624_v19 = vadd.f32 %v751_v18, %v743_v17 }
 0xee1   :  { %4053 = vtanh.f32 %v4624_v19 }
 0xee6   :  { %v612_v20 = vpop.permute.xlu0 %611 }
 0xee7   :  { %v4054_v21 = vpop.eup %4053  ;;  %3910 = vmatmul.msk.f32.vlgmr.msrb.gmra.mxu3 %vm76_vm1, %v612_v20 }
 0xee8   :  { %756 = vrot.lane.b32.xlu2 %v4054_v21, %s4327_s1  ;;  %998 = vmatpush.msrb.mxu3 %v4375_v12 }
 0xeea   :  { %999 = vmatpush.msrb.mxu3 %v4411_v25 }
 0xeec   :  { %1000 = vmatpush.msrb.mxu3 %v4420_v29 }
 0xeee   :  { %1001 = vmatpush.msrb.mxu3 %v4429_v34  ;;  %v829_v33 = vpop.permute.xlu0 %828 }
 0xeef   :  { %v831_v22 = vmul.f32 %v829_v33, %v4619_v14 }
 0xf42   :  { %v757_v31 = vpop.permute.xlu2 %756 }
 0xf43   :  { %v759_v6 = vmul.f32 %v757_v31, %v740_v3 }
 0xf45   :  { %765 = vrot.lane.b32.xlu2 %v759_v6, %s4328_s24 }
 0xf4d   :  { %833 = vrot.lane.b32.xlu2 %v831_v22, %s4330_s29 }
 0xf6a   :  { %v632_v29 = vpop.f32.mrf.mxu3 }
 0xf9f   :  { %v4636_v23 = vpop.permute.xlu2 %765 }
 0xfa0   :  { %3915 = vmatmul.msk.f32.vlgmr.msra.gmra.mxu3 %vm76_vm1, %v4636_v23 }
 0xfa7   :  { %v834_v12 = vpop.permute.xlu2 %833 }
 0xfa8   :  { %3922 = vmatmul.msk.f32.vlgmr.msrb.gmra.mxu3 %vm76_vm1, %v699_v48  ;;  %v836_v25 = vsel %vm414_vm15, %v834_v12, 0.0 }
 0xfa9   :  { %837 = vadd.xlane.f32.xlu0 %v836_v25 }
0x101c   :  { %v838_v59 = vpop.xlane.xlu0 %837 }
0x101d   :  { %v839_v60 = vmul.f32 0.17677669, %v838_v59  ;;  %v4669_v59 = vld [vmem:[#allocation2 + $0x150] sm:$0xff] }
0x101f   :  { %v840_v39 = vsub.f32 %v839_v60, %v839_v60 }
0x1021   :  { %v841_v26 = vmul.f32 1.442695, %v840_v39  ;;  %v3920_v39 = vld [vmem:[%s5713_s2 + $0x2] sm:$0x3] }
0x1023   :  { %v786_v34 = vpop.f32.mrf.mxu3 }
0x1024   :  { %v787_v27 = vadd.f32 %v786_v34, %v632_v29 }
0x1026   :  { %v789_v32 = vadd.f32 %v787_v27, %v4531_v4 }
0x1028   :  { %4055 = vtanh.f32 %v789_v32  ;;  %v3916_v43 = vmul.f32 -1.442695, %v789_v32 }
0x102a   :  { %4057 = vpow2.f32 %v3916_v43 }
0x102e   :  { %v4056_v37 = vpop.eup %4055 }
0x102f   :  { %812 = vrot.lane.b32.xlu1 %v4056_v37, %s4327_s1 }
0x1030   :  { %v4058_v49 = vpop.eup %4057 }
0x1031   :  { %v793_v58 = vadd.f32 1.0, %v4058_v49  ;;  %v4664_v49 = vld [vmem:[#allocation2 + $0x170] sm:$0xff] }
0x1032   :  { %1022 = vmatpush.msra.mxu1 %v4664_v49 }
0x1033   :  { %4059 = vrcp.f32 %v793_v58  ;;  %v805_v48 = vand.u32 2147483648, %v793_v58  ;;  %vm799_vm4 = vweird.f32 %v793_v58  ;;  %v803_v45 = vand.u32 2147483647, %v793_v58 }
0x1034   :  { %4061 = vpow2.f32 %v841_v26 }
0x1035   :  { %v806_v50 = vor.u32 1.1754944e-38, %v805_v48  ;;  %vm804_vm7 = vcmp.eq.f32.partialorder %v803_v45, 8.507059e+37  ;;  %v4688_v48 = vld [vmem:[#allocation2 + $0xf0] sm:$0xff]  ;;  %v4690_v45 = vld [vmem:[#allocation2 + $0xe0] sm:$0xff] }
0x1036   :  { %1059 = vmatpush.msra.mxu3 %v4688_v48 }
0x1038   :  { %1060 = vmatpush.msra.mxu3 %v4690_v45 }
0x1039   :  { %v4060_v16 = vpop.eup %4059 }
0x103a   :  { %v795_v62 = vmul.f32 %v4060_v16, %v793_v58  ;;  %v4062_v42 = vpop.eup %4061  ;;  %vm800_vm3 = vweird.f32 %v4060_v16  ;;  %v4666_v58 = vld [vmem:[#allocation2 + $0x160] sm:$0xff] }
0x103b   :  { %4063 = vrcp.f32 %v4062_v42  ;;  %vm801_vm6 = vmor %vm799_vm4, %vm800_vm3  ;;  %1023 = vmatpush.msra.mxu1 %v4666_v58 }
0x103c   :  { %v796_v41 = vsub.f32 1.0, %v795_v62 }
0x103d   :  { %1024 = vmatpush.msra.mxu1 %v4669_v59 }
0x103e   :  { %v797_v63 = vmul.f32 %v4060_v16, %v796_v41 }
0x103f   :  { %1025 = vmatpush.msra.mxu1 %v4431_v35 }
0x1040   :  { %v798_v4 = vadd.f32 %v4060_v16, %v797_v63 }
0x1041   :  { %v4064_v57 = vpop.eup %4063 }
0x1042   :  { %v802_v46 = vsel %vm801_vm6, %v4060_v16, %v798_v4  ;;  %v845_v1 = vmul.f32 %v4064_v57, %v4062_v42  ;;  %v4708_v57 = vld [vmem:[#allocation2 + $0x80] sm:$0xff] }
0x1043   :  { %v807_v52 = vsel %vm804_vm7, %v806_v50, %v802_v46  ;;  %v4693_v46 = vld [vmem:[#allocation2 + $0xd0] sm:$0xff]  ;;  %v4696_v50 = vld [vmem:[#allocation2 + $0xc0] sm:$0xff] }
0x1044   :  { %v846_v2 = vmul.f32 %v845_v1, %v4619_v14  ;;  %v810_v7 = vmul.f32 %v807_v52, %v4536_v0  ;;  %1061 = vmatpush.msra.mxu3 %v4693_v46  ;;  %v4711_v1 = vld [vmem:[#allocation2 + $0x70] sm:$0xff] }
0x1046   :  { %1062 = vmatpush.msra.mxu3 %v4696_v50 }
0x10a1   :  { %v813_v28 = vpop.permute.xlu1 %812 }
0x10a2   :  { %v815_v54 = vmul.f32 %v813_v28, %v807_v52  ;;  %v4699_v28 = vld [vmem:[#allocation2 + $0xb0] sm:$0xff] }
0x10a3   :  { %1063 = vmatpush.msra.mxu3 %v4699_v28 }
0x10a4   :  { %817 = vrot.lane.b32.xlu2 %v815_v54, %s4328_s24  ;;  %v4705_v54 = vld [vmem:[#allocation2 + $0x90] sm:$0xff] }
0x10ac   :  { %849 = vrot.lane.b32.xlu2 %v846_v2, %s4328_s24  ;;  %v4714_v2 = vld [vmem:[#allocation2 + $0x60] sm:$0xff] }
0x10fe   :  { %v818_v9 = vpop.permute.xlu2 %817 }
0x10ff   :  { %v4648_v10 = vadd.f32 %v818_v9, %v810_v7  ;;  %v4717_v7 = vld [vmem:[#allocation2 + $0x50] sm:$0xff]  ;;  %v4720_v9 = vld [vmem:[#allocation2 + $0x40] sm:$0xff] }
0x1101   :  { %4065 = vtanh.f32 %v4648_v10 }
0x1106   :  { %v850_v51 = vpop.permute.xlu2 %849 }
0x1107   :  { %v4066_v13 = vpop.eup %4065 }
0x1108   :  { %823 = vrot.lane.b32.xlu1 %v4066_v13, %s4327_s1  ;;  %v4723_v13 = vld [vmem:[#allocation2 + $0x30] sm:$0xff] }
0x117a   :  { %v824_v15 = vpop.permute.xlu1 %823 }
0x117b   :  { %v4652_v24 = vmul.f32 %v824_v15, %v807_v52  ;;  %v4702_v52 = vld [vmem:[#allocation2 + $0xa0] sm:$0xff] }
0x117c   :  { %1064 = vmatpush.msra.mxu3 %v4702_v52 }
0x117d   :  { %v852_v47 = vadd.f32 %v850_v51, %v4652_v24 }
0x117e   :  { %1065 = vmatpush.msra.mxu3 %v4705_v54 }
0x117f   :  { %854 = vrot.lane.b32.xlu1 %v852_v47, %s4328_s24 }
0x1180   :  { %1066 = vmatpush.msra.mxu3 %v4708_v57 }
0x1182   :  { %1067 = vmatpush.msra.mxu3 %v4711_v1 }
0x1184   :  { %1068 = vmatpush.msra.mxu3 %v4714_v2 }
0x1186   :  { %1069 = vmatpush.msra.mxu3 %v4717_v7 }
0x1188   :  { %1070 = vmatpush.msra.mxu3 %v4720_v9 }
0x118a   :  { %1071 = vmatpush.msra.mxu3 %v4723_v13 }
0x11f1   :  { %v855_v55 = vpop.permute.xlu1 %854 }
0x11f2   :  { %v857_v3 = vsel %vm414_vm15, %v855_v55, 0.0 }
0x11f3   :  { %858 = vadd.xlane.f32.xlu2 %v857_v3  ;;  %v4727_v3 = vld [vmem:[#allocation2 + $0x20] sm:$0xff] }
0x11f4   :  { %1072 = vmatpush.msra.mxu3 %v4727_v3 }
0x1266   :  { %v859_v0 = vpop.xlane.xlu2 %858 }
0x1267   :  { %v860_v5 = vmul.f32 %v859_v0, %v4545_v56  ;;  %v4730_v0 = vld [vmem:[#allocation2 + $0x10] sm:$0xff] }
0x1268   :  { %1073 = vmatpush.msra.mxu3 %v4730_v0 }
0x1269   :  { %v861_v11 = vsub.f32 %v852_v47, %v860_v5  ;;  %v4732_v5 = vld [vmem:[#allocation2] sm:$0xff] }
0x126a   :  { %1074 = vmatpush.msra.mxu3 %v4732_v5 }
0x126b   :  { %v862_v17 = vmul.f32 %v861_v11, %v861_v11 }
0x126d   :  { %864 = vrot.lane.b32.xlu1 %v862_v17, %s4328_s24 }
0x12df   :  { %v865_v18 = vpop.permute.xlu1 %864 }
0x12e0   :  { %v867_v20 = vsel %vm414_vm15, %v865_v18, 0.0 }
0x12e1   :  { %868 = vadd.xlane.f32.xlu1 %v867_v20 }
0x1354   :  { %v869_v21 = vpop.xlane.xlu1 %868 }
0x1355   :  { %v870_v31 = vmul.f32 %v869_v21, %v4545_v56 }
0x1357   :  { %v871_v6 = vadd.f32 1e-05, %v870_v31  ;;  %v1003_v31 = vpop.f32.mrf.mxu3 }
0x1359   :  { %4067 = vrsqrt.f32 %v871_v6  ;;  %vm878_vm9 = vweird.f32 %v871_v6 }
0x135f   :  { %v4068_v33 = vpop.eup %4067 }
0x1360   :  { %v873_v22 = vmul.f32 %v4068_v33, %v871_v6  ;;  %vm879_vm8 = vweird.f32 %v4068_v33 }
0x1361   :  { %vm880_vm10 = vmor %vm878_vm9, %vm879_vm8 }
0x1362   :  { %v874_v12 = vmul.f32 %v4068_v33, %v873_v22 }
0x1364   :  { %v875_v25 = vmul.f32 0.5, %v874_v12 }
0x1366   :  { %v876_v29 = vsub.f32 1.5, %v875_v25 }
0x1368   :  { %v877_v34 = vmul.f32 %v4068_v33, %v876_v29 }
0x136a   :  { %v881_v27 = vsel %vm880_vm10, %v4068_v33, %v877_v34 }
0x136b   :  { %v882_v32 = vmul.f32 %v881_v27, %v861_v11 }
0x136d   :  { %v883_v37 = vmul.f32 %v882_v32, %v4564_v61 }
0x136f   :  { %v884_v43 = vadd.f32 %v883_v37, %v4566_v30 }
0x1371   :  { %894 = vrot.lane.b32.xlu0 %v884_v43, %s4328_s24 }
0x13e3   :  { %v895_v60 = vpop.permute.xlu0 %894 }
0x13e4   :  { %3917 = vmatmul.msk.f32.vlgmr.msrb.gmra.mxu1 %vm76_vm1, %v895_v60  ;;  %3918 = vmatmul.msk.f32.vlgmr.msrb.gmra.mxu2 %vm76_vm1, %v895_v60 }
0x13ec   :  { %3923 = vmatmul.msk.f32.vlgmr.msra.gmra.mxu1 %vm76_vm1, %v4636_v23 }
0x1461   :  { %v915_v16 = vpop.f32.mrf.mxu1 }
0x1462   :  { %v916_v62 = vadd.f32 %v915_v16, %v4586_v44 }
0x1464   :  { %3919 = vst [vmem:[%s5715_s4 + $0x2] sm:$0x3] %v916_v62  ;;  %v942_v35 = vadd.f32 %v3920_v39, %v916_v62 }
0x1466   :  { %v943_v26 = vsel %vm518_vm5, %v942_v35, -inf }
0x1467   :  { %944 = vmax.xlane.f32.xlu2 %v943_v26 }
0x14da   :  { %v945_v41 = vpop.xlane.xlu2 %944 }
0x14db   :  { %vm946_vm11 = vcmp.ge.f32.partialorder %v942_v35, %v945_v41 }
0x14dc   :  { %v947_v63 = vsel %vm946_vm11, %v4433_v36, 128 }
0x14dd   :  { %v948_v23 = vsel %vm518_vm5, %v947_v63, 2147483647 }
0x14de   :  { %v950_v42 = vshra.s32 %v948_v23, 16  ;;  %v949_v15 = vand.u32 65535, %v948_v23 }
0x14e0   :  { %v952_v4 = vcvt.s32.f32 %v950_v42  ;;  %v951_v47 = vcvt.s32.f32 %v949_v15 }
0x14e2   :  { %953 = vmin.xlane.f32.xlu0 %v952_v4 }
0x1555   :  { %v954_v51 = vpop.xlane.xlu0 %953 }
0x1556   :  { %vm955_vm12 = vcmp.eq.f32.partialorder %v952_v4, %v954_v51  ;;  %v960_v11 = vcvt.f32.s32 %v954_v51  ;;  %v4746_v51 = vld [vmem:[#allocation2 + $0x1f0] sm:$0xff] }
0x1557   :  { %v956_v55 = vsel %vm955_vm12, %v951_v47, inf  ;;  %v4748_v47 = vld [vmem:[#allocation2 + $0x1e0] sm:$0xff]  ;;  %1138 = vmatpush.msrb.mxu1 %v4746_v51 }
0x1558   :  { %957 = vmin.xlane.f32.xlu2 %v956_v55  ;;  %v961_v18 = vshll.u32 %v960_v11, 16  ;;  %v4751_v55 = vld [vmem:[#allocation2 + $0x1d0] sm:$0xff]  ;;  %v4754_v11 = vld [vmem:[#allocation2 + $0x1c0] sm:$0xff] }
0x1559   :  { %1139 = vmatpush.msrb.mxu1 %v4748_v47 }
0x155b   :  { %1140 = vmatpush.msrb.mxu1 %v4751_v55 }
0x155d   :  { %1141 = vmatpush.msrb.mxu1 %v4754_v11 }
0x15cb   :  { %v958_v17 = vpop.xlane.xlu2 %957 }
0x15cc   :  { %v959_v20 = vcvt.f32.s32 %v958_v17 }
0x15ce   :  { %v962_v21 = vadd.s32 %v961_v18, %v959_v20  ;;  %v1027_v20 = vpop.f32.mrf.mxu1 }
0x15d0   :  { %vm963_vm13 = vcmp.eq.s32.totalorder %v4433_v36, %v962_v21 }
0x15d1   :  { %3925 = vmatmul.msk.f32.vlgmr.msra.gmra.mxu3 %vm963_vm13, %v4326_v38  ;;  %vm1290_vm13 = vcmask 779776  }
0x1654   :  { %v1076_v6 = vpop.f32.mrf.mxu3 }
0x1655   :  { %v1077_v33 = vadd.f32 %v1076_v6, %v1003_v31  ;;  %v4763_v6 = vld [vmem:[#allocation2 + $0x322] ss:$0 sm:$0xff] }
0x1657   :  { %v1079_v22 = vadd.f32 %v1077_v33, %v4461_v53 }
0x1659   :  { %4069 = vtanh.f32 %v1079_v22  ;;  %v3926_v25 = vmul.f32 -1.442695, %v1079_v22 }
0x165b   :  { %4071 = vpow2.f32 %v3926_v25 }
0x165f   :  { %v4070_v12 = vpop.eup %4069 }
0x1660   :  { %1102 = vrot.lane.b32.xlu1 %v4070_v12, %s4327_s1 }
0x1661   :  { %v4072_v29 = vpop.eup %4071 }
0x1662   :  { %v1083_v34 = vadd.f32 1.0, %v4072_v29 }
0x1664   :  { %4073 = vrcp.f32 %v1083_v34  ;;  %v1095_v16 = vand.u32 2147483648, %v1083_v34  ;;  %vm1089_vm0 = vweird.f32 %v1083_v34  ;;  %v1093_v39 = vand.u32 2147483647, %v1083_v34 }
0x1666   :  { %v1096_v35 = vor.u32 1.1754944e-38, %v1095_v16  ;;  %vm1094_vm3 = vcmp.eq.f32.partialorder %v1093_v39, 8.507059e+37 }
0x166a   :  { %v4074_v27 = vpop.eup %4073 }
0x166b   :  { %v1085_v32 = vmul.f32 %v4074_v27, %v1083_v34  ;;  %vm1090_vm14 = vweird.f32 %v4074_v27 }
0x166c   :  { %vm1091_vm2 = vmor %vm1089_vm0, %vm1090_vm14 }
0x166d   :  { %v1086_v37 = vsub.f32 1.0, %v1085_v32 }
0x166f   :  { %v1087_v43 = vmul.f32 %v4074_v27, %v1086_v37 }
0x1671   :  { %v1088_v60 = vadd.f32 %v4074_v27, %v1087_v43 }
0x1673   :  { %v1092_v62 = vsel %vm1091_vm2, %v4074_v27, %v1088_v60 }
0x1674   :  { %v1097_v41 = vsel %vm1094_vm3, %v1096_v35, %v1092_v62 }
0x1675   :  { %v1100_v23 = vmul.f32 %v1097_v41, %v4604_v40 }
0x16d2   :  { %v1103_v26 = vpop.permute.xlu1 %1102 }
0x16d3   :  { %v1105_v63 = vmul.f32 %v1103_v26, %v1097_v41 }
0x16d5   :  { %1107 = vrot.lane.b32.xlu2 %v1105_v63, %s4328_s24  ;;  %v935_v63 = vpop.f32.mrf.mxu2 }
0x172f   :  { %v1108_v42 = vpop.permute.xlu2 %1107 }
0x1730   :  { %v4742_v4 = vadd.f32 %v1108_v42, %v1100_v23  ;;  %v4771_v23 = vadd.f32 %v935_v63, %v4616_v8  ;;  %v4775_v42 = vld [vmem:[#allocation2 + $0x1b0] sm:$0xff] }
0x1731   :  { %1051 = vmatpush.msra.mxu2 %v4775_v42 }
0x1732   :  { %4075 = vtanh.f32 %v4742_v4 }
0x1738   :  { %v4076_v15 = vpop.eup %4075 }
0x1739   :  { %1113 = vrot.lane.b32.xlu1 %v4076_v15, %s4327_s1  ;;  %v4778_v15 = vld [vmem:[#allocation2 + $0x1a0] sm:$0xff] }
0x173a   :  { %1052 = vmatpush.msra.mxu2 %v4778_v15 }
0x17ab   :  { %v1114_v40 = vpop.permute.xlu1 %1113 }
0x17ac   :  { %v1116_v17 = vmul.f32 %v1114_v40, %v1097_v41  ;;  %v4780_v40 = vld [vmem:[#allocation2 + $0x190] sm:$0xff] }
0x17ad   :  { %1053 = vmatpush.msra.mxu2 %v4780_v40 }
0x17ae   :  { %1122 = vrot.lane.b32.xlu2 %v1116_v17, %s4328_s24  ;;  %v4783_v17 = vld [vmem:[#allocation2 + $0x180] sm:$0xff] }
0x17af   :  { %1054 = vmatpush.msra.mxu2 %v4783_v17 }
0x1808   :  { %v4759_v18 = vpop.permute.xlu2 %1122 }
0x1809   :  { %3927 = vmatmul.msk.f32.vlgmr.msrb.gmra.mxu1 %vm76_vm1, %v4759_v18 }
0x1886   :  { %v1143_v21 = vpop.f32.mrf.mxu1 }
0x1887   :  { %v1144_v31 = vadd.f32 %v1143_v21, %v1027_v20 }
0x1889   :  { %v1146_v33 = vadd.f32 %v4763_v6, %v1144_v31 }
0x188b   :  { %4077 = vtanh.f32 %v1146_v33  ;;  %v3928_v12 = vmul.f32 -1.442695, %v1146_v33 }
0x188d   :  { %4079 = vpow2.f32 %v3928_v12 }
0x1891   :  { %v4078_v22 = vpop.eup %4077 }
0x1892   :  { %1169 = vrot.lane.b32.xlu0 %v4078_v22, %s4327_s1 }
0x1893   :  { %v4080_v25 = vpop.eup %4079 }
0x1894   :  { %v1150_v29 = vadd.f32 1.0, %v4080_v25 }
0x1896   :  { %4081 = vrcp.f32 %v1150_v29  ;;  %v1162_v60 = vand.u32 2147483648, %v1150_v29  ;;  %vm1156_vm6 = vweird.f32 %v1150_v29  ;;  %v1160_v16 = vand.u32 2147483647, %v1150_v29 }
0x1898   :  { %v1163_v62 = vor.u32 1.1754944e-38, %v1162_v60  ;;  %vm1161_vm8 = vcmp.eq.f32.partialorder %v1160_v16, 8.507059e+37  ;;  %v4811_v16 = vld [vmem:[#allocation2 + $0x130] sm:$0xff] }
0x189c   :  { %v4082_v34 = vpop.eup %4081 }
0x189d   :  { %v1152_v27 = vmul.f32 %v4082_v34, %v1150_v29  ;;  %vm1157_vm4 = vweird.f32 %v4082_v34 }
0x189e   :  { %vm1158_vm7 = vmor %vm1156_vm6, %vm1157_vm4 }
0x189f   :  { %v1153_v32 = vsub.f32 1.0, %v1152_v27 }
0x18a1   :  { %v1154_v37 = vmul.f32 %v4082_v34, %v1153_v32  ;;  %v4802_v32 = vld [vmem:[#allocation2 + $0x210] sm:$0xff] }
0x18a3   :  { %v1155_v43 = vadd.f32 %v4082_v34, %v1154_v37  ;;  %v4806_v37 = vld [vmem:[#allocation2 + $0x200] sm:$0xff] }
0x18a5   :  { %v1159_v39 = vsel %vm1158_vm7, %v4082_v34, %v1155_v43  ;;  %v4798_v34 = vld [vmem:[#allocation2 + $0x220] sm:$0xff] }
0x18a6   :  { %v1164_v26 = vsel %vm1161_vm8, %v1163_v62, %v1159_v39  ;;  %v4813_v39 = vld [vmem:[#allocation2 + $0x120] sm:$0xff]  ;;  %v4816_v62 = vld [vmem:[#allocation2 + $0x110] sm:$0xff] }
0x1904   :  { %v1170_v35 = vpop.permute.xlu0 %1169 }
0x1905   :  { %v1172_v41 = vmul.f32 %v1170_v35, %v1164_v26  ;;  %v4819_v35 = vld [vmem:[#allocation2 + $0x100] sm:$0xff] }
0x1907   :  { %1174 = vrot.lane.b32.xlu1 %v1172_v41, %s4328_s24 }
0x190f   :  { %1035 = vrot.lane.b32.xlu1 %v4652_v24, %s4328_s24  ;;  %v1167_v24 = vmul.f32 %v1164_v26, %v4624_v19  ;;  %v4796_v19 = vld [vmem:[#allocation2 + $0x230] sm:$0xff] }
0x1910   :  { %1205 = vmatpush.msrb.mxu2 %v4796_v19 }
0x1912   :  { %1206 = vmatpush.msrb.mxu2 %v4798_v34 }
0x1914   :  { %1207 = vmatpush.msrb.mxu2 %v4802_v32 }
0x1916   :  { %1208 = vmatpush.msrb.mxu2 %v4806_v37 }
0x1917   :  { %1252 = vrot.lane.b32.xlu1 %v4771_v23, %s4328_s24 }
0x1979   :  { %v1175_v20 = vpop.permute.xlu1 %1174 }
0x197a   :  { %v4788_v21 = vadd.f32 %v1175_v20, %v1167_v24 }
0x197c   :  { %4083 = vtanh.f32 %v4788_v21 }
0x1981   :  { %v1036_v31 = vpop.permute.xlu1 %1035 }
0x1982   :  { %v4084_v33 = vpop.eup %4083  ;;  %3924 = vmatmul.msk.f32.vlgmr.msra.gmra.mxu2 %vm76_vm1, %v1036_v31 }
0x1983   :  { %1180 = vrot.lane.b32.xlu2 %v4084_v33, %s4327_s1  ;;  %1444 = vmatpush.msra.mxu2 %v4811_v16 }
0x1985   :  { %1445 = vmatpush.msra.mxu2 %v4813_v39 }
0x1987   :  { %1446 = vmatpush.msra.mxu2 %v4816_v62 }
0x1989   :  { %v1253_v22 = vpop.permute.xlu1 %1252  ;;  %1447 = vmatpush.msra.mxu2 %v4819_v35 }
0x198a   :  { %v1255_v12 = vmul.f32 %v1253_v22, %v4619_v14  ;;  %v1256_v27 = vmul.f32 %v1253_v22, %v4771_v23 }
0x198c   :  { %1259 = vrot.lane.b32.xlu0 %v1255_v12, %s4330_s29 }
0x19dd   :  { %v1181_v25 = vpop.permute.xlu2 %1180 }
0x19de   :  { %v1183_v29 = vmul.f32 %v1181_v25, %v1164_v26 }
0x19e0   :  { %1189 = vrot.lane.b32.xlu2 %v1183_v29, %s4328_s24 }
0x19e8   :  { %1261 = vrot.lane.b32.xlu2 %v1256_v27, %s4330_s29 }
0x19fe   :  { %v1260_v43 = vpop.permute.xlu0 %1259 }
0x19ff   :  { %v1265_v60 = vsel %vm414_vm15, %v1260_v43, 0.0 }
0x1a00   :  { %1266 = vadd.xlane.f32.xlu0 %v1265_v60 }
0x1a3a   :  { %v4823_v26 = vpop.permute.xlu2 %1189 }
0x1a3b   :  { %3929 = vmatmul.msk.f32.vlgmr.msrb.gmra.mxu2 %vm76_vm1, %v4823_v26 }
0x1a3c   :  { %1505 = vmatpush.msrb.mxu2 %v4688_v48  ;;  %v1056_v48 = vpop.f32.mrf.mxu2 }
0x1a3e   :  { %1506 = vmatpush.msrb.mxu2 %v4690_v45 }
0x1a40   :  { %1507 = vmatpush.msrb.mxu2 %v4693_v46 }
0x1a42   :  { %v1262_v41 = vpop.permute.xlu2 %1261  ;;  %1508 = vmatpush.msrb.mxu2 %v4696_v50  ;;  %v4846_v50 = vld [vmem:[#allocation2 + $0x323] ss:$0 sm:$0xff] }
0x1a43   :  { %3936 = vmatmul.msk.f32.vlgmr.msra.gmra.mxu2 %vm76_vm1, %v4759_v18  ;;  %v1268_v63 = vsel %vm414_vm15, %v1262_v41, 0.0 }
0x1a44   :  { %1269 = vadd.xlane.f32.xlu2 %v1268_v63  ;;  %1509 = vmatpush.msrb.mxu2 %v4699_v28 }
0x1a46   :  { %1510 = vmatpush.msrb.mxu2 %v4702_v52 }
0x1a48   :  { %1511 = vmatpush.msrb.mxu2 %v4705_v54 }
0x1a4a   :  { %1512 = vmatpush.msrb.mxu2 %v4708_v57 }
0x1a4c   :  { %1513 = vmatpush.msrb.mxu2 %v4711_v1 }
0x1a4e   :  { %1514 = vmatpush.msrb.mxu2 %v4714_v2 }
0x1a50   :  { %1515 = vmatpush.msrb.mxu2 %v4717_v7 }
0x1a52   :  { %1516 = vmatpush.msrb.mxu2 %v4720_v9 }
0x1a54   :  { %1517 = vmatpush.msrb.mxu2 %v4723_v13 }
0x1a56   :  { %1518 = vmatpush.msrb.mxu2 %v4727_v3 }
0x1a58   :  { %1519 = vmatpush.msrb.mxu2 %v4730_v0 }
0x1a5a   :  { %1520 = vmatpush.msrb.mxu2 %v4732_v5 }
0x1a73   :  { %v1267_v12 = vpop.xlane.xlu0 %1266 }
0x1a74   :  { %v1271_v29 = vmul.f32 0.17677669, %v1267_v12 }
0x1a76   :  { %v1273_v43 = vsel %vm518_vm5, %v1271_v29, -inf }
0x1ab7   :  { %v1270_v22 = vpop.xlane.xlu2 %1269 }
0x1ab8   :  { %v1272_v25 = vmul.f32 0.17677669, %v1270_v22 }
0x1aba   :  { %v1274_v27 = vsel %vm518_vm5, %v1272_v25, -inf }
0x1abb   :  { %v1275_v60 = vmax.f32 %v1273_v43, %v1274_v27 }
0x1abd   :  { %v1276_v41 = vsub.f32 %v1271_v29, %v1275_v60  ;;  %v1277_v63 = vsub.f32 %v1272_v25, %v1275_v60 }
0x1abe   :  { %v1210_v45 = vpop.f32.mrf.mxu2 }
0x1abf   :  { %v1211_v46 = vadd.f32 %v1210_v45, %v1056_v48  ;;  %v1278_v48 = vmul.f32 1.442695, %v1276_v41  ;;  %v1280_v45 = vmul.f32 1.442695, %v1277_v63 }
0x1ac1   :  { %v1213_v28 = vadd.f32 %v4846_v50, %v1211_v46 }
0x1ac3   :  { %4085 = vtanh.f32 %v1213_v28  ;;  %v3930_v54 = vmul.f32 -1.442695, %v1213_v28 }
0x1ac5   :  { %4087 = vpow2.f32 %v3930_v54 }
0x1ac9   :  { %v4086_v52 = vpop.eup %4085 }
0x1aca   :  { %1236 = vrot.lane.b32.xlu1 %v4086_v52, %s4327_s1 }
0x1acb   :  { %v4088_v57 = vpop.eup %4087 }
0x1acc   :  { %v1217_v1 = vadd.f32 1.0, %v4088_v57 }
0x1ace   :  { %4089 = vrcp.f32 %v1217_v1  ;;  %v1229_v0 = vand.u32 2147483648, %v1217_v1  ;;  %vm1223_vm10 = vweird.f32 %v1217_v1  ;;  %v1227_v5 = vand.u32 2147483647, %v1217_v1 }
0x1acf   :  { %4091 = vpow2.f32 %v1278_v48 }
0x1ad0   :  { %v1230_v24 = vor.u32 1.1754944e-38, %v1229_v0  ;;  %vm1228_vm12 = vcmp.eq.f32.partialorder %v1227_v5, 8.507059e+37  ;;  %4093 = vpow2.f32 %v1280_v45  ;;  %v1337_v45 = vld [vmem:[#allocation2 + $0x310] sm:$0xff] }
0x1ad1   :  { %1356 = vmatpush.msra.mxu0 %v1337_v45  ;;  %1821 = vmatpush.msrb.mxu3 %v1337_v45 }
0x1ad4   :  { %v4090_v2 = vpop.eup %4089 }
0x1ad5   :  { %v1219_v7 = vmul.f32 %v4090_v2, %v1217_v1  ;;  %vm1224_vm9 = vweird.f32 %v4090_v2  ;;  %v4092_v46 = vpop.eup %4091 }
0x1ad6   :  { %vm1225_vm11 = vmor %vm1223_vm10, %vm1224_vm9  ;;  %v4094_v28 = vpop.eup %4093  ;;  %v1282_v52 = vsel %vm518_vm5, %v4092_v46, 0.0 }
0x1ad7   :  { %v1220_v9 = vsub.f32 1.0, %v1219_v7  ;;  %v1283_v54 = vsel %vm518_vm5, %v4094_v28, 0.0 }
0x1ad8   :  { %v1284_v57 = vadd.f32 %v1283_v54, %v1282_v52  ;;  %v1336_v52 = vld [vmem:[#allocation2 + $0x308] sm:$0xff]  ;;  %v1333_v54 = vld [vmem:[#allocation2 + $0x2f0] sm:$0xff] }
0x1ad9   :  { %v1221_v13 = vmul.f32 %v4090_v2, %v1220_v9 }
0x1ada   :  { %4095 = vrcp.f32 %v1284_v57  ;;  %v1334_v57 = vld [vmem:[#allocation2 + $0x2f8] sm:$0xff] }
0x1adb   :  { %v1222_v3 = vadd.f32 %v4090_v2, %v1221_v13 }
0x1add   :  { %v1226_v18 = vsel %vm1225_vm11, %v4090_v2, %v1222_v3 }
0x1ade   :  { %v1231_v31 = vsel %vm1228_vm12, %v1230_v24, %v1226_v18 }
0x1adf   :  { %v1234_v1 = vmul.f32 %v1231_v31, %v4648_v10 }
0x1ae0   :  { %v4096_v9 = vpop.eup %4095 }
0x1ae1   :  { %v1286_v13 = vmul.f32 %v4096_v9, %v4092_v46  ;;  %v1287_v3 = vmul.f32 %v4096_v9, %v4094_v28  ;;  %v1338_v46 = vld [vmem:[#allocation2 + $0x318] sm:$0xff]  ;;  %v1335_v28 = vld [vmem:[#allocation2 + $0x300] sm:$0xff] }
0x1ae2   :  { %1376 = vmatpush.msra.mxu1 %v1338_v46  ;;  %1357 = vmatpush.msra.mxu0 %v1335_v28  ;;  %v1331_v9 = vld [vmem:[#allocation2 + $0x2e0] sm:$0xff] }
0x1ae3   :  { %v1288_v5 = vmul.f32 %v1286_v13, %v4619_v14  ;;  %v1289_v18 = vmul.f32 %v1287_v3, %v4771_v23  ;;  %v1332_v13 = vld [vmem:[#allocation2 + $0x2e8] sm:$0xff]  ;;  %1822 = vmatpush.msrb.mxu3 %v1335_v28 }
0x1ae4   :  { %1377 = vmatpush.msra.mxu1 %v1336_v52  ;;  %1358 = vmatpush.msra.mxu0 %v1333_v54 }
0x1ae5   :  { %v1291_v24 = vsel %vm1290_vm13, %v1288_v5, 0.0  ;;  %v1292_v10 = vsel %vm1290_vm13, %v1289_v18, 0.0  ;;  %1823 = vmatpush.msrb.mxu3 %v1333_v54 }
0x1ae6   :  { %1378 = vmatpush.msra.mxu1 %v1334_v57  ;;  %1359 = vmatpush.msra.mxu0 %v1331_v9 }
0x1ae7   :  { %1824 = vmatpush.msrb.mxu3 %v1331_v9 }
0x1ae8   :  { %1379 = vmatpush.msra.mxu1 %v1332_v13  ;;  %1468 = vmatpush.msrb.mxu0 %v4664_v49 }
0x1aea   :  { %1497 = vmatpush.msrb.mxu1 %v4775_v42  ;;  %1469 = vmatpush.msrb.mxu0 %v4666_v58 }
0x1aec   :  { %1498 = vmatpush.msrb.mxu1 %v4778_v15  ;;  %1470 = vmatpush.msrb.mxu0 %v4669_v59  ;;  %v4884_v59 = vld [vmem:[#allocation2 + $0x140] sm:$0xff] }
0x1aee   :  { %1499 = vmatpush.msrb.mxu1 %v4780_v40  ;;  %1471 = vmatpush.msrb.mxu0 %v4884_v59 }
0x1af0   :  { %1500 = vmatpush.msrb.mxu1 %v4783_v17 }
0x1b3c   :  { %v1237_v20 = vpop.permute.xlu1 %1236 }
0x1b3d   :  { %v1239_v33 = vmul.f32 %v1237_v20, %v1231_v31  ;;  %v1293_v20 = vadd.f32 %v1292_v10, %v1291_v24 }
0x1b3f   :  { %1241 = vrot.lane.b32.xlu1 %v1239_v33, %s4328_s24 }
0x1bb1   :  { %v1242_v2 = vpop.permute.xlu1 %1241 }
0x1bb2   :  { %v4856_v7 = vadd.f32 %v1242_v2, %v1234_v1 }
0x1bb4   :  { %4097 = vtanh.f32 %v4856_v7 }
0x1bba   :  { %v4098_v0 = vpop.eup %4097 }
0x1bbb   :  { %1247 = vrot.lane.b32.xlu1 %v4098_v0, %s4327_s1 }
0x1bc3   :  { %1295 = vrot.lane.b32.xlu1 %v1293_v20, %s4328_s24 }
0x1c2d   :  { %v1248_v33 = vpop.permute.xlu1 %1247 }
0x1c2e   :  { %v4865_v22 = vmul.f32 %v1248_v33, %v1231_v31 }
0x1c35   :  { %v1296_v12 = vpop.permute.xlu1 %1295 }
0x1c36   :  { %v1298_v25 = vadd.f32 %v1296_v12, %v4865_v22 }
0x1c38   :  { %1300 = vrot.lane.b32.xlu1 %v1298_v25, %s4328_s24 }
0x1caa   :  { %v1301_v29 = vpop.permute.xlu1 %1300 }
0x1cab   :  { %v1303_v27 = vsel %vm414_vm15, %v1301_v29, 0.0 }
0x1cac   :  { %1304 = vadd.xlane.f32.xlu1 %v1303_v27 }
0x1d1f   :  { %v1305_v43 = vpop.xlane.xlu1 %1304 }
0x1d20   :  { %v1306_v60 = vmul.f32 %v1305_v43, %v4545_v56 }
0x1d22   :  { %v1307_v41 = vsub.f32 %v1298_v25, %v1306_v60 }
0x1d24   :  { %v1308_v63 = vmul.f32 %v1307_v41, %v1307_v41 }
0x1d26   :  { %1310 = vrot.lane.b32.xlu2 %v1308_v63, %s4328_s24 }
0x1d80   :  { %v1311_v48 = vpop.permute.xlu2 %1310 }
0x1d81   :  { %v1313_v31 = vsel %vm414_vm15, %v1311_v48, 0.0  ;;  %v1449_v48 = vpop.f32.mrf.mxu2 }
0x1d82   :  { %1314 = vadd.xlane.f32.xlu0 %v1313_v31 }
0x1df5   :  { %v1315_v1 = vpop.xlane.xlu0 %1314 }
0x1df6   :  { %v1316_v2 = vmul.f32 %v1315_v1, %v4545_v56 }
0x1df8   :  { %v1317_v3 = vadd.f32 1e-05, %v1316_v2 }
0x1dfa   :  { %4099 = vrsqrt.f32 %v1317_v3  ;;  %vm1324_vm0 = vweird.f32 %v1317_v3 }
0x1e00   :  { %v4100_v0 = vpop.eup %4099 }
0x1e01   :  { %v1319_v5 = vmul.f32 %v4100_v0, %v1317_v3  ;;  %vm1325_vm14 = vweird.f32 %v4100_v0 }
0x1e02   :  { %vm1326_vm2 = vmor %vm1324_vm0, %vm1325_vm14 }
0x1e03   :  { %v1320_v18 = vmul.f32 %v4100_v0, %v1319_v5 }
0x1e05   :  { %v1321_v24 = vmul.f32 0.5, %v1320_v18 }
0x1e07   :  { %v1322_v10 = vsub.f32 1.5, %v1321_v24 }
0x1e09   :  { %v1323_v49 = vmul.f32 %v4100_v0, %v1322_v10 }
0x1e0b   :  { %v1327_v42 = vsel %vm1326_vm2, %v4100_v0, %v1323_v49 }
0x1e0c   :  { %v1328_v20 = vmul.f32 %v1327_v42, %v1307_v41 }
0x1e0e   :  { %v1329_v58 = vmul.f32 %v1328_v20, %v4564_v61 }
0x1e10   :  { %v1330_v15 = vadd.f32 %v1329_v58, %v4566_v30 }
0x1e12   :  { %1340 = vrot.lane.b32.xlu0 %v1330_v15, %s4328_s24 }
0x1e84   :  { %v1341_v40 = vpop.permute.xlu0 %1340 }
0x1e85   :  { %3931 = vmatmul.msk.f32.vlgmr.msra.gmra.mxu0 %vm76_vm1, %v1341_v40  ;;  %3932 = vmatmul.msk.f32.vlgmr.msra.gmra.mxu1 %vm76_vm1, %v1341_v40 }
0x1e86   :  { %1584 = vmatpush.msra.mxu0 %v4746_v51  ;;  %1651 = vmatpush.msra.mxu1 %v4796_v19 }
0x1e88   :  { %1585 = vmatpush.msra.mxu0 %v4748_v47  ;;  %1652 = vmatpush.msra.mxu1 %v4798_v34  ;;  %v3934_v47 = vld [vmem:[%s5713_s2 + $0x4] sm:$0x3] }
0x1e8a   :  { %1586 = vmatpush.msra.mxu0 %v4751_v55  ;;  %1653 = vmatpush.msra.mxu1 %v4802_v32 }
0x1e8c   :  { %1587 = vmatpush.msra.mxu0 %v4754_v11  ;;  %1654 = vmatpush.msra.mxu1 %v4806_v37 }
0x1e8d   :  { %3937 = vmatmul.msk.f32.vlgmr.msrb.gmra.mxu0 %vm76_vm1, %v4823_v26 }
0x1e8e   :  { %1841 = vmatpush.msrb.mxu0 %v1338_v46 }
0x1e90   :  { %1842 = vmatpush.msrb.mxu0 %v1336_v52 }
0x1e92   :  { %1843 = vmatpush.msrb.mxu0 %v1334_v57 }
0x1e94   :  { %1844 = vmatpush.msrb.mxu0 %v1332_v13 }
0x1f02   :  { %v1361_v51 = vpop.f32.mrf.mxu0 }
0x1f03   :  { %v1362_v55 = vadd.f32 %v1361_v51, %v4586_v44 }
0x1f05   :  { %3933 = vst [vmem:[%s5715_s4 + $0x4] sm:$0x3] %v1362_v55  ;;  %v1388_v11 = vadd.f32 %v3934_v47, %v1362_v55 }
0x1f07   :  { %v1389_v17 = vsel %vm518_vm5, %v1388_v11, -inf }
0x1f08   :  { %1390 = vmax.xlane.f32.xlu2 %v1389_v17 }
0x1f7b   :  { %v1391_v19 = vpop.xlane.xlu2 %1390 }
0x1f7c   :  { %vm1392_vm3 = vcmp.ge.f32.partialorder %v1388_v11, %v1391_v19 }
0x1f7d   :  { %v1393_v34 = vsel %vm1392_vm3, %v4433_v36, 128 }
0x1f7e   :  { %v1394_v32 = vsel %vm518_vm5, %v1393_v34, 2147483647 }
0x1f7f   :  { %v1396_v37 = vshra.s32 %v1394_v32, 16  ;;  %v1395_v33 = vand.u32 65535, %v1394_v32 }
0x1f81   :  { %v1398_v26 = vcvt.s32.f32 %v1396_v37  ;;  %v1397_v25 = vcvt.s32.f32 %v1395_v33 }
0x1f83   :  { %1399 = vmin.xlane.f32.xlu0 %v1398_v26 }
0x1ff6   :  { %v1400_v12 = vpop.xlane.xlu0 %1399 }
0x1ff7   :  { %vm1401_vm4 = vcmp.eq.f32.partialorder %v1398_v26, %v1400_v12  ;;  %v1406_v27 = vcvt.f32.s32 %v1400_v12 }
0x1ff8   :  { %v1402_v29 = vsel %vm1401_vm4, %v1397_v25, inf }
0x1ff9   :  { %1403 = vmin.xlane.f32.xlu1 %v1402_v29  ;;  %v1407_v60 = vshll.u32 %v1406_v27, 16 }
0x206c   :  { %v1404_v43 = vpop.xlane.xlu1 %1403 }
0x206d   :  { %v1405_v41 = vcvt.f32.s32 %v1404_v43 }
0x206f   :  { %v1408_v63 = vadd.s32 %v1407_v60, %v1405_v41 }
0x2071   :  { %vm1409_vm6 = vcmp.eq.s32.totalorder %v4433_v36, %v1408_v63 }
0x2072   :  { %3939 = vmatmul.msk.f32.vlgmr.msrb.gmra.mxu2 %vm1409_vm6, %v4326_v38 }
0x20f5   :  { %v1522_v31 = vpop.f32.mrf.mxu2 }
0x20f6   :  { %v1523_v45 = vadd.f32 %v1522_v31, %v1449_v48 }
0x20f8   :  { %v1525_v46 = vadd.f32 %v1523_v45, %v4461_v53  ;;  %v1381_v45 = vpop.f32.mrf.mxu1 }
0x20fa   :  { %4101 = vtanh.f32 %v1525_v46  ;;  %v3940_v52 = vmul.f32 -1.442695, %v1525_v46  ;;  %v4937_v46 = vadd.f32 %v1381_v45, %v4616_v8 }
0x20fc   :  { %4103 = vpow2.f32 %v3940_v52 }
0x2100   :  { %v4102_v28 = vpop.eup %4101 }
0x2101   :  { %1548 = vrot.lane.b32.xlu1 %v4102_v28, %s4327_s1 }
0x2102   :  { %v4104_v54 = vpop.eup %4103 }
0x2103   :  { %v1529_v57 = vadd.f32 1.0, %v4104_v54 }
0x2105   :  { %4105 = vrcp.f32 %v1529_v57  ;;  %v1541_v0 = vand.u32 2147483648, %v1529_v57  ;;  %vm1535_vm8 = vweird.f32 %v1529_v57  ;;  %v1539_v5 = vand.u32 2147483647, %v1529_v57 }
0x2107   :  { %v1542_v24 = vor.u32 1.1754944e-38, %v1541_v0  ;;  %vm1540_vm10 = vcmp.eq.f32.partialorder %v1539_v5, 8.507059e+37 }
0x210b   :  { %v4106_v1 = vpop.eup %4105 }
0x210c   :  { %v1531_v2 = vmul.f32 %v4106_v1, %v1529_v57  ;;  %vm1536_vm7 = vweird.f32 %v4106_v1 }
0x210d   :  { %vm1537_vm9 = vmor %vm1535_vm8, %vm1536_vm7 }
0x210e   :  { %v1532_v9 = vsub.f32 1.0, %v1531_v2 }
0x2110   :  { %v1533_v13 = vmul.f32 %v4106_v1, %v1532_v9 }
0x2112   :  { %v1534_v3 = vadd.f32 %v4106_v1, %v1533_v13 }
0x2114   :  { %v1538_v18 = vsel %vm1537_vm9, %v4106_v1, %v1534_v3 }
0x2115   :  { %v1543_v49 = vsel %vm1540_vm10, %v1542_v24, %v1538_v18 }
0x2116   :  { %v1546_v20 = vmul.f32 %v1543_v49, %v4742_v4  ;;  %v1473_v4 = vpop.f32.mrf.mxu0 }
0x2173   :  { %v1549_v10 = vpop.permute.xlu1 %1548 }
0x2174   :  { %v1551_v42 = vmul.f32 %v1549_v10, %v1543_v49 }
0x2176   :  { %1553 = vrot.lane.b32.xlu2 %v1551_v42, %s4328_s24 }
0x21d0   :  { %v1554_v58 = vpop.permute.xlu2 %1553 }
0x21d1   :  { %v4915_v15 = vadd.f32 %v1554_v58, %v1546_v20 }
0x21d3   :  { %4107 = vtanh.f32 %v4915_v15 }
0x21d9   :  { %v4108_v40 = vpop.eup %4107 }
0x21da   :  { %1559 = vrot.lane.b32.xlu1 %v4108_v40, %s4327_s1 }
0x224c   :  { %v1560_v51 = vpop.permute.xlu1 %1559 }
0x224d   :  { %v1562_v47 = vmul.f32 %v1560_v51, %v1543_v49 }
0x224f   :  { %1568 = vrot.lane.b32.xlu0 %v1562_v47, %s4328_s24 }
0x2257   :  { %1481 = vrot.lane.b32.xlu0 %v4865_v22, %s4328_s24 }
0x22c1   :  { %v1569_v55 = vpop.permute.xlu0 %1568 }
0x22c2   :  { %3941 = vmatmul.msk.f32.vlgmr.msra.gmra.mxu0 %vm76_vm1, %v1569_v55 }
0x22c9   :  { %v1482_v11 = vpop.permute.xlu0 %1481 }
0x22ca   :  { %3938 = vmatmul.msk.f32.vlgmr.msrb.gmra.mxu1 %vm76_vm1, %v1482_v11 }
0x22cb   :  { %1909 = vmatpush.msrb.mxu1 %v4811_v16 }
0x22cd   :  { %1910 = vmatpush.msrb.mxu1 %v4813_v39 }
0x22cf   :  { %1911 = vmatpush.msrb.mxu1 %v4816_v62 }
0x22d1   :  { %1912 = vmatpush.msrb.mxu1 %v4819_v35 }
0x233f   :  { %v1589_v17 = vpop.f32.mrf.mxu0 }
0x2340   :  { %v1590_v19 = vadd.f32 %v1589_v17, %v1473_v4 }
0x2342   :  { %v1592_v34 = vadd.f32 %v4763_v6, %v1590_v19 }
0x2344   :  { %4109 = vtanh.f32 %v1592_v34  ;;  %v3942_v32 = vmul.f32 -1.442695, %v1592_v34 }
0x2346   :  { %4111 = vpow2.f32 %v3942_v32 }
0x2347   :  { %v1502_v5 = vpop.f32.mrf.mxu1 }
0x234a   :  { %v4110_v22 = vpop.eup %4109 }
0x234b   :  { %1615 = vrot.lane.b32.xlu1 %v4110_v22, %s4327_s1 }
0x234c   :  { %v4112_v37 = vpop.eup %4111 }
0x234d   :  { %v1596_v26 = vadd.f32 1.0, %v4112_v37 }
0x234f   :  { %4113 = vrcp.f32 %v1596_v26  ;;  %v1608_v35 = vand.u32 2147483648, %v1596_v26  ;;  %vm1602_vm12 = vweird.f32 %v1596_v26  ;;  %v1606_v25 = vand.u32 2147483647, %v1596_v26 }
0x2351   :  { %v1609_v29 = vor.u32 1.1754944e-38, %v1608_v35  ;;  %vm1607_vm0 = vcmp.eq.f32.partialorder %v1606_v25, 8.507059e+37 }
0x2355   :  { %v4114_v16 = vpop.eup %4113 }
0x2356   :  { %v1598_v39 = vmul.f32 %v4114_v16, %v1596_v26  ;;  %vm1603_vm11 = vweird.f32 %v4114_v16 }
0x2357   :  { %vm1604_vm14 = vmor %vm1602_vm12, %vm1603_vm11 }
0x2358   :  { %v1599_v33 = vsub.f32 1.0, %v1598_v39 }
0x235a   :  { %v1600_v62 = vmul.f32 %v4114_v16, %v1599_v33 }
0x235c   :  { %v1601_v12 = vadd.f32 %v4114_v16, %v1600_v62 }
0x235e   :  { %v1605_v6 = vsel %vm1604_vm14, %v4114_v16, %v1601_v12 }
0x235f   :  { %v1610_v43 = vsel %vm1607_vm0, %v1609_v29, %v1605_v6 }
0x2360   :  { %v1613_v41 = vmul.f32 %v1610_v43, %v4788_v21 }
0x23bd   :  { %v1616_v27 = vpop.permute.xlu1 %1615 }
0x23be   :  { %v1618_v60 = vmul.f32 %v1616_v27, %v1610_v43 }
0x23c0   :  { %1620 = vrot.lane.b32.xlu1 %v1618_v60, %s4328_s24 }
0x2432   :  { %v1621_v63 = vpop.permute.xlu1 %1620 }
0x2433   :  { %v4932_v48 = vadd.f32 %v1621_v63, %v1613_v41 }
0x2435   :  { %4115 = vtanh.f32 %v4932_v48 }
0x243b   :  { %v4116_v31 = vpop.eup %4115 }
0x243c   :  { %1626 = vrot.lane.b32.xlu2 %v4116_v31, %s4327_s1 }
0x2444   :  { %1698 = vrot.lane.b32.xlu2 %v4937_v46, %s4328_s24 }
0x2496   :  { %v1627_v28 = vpop.permute.xlu2 %1626 }
0x2497   :  { %v1629_v52 = vmul.f32 %v1627_v28, %v1610_v43 }
0x2499   :  { %1635 = vrot.lane.b32.xlu1 %v1629_v52, %s4328_s24 }
0x249e   :  { %v1699_v21 = vpop.permute.xlu2 %1698 }
0x249f   :  { %v1701_v54 = vmul.f32 %v1699_v21, %v4619_v14  ;;  %v1702_v57 = vmul.f32 %v1699_v21, %v4771_v23  ;;  %v1703_v1 = vmul.f32 %v1699_v21, %v4937_v46 }
0x24a1   :  { %1711 = vrot.lane.b32.xlu2 %v1703_v1, %s4330_s29  ;;  %1709 = vrot.lane.b32.xlu1 %v1702_v57, %s4330_s29 }
0x24a2   :  { %1707 = vrot.lane.b32.xlu0 %v1701_v54, %s4330_s29 }
0x24fb   :  { %v1712_v42 = vpop.permute.xlu2 %1711 }
0x24fc   :  { %v1722_v20 = vsel %vm414_vm15, %v1712_v42, 0.0 }
0x250b   :  { %v4948_v2 = vpop.permute.xlu1 %1635 }
0x250c   :  { %3943 = vmatmul.msk.f32.vlgmr.msra.gmra.mxu1 %vm76_vm1, %v4948_v2 }
0x2513   :  { %v1710_v9 = vpop.permute.xlu1 %1709 }
0x2514   :  { %v1708_v13 = vpop.permute.xlu0 %1707  ;;  %3950 = vmatmul.msk.f32.vlgmr.msrb.gmra.mxu1 %vm76_vm1, %v1569_v55  ;;  %v1719_v3 = vsel %vm414_vm15, %v1710_v9, 0.0 }
0x2515   :  { %1720 = vadd.xlane.f32.xlu2 %v1719_v3  ;;  %v1716_v0 = vsel %vm414_vm15, %v1708_v13, 0.0 }
0x2516   :  { %1717 = vadd.xlane.f32.xlu1 %v1716_v0 }
0x2588   :  { %v1721_v16 = vpop.xlane.xlu2 %1720 }
0x2589   :  { %v1656_v18 = vpop.f32.mrf.mxu1  ;;  %v1718_v39 = vpop.xlane.xlu1 %1717  ;;  %v1726_v33 = vmul.f32 0.17677669, %v1721_v16 }
0x258a   :  { %v1657_v24 = vadd.f32 %v1656_v18, %v1502_v5  ;;  %v1725_v62 = vmul.f32 0.17677669, %v1718_v39 }
0x258b   :  { %v1729_v12 = vsel %vm518_vm5, %v1726_v33, -inf }
0x258c   :  { %v1659_v10 = vadd.f32 %v4846_v50, %v1657_v24  ;;  %v1728_v35 = vsel %vm518_vm5, %v1725_v62, -inf }
0x258d   :  { %v1731_v29 = vmax.f32 %v1728_v35, %v1729_v12 }
0x258e   :  { %4117 = vtanh.f32 %v1659_v10  ;;  %v3944_v58 = vmul.f32 -1.442695, %v1659_v10 }
0x2590   :  { %4119 = vpow2.f32 %v3944_v58 }
0x2594   :  { %v4118_v49 = vpop.eup %4117 }
0x2595   :  { %1682 = vrot.lane.b32.xlu0 %v4118_v49, %s4327_s1 }
0x2596   :  { %v4120_v40 = vpop.eup %4119 }
0x2597   :  { %v1663_v51 = vadd.f32 1.0, %v4120_v40 }
0x2599   :  { %4121 = vrcp.f32 %v1663_v51  ;;  %v1675_v50 = vand.u32 2147483648, %v1663_v51  ;;  %vm1669_vm3 = vweird.f32 %v1663_v51  ;;  %v1673_v19 = vand.u32 2147483647, %v1663_v51 }
0x259b   :  { %v1676_v22 = vor.u32 1.1754944e-38, %v1675_v50  ;;  %vm1674_vm6 = vcmp.eq.f32.partialorder %v1673_v19, 8.507059e+37 }
0x259f   :  { %v4122_v47 = vpop.eup %4121 }
0x25a0   :  { %v1665_v55 = vmul.f32 %v4122_v47, %v1663_v51  ;;  %vm1670_vm2 = vweird.f32 %v4122_v47 }
0x25a1   :  { %vm1671_vm4 = vmor %vm1669_vm3, %vm1670_vm2 }
0x25a2   :  { %v1666_v11 = vsub.f32 1.0, %v1665_v55 }
0x25a4   :  { %v1667_v4 = vmul.f32 %v4122_v47, %v1666_v11 }
0x25a6   :  { %v1668_v17 = vadd.f32 %v4122_v47, %v1667_v4 }
0x25a8   :  { %v1672_v34 = vsel %vm1671_vm4, %v4122_v47, %v1668_v17 }
0x25a9   :  { %v1677_v32 = vsel %vm1674_vm6, %v1676_v22, %v1672_v34 }
0x25aa   :  { %v1680_v55 = vmul.f32 %v1677_v32, %v4856_v7 }
0x25bf   :  { %1723 = vadd.xlane.f32.xlu0 %v1722_v20 }
0x2607   :  { %v1683_v37 = vpop.permute.xlu0 %1682 }
0x2608   :  { %v1685_v26 = vmul.f32 %v1683_v37, %v1677_v32 }
0x260a   :  { %1687 = vrot.lane.b32.xlu1 %v1685_v26, %s4328_s24 }
0x2632   :  { %v1724_v25 = vpop.xlane.xlu0 %1723 }
0x2633   :  { %v1727_v6 = vmul.f32 0.17677669, %v1724_v25 }
0x2635   :  { %v1730_v27 = vsel %vm518_vm5, %v1727_v6, -inf }
0x2636   :  { %v1732_v43 = vmax.f32 %v1731_v29, %v1730_v27 }
0x2638   :  { %v1733_v60 = vsub.f32 %v1725_v62, %v1732_v43  ;;  %v1734_v41 = vsub.f32 %v1726_v33, %v1732_v43  ;;  %v1735_v63 = vsub.f32 %v1727_v6, %v1732_v43 }
0x263a   :  { %v1736_v31 = vmul.f32 1.442695, %v1733_v60  ;;  %v1738_v45 = vmul.f32 1.442695, %v1734_v41  ;;  %v1740_v28 = vmul.f32 1.442695, %v1735_v63 }
0x263c   :  { %4123 = vpow2.f32 %v1736_v31 }
0x263d   :  { %4125 = vpow2.f32 %v1738_v45 }
0x263e   :  { %4127 = vpow2.f32 %v1740_v28 }
0x2642   :  { %v4124_v52 = vpop.eup %4123 }
0x2643   :  { %v4126_v21 = vpop.eup %4125  ;;  %v1742_v54 = vsel %vm518_vm5, %v4124_v52, 0.0 }
0x2644   :  { %v4128_v57 = vpop.eup %4127  ;;  %v1743_v1 = vsel %vm518_vm5, %v4126_v21, 0.0 }
0x2645   :  { %v1744_v9 = vadd.f32 %v1743_v1, %v1742_v54  ;;  %v1745_v13 = vsel %vm518_vm5, %v4128_v57, 0.0  ;;  %v4994_v54 = vld [vmem:[#allocation2 + $0x150] sm:$0xff] }
0x2647   :  { %v1746_v3 = vadd.f32 %v1745_v13, %v1744_v9  ;;  %v3948_v9 = vld [vmem:[%s5713_s2 + $0x6] sm:$0x3] }
0x2649   :  { %4129 = vrcp.f32 %v1746_v3 }
0x264f   :  { %v4130_v0 = vpop.eup %4129 }
0x2650   :  { %v1748_v5 = vmul.f32 %v4130_v0, %v4124_v52  ;;  %v1749_v18 = vmul.f32 %v4130_v0, %v4126_v21  ;;  %v1750_v24 = vmul.f32 %v4130_v0, %v4128_v57  ;;  %v4989_v52 = vld [vmem:[#allocation2 + $0x170] sm:$0xff]  ;;  %v4991_v21 = vld [vmem:[#allocation2 + $0x160] sm:$0xff] }
0x2651   :  { %1933 = vmatpush.msra.mxu3 %v4989_v52 }
0x2652   :  { %v1751_v10 = vmul.f32 %v1748_v5, %v4619_v14  ;;  %v1752_v49 = vmul.f32 %v1749_v18, %v4771_v23  ;;  %v1753_v42 = vmul.f32 %v1750_v24, %v4937_v46 }
0x2653   :  { %1934 = vmatpush.msra.mxu3 %v4991_v21 }
0x2654   :  { %v1754_v20 = vsel %vm1290_vm13, %v1751_v10, 0.0  ;;  %v1755_v58 = vsel %vm1290_vm13, %v1752_v49, 0.0  ;;  %v1757_v51 = vsel %vm1290_vm13, %v1753_v42, 0.0  ;;  %v5013_v10 = vld [vmem:[#allocation2 + $0xf0] sm:$0xff]  ;;  %v5015_v49 = vld [vmem:[#allocation2 + $0xe0] sm:$0xff] }
0x2655   :  { %v1756_v40 = vadd.f32 %v1755_v58, %v1754_v20  ;;  %1935 = vmatpush.msra.mxu3 %v4994_v54  ;;  %1970 = vmatpush.msra.mxu1 %v5013_v10  ;;  %v5018_v42 = vld [vmem:[#allocation2 + $0xd0] sm:$0xff]  ;;  %v5021_v20 = vld [vmem:[#allocation2 + $0xc0] sm:$0xff] }
0x2656   :  { %v5024_v58 = vld [vmem:[#allocation2 + $0xb0] sm:$0xff] }
0x2657   :  { %v1758_v47 = vadd.f32 %v1757_v51, %v1756_v40  ;;  %1936 = vmatpush.msra.mxu3 %v4884_v59  ;;  %1971 = vmatpush.msra.mxu1 %v5015_v49  ;;  %v5027_v40 = vld [vmem:[#allocation2 + $0xa0] sm:$0xff]  ;;  %v5030_v51 = vld [vmem:[#allocation2 + $0x90] sm:$0xff] }
0x2659   :  { %1760 = vrot.lane.b32.xlu0 %v1758_v47, %s4328_s24  ;;  %1972 = vmatpush.msra.mxu1 %v5018_v42  ;;  %v5033_v47 = vld [vmem:[#allocation2 + $0x80] sm:$0xff] }
0x265b   :  { %1973 = vmatpush.msra.mxu1 %v5021_v20 }
0x265d   :  { %1974 = vmatpush.msra.mxu1 %v5024_v58 }
0x265f   :  { %1975 = vmatpush.msra.mxu1 %v5027_v40 }
0x2661   :  { %1976 = vmatpush.msra.mxu1 %v5030_v51 }
0x2663   :  { %1977 = vmatpush.msra.mxu1 %v5033_v47 }
0x267c   :  { %v1688_v11 = vpop.permute.xlu1 %1687 }
0x267d   :  { %v4973_v4 = vadd.f32 %v1688_v11, %v1680_v55  ;;  %v5036_v55 = vld [vmem:[#allocation2 + $0x70] sm:$0xff]  ;;  %v5039_v11 = vld [vmem:[#allocation2 + $0x60] sm:$0xff] }
0x267e   :  { %1978 = vmatpush.msra.mxu1 %v5036_v55 }
0x267f   :  { %4131 = vtanh.f32 %v4973_v4 }
0x2680   :  { %1979 = vmatpush.msra.mxu1 %v5039_v11 }
0x2685   :  { %v4132_v17 = vpop.eup %4131 }
0x2686   :  { %1693 = vrot.lane.b32.xlu2 %v4132_v17, %s4327_s1  ;;  %v5042_v17 = vld [vmem:[#allocation2 + $0x50] sm:$0xff] }
0x2687   :  { %1980 = vmatpush.msra.mxu1 %v5042_v17 }
0x26cb   :  { %v1761_v34 = vpop.permute.xlu0 %1760 }
0x26e0   :  { %v1694_v50 = vpop.permute.xlu2 %1693 }
0x26e1   :  { %v4977_v19 = vmul.f32 %v1694_v50, %v1677_v32  ;;  %v5045_v50 = vld [vmem:[#allocation2 + $0x40] sm:$0xff] }
0x26e2   :  { %1981 = vmatpush.msra.mxu1 %v5045_v50 }
0x26e3   :  { %v1763_v22 = vadd.f32 %v1761_v34, %v4977_v19  ;;  %v5048_v34 = vld [vmem:[#allocation2 + $0x30] sm:$0xff] }
0x26e4   :  { %1982 = vmatpush.msra.mxu1 %v5048_v34 }
0x26e5   :  { %1765 = vrot.lane.b32.xlu0 %v1763_v22, %s4328_s24 }
0x2757   :  { %v1766_v37 = vpop.permute.xlu0 %1765 }
0x2758   :  { %v1768_v26 = vsel %vm414_vm15, %v1766_v37, 0.0 }
0x2759   :  { %1769 = vadd.xlane.f32.xlu1 %v1768_v26 }
0x27cc   :  { %v1770_v7 = vpop.xlane.xlu1 %1769 }
0x27cd   :  { %v1771_v16 = vmul.f32 %v1770_v7, %v4545_v56 }
0x27cf   :  { %v1772_v39 = vsub.f32 %v1763_v22, %v1771_v16  ;;  %v5052_v16 = vld [vmem:[#allocation2 + $0x20] sm:$0xff] }
0x27d0   :  { %1983 = vmatpush.msra.mxu1 %v5052_v16 }
0x27d1   :  { %v1773_v33 = vmul.f32 %v1772_v39, %v1772_v39 }
0x27d3   :  { %1775 = vrot.lane.b32.xlu2 %v1773_v33, %s4328_s24  ;;  %v5058_v33 = vld [vmem:[#allocation2] sm:$0xff] }
0x282d   :  { %v1776_v62 = vpop.permute.xlu2 %1775 }
0x282e   :  { %v1778_v32 = vsel %vm414_vm15, %v1776_v62, 0.0 }
0x282f   :  { %1779 = vadd.xlane.f32.xlu0 %v1778_v32 }
0x28a2   :  { %v1780_v12 = vpop.xlane.xlu0 %1779 }
0x28a3   :  { %v1781_v35 = vmul.f32 %v1780_v12, %v4545_v56 }
0x28a5   :  { %v1782_v25 = vadd.f32 1e-05, %v1781_v35 }
0x28a7   :  { %4133 = vrsqrt.f32 %v1782_v25  ;;  %vm1789_vm8 = vweird.f32 %v1782_v25 }
0x28ad   :  { %v4134_v6 = vpop.eup %4133 }
0x28ae   :  { %v1784_v29 = vmul.f32 %v4134_v6, %v1782_v25  ;;  %vm1790_vm7 = vweird.f32 %v4134_v6 }
0x28af   :  { %vm1791_vm9 = vmor %vm1789_vm8, %vm1790_vm7 }
0x28b0   :  { %v1785_v27 = vmul.f32 %v4134_v6, %v1784_v29 }
0x28b2   :  { %v1786_v43 = vmul.f32 0.5, %v1785_v27 }
0x28b4   :  { %v1787_v60 = vsub.f32 1.5, %v1786_v43 }
0x28b6   :  { %v1788_v41 = vmul.f32 %v4134_v6, %v1787_v60 }
0x28b8   :  { %v1792_v63 = vsel %vm1791_vm9, %v4134_v6, %v1788_v41  ;;  %v1914_v6 = vpop.f32.mrf.mxu1 }
0x28b9   :  { %v1793_v31 = vmul.f32 %v1792_v63, %v1772_v39  ;;  %v5055_v39 = vld [vmem:[#allocation2 + $0x10] sm:$0xff] }
0x28ba   :  { %1984 = vmatpush.msra.mxu1 %v5055_v39 }
0x28bb   :  { %v1794_v45 = vmul.f32 %v1793_v31, %v4564_v61 }
0x28bc   :  { %1985 = vmatpush.msra.mxu1 %v5058_v33 }
0x28bd   :  { %v1795_v28 = vadd.f32 %v1794_v45, %v4566_v30 }
0x28bf   :  { %1805 = vrot.lane.b32.xlu2 %v1795_v28, %s4328_s24 }
0x2919   :  { %v1806_v57 = vpop.permute.xlu2 %1805 }
0x291a   :  { %3945 = vmatmul.msk.f32.vlgmr.msrb.gmra.mxu3 %vm76_vm1, %v1806_v57  ;;  %3946 = vmatmul.msk.f32.vlgmr.msrb.gmra.mxu0 %vm76_vm1, %v1806_v57 }
0x2922   :  { %3951 = vmatmul.msk.f32.vlgmr.msra.gmra.mxu3 %vm76_vm1, %v4948_v2 }
0x299d   :  { %v1826_v1 = vpop.f32.mrf.mxu3 }
0x299e   :  { %v1827_v13 = vadd.f32 %v1826_v1, %v4586_v44 }
0x29a0   :  { %3947 = vst [vmem:[%s5715_s4 + $0x6] sm:$0x3] %v1827_v13  ;;  %v1853_v59 = vadd.f32 %v3948_v9, %v1827_v13 }
0x29a2   :  { %v1854_v3 = vsel %vm518_vm5, %v1853_v59, -inf }
0x29a3   :  { %1855 = vmax.xlane.f32.xlu2 %v1854_v3 }
0x2a16   :  { %v1856_v0 = vpop.xlane.xlu2 %1855 }
0x2a17   :  { %vm1857_vm10 = vcmp.ge.f32.partialorder %v1853_v59, %v1856_v0 }
0x2a18   :  { %v1858_v5 = vsel %vm1857_vm10, %v4433_v36, 128 }
0x2a19   :  { %v1859_v2 = vsel %vm518_vm5, %v1858_v5, 2147483647 }
0x2a1a   :  { %v1861_v18 = vshra.s32 %v1859_v2, 16  ;;  %v1860_v22 = vand.u32 65535, %v1859_v2 }
0x2a1c   :  { %v1863_v24 = vcvt.s32.f32 %v1861_v18  ;;  %v1862_v26 = vcvt.s32.f32 %v1860_v22 }
0x2a1e   :  { %1864 = vmin.xlane.f32.xlu1 %v1863_v24 }
0x2a91   :  { %v1865_v37 = vpop.xlane.xlu1 %1864 }
0x2a92   :  { %vm1866_vm11 = vcmp.eq.f32.partialorder %v1863_v24, %v1865_v37  ;;  %v1871_v62 = vcvt.f32.s32 %v1865_v37 }
0x2a93   :  { %v1867_v7 = vsel %vm1866_vm11, %v1862_v26, inf }
0x2a94   :  { %1868 = vmin.xlane.f32.xlu0 %v1867_v7  ;;  %v1872_v12 = vshll.u32 %v1871_v62, 16  ;;  %v5071_v7 = vld [vmem:[#allocation2 + $0x1f0] sm:$0xff]  ;;  %v5073_v62 = vld [vmem:[#allocation2 + $0x1e0] sm:$0xff] }
0x2a95   :  { %2049 = vmatpush.msrb.mxu3 %v5071_v7 }
0x2a97   :  { %2050 = vmatpush.msrb.mxu3 %v5073_v62 }
0x2b07   :  { %v1869_v32 = vpop.xlane.xlu0 %1868 }
0x2b08   :  { %v1870_v35 = vcvt.f32.s32 %v1869_v32  ;;  %v5076_v32 = vld [vmem:[#allocation2 + $0x1d0] sm:$0xff] }
0x2b09   :  { %2051 = vmatpush.msrb.mxu3 %v5076_v32 }
0x2b0a   :  { %v1873_v25 = vadd.s32 %v1872_v12, %v1870_v35  ;;  %v5079_v12 = vld [vmem:[#allocation2 + $0x1c0] sm:$0xff] }
0x2b0b   :  { %2052 = vmatpush.msrb.mxu3 %v5079_v12 }
0x2b0c   :  { %vm1874_vm12 = vcmp.eq.s32.totalorder %v4433_v36, %v1873_v25 }
0x2b0d   :  { %3953 = vmatmul.msk.f32.vlgmr.msra.gmra.mxu1 %vm1874_vm12, %v4326_v38 }
0x2b8a   :  { %v1987_v29 = vpop.f32.mrf.mxu1 }
0x2b8b   :  { %v1988_v27 = vadd.f32 %v1987_v29, %v1914_v6  ;;  %v1938_v6 = vpop.f32.mrf.mxu3 }
0x2b8d   :  { %v1990_v43 = vadd.f32 %v1988_v27, %v4461_v53 }
0x2b8f   :  { %4135 = vtanh.f32 %v1990_v43  ;;  %v3954_v41 = vmul.f32 -1.442695, %v1990_v43  ;;  %v5088_v43 = vld [vmem:[#allocation2 + $0x322] ss:$0 sm:$0xff] }
0x2b91   :  { %4137 = vpow2.f32 %v3954_v41 }
0x2b95   :  { %v4136_v60 = vpop.eup %4135 }
0x2b96   :  { %2013 = vrot.lane.b32.xlu1 %v4136_v60, %s4327_s1 }
0x2b97   :  { %v4138_v63 = vpop.eup %4137 }
0x2b98   :  { %v1994_v31 = vadd.f32 1.0, %v4138_v63 }
0x2b9a   :  { %4139 = vrcp.f32 %v1994_v31  ;;  %v2006_v13 = vand.u32 2147483648, %v1994_v31  ;;  %vm2000_vm0 = vweird.f32 %v1994_v31  ;;  %v2004_v59 = vand.u32 2147483647, %v1994_v31 }
0x2b9c   :  { %v2007_v0 = vor.u32 1.1754944e-38, %v2006_v13  ;;  %vm2005_vm3 = vcmp.eq.f32.partialorder %v2004_v59, 8.507059e+37 }
0x2ba0   :  { %v4140_v45 = vpop.eup %4139 }
0x2ba1   :  { %v1996_v28 = vmul.f32 %v4140_v45, %v1994_v31  ;;  %vm2001_vm14 = vweird.f32 %v4140_v45 }
0x2ba2   :  { %vm2002_vm2 = vmor %vm2000_vm0, %vm2001_vm14 }
0x2ba3   :  { %v1997_v57 = vsub.f32 1.0, %v1996_v28  ;;  %v5094_v28 = vld [vmem:[#allocation2 + $0x1b0] sm:$0xff] }
0x2ba4   :  { %1962 = vmatpush.msra.mxu0 %v5094_v28 }
0x2ba5   :  { %v1998_v1 = vmul.f32 %v4140_v45, %v1997_v57  ;;  %v5097_v57 = vld [vmem:[#allocation2 + $0x1a0] sm:$0xff] }
0x2ba6   :  { %1963 = vmatpush.msra.mxu0 %v5097_v57 }
0x2ba7   :  { %v1999_v9 = vadd.f32 %v4140_v45, %v1998_v1  ;;  %v5099_v1 = vld [vmem:[#allocation2 + $0x190] sm:$0xff] }
0x2ba8   :  { %1964 = vmatpush.msra.mxu0 %v5099_v1 }
0x2ba9   :  { %v2003_v3 = vsel %vm2002_vm2, %v4140_v45, %v1999_v9  ;;  %v5102_v9 = vld [vmem:[#allocation2 + $0x180] sm:$0xff] }
0x2baa   :  { %v2008_v2 = vsel %vm2005_vm3, %v2007_v0, %v2003_v3  ;;  %1965 = vmatpush.msra.mxu0 %v5102_v9 }
0x2bab   :  { %v2011_v24 = vmul.f32 %v2008_v2, %v4915_v15 }
0x2c08   :  { %v2014_v5 = vpop.permute.xlu1 %2013 }
0x2c09   :  { %v2016_v18 = vmul.f32 %v2014_v5, %v2008_v2 }
0x2c0b   :  { %2018 = vrot.lane.b32.xlu0 %v2016_v18, %s4328_s24 }
0x2c7d   :  { %v2019_v22 = vpop.permute.xlu0 %2018 }
0x2c7e   :  { %v5067_v37 = vadd.f32 %v2019_v22, %v2011_v24 }
0x2c80   :  { %4141 = vtanh.f32 %v5067_v37 }
0x2c86   :  { %v4142_v26 = vpop.eup %4141 }
0x2c87   :  { %2024 = vrot.lane.b32.xlu2 %v4142_v26, %s4327_s1 }
0x2ce1   :  { %v2025_v15 = vpop.permute.xlu2 %2024 }
0x2ce2   :  { %v2027_v35 = vmul.f32 %v2025_v15, %v2008_v2 }
0x2ce4   :  { %2033 = vrot.lane.b32.xlu1 %v2027_v35, %s4328_s24 }
0x2d56   :  { %v5084_v25 = vpop.permute.xlu1 %2033 }
0x2d57   :  { %3955 = vmatmul.msk.f32.vlgmr.msrb.gmra.mxu3 %vm76_vm1, %v5084_v25 }
0x2dda   :  { %v2054_v29 = vpop.f32.mrf.mxu3 }
0x2ddb   :  { %v2055_v27 = vadd.f32 %v2054_v29, %v1938_v6 }
0x2ddd   :  { %v2057_v60 = vadd.f32 %v5088_v43, %v2055_v27 }
0x2ddf   :  { %4143 = vtanh.f32 %v2057_v60  ;;  %v3956_v63 = vmul.f32 -1.442695, %v2057_v60 }
0x2de1   :  { %4145 = vpow2.f32 %v3956_v63 }
0x2de5   :  { %v4144_v41 = vpop.eup %4143 }
0x2de6   :  { %2080 = vrot.lane.b32.xlu0 %v4144_v41, %s4327_s1  ;;  %v1846_v41 = vpop.f32.mrf.mxu0 }
0x2de7   :  { %v4146_v31 = vpop.eup %4145  ;;  %v5114_v63 = vadd.f32 %v1846_v41, %v4616_v8 }
0x2de8   :  { %v2061_v45 = vadd.f32 1.0, %v4146_v31  ;;  %v5118_v31 = vld [vmem:[#allocation2 + $0x230] sm:$0xff] }
0x2de9   :  { %2116 = vmatpush.msrb.mxu0 %v5118_v31 }
0x2dea   :  { %4147 = vrcp.f32 %v2061_v45  ;;  %v2073_v5 = vand.u32 2147483648, %v2061_v45  ;;  %vm2067_vm6 = vweird.f32 %v2061_v45  ;;  %v2071_v2 = vand.u32 2147483647, %v2061_v45 }
0x2dec   :  { %v2074_v24 = vor.u32 1.1754944e-38, %v2073_v5  ;;  %vm2072_vm8 = vcmp.eq.f32.partialorder %v2071_v2, 8.507059e+37 }
0x2dee   :  { %1946 = vrot.lane.b32.xlu0 %v4977_v19, %s4328_s24 }
0x2df0   :  { %v4148_v19 = vpop.eup %4147 }
0x2df1   :  { %v2063_v13 = vmul.f32 %v4148_v19, %v2061_v45  ;;  %vm2068_vm4 = vweird.f32 %v4148_v19  ;;  %v5120_v45 = vld [vmem:[#allocation2 + $0x220] sm:$0xff] }
0x2df2   :  { %vm2069_vm7 = vmor %vm2067_vm6, %vm2068_vm4  ;;  %2117 = vmatpush.msrb.mxu0 %v5120_v45 }
0x2df3   :  { %v2064_v59 = vsub.f32 1.0, %v2063_v13 }
0x2df5   :  { %v2065_v3 = vmul.f32 %v4148_v19, %v2064_v59 }
0x2df7   :  { %v2066_v0 = vadd.f32 %v4148_v19, %v2065_v3 }
0x2df9   :  { %v2070_v18 = vsel %vm2069_vm7, %v4148_v19, %v2066_v0  ;;  %v5126_v19 = vld [vmem:[#allocation2 + $0x200] sm:$0xff] }
0x2dfa   :  { %v2075_v26 = vsel %vm2072_vm8, %v2074_v24, %v2070_v18  ;;  %v5139_v24 = vld [vmem:[#allocation2 + $0x130] sm:$0xff] }
0x2dfb   :  { %v2078_v6 = vmul.f32 %v2075_v26, %v4932_v48  ;;  %v5123_v48 = vld [vmem:[#allocation2 + $0x210] sm:$0xff] }
0x2dfc   :  { %2118 = vmatpush.msrb.mxu0 %v5123_v48 }
0x2dfe   :  { %2119 = vmatpush.msrb.mxu0 %v5126_v19 }
0x2e58   :  { %v2081_v22 = vpop.permute.xlu0 %2080 }
0x2e59   :  { %v2083_v15 = vmul.f32 %v2081_v22, %v2075_v26  ;;  %v5141_v22 = vld [vmem:[#allocation2 + $0x120] sm:$0xff] }
0x2e5b   :  { %2085 = vrot.lane.b32.xlu2 %v2083_v15, %s4328_s24  ;;  %v5147_v15 = vld [vmem:[#allocation2 + $0x100] sm:$0xff] }
0x2e60   :  { %v1947_v35 = vpop.permute.xlu0 %1946 }
0x2e61   :  { %3952 = vmatmul.msk.f32.vlgmr.msra.gmra.mxu0 %vm76_vm1, %v1947_v35 }
0x2e62   :  { %2394 = vmatpush.msra.mxu0 %v5139_v24 }
0x2e64   :  { %2395 = vmatpush.msra.mxu0 %v5141_v22 }
0x2eb5   :  { %v2086_v29 = vpop.permute.xlu2 %2085 }
0x2eb6   :  { %v5109_v27 = vadd.f32 %v2086_v29, %v2078_v6 }
0x2eb8   :  { %4149 = vtanh.f32 %v5109_v27 }
0x2ebe   :  { %v4150_v60 = vpop.eup %4149 }
0x2ebf   :  { %2091 = vrot.lane.b32.xlu1 %v4150_v60, %s4327_s1 }
0x2ec7   :  { %2163 = vrot.lane.b32.xlu1 %v5114_v63, %s4328_s24 }
0x2f31   :  { %v2092_v13 = vpop.permute.xlu1 %2091 }
0x2f32   :  { %v2094_v59 = vmul.f32 %v2092_v13, %v2075_v26  ;;  %v5144_v26 = vld [vmem:[#allocation2 + $0x110] sm:$0xff] }
0x2f33   :  { %2396 = vmatpush.msra.mxu0 %v5144_v26 }
0x2f34   :  { %2100 = vrot.lane.b32.xlu2 %v2094_v59, %s4328_s24 }
0x2f35   :  { %2397 = vmatpush.msra.mxu0 %v5147_v15 }
0x2f39   :  { %v2164_v3 = vpop.permute.xlu1 %2163 }
0x2f3a   :  { %v2168_v0 = vmul.f32 %v2164_v3, %v4937_v46  ;;  %v2167_v5 = vmul.f32 %v2164_v3, %v4771_v23  ;;  %v2166_v2 = vmul.f32 %v2164_v3, %v4619_v14  ;;  %v2169_v18 = vmul.f32 %v2164_v3, %v5114_v63 }
0x2f3c   :  { %2178 = vrot.lane.b32.xlu1 %v2168_v0, %s4330_s29  ;;  %2176 = vrot.lane.b32.xlu2 %v2167_v5, %s4330_s29 }
0x2f3d   :  { %2174 = vrot.lane.b32.xlu0 %v2166_v2, %s4330_s29 }
0x2f45   :  { %2180 = vrot.lane.b32.xlu0 %v2169_v18, %s4330_s29 }
0x2f8e   :  { %v5151_v35 = vpop.permute.xlu2 %2100 }
0x2f8f   :  { %3957 = vmatmul.msk.f32.vlgmr.msrb.gmra.mxu0 %vm76_vm1, %v5151_v35 }
0x2f90   :  { %2455 = vmatpush.msrb.mxu0 %v5013_v10 }
0x2f92   :  { %2456 = vmatpush.msrb.mxu0 %v5015_v49 }
0x2f94   :  { %2457 = vmatpush.msrb.mxu0 %v5018_v42 }
0x2f96   :  { %v2177_v6 = vpop.permute.xlu2 %2176  ;;  %2458 = vmatpush.msrb.mxu0 %v5021_v20 }
0x2f97   :  { %3964 = vmatmul.msk.f32.vlgmr.msra.gmra.mxu0 %vm76_vm1, %v5084_v25  ;;  %v2189_v29 = vsel %vm414_vm15, %v2177_v6, 0.0 }
0x2f98   :  { %2190 = vadd.xlane.f32.xlu0 %v2189_v29  ;;  %2459 = vmatpush.msrb.mxu0 %v5024_v58  ;;  %v1967_v58 = vpop.f32.mrf.mxu0 }
0x2f9a   :  { %2460 = vmatpush.msrb.mxu0 %v5027_v40 }
0x2f9c   :  { %2461 = vmatpush.msrb.mxu0 %v5030_v51 }
0x2f9e   :  { %2462 = vmatpush.msrb.mxu0 %v5033_v47  ;;  %v5176_v47 = vld [vmem:[#allocation2 + $0x323] ss:$0 sm:$0xff] }
0x2fa0   :  { %2463 = vmatpush.msrb.mxu0 %v5036_v55 }
0x2fa2   :  { %2464 = vmatpush.msrb.mxu0 %v5039_v11 }
0x2fa4   :  { %2465 = vmatpush.msrb.mxu0 %v5042_v17 }
0x2fa6   :  { %2466 = vmatpush.msrb.mxu0 %v5045_v50 }
0x2fa8   :  { %2467 = vmatpush.msrb.mxu0 %v5048_v34 }
0x2faa   :  { %2468 = vmatpush.msrb.mxu0 %v5052_v16 }
0x2fac   :  { %2469 = vmatpush.msrb.mxu0 %v5055_v39 }
0x2fae   :  { %2470 = vmatpush.msrb.mxu0 %v5058_v33  ;;  %v2179_v17 = vpop.permute.xlu1 %2178 }
0x2faf   :  { %v2175_v10 = vpop.permute.xlu0 %2174  ;;  %v2192_v50 = vsel %vm414_vm15, %v2179_v17, 0.0 }
0x2fb0   :  { %v2186_v49 = vsel %vm414_vm15, %v2175_v10, 0.0 }
0x2fb1   :  { %2187 = vadd.xlane.f32.xlu1 %v2186_v49 }
0x2fb7   :  { %v2181_v42 = vpop.permute.xlu0 %2180 }
0x2fb8   :  { %v2195_v20 = vsel %vm414_vm15, %v2181_v42, 0.0 }
0x2fb9   :  { %2196 = vadd.xlane.f32.xlu1 %v2195_v20 }
0x300b   :  { %v2191_v10 = vpop.xlane.xlu0 %2190 }
0x300c   :  { %v2121_v40 = vpop.f32.mrf.mxu0  ;;  %v2199_v20 = vmul.f32 0.17677669, %v2191_v10 }
0x300d   :  { %v2122_v51 = vadd.f32 %v2121_v40, %v1967_v58 }
0x300f   :  { %v2124_v55 = vadd.f32 %v5176_v47, %v2122_v51 }
0x3011   :  { %4151 = vtanh.f32 %v2124_v55  ;;  %v3958_v34 = vmul.f32 -1.442695, %v2124_v55 }
0x3013   :  { %4153 = vpow2.f32 %v3958_v34 }
0x3017   :  { %v4152_v11 = vpop.eup %4151 }
0x3018   :  { %2147 = vrot.lane.b32.xlu2 %v4152_v11, %s4327_s1  ;;  %v2203_v11 = vsel %vm518_vm5, %v2199_v20, -inf }
0x3019   :  { %v4154_v16 = vpop.eup %4153 }
0x301a   :  { %v2128_v39 = vadd.f32 1.0, %v4154_v16 }
0x301c   :  { %4155 = vrcp.f32 %v2128_v39  ;;  %v2140_v59 = vand.u32 2147483648, %v2128_v39  ;;  %vm2134_vm10 = vweird.f32 %v2128_v39  ;;  %v2138_v3 = vand.u32 2147483647, %v2128_v39 }
0x301e   :  { %v2141_v5 = vor.u32 1.1754944e-38, %v2140_v59  ;;  %vm2139_vm12 = vcmp.eq.f32.partialorder %v2138_v3, 8.507059e+37 }
0x3022   :  { %v4156_v33 = vpop.eup %4155 }
0x3023   :  { %v2130_v25 = vmul.f32 %v4156_v33, %v2128_v39  ;;  %vm2135_vm9 = vweird.f32 %v4156_v33 }
0x3024   :  { %vm2136_vm11 = vmor %vm2134_vm10, %vm2135_vm9  ;;  %v2188_v29 = vpop.xlane.xlu1 %2187 }
0x3025   :  { %v2131_v60 = vsub.f32 1.0, %v2130_v25  ;;  %v2198_v42 = vmul.f32 0.17677669, %v2188_v29 }
0x3027   :  { %v2132_v41 = vmul.f32 %v4156_v33, %v2131_v60  ;;  %v2202_v51 = vsel %vm518_vm5, %v2198_v42, -inf }
0x3028   :  { %v2206_v34 = vmax.f32 %v2202_v51, %v2203_v11 }
0x3029   :  { %v2133_v13 = vadd.f32 %v4156_v33, %v2132_v41 }
0x302b   :  { %v2137_v0 = vsel %vm2136_vm11, %v4156_v33, %v2133_v13 }
0x302c   :  { %v5181_v2 = vsel %vm2139_vm12, %v2141_v5, %v2137_v0  ;;  %v2197_v49 = vpop.xlane.xlu1 %2196 }
0x302d   :  { %v2201_v58 = vmul.f32 0.17677669, %v2197_v49 }
0x302f   :  { %v2205_v17 = vsel %vm518_vm5, %v2201_v58, -inf }
0x3041   :  { %2193 = vadd.xlane.f32.xlu2 %v2192_v50 }
0x3072   :  { %v2148_v18 = vpop.permute.xlu2 %2147 }
0x3073   :  { %v2150_v6 = vmul.f32 %v2148_v18, %v5181_v2 }
0x3075   :  { %2152 = vrot.lane.b32.xlu0 %v2150_v6, %s4328_s24 }
0x30b4   :  { %v2194_v40 = vpop.xlane.xlu2 %2193 }
0x30b5   :  { %v2200_v55 = vmul.f32 0.17677669, %v2194_v40 }
0x30b7   :  { %v2204_v50 = vsel %vm518_vm5, %v2200_v55, -inf }
0x30b8   :  { %v2207_v16 = vmax.f32 %v2204_v50, %v2205_v17 }
0x30ba   :  { %v2208_v39 = vmax.f32 %v2206_v34, %v2207_v16 }
0x30bc   :  { %v2209_v33 = vsub.f32 %v2198_v42, %v2208_v39  ;;  %v2210_v25 = vsub.f32 %v2199_v20, %v2208_v39  ;;  %v2211_v60 = vsub.f32 %v2200_v55, %v2208_v39  ;;  %v2212_v41 = vsub.f32 %v2201_v58, %v2208_v39 }
0x30be   :  { %v2213_v13 = vmul.f32 1.442695, %v2209_v33  ;;  %v2215_v59 = vmul.f32 1.442695, %v2210_v25  ;;  %v2217_v3 = vmul.f32 1.442695, %v2211_v60 }
0x30bf   :  { %v2219_v0 = vmul.f32 1.442695, %v2212_v41 }
0x30c0   :  { %4157 = vpow2.f32 %v2213_v13 }
0x30c1   :  { %4159 = vpow2.f32 %v2215_v59 }
0x30c2   :  { %4161 = vpow2.f32 %v2217_v3 }
0x30c3   :  { %4163 = vpow2.f32 %v2219_v0 }
0x30c6   :  { %v4158_v5 = vpop.eup %4157 }
0x30c7   :  { %v4160_v18 = vpop.eup %4159  ;;  %v2221_v6 = vsel %vm518_vm5, %v4158_v5, 0.0 }
0x30c8   :  { %v4162_v29 = vpop.eup %4161  ;;  %v2222_v10 = vsel %vm518_vm5, %v4160_v18, 0.0 }
0x30c9   :  { %v4164_v49 = vpop.eup %4163  ;;  %v2223_v42 = vadd.f32 %v2222_v10, %v2221_v6  ;;  %v2224_v20 = vsel %vm518_vm5, %v4162_v29, 0.0 }
0x30ca   :  { %v2226_v40 = vsel %vm518_vm5, %v4164_v49, 0.0 }
0x30cb   :  { %v2225_v58 = vadd.f32 %v2224_v20, %v2223_v42 }
0x30cd   :  { %v2227_v51 = vadd.f32 %v2226_v40, %v2225_v58 }
0x30cf   :  { %4165 = vrcp.f32 %v2227_v51 }
0x30d5   :  { %v4166_v55 = vpop.eup %4165 }
0x30d6   :  { %v2231_v11 = vmul.f32 %v4166_v55, %v4162_v29  ;;  %v2229_v17 = vmul.f32 %v4166_v55, %v4158_v5  ;;  %v2230_v50 = vmul.f32 %v4166_v55, %v4160_v18  ;;  %v2232_v34 = vmul.f32 %v4166_v55, %v4164_v49 }
0x30d7   :  { %v2145_v18 = vmul.f32 %v5181_v2, %v4973_v4 }
0x30d8   :  { %v2233_v16 = vmul.f32 %v2229_v17, %v4619_v14  ;;  %v2234_v39 = vmul.f32 %v2230_v50, %v4771_v23  ;;  %v2235_v33 = vmul.f32 %v2231_v11, %v4937_v46  ;;  %v2236_v25 = vmul.f32 %v2232_v34, %v5114_v63  ;;  %v2287_v34 = vld [vmem:[#allocation2 + $0x310] sm:$0xff] }
0x30d9   :  { %2306 = vmatpush.msra.mxu2 %v2287_v34  ;;  %2811 = vmatpush.msrb.mxu1 %v2287_v34  ;;  %v2399_v34 = vpop.f32.mrf.mxu0 }
0x30da   :  { %v2237_v60 = vsel %vm1290_vm13, %v2233_v16, 0.0  ;;  %v2238_v41 = vsel %vm1290_vm13, %v2234_v39, 0.0  ;;  %v2240_v59 = vsel %vm1290_vm13, %v2235_v33, 0.0  ;;  %v2242_v0 = vsel %vm1290_vm13, %v2236_v25, 0.0  ;;  %v2288_v16 = vld [vmem:[#allocation2 + $0x318] sm:$0xff]  ;;  %v2285_v39 = vld [vmem:[#allocation2 + $0x300] sm:$0xff] }
0x30db   :  { %v2239_v13 = vadd.f32 %v2238_v41, %v2237_v60  ;;  %2326 = vmatpush.msra.mxu3 %v2288_v16  ;;  %v2286_v33 = vld [vmem:[#allocation2 + $0x308] sm:$0xff]  ;;  %v2283_v25 = vld [vmem:[#allocation2 + $0x2f0] sm:$0xff]  ;;  %v2284_v60 = vld [vmem:[#allocation2 + $0x2f8] sm:$0xff]  ;;  %2307 = vmatpush.msra.mxu2 %v2285_v39 }
0x30dc   :  { %2812 = vmatpush.msrb.mxu1 %v2285_v39 }
0x30dd   :  { %v2241_v3 = vadd.f32 %v2240_v59, %v2239_v13  ;;  %2327 = vmatpush.msra.mxu3 %v2286_v33  ;;  %v2281_v59 = vld [vmem:[#allocation2 + $0x2e0] sm:$0xff]  ;;  %2308 = vmatpush.msra.mxu2 %v2283_v25 }
0x30de   :  { %2813 = vmatpush.msrb.mxu1 %v2283_v25 }
0x30df   :  { %v2243_v5 = vadd.f32 %v2242_v0, %v2241_v3  ;;  %v2282_v3 = vld [vmem:[#allocation2 + $0x2e8] sm:$0xff]  ;;  %2328 = vmatpush.msra.mxu3 %v2284_v60  ;;  %2309 = vmatpush.msra.mxu2 %v2281_v59 }
0x30e0   :  { %2814 = vmatpush.msrb.mxu1 %v2281_v59 }
0x30e1   :  { %2245 = vrot.lane.b32.xlu1 %v2243_v5, %s4328_s24  ;;  %2329 = vmatpush.msra.mxu3 %v2282_v3 }
0x30e2   :  { %2418 = vmatpush.msrb.mxu2 %v4989_v52 }
0x30e3   :  { %2447 = vmatpush.msrb.mxu3 %v5094_v28 }
0x30e4   :  { %2419 = vmatpush.msrb.mxu2 %v4991_v21 }
0x30e5   :  { %2448 = vmatpush.msrb.mxu3 %v5097_v57 }
0x30e6   :  { %2420 = vmatpush.msrb.mxu2 %v4994_v54  ;;  %v5228_v54 = vld [vmem:[#allocation2 + $0x140] sm:$0xff] }
0x30e7   :  { %v2153_v6 = vpop.permute.xlu0 %2152  ;;  %2449 = vmatpush.msrb.mxu3 %v5099_v1 }
0x30e8   :  { %v5204_v29 = vadd.f32 %v2153_v6, %v2145_v18  ;;  %2421 = vmatpush.msrb.mxu2 %v5228_v54 }
0x30e9   :  { %2450 = vmatpush.msrb.mxu3 %v5102_v9 }
0x30ea   :  { %4167 = vtanh.f32 %v5204_v29 }
0x30f0   :  { %v4168_v10 = vpop.eup %4167 }
0x30f1   :  { %2158 = vrot.lane.b32.xlu2 %v4168_v10, %s4327_s1 }
0x314b   :  { %v2159_v49 = vpop.permute.xlu2 %2158 }
0x314c   :  { %v5209_v42 = vmul.f32 %v2159_v49, %v5181_v2 }
0x3153   :  { %v2246_v20 = vpop.permute.xlu1 %2245 }
0x3154   :  { %v2248_v58 = vadd.f32 %v2246_v20, %v5209_v42 }
0x3156   :  { %2250 = vrot.lane.b32.xlu0 %v2248_v58, %s4328_s24 }
0x31c8   :  { %v2251_v40 = vpop.permute.xlu0 %2250 }
0x31c9   :  { %v2253_v4 = vsel %vm414_vm15, %v2251_v40, 0.0 }
0x31ca   :  { %2254 = vadd.xlane.f32.xlu2 %v2253_v4 }
0x323d   :  { %v2255_v51 = vpop.xlane.xlu2 %2254 }
0x323e   :  { %v2256_v55 = vmul.f32 %v2255_v51, %v4545_v56 }
0x3240   :  { %v2257_v11 = vsub.f32 %v2248_v58, %v2256_v55 }
0x3242   :  { %v2258_v17 = vmul.f32 %v2257_v11, %v2257_v11 }
0x3244   :  { %2260 = vrot.lane.b32.xlu0 %v2258_v17, %s4328_s24 }
0x32b6   :  { %v2261_v50 = vpop.permute.xlu0 %2260 }
0x32b7   :  { %v2263_v2 = vsel %vm414_vm15, %v2261_v50, 0.0 }
0x32b8   :  { %2264 = vadd.xlane.f32.xlu1 %v2263_v2 }
0x332b   :  { %v2265_v41 = vpop.xlane.xlu1 %2264 }
0x332c   :  { %v2266_v13 = vmul.f32 %v2265_v41, %v4545_v56 }
0x332e   :  { %v2267_v0 = vadd.f32 1e-05, %v2266_v13 }
0x3330   :  { %4169 = vrsqrt.f32 %v2267_v0  ;;  %vm2274_vm0 = vweird.f32 %v2267_v0 }
0x3336   :  { %v4170_v5 = vpop.eup %4169 }
0x3337   :  { %v2269_v18 = vmul.f32 %v4170_v5, %v2267_v0  ;;  %vm2275_vm14 = vweird.f32 %v4170_v5 }
0x3338   :  { %vm2276_vm2 = vmor %vm2274_vm0, %vm2275_vm14 }
0x3339   :  { %v2270_v6 = vmul.f32 %v4170_v5, %v2269_v18 }
0x333b   :  { %v2271_v10 = vmul.f32 0.5, %v2270_v6 }
0x333d   :  { %v2272_v49 = vsub.f32 1.5, %v2271_v10 }
0x333f   :  { %v2273_v52 = vmul.f32 %v4170_v5, %v2272_v49 }
0x3341   :  { %v2277_v28 = vsel %vm2276_vm2, %v4170_v5, %v2273_v52 }
0x3342   :  { %v2278_v20 = vmul.f32 %v2277_v28, %v2257_v11 }
0x3344   :  { %v2279_v21 = vmul.f32 %v2278_v20, %v4564_v61 }
0x3346   :  { %v2280_v57 = vadd.f32 %v2279_v21, %v4566_v30 }
0x3348   :  { %2290 = vrot.lane.b32.xlu0 %v2280_v57, %s4328_s24 }
0x33ba   :  { %v2291_v1 = vpop.permute.xlu0 %2290 }
0x33bb   :  { %3959 = vmatmul.msk.f32.vlgmr.msra.gmra.mxu2 %vm76_vm1, %v2291_v1  ;;  %3960 = vmatmul.msk.f32.vlgmr.msra.gmra.mxu3 %vm76_vm1, %v2291_v1 }
0x33bc   :  { %2534 = vmatpush.msra.mxu2 %v5071_v7  ;;  %2601 = vmatpush.msra.mxu3 %v5118_v31 }
0x33be   :  { %2535 = vmatpush.msra.mxu2 %v5073_v62  ;;  %2602 = vmatpush.msra.mxu3 %v5120_v45  ;;  %v3962_v62 = vld [vmem:[%s5713_s2 + $0x8] sm:$0x3] }
0x33c0   :  { %2536 = vmatpush.msra.mxu2 %v5076_v32  ;;  %2603 = vmatpush.msra.mxu3 %v5123_v48 }
0x33c2   :  { %2537 = vmatpush.msra.mxu2 %v5079_v12  ;;  %2604 = vmatpush.msra.mxu3 %v5126_v19 }
0x33c3   :  { %3965 = vmatmul.msk.f32.vlgmr.msrb.gmra.mxu2 %vm76_vm1, %v5151_v35 }
0x33c4   :  { %2831 = vmatpush.msrb.mxu2 %v2288_v16 }
0x33c6   :  { %2832 = vmatpush.msrb.mxu2 %v2286_v33 }
0x33c8   :  { %2833 = vmatpush.msrb.mxu2 %v2284_v60 }
0x33ca   :  { %2834 = vmatpush.msrb.mxu2 %v2282_v3 }
0x343e   :  { %v2311_v7 = vpop.f32.mrf.mxu2 }
0x343f   :  { %v2312_v32 = vadd.f32 %v2311_v7, %v4586_v44 }
0x3441   :  { %3961 = vst [vmem:[%s5715_s4 + $0x8] sm:$0x3] %v2312_v32  ;;  %v2338_v12 = vadd.f32 %v3962_v62, %v2312_v32 }
0x3443   :  { %v2339_v9 = vsel %vm518_vm5, %v2338_v12, -inf }
0x3444   :  { %2340 = vmax.xlane.f32.xlu0 %v2339_v9 }
0x34b7   :  { %v2341_v31 = vpop.xlane.xlu0 %2340 }
0x34b8   :  { %vm2342_vm3 = vcmp.ge.f32.partialorder %v2338_v12, %v2341_v31  ;;  %v2423_v31 = vpop.f32.mrf.mxu2 }
0x34b9   :  { %v2343_v45 = vsel %vm2342_vm3, %v4433_v36, 128 }
0x34ba   :  { %v2344_v48 = vsel %vm518_vm5, %v2343_v45, 2147483647 }
0x34bb   :  { %v2346_v19 = vshra.s32 %v2344_v48, 16  ;;  %v2345_v58 = vand.u32 65535, %v2344_v48 }
0x34bd   :  { %v2348_v35 = vcvt.s32.f32 %v2346_v19  ;;  %v2347_v4 = vcvt.s32.f32 %v2345_v58 }
0x34bf   :  { %2349 = vmin.xlane.f32.xlu2 %v2348_v35 }
0x3532   :  { %v2350_v40 = vpop.xlane.xlu2 %2349 }
0x3533   :  { %vm2351_vm4 = vcmp.eq.f32.partialorder %v2348_v35, %v2350_v40  ;;  %v2356_v55 = vcvt.f32.s32 %v2350_v40 }
0x3534   :  { %v2352_v51 = vsel %vm2351_vm4, %v2347_v4, inf }
0x3535   :  { %2353 = vmin.xlane.f32.xlu1 %v2352_v51  ;;  %v2357_v17 = vshll.u32 %v2356_v55, 16 }
0x35a8   :  { %v2354_v11 = vpop.xlane.xlu1 %2353 }
0x35a9   :  { %v2355_v50 = vcvt.f32.s32 %v2354_v11 }
0x35ab   :  { %v2358_v2 = vadd.s32 %v2357_v17, %v2355_v50 }
0x35ad   :  { %vm2359_vm6 = vcmp.eq.s32.totalorder %v4433_v36, %v2358_v2 }
0x35ae   :  { %3967 = vmatmul.msk.f32.vlgmr.msrb.gmra.mxu0 %vm2359_vm6, %v4326_v38 }
0x362b   :  { %v2472_v16 = vpop.f32.mrf.mxu0 }
0x362c   :  { %v2473_v39 = vadd.f32 %v2472_v16, %v2399_v34 }
0x362e   :  { %v2475_v33 = vadd.f32 %v2473_v39, %v4461_v53 }
0x3630   :  { %4171 = vtanh.f32 %v2475_v33  ;;  %v3968_v60 = vmul.f32 -1.442695, %v2475_v33 }
0x3632   :  { %4173 = vpow2.f32 %v3968_v60 }
0x3636   :  { %v4172_v25 = vpop.eup %4171 }
0x3637   :  { %2498 = vrot.lane.b32.xlu2 %v4172_v25, %s4327_s1 }
0x3638   :  { %v4174_v41 = vpop.eup %4173 }
0x3639   :  { %v2479_v13 = vadd.f32 1.0, %v4174_v41 }
0x363b   :  { %4175 = vrcp.f32 %v2479_v13  ;;  %v2491_v6 = vand.u32 2147483648, %v2479_v13  ;;  %vm2485_vm8 = vweird.f32 %v2479_v13  ;;  %v2489_v10 = vand.u32 2147483647, %v2479_v13 }
0x363d   :  { %v2492_v52 = vor.u32 1.1754944e-38, %v2491_v6  ;;  %vm2490_vm10 = vcmp.eq.f32.partialorder %v2489_v10, 8.507059e+37 }
0x3641   :  { %v4176_v59 = vpop.eup %4175 }
0x3642   :  { %v2481_v3 = vmul.f32 %v4176_v59, %v2479_v13  ;;  %vm2486_vm7 = vweird.f32 %v4176_v59 }
0x3643   :  { %vm2487_vm9 = vmor %vm2485_vm8, %vm2486_vm7 }
0x3644   :  { %v2482_v0 = vsub.f32 1.0, %v2481_v3 }
0x3646   :  { %v2483_v5 = vmul.f32 %v4176_v59, %v2482_v0 }
0x3648   :  { %v2484_v18 = vadd.f32 %v4176_v59, %v2483_v5 }
0x364a   :  { %v2488_v49 = vsel %vm2487_vm9, %v4176_v59, %v2484_v18  ;;  %v2331_v59 = vpop.f32.mrf.mxu3 }
0x364b   :  { %v2493_v20 = vsel %vm2490_vm10, %v2492_v52, %v2488_v49  ;;  %v5284_v3 = vadd.f32 %v2331_v59, %v4616_v8 }
0x364c   :  { %v2496_v57 = vmul.f32 %v2493_v20, %v5067_v37 }
0x3691   :  { %v2499_v28 = vpop.permute.xlu2 %2498 }
0x3692   :  { %v2501_v21 = vmul.f32 %v2499_v28, %v2493_v20 }
0x3694   :  { %2503 = vrot.lane.b32.xlu1 %v2501_v21, %s4328_s24 }
0x3706   :  { %v2504_v1 = vpop.permute.xlu1 %2503 }
0x3707   :  { %v5259_v7 = vadd.f32 %v2504_v1, %v2496_v57 }
0x3709   :  { %4177 = vtanh.f32 %v5259_v7 }
0x370f   :  { %v4178_v62 = vpop.eup %4177 }
0x3710   :  { %2509 = vrot.lane.b32.xlu0 %v4178_v62, %s4327_s1 }
0x3782   :  { %v2510_v32 = vpop.permute.xlu0 %2509 }
0x3783   :  { %v2512_v12 = vmul.f32 %v2510_v32, %v2493_v20 }
0x3785   :  { %2518 = vrot.lane.b32.xlu2 %v2512_v12, %s4328_s24 }
0x37df   :  { %v5264_v9 = vpop.permute.xlu2 %2518 }
0x37e0   :  { %3969 = vmatmul.msk.f32.vlgmr.msra.gmra.mxu2 %vm76_vm1, %v5264_v9 }
0x3863   :  { %v2539_v45 = vpop.f32.mrf.mxu2 }
0x3864   :  { %v2540_v37 = vadd.f32 %v2539_v45, %v2423_v31 }
0x3866   :  { %v2542_v48 = vadd.f32 %v5088_v43, %v2540_v37 }
0x3868   :  { %4179 = vtanh.f32 %v2542_v48  ;;  %v3970_v35 = vmul.f32 -1.442695, %v2542_v48 }
0x386a   :  { %4181 = vpow2.f32 %v3970_v35 }
0x386e   :  { %v4180_v19 = vpop.eup %4179 }
0x386f   :  { %2565 = vrot.lane.b32.xlu1 %v4180_v19, %s4327_s1 }
0x3870   :  { %v4182_v58 = vpop.eup %4181 }
0x3871   :  { %v2546_v40 = vadd.f32 1.0, %v4182_v58 }
0x3873   :  { %4183 = vrcp.f32 %v2546_v40  ;;  %v2558_v50 = vand.u32 2147483648, %v2546_v40  ;;  %vm2552_vm12 = vweird.f32 %v2546_v40  ;;  %v2556_v43 = vand.u32 2147483647, %v2546_v40 }
0x3875   :  { %v2559_v34 = vor.u32 1.1754944e-38, %v2558_v50  ;;  %vm2557_vm0 = vcmp.eq.f32.partialorder %v2556_v43, 8.507059e+37 }
0x3877   :  { %2431 = vrot.lane.b32.xlu1 %v5209_v42, %s4328_s24 }
0x3879   :  { %v4184_v4 = vpop.eup %4183 }
0x387a   :  { %v2548_v51 = vmul.f32 %v4184_v4, %v2546_v40  ;;  %vm2553_vm11 = vweird.f32 %v4184_v4 }
0x387b   :  { %vm2554_vm14 = vmor %vm2552_vm12, %vm2553_vm11 }
0x387c   :  { %v2549_v55 = vsub.f32 1.0, %v2548_v51 }
0x387e   :  { %v2550_v11 = vmul.f32 %v4184_v4, %v2549_v55 }
0x3880   :  { %v2551_v17 = vadd.f32 %v4184_v4, %v2550_v11 }
0x3882   :  { %v2555_v2 = vsel %vm2554_vm14, %v4184_v4, %v2551_v17 }
0x3883   :  { %v2560_v42 = vsel %vm2557_vm0, %v2559_v34, %v2555_v2 }
0x3884   :  { %v2563_v25 = vmul.f32 %v2560_v42, %v5109_v27 }
0x38e1   :  { %v2566_v16 = vpop.permute.xlu1 %2565 }
0x38e2   :  { %v2568_v39 = vmul.f32 %v2566_v16, %v2560_v42 }
0x38e4   :  { %2570 = vrot.lane.b32.xlu0 %v2568_v39, %s4328_s24 }
0x38e9   :  { %v2432_v33 = vpop.permute.xlu1 %2431 }
0x38ea   :  { %3966 = vmatmul.msk.f32.vlgmr.msrb.gmra.mxu3 %vm76_vm1, %v2432_v33 }
0x38eb   :  { %2899 = vmatpush.msrb.mxu3 %v5139_v24 }
0x38ed   :  { %2900 = vmatpush.msrb.mxu3 %v5141_v22 }
0x38ef   :  { %2901 = vmatpush.msrb.mxu3 %v5144_v26 }
0x38f1   :  { %2902 = vmatpush.msrb.mxu3 %v5147_v15 }
0x3956   :  { %v2571_v60 = vpop.permute.xlu0 %2570 }
0x3957   :  { %v5279_v41 = vadd.f32 %v2571_v60, %v2563_v25 }
0x3959   :  { %4185 = vtanh.f32 %v5279_v41 }
0x395f   :  { %v4186_v13 = vpop.eup %4185 }
0x3960   :  { %2576 = vrot.lane.b32.xlu2 %v4186_v13, %s4327_s1 }
0x3968   :  { %2648 = vrot.lane.b32.xlu2 %v5284_v3, %s4328_s24 }
0x396d   :  { %v2452_v62 = vpop.f32.mrf.mxu3 }
0x39ba   :  { %v2577_v24 = vpop.permute.xlu2 %2576 }
0x39bb   :  { %v2579_v22 = vmul.f32 %v2577_v24, %v2560_v42 }
0x39bd   :  { %2585 = vrot.lane.b32.xlu0 %v2579_v22, %s4328_s24 }
0x39c2   :  { %v2649_v27 = vpop.permute.xlu2 %2648 }
0x39c3   :  { %v2655_v26 = vmul.f32 %v2649_v27, %v5284_v3  ;;  %v2652_v15 = vmul.f32 %v2649_v27, %v4771_v23  ;;  %v2651_v0 = vmul.f32 %v2649_v27, %v4619_v14  ;;  %v2654_v5 = vmul.f32 %v2649_v27, %v5114_v63 }
0x39c4   :  { %v2653_v18 = vmul.f32 %v2649_v27, %v4937_v46 }
0x39c5   :  { %2669 = vrot.lane.b32.xlu0 %v2655_v26, %s4330_s29  ;;  %2663 = vrot.lane.b32.xlu2 %v2652_v15, %s4330_s29 }
0x39c6   :  { %2661 = vrot.lane.b32.xlu1 %v2651_v0, %s4330_s29 }
0x39cd   :  { %2667 = vrot.lane.b32.xlu0 %v2654_v5, %s4330_s29 }
0x39ce   :  { %2665 = vrot.lane.b32.xlu1 %v2653_v18, %s4330_s29 }
0x3a1f   :  { %v2664_v45 = vpop.permute.xlu2 %2663 }
0x3a20   :  { %v2679_v37 = vsel %vm414_vm15, %v2664_v45, 0.0 }
0x3a2f   :  { %v5299_v6 = vpop.permute.xlu0 %2585 }
0x3a30   :  { %3971 = vmatmul.msk.f32.vlgmr.msra.gmra.mxu3 %vm76_vm1, %v5299_v6 }
0x3a37   :  { %v2670_v10 = vpop.permute.xlu0 %2669 }
0x3a38   :  { %v2662_v49 = vpop.permute.xlu1 %2661  ;;  %3978 = vmatmul.msk.f32.vlgmr.msrb.gmra.mxu3 %vm76_vm1, %v5264_v9  ;;  %v2688_v52 = vsel %vm414_vm15, %v2670_v10, 0.0 }
0x3a39   :  { %v2676_v28 = vsel %vm414_vm15, %v2662_v49, 0.0  ;;  %2689 = vadd.xlane.f32.xlu0 %v2688_v52 }
0x3a3a   :  { %2677 = vadd.xlane.f32.xlu1 %v2676_v28 }
0x3a3f   :  { %v2668_v20 = vpop.permute.xlu0 %2667 }
0x3a40   :  { %v2666_v21 = vpop.permute.xlu1 %2665  ;;  %v2685_v57 = vsel %vm414_vm15, %v2668_v20, 0.0 }
0x3a41   :  { %v2682_v1 = vsel %vm414_vm15, %v2666_v21, 0.0  ;;  %2686 = vadd.xlane.f32.xlu0 %v2685_v57 }
0x3a42   :  { %2683 = vadd.xlane.f32.xlu1 %v2682_v1 }
0x3aac   :  { %v2690_v16 = vpop.xlane.xlu0 %2689 }
0x3aad   :  { %v2678_v42 = vpop.xlane.xlu1 %2677  ;;  %v2695_v25 = vmul.f32 0.17677669, %v2690_v16 }
0x3aae   :  { %v2691_v60 = vmul.f32 0.17677669, %v2678_v42 }
0x3aaf   :  { %v2700_v24 = vsel %vm518_vm5, %v2695_v25, -inf }
0x3ab0   :  { %v2696_v22 = vsel %vm518_vm5, %v2691_v60, -inf }
0x3ab1   :  { %v2701_v5 = vmax.f32 %v2696_v22, %v2700_v24 }
0x3ab3   :  { %v2606_v32 = vpop.f32.mrf.mxu3 }
0x3ab4   :  { %v2607_v12 = vadd.f32 %v2606_v32, %v2452_v62  ;;  %v2687_v39 = vpop.xlane.xlu0 %2686 }
0x3ab5   :  { %v2684_v33 = vpop.xlane.xlu1 %2683  ;;  %v2694_v13 = vmul.f32 0.17677669, %v2687_v39 }
0x3ab6   :  { %v2609_v31 = vadd.f32 %v5176_v47, %v2607_v12  ;;  %v2693_v59 = vmul.f32 0.17677669, %v2684_v33 }
0x3ab7   :  { %v2699_v26 = vsel %vm518_vm5, %v2694_v13, -inf }
0x3ab8   :  { %4187 = vtanh.f32 %v2609_v31  ;;  %v3972_v48 = vmul.f32 -1.442695, %v2609_v31  ;;  %v2698_v15 = vsel %vm518_vm5, %v2693_v59, -inf }
0x3ab9   :  { %v2703_v10 = vmax.f32 %v2698_v15, %v2699_v26 }
0x3aba   :  { %4189 = vpow2.f32 %v3972_v48 }
0x3abe   :  { %v4188_v9 = vpop.eup %4187 }
0x3abf   :  { %2632 = vrot.lane.b32.xlu2 %v4188_v9, %s4327_s1 }
0x3ac0   :  { %v4190_v19 = vpop.eup %4189 }
0x3ac1   :  { %v2613_v35 = vadd.f32 1.0, %v4190_v19 }
0x3ac3   :  { %4191 = vrcp.f32 %v2613_v35  ;;  %v2625_v47 = vand.u32 2147483648, %v2613_v35  ;;  %vm2619_vm3 = vweird.f32 %v2613_v35  ;;  %v2623_v11 = vand.u32 2147483647, %v2613_v35 }
0x3ac5   :  { %v2626_v50 = vor.u32 1.1754944e-38, %v2625_v47  ;;  %vm2624_vm6 = vcmp.eq.f32.partialorder %v2623_v11, 8.507059e+37 }
0x3ac9   :  { %v4192_v58 = vpop.eup %4191 }
0x3aca   :  { %v2615_v40 = vmul.f32 %v4192_v58, %v2613_v35  ;;  %vm2620_vm2 = vweird.f32 %v4192_v58 }
0x3acb   :  { %vm2621_vm4 = vmor %vm2619_vm3, %vm2620_vm2 }
0x3acc   :  { %v2616_v4 = vsub.f32 1.0, %v2615_v40 }
0x3ace   :  { %v2617_v51 = vmul.f32 %v4192_v58, %v2616_v4 }
0x3ad0   :  { %v2618_v55 = vadd.f32 %v4192_v58, %v2617_v51 }
0x3ad2   :  { %v2622_v17 = vsel %vm2621_vm4, %v4192_v58, %v2618_v55 }
0x3ad3   :  { %v5312_v43 = vsel %vm2624_vm6, %v2626_v50, %v2622_v17 }
0x3ad4   :  { %v2630_v50 = vmul.f32 %v5312_v43, %v5204_v29 }
0x3ae8   :  { %2680 = vadd.xlane.f32.xlu2 %v2679_v37 }
0x3b19   :  { %v2633_v2 = vpop.permute.xlu2 %2632 }
0x3b1a   :  { %v2635_v34 = vmul.f32 %v2633_v2, %v5312_v43 }
0x3b1c   :  { %2637 = vrot.lane.b32.xlu2 %v2635_v34, %s4328_s24 }
0x3b5b   :  { %v2681_v27 = vpop.xlane.xlu2 %2680 }
0x3b5c   :  { %v2692_v0 = vmul.f32 0.17677669, %v2681_v27 }
0x3b5e   :  { %v2697_v18 = vsel %vm518_vm5, %v2692_v0, -inf }
0x3b5f   :  { %v2702_v49 = vmax.f32 %v2701_v5, %v2697_v18 }
0x3b61   :  { %v2704_v52 = vmax.f32 %v2702_v49, %v2703_v10 }
0x3b63   :  { %v2705_v28 = vsub.f32 %v2691_v60, %v2704_v52  ;;  %v2706_v20 = vsub.f32 %v2692_v0, %v2704_v52  ;;  %v2707_v21 = vsub.f32 %v2693_v59, %v2704_v52  ;;  %v2708_v57 = vsub.f32 %v2694_v13, %v2704_v52 }
0x3b64   :  { %v2709_v1 = vsub.f32 %v2695_v25, %v2704_v52 }
0x3b65   :  { %v2710_v62 = vmul.f32 1.442695, %v2705_v28  ;;  %v2712_v32 = vmul.f32 1.442695, %v2706_v20  ;;  %v2714_v12 = vmul.f32 1.442695, %v2707_v21 }
0x3b66   :  { %v2716_v31 = vmul.f32 1.442695, %v2708_v57  ;;  %v2718_v9 = vmul.f32 1.442695, %v2709_v1 }
0x3b67   :  { %4193 = vpow2.f32 %v2710_v62 }
0x3b68   :  { %4195 = vpow2.f32 %v2712_v32 }
0x3b69   :  { %4197 = vpow2.f32 %v2714_v12 }
0x3b6a   :  { %4199 = vpow2.f32 %v2716_v31 }
0x3b6b   :  { %4201 = vpow2.f32 %v2718_v9 }
0x3b6d   :  { %v4194_v45 = vpop.eup %4193 }
0x3b6e   :  { %v4196_v37 = vpop.eup %4195  ;;  %v2720_v48 = vsel %vm518_vm5, %v4194_v45, 0.0 }
0x3b6f   :  { %v4198_v19 = vpop.eup %4197  ;;  %v2721_v35 = vsel %vm518_vm5, %v4196_v37, 0.0 }
0x3b70   :  { %v4200_v58 = vpop.eup %4199  ;;  %v2722_v40 = vadd.f32 %v2721_v35, %v2720_v48  ;;  %v2723_v4 = vsel %vm518_vm5, %v4198_v19, 0.0 }
0x3b71   :  { %v4202_v51 = vpop.eup %4201  ;;  %v2725_v47 = vsel %vm518_vm5, %v4200_v58, 0.0 }
0x3b72   :  { %v2724_v55 = vadd.f32 %v2723_v4, %v2722_v40  ;;  %v2727_v17 = vsel %vm518_vm5, %v4202_v51, 0.0 }
0x3b74   :  { %v2726_v11 = vadd.f32 %v2725_v47, %v2724_v55 }
0x3b76   :  { %v2728_v2 = vadd.f32 %v2727_v17, %v2726_v11  ;;  %v2638_v34 = vpop.permute.xlu2 %2637 }
0x3b77   :  { %v5328_v16 = vadd.f32 %v2638_v34, %v2630_v50 }
0x3b78   :  { %4203 = vrcp.f32 %v2728_v2 }
0x3b79   :  { %4205 = vtanh.f32 %v5328_v16 }
0x3b7e   :  { %v4204_v42 = vpop.eup %4203 }
0x3b7f   :  { %v4206_v39 = vpop.eup %4205  ;;  %v2731_v33 = vmul.f32 %v4204_v42, %v4196_v37  ;;  %v2730_v25 = vmul.f32 %v4204_v42, %v4194_v45  ;;  %v2732_v60 = vmul.f32 %v4204_v42, %v4198_v19  ;;  %v2733_v13 = vmul.f32 %v4204_v42, %v4200_v58 }
0x3b80   :  { %2643 = vrot.lane.b32.xlu1 %v4206_v39, %s4327_s1  ;;  %v2734_v24 = vmul.f32 %v4204_v42, %v4202_v51  ;;  %v5356_v42 = vld [vmem:[#allocation2 + $0x170] sm:$0xff]  ;;  %v5358_v39 = vld [vmem:[#allocation2 + $0x160] sm:$0xff] }
0x3b81   :  { %v2736_v59 = vmul.f32 %v2731_v33, %v4771_v23  ;;  %v2735_v29 = vmul.f32 %v2730_v25, %v4619_v14  ;;  %v2737_v22 = vmul.f32 %v2732_v60, %v4937_v46  ;;  %v2738_v27 = vmul.f32 %v2733_v13, %v5114_v63  ;;  %2923 = vmatpush.msra.mxu1 %v5356_v42  ;;  %v5361_v33 = vld [vmem:[#allocation2 + $0x150] sm:$0xff]  ;;  %v3976_v13 = vld [vmem:[%s5713_s2 + $0xa] sm:$0x3] }
0x3b82   :  { %v2739_v5 = vmul.f32 %v2734_v24, %v5284_v3 }
0x3b83   :  { %v2740_v26 = vsel %vm1290_vm13, %v2735_v29, 0.0  ;;  %v2741_v15 = vsel %vm1290_vm13, %v2736_v59, 0.0  ;;  %v2743_v18 = vsel %vm1290_vm13, %v2737_v22, 0.0  ;;  %v2745_v49 = vsel %vm1290_vm13, %v2738_v27, 0.0  ;;  %2924 = vmatpush.msra.mxu1 %v5358_v39 }
0x3b84   :  { %v2742_v0 = vadd.f32 %v2741_v15, %v2740_v26  ;;  %v2747_v28 = vsel %vm1290_vm13, %v2739_v5, 0.0  ;;  %v5380_v15 = vld [vmem:[#allocation2 + $0xf0] sm:$0xff] }
0x3b85   :  { %2925 = vmatpush.msra.mxu1 %v5361_v33  ;;  %2960 = vmatpush.msra.mxu3 %v5380_v15  ;;  %v5385_v5 = vld [vmem:[#allocation2 + $0xd0] sm:$0xff] }
0x3b86   :  { %v2744_v10 = vadd.f32 %v2743_v18, %v2742_v0  ;;  %v5382_v0 = vld [vmem:[#allocation2 + $0xe0] sm:$0xff] }
0x3b87   :  { %2926 = vmatpush.msra.mxu1 %v5228_v54  ;;  %2961 = vmatpush.msra.mxu3 %v5382_v0  ;;  %v5388_v18 = vld [vmem:[#allocation2 + $0xc0] sm:$0xff] }
0x3b88   :  { %v2746_v52 = vadd.f32 %v2745_v49, %v2744_v10  ;;  %v5391_v10 = vld [vmem:[#allocation2 + $0xb0] sm:$0xff]  ;;  %v5394_v49 = vld [vmem:[#allocation2 + $0xa0] sm:$0xff] }
0x3b89   :  { %2962 = vmatpush.msra.mxu3 %v5385_v5 }
0x3b8a   :  { %v2748_v20 = vadd.f32 %v2747_v28, %v2746_v52  ;;  %v5397_v52 = vld [vmem:[#allocation2 + $0x90] sm:$0xff]  ;;  %v5400_v28 = vld [vmem:[#allocation2 + $0x80] sm:$0xff] }
0x3b8b   :  { %2963 = vmatpush.msra.mxu3 %v5388_v18 }
0x3b8c   :  { %2750 = vrot.lane.b32.xlu0 %v2748_v20, %s4328_s24  ;;  %v5403_v20 = vld [vmem:[#allocation2 + $0x70] sm:$0xff] }
0x3b8d   :  { %2964 = vmatpush.msra.mxu3 %v5391_v10 }
0x3b8f   :  { %2965 = vmatpush.msra.mxu3 %v5394_v49 }
0x3b91   :  { %2966 = vmatpush.msra.mxu3 %v5397_v52 }
0x3b93   :  { %2967 = vmatpush.msra.mxu3 %v5400_v28 }
0x3b95   :  { %2968 = vmatpush.msra.mxu3 %v5403_v20 }
0x3bf2   :  { %v2644_v21 = vpop.permute.xlu1 %2643 }
0x3bf3   :  { %v5344_v57 = vmul.f32 %v2644_v21, %v5312_v43  ;;  %v5406_v21 = vld [vmem:[#allocation2 + $0x60] sm:$0xff] }
0x3bf4   :  { %2969 = vmatpush.msra.mxu3 %v5406_v21 }
0x3bfe   :  { %v2751_v1 = vpop.permute.xlu0 %2750 }
0x3bff   :  { %v2753_v62 = vadd.f32 %v2751_v1, %v5344_v57  ;;  %v5409_v1 = vld [vmem:[#allocation2 + $0x50] sm:$0xff] }
0x3c00   :  { %2970 = vmatpush.msra.mxu3 %v5409_v1 }
0x3c01   :  { %2755 = vrot.lane.b32.xlu2 %v2753_v62, %s4328_s24 }
0x3c5b   :  { %v2756_v32 = vpop.permute.xlu2 %2755 }
0x3c5c   :  { %v2758_v12 = vsel %vm414_vm15, %v2756_v32, 0.0  ;;  %v5415_v32 = vld [vmem:[#allocation2 + $0x30] sm:$0xff] }
0x3c5d   :  { %2759 = vadd.xlane.f32.xlu0 %v2758_v12 }
0x3cd0   :  { %v2760_v31 = vpop.xlane.xlu0 %2759 }
0x3cd1   :  { %v2761_v9 = vmul.f32 %v2760_v31, %v4545_v56 }
0x3cd3   :  { %v2762_v45 = vsub.f32 %v2753_v62, %v2761_v9  ;;  %v5412_v62 = vld [vmem:[#allocation2 + $0x40] sm:$0xff] }
0x3cd4   :  { %2971 = vmatpush.msra.mxu3 %v5412_v62 }
0x3cd5   :  { %v2763_v37 = vmul.f32 %v2762_v45, %v2762_v45 }
0x3cd6   :  { %2972 = vmatpush.msra.mxu3 %v5415_v32 }
0x3cd7   :  { %2765 = vrot.lane.b32.xlu1 %v2763_v37, %s4328_s24  ;;  %v5419_v37 = vld [vmem:[#allocation2 + $0x20] sm:$0xff] }
0x3cd8   :  { %2973 = vmatpush.msra.mxu3 %v5419_v37 }
0x3d49   :  { %v2766_v48 = vpop.permute.xlu1 %2765 }
0x3d4a   :  { %v2768_v43 = vsel %vm414_vm15, %v2766_v48, 0.0  ;;  %v5422_v48 = vld [vmem:[#allocation2 + $0x10] sm:$0xff] }
0x3d4b   :  { %2769 = vadd.xlane.f32.xlu2 %v2768_v43  ;;  %v5424_v43 = vld [vmem:[#allocation2] sm:$0xff]  ;;  %2974 = vmatpush.msra.mxu3 %v5422_v48 }
0x3d4d   :  { %2975 = vmatpush.msra.mxu3 %v5424_v43 }
0x3dbe   :  { %v2770_v19 = vpop.xlane.xlu2 %2769 }
0x3dbf   :  { %v2771_v35 = vmul.f32 %v2770_v19, %v4545_v56 }
0x3dc1   :  { %v2772_v58 = vadd.f32 1e-05, %v2771_v35 }
0x3dc3   :  { %4207 = vrsqrt.f32 %v2772_v58  ;;  %vm2779_vm8 = vweird.f32 %v2772_v58 }
0x3dc9   :  { %v4208_v40 = vpop.eup %4207 }
0x3dca   :  { %v2774_v4 = vmul.f32 %v4208_v40, %v2772_v58  ;;  %vm2780_vm7 = vweird.f32 %v4208_v40 }
0x3dcb   :  { %vm2781_vm9 = vmor %vm2779_vm8, %vm2780_vm7 }
0x3dcc   :  { %v2775_v51 = vmul.f32 %v4208_v40, %v2774_v4 }
0x3dce   :  { %v2776_v55 = vmul.f32 0.5, %v2775_v51  ;;  %v2904_v51 = vpop.f32.mrf.mxu3 }
0x3dd0   :  { %v2777_v47 = vsub.f32 1.5, %v2776_v55 }
0x3dd2   :  { %v2778_v11 = vmul.f32 %v4208_v40, %v2777_v47 }
0x3dd4   :  { %v2782_v17 = vsel %vm2781_vm9, %v4208_v40, %v2778_v11 }
0x3dd5   :  { %v2783_v50 = vmul.f32 %v2782_v17, %v2762_v45 }
0x3dd7   :  { %v2784_v2 = vmul.f32 %v2783_v50, %v4564_v61 }
0x3dd9   :  { %v2785_v34 = vadd.f32 %v2784_v2, %v4566_v30 }
0x3ddb   :  { %2795 = vrot.lane.b32.xlu1 %v2785_v34, %s4328_s24 }
0x3e4d   :  { %v2796_v25 = vpop.permute.xlu1 %2795 }
0x3e4e   :  { %3973 = vmatmul.msk.f32.vlgmr.msrb.gmra.mxu1 %vm76_vm1, %v2796_v25  ;;  %3974 = vmatmul.msk.f32.vlgmr.msrb.gmra.mxu2 %vm76_vm1, %v2796_v25 }
0x3e56   :  { %3979 = vmatmul.msk.f32.vlgmr.msra.gmra.mxu1 %vm76_vm1, %v5299_v6 }
0x3ecb   :  { %v2816_v60 = vpop.f32.mrf.mxu1 }
0x3ecc   :  { %v2817_v59 = vadd.f32 %v2816_v60, %v4586_v44 }
0x3ece   :  { %3975 = vst [vmem:[%s5715_s4 + $0xa] sm:$0x3] %v2817_v59  ;;  %v2843_v54 = vadd.f32 %v3976_v13, %v2817_v59 }
0x3ed0   :  { %v2844_v24 = vsel %vm518_vm5, %v2843_v54, -inf }
0x3ed1   :  { %2845 = vmax.xlane.f32.xlu1 %v2844_v24 }
0x3f44   :  { %v2846_v29 = vpop.xlane.xlu1 %2845 }
0x3f45   :  { %vm2847_vm10 = vcmp.ge.f32.partialorder %v2843_v54, %v2846_v29 }
0x3f46   :  { %v2848_v22 = vsel %vm2847_vm10, %v4433_v36, 128 }
0x3f47   :  { %v2849_v6 = vsel %vm518_vm5, %v2848_v22, 2147483647 }
0x3f48   :  { %v2851_v27 = vshra.s32 %v2849_v6, 16  ;;  %v2850_v12 = vand.u32 65535, %v2849_v6 }
0x3f4a   :  { %v2853_v26 = vcvt.s32.f32 %v2851_v27  ;;  %v2852_v9 = vcvt.s32.f32 %v2850_v12 }
0x3f4c   :  { %2854 = vmin.xlane.f32.xlu0 %v2853_v26 }
0x3fbf   :  { %v2855_v31 = vpop.xlane.xlu0 %2854 }
0x3fc0   :  { %vm2856_vm11 = vcmp.eq.f32.partialorder %v2853_v26, %v2855_v31  ;;  %v2861_v19 = vcvt.f32.s32 %v2855_v31 }
0x3fc1   :  { %v2857_v45 = vsel %vm2856_vm11, %v2852_v9, inf }
0x3fc2   :  { %2858 = vmin.xlane.f32.xlu2 %v2857_v45  ;;  %v2862_v58 = vshll.u32 %v2861_v19, 16 }
0x4035   :  { %v2859_v35 = vpop.xlane.xlu2 %2858 }
0x4036   :  { %v2860_v40 = vcvt.f32.s32 %v2859_v35  ;;  %v5438_v35 = vld [vmem:[#allocation2 + $0x1f0] sm:$0xff] }
0x4037   :  { %3039 = vmatpush.msrb.mxu1 %v5438_v35 }
0x4038   :  { %v2863_v4 = vadd.s32 %v2862_v58, %v2860_v40  ;;  %v5440_v58 = vld [vmem:[#allocation2 + $0x1e0] sm:$0xff]  ;;  %v5443_v40 = vld [vmem:[#allocation2 + $0x1d0] sm:$0xff] }
0x4039   :  { %3040 = vmatpush.msrb.mxu1 %v5440_v58 }
0x403a   :  { %vm2864_vm12 = vcmp.eq.s32.totalorder %v4433_v36, %v2863_v4  ;;  %v5446_v4 = vld [vmem:[#allocation2 + $0x1c0] sm:$0xff] }
0x403b   :  { %3981 = vmatmul.msk.f32.vlgmr.msra.gmra.mxu3 %vm2864_vm12, %v4326_v38  ;;  %3041 = vmatpush.msrb.mxu1 %v5443_v40 }
0x403d   :  { %3042 = vmatpush.msrb.mxu1 %v5446_v4 }
0x40be   :  { %v2977_v55 = vpop.f32.mrf.mxu3 }
0x40bf   :  { %v2978_v47 = vadd.f32 %v2977_v55, %v2904_v51 }
0x40c1   :  { %v2980_v11 = vadd.f32 %v2978_v47, %v4461_v53  ;;  %v2928_v47 = vpop.f32.mrf.mxu1 }
0x40c3   :  { %4209 = vtanh.f32 %v2980_v11  ;;  %v3982_v50 = vmul.f32 -1.442695, %v2980_v11 }
0x40c5   :  { %4211 = vpow2.f32 %v3982_v50  ;;  %v5455_v50 = vld [vmem:[#allocation2 + $0x322] ss:$0 sm:$0xff] }
0x40c9   :  { %v4210_v17 = vpop.eup %4209 }
0x40ca   :  { %3003 = vrot.lane.b32.xlu0 %v4210_v17, %s4327_s1 }
0x40cb   :  { %v4212_v2 = vpop.eup %4211 }
0x40cc   :  { %v2984_v34 = vadd.f32 1.0, %v4212_v2 }
0x40ce   :  { %4213 = vrcp.f32 %v2984_v34  ;;  %v2996_v24 = vand.u32 2147483648, %v2984_v34  ;;  %vm2990_vm0 = vweird.f32 %v2984_v34  ;;  %v2994_v29 = vand.u32 2147483647, %v2984_v34 }
0x40d0   :  { %v2997_v6 = vor.u32 1.1754944e-38, %v2996_v24  ;;  %vm2995_vm3 = vcmp.eq.f32.partialorder %v2994_v29, 8.507059e+37 }
0x40d4   :  { %v4214_v25 = vpop.eup %4213 }
0x40d5   :  { %v2986_v60 = vmul.f32 %v4214_v25, %v2984_v34  ;;  %vm2991_vm14 = vweird.f32 %v4214_v25 }
0x40d6   :  { %vm2992_vm2 = vmor %vm2990_vm0, %vm2991_vm14 }
0x40d7   :  { %v2987_v13 = vsub.f32 1.0, %v2986_v60 }
0x40d9   :  { %v2988_v59 = vmul.f32 %v4214_v25, %v2987_v13 }
0x40db   :  { %v2989_v54 = vadd.f32 %v4214_v25, %v2988_v59 }
0x40dd   :  { %v2993_v22 = vsel %vm2992_vm2, %v4214_v25, %v2989_v54 }
0x40de   :  { %v2998_v26 = vsel %vm2995_vm3, %v2997_v6, %v2993_v22 }
0x40df   :  { %v3001_v31 = vmul.f32 %v2998_v26, %v5259_v7 }
0x413c   :  { %v3004_v27 = vpop.permute.xlu0 %3003 }
0x413d   :  { %v3006_v12 = vmul.f32 %v3004_v27, %v2998_v26 }
0x413f   :  { %3008 = vrot.lane.b32.xlu2 %v3006_v12, %s4328_s24 }
0x4199   :  { %v3009_v9 = vpop.permute.xlu2 %3008 }
0x419a   :  { %v5434_v45 = vadd.f32 %v3009_v9, %v3001_v31 }
0x419c   :  { %4215 = vtanh.f32 %v5434_v45 }
0x41a2   :  { %v4216_v19 = vpop.eup %4215 }
0x41a3   :  { %3014 = vrot.lane.b32.xlu1 %v4216_v19, %s4327_s1 }
0x4215   :  { %v3015_v7 = vpop.permute.xlu1 %3014 }
0x4216   :  { %v3017_v51 = vmul.f32 %v3015_v7, %v2998_v26  ;;  %v5462_v7 = vld [vmem:[#allocation2 + $0x1b0] sm:$0xff] }
0x4217   :  { %2952 = vmatpush.msra.mxu2 %v5462_v7 }
0x4218   :  { %3023 = vrot.lane.b32.xlu0 %v3017_v51, %s4328_s24  ;;  %v5464_v51 = vld [vmem:[#allocation2 + $0x1a0] sm:$0xff] }
0x4219   :  { %2953 = vmatpush.msra.mxu2 %v5464_v51 }
0x428a   :  { %v5451_v55 = vpop.permute.xlu0 %3023 }
0x428b   :  { %3983 = vmatmul.msk.f32.vlgmr.msrb.gmra.mxu1 %vm76_vm1, %v5451_v55 }
0x4308   :  { %v3044_v11 = vpop.f32.mrf.mxu1 }
0x4309   :  { %v3045_v17 = vadd.f32 %v3044_v11, %v2928_v47  ;;  %v5467_v47 = vld [vmem:[#allocation2 + $0x190] sm:$0xff]  ;;  %v5470_v11 = vld [vmem:[#allocation2 + $0x180] sm:$0xff] }
0x430a   :  { %2954 = vmatpush.msra.mxu2 %v5467_v47 }
0x430b   :  { %v3047_v2 = vadd.f32 %v5455_v50, %v3045_v17 }
0x430c   :  { %2955 = vmatpush.msra.mxu2 %v5470_v11 }
0x430d   :  { %4217 = vtanh.f32 %v3047_v2  ;;  %v3984_v25 = vmul.f32 -1.442695, %v3047_v2 }
0x430f   :  { %4219 = vpow2.f32 %v3984_v25 }
0x4313   :  { %v4218_v34 = vpop.eup %4217 }
0x4314   :  { %3070 = vrot.lane.b32.xlu0 %v4218_v34, %s4327_s1 }
0x4315   :  { %v4220_v60 = vpop.eup %4219 }
0x4316   :  { %v3051_v13 = vadd.f32 1.0, %v4220_v60  ;;  %v2836_v60 = vpop.f32.mrf.mxu2 }
0x4318   :  { %4221 = vrcp.f32 %v3051_v13  ;;  %v3063_v6 = vand.u32 2147483648, %v3051_v13  ;;  %vm3057_vm6 = vweird.f32 %v3051_v13  ;;  %v3061_v27 = vand.u32 2147483647, %v3051_v13 }
0x431a   :  { %v3064_v12 = vor.u32 1.1754944e-38, %v3063_v6  ;;  %vm3062_vm8 = vcmp.eq.f32.partialorder %v3061_v27, 8.507059e+37 }
0x431e   :  { %v4222_v59 = vpop.eup %4221 }
0x431f   :  { %v3053_v54 = vmul.f32 %v4222_v59, %v3051_v13  ;;  %vm3058_vm4 = vweird.f32 %v4222_v59  ;;  %v5481_v13 = vadd.f32 %v2836_v60, %v4616_v8 }
0x4320   :  { %vm3059_vm7 = vmor %vm3057_vm6, %vm3058_vm4 }
0x4321   :  { %v3054_v24 = vsub.f32 1.0, %v3053_v54 }
0x4323   :  { %v3055_v29 = vmul.f32 %v4222_v59, %v3054_v24 }
0x4325   :  { %v3056_v22 = vadd.f32 %v4222_v59, %v3055_v29 }
0x4327   :  { %v3060_v26 = vsel %vm3059_vm7, %v4222_v59, %v3056_v22 }
0x4328   :  { %v3065_v9 = vsel %vm3062_vm8, %v3064_v12, %v3060_v26  ;;  %v5498_v12 = vld [vmem:[#allocation2 + $0x230] sm:$0xff] }
0x4329   :  { %v3068_v17 = vmul.f32 %v3065_v9, %v5279_v41  ;;  %3106 = vmatpush.msrb.mxu2 %v5498_v12 }
0x4386   :  { %v3071_v31 = vpop.permute.xlu0 %3070 }
0x4387   :  { %v3073_v19 = vmul.f32 %v3071_v31, %v3065_v9  ;;  %v5501_v31 = vld [vmem:[#allocation2 + $0x220] sm:$0xff] }
0x4388   :  { %3107 = vmatpush.msrb.mxu2 %v5501_v31 }
0x4389   :  { %3075 = vrot.lane.b32.xlu2 %v3073_v19, %s4328_s24  ;;  %v5506_v19 = vld [vmem:[#allocation2 + $0x200] sm:$0xff] }
0x4391   :  { %2936 = vrot.lane.b32.xlu2 %v5344_v57, %s4328_s24 }
0x43e3   :  { %v3076_v2 = vpop.permute.xlu2 %3075 }
0x43e4   :  { %v5475_v57 = vadd.f32 %v3076_v2, %v3068_v17  ;;  %v3411_v17 = vld [vmem:[#allocation2 + $0x130] sm:$0xff]  ;;  %v3410_v2 = vld [vmem:[#allocation2 + $0x120] sm:$0xff] }
0x43e6   :  { %4223 = vtanh.f32 %v5475_v57 }
0x43eb   :  { %v2937_v34 = vpop.permute.xlu2 %2936 }
0x43ec   :  { %v4224_v25 = vpop.eup %4223  ;;  %3980 = vmatmul.msk.f32.vlgmr.msra.gmra.mxu2 %vm76_vm1, %v2937_v34  ;;  %v3409_v34 = vld [vmem:[#allocation2 + $0x110] sm:$0xff] }
0x43ed   :  { %3081 = vrot.lane.b32.xlu0 %v4224_v25, %s4327_s1  ;;  %v3408_v25 = vld [vmem:[#allocation2 + $0x100] sm:$0xff] }
0x43f5   :  { %3153 = vrot.lane.b32.xlu0 %v5481_v13, %s4328_s24 }
0x445f   :  { %v3082_v59 = vpop.permute.xlu0 %3081 }
0x4460   :  { %v3084_v41 = vmul.f32 %v3082_v59, %v3065_v9  ;;  %v5503_v9 = vld [vmem:[#allocation2 + $0x210] sm:$0xff] }
0x4461   :  { %3108 = vmatpush.msrb.mxu2 %v5503_v9 }
0x4462   :  { %3090 = vrot.lane.b32.xlu1 %v3084_v41, %s4328_s24 }
0x4463   :  { %3109 = vmatpush.msrb.mxu2 %v5506_v19 }
0x4465   :  { %3424 = vmatpush.msra.mxu2 %v3411_v17 }
0x4467   :  { %v3154_v54 = vpop.permute.xlu0 %3153  ;;  %3425 = vmatpush.msra.mxu2 %v3410_v2 }
0x4468   :  { %v3160_v24 = vmul.f32 %v3154_v54, %v5284_v3  ;;  %v3157_v29 = vmul.f32 %v3154_v54, %v4771_v23  ;;  %v3156_v22 = vmul.f32 %v3154_v54, %v4619_v14  ;;  %v3159_v6 = vmul.f32 %v3154_v54, %v5114_v63 }
0x4469   :  { %v3158_v27 = vmul.f32 %v3154_v54, %v4937_v46  ;;  %v3161_v26 = vmul.f32 %v3154_v54, %v5481_v13  ;;  %3426 = vmatpush.msra.mxu2 %v3409_v34 }
0x446a   :  { %3176 = vrot.lane.b32.xlu0 %v3160_v24, %s4330_s29  ;;  %3170 = vrot.lane.b32.xlu1 %v3157_v29, %s4330_s29 }
0x446b   :  { %3168 = vrot.lane.b32.xlu2 %v3156_v22, %s4330_s29  ;;  %3427 = vmatpush.msra.mxu2 %v3408_v25 }
0x4472   :  { %3174 = vrot.lane.b32.xlu0 %v3159_v6, %s4330_s29  ;;  %3172 = vrot.lane.b32.xlu1 %v3158_v27, %s4330_s29 }
0x4473   :  { %3178 = vrot.lane.b32.xlu2 %v3161_v26, %s4330_s29 }
0x44c5   :  { %v3169_v60 = vpop.permute.xlu2 %3168 }
0x44c6   :  { %v3186_v59 = vsel %vm414_vm15, %v3169_v60, 0.0 }
0x44c7   :  { %3187 = vadd.xlane.f32.xlu2 %v3186_v59 }
0x44cd   :  { %v3179_v41 = vpop.permute.xlu2 %3178 }
0x44ce   :  { %v3201_v54 = vsel %vm414_vm15, %v3179_v41, 0.0 }
0x44cf   :  { %3202 = vadd.xlane.f32.xlu2 %v3201_v54  ;;  %v5542_v54 = vld [vmem:[#allocation2 + $0x323] ss:$0 sm:$0xff] }
0x44d4   :  { %v5512_v24 = vpop.permute.xlu1 %3090 }
0x44d5   :  { %3985 = vmatmul.msk.f32.vlgmr.msrb.gmra.mxu2 %vm76_vm1, %v5512_v24 }
0x44d6   :  { %3485 = vmatpush.msrb.mxu2 %v5380_v15 }
0x44d8   :  { %3486 = vmatpush.msrb.mxu2 %v5382_v0 }
0x44da   :  { %3487 = vmatpush.msrb.mxu2 %v5385_v5 }
0x44dc   :  { %v3177_v29 = vpop.permute.xlu0 %3176  ;;  %v3171_v22 = vpop.permute.xlu1 %3170  ;;  %3488 = vmatpush.msrb.mxu2 %v5388_v18 }
0x44dd   :  { %v3198_v6 = vsel %vm414_vm15, %v3177_v29, 0.0  ;;  %v3189_v27 = vsel %vm414_vm15, %v3171_v22, 0.0  ;;  %3992 = vmatmul.msk.f32.vlgmr.msra.gmra.mxu2 %vm76_vm1, %v5451_v55 }
0x44de   :  { %3199 = vadd.xlane.f32.xlu0 %v3198_v6  ;;  %3190 = vadd.xlane.f32.xlu1 %v3189_v27 }
0x44df   :  { %3489 = vmatpush.msrb.mxu2 %v5391_v10 }
0x44e1   :  { %3490 = vmatpush.msrb.mxu2 %v5394_v49  ;;  %v2957_v49 = vpop.f32.mrf.mxu2 }
0x44e3   :  { %3491 = vmatpush.msrb.mxu2 %v5397_v52 }
0x44e4   :  { %v3175_v15 = vpop.permute.xlu0 %3174  ;;  %v3173_v0 = vpop.permute.xlu1 %3172 }
0x44e5   :  { %v3195_v5 = vsel %vm414_vm15, %v3175_v15, 0.0  ;;  %v3192_v18 = vsel %vm414_vm15, %v3173_v0, 0.0  ;;  %3492 = vmatpush.msrb.mxu2 %v5400_v28 }
0x44e6   :  { %3196 = vadd.xlane.f32.xlu0 %v3195_v5  ;;  %3193 = vadd.xlane.f32.xlu2 %v3192_v18 }
0x44e7   :  { %3493 = vmatpush.msrb.mxu2 %v5403_v20 }
0x44e9   :  { %3494 = vmatpush.msrb.mxu2 %v5406_v21 }
0x44eb   :  { %3495 = vmatpush.msrb.mxu2 %v5409_v1 }
0x44ed   :  { %3496 = vmatpush.msrb.mxu2 %v5412_v62 }
0x44ef   :  { %3497 = vmatpush.msrb.mxu2 %v5415_v32 }
0x44f1   :  { %3498 = vmatpush.msrb.mxu2 %v5419_v37 }
0x44f3   :  { %3499 = vmatpush.msrb.mxu2 %v5422_v48 }
0x44f5   :  { %3500 = vmatpush.msrb.mxu2 %v5424_v43 }
0x453a   :  { %v3188_v10 = vpop.xlane.xlu2 %3187 }
0x453b   :  { %v3204_v21 = vmul.f32 0.17677669, %v3188_v10 }
0x453d   :  { %v3210_v32 = vsel %vm518_vm5, %v3204_v21, -inf }
0x4542   :  { %v3203_v52 = vpop.xlane.xlu2 %3202 }
0x4543   :  { %v3209_v17 = vmul.f32 0.17677669, %v3203_v52 }
0x4545   :  { %v3216_v37 = vsel %vm518_vm5, %v3209_v17, -inf }
0x4551   :  { %v3200_v28 = vpop.xlane.xlu0 %3199  ;;  %v3191_v55 = vpop.xlane.xlu1 %3190 }
0x4552   :  { %v3208_v20 = vmul.f32 0.17677669, %v3200_v28  ;;  %v3205_v26 = vmul.f32 0.17677669, %v3191_v55 }
0x4554   :  { %v3214_v1 = vsel %vm518_vm5, %v3208_v20, -inf  ;;  %v3211_v62 = vsel %vm518_vm5, %v3205_v26, -inf }
0x4555   :  { %v3215_v2 = vmax.f32 %v3210_v32, %v3214_v1  ;;  %v3217_v43 = vmax.f32 %v3211_v62, %v3216_v37 }
0x4557   :  { %v3218_v27 = vmax.f32 %v3215_v2, %v3217_v43 }
0x4558   :  { %v3111_v48 = vpop.f32.mrf.mxu2 }
0x4559   :  { %v3112_v34 = vadd.f32 %v3111_v48, %v2957_v49  ;;  %v3197_v25 = vpop.xlane.xlu0 %3196  ;;  %v3194_v60 = vpop.xlane.xlu2 %3193 }
0x455a   :  { %v3207_v59 = vmul.f32 0.17677669, %v3197_v25  ;;  %v3206_v41 = vmul.f32 0.17677669, %v3194_v60 }
0x455b   :  { %v5545_v29 = vadd.f32 %v5542_v54, %v3112_v34 }
0x455c   :  { %v3213_v22 = vsel %vm518_vm5, %v3207_v59, -inf  ;;  %v3212_v6 = vsel %vm518_vm5, %v3206_v41, -inf }
0x455d   :  { %4225 = vtanh.f32 %v5545_v29  ;;  %v3219_v15 = vmax.f32 %v3212_v6, %v3213_v22 }
0x455f   :  { %v3220_v0 = vmax.f32 %v3218_v27, %v3219_v15 }
0x4561   :  { %v3221_v5 = vsub.f32 %v3204_v21, %v3220_v0  ;;  %v3222_v18 = vsub.f32 %v3205_v26, %v3220_v0  ;;  %v3223_v10 = vsub.f32 %v3206_v41, %v3220_v0  ;;  %v3224_v49 = vsub.f32 %v3207_v59, %v3220_v0 }
0x4562   :  { %v3225_v52 = vsub.f32 %v3208_v20, %v3220_v0  ;;  %v3226_v32 = vsub.f32 %v3209_v17, %v3220_v0 }
0x4563   :  { %v4226_v28 = vpop.eup %4225  ;;  %v3227_v55 = vmul.f32 1.442695, %v3221_v5  ;;  %v3229_v1 = vmul.f32 1.442695, %v3222_v18  ;;  %v3231_v62 = vmul.f32 1.442695, %v3223_v10 }
0x4564   :  { %3137 = vrot.lane.b32.xlu1 %v4226_v28, %s4327_s1  ;;  %v3233_v37 = vmul.f32 1.442695, %v3224_v49  ;;  %v3235_v48 = vmul.f32 1.442695, %v3225_v52  ;;  %v3237_v2 = vmul.f32 1.442695, %v3226_v32 }
0x4565   :  { %4227 = vpow2.f32 %v3227_v55 }
0x4566   :  { %4229 = vpow2.f32 %v3229_v1 }
0x4567   :  { %4231 = vpow2.f32 %v3231_v62 }
0x4568   :  { %4233 = vpow2.f32 %v3233_v37 }
0x4569   :  { %4235 = vpow2.f32 %v3235_v48 }
0x456a   :  { %4237 = vpow2.f32 %v3237_v2 }
0x456b   :  { %v4228_v21 = vpop.eup %4227 }
0x456c   :  { %v4230_v26 = vpop.eup %4229  ;;  %v3239_v20 = vsel %vm518_vm5, %v4228_v21, 0.0 }
0x456d   :  { %v4232_v43 = vpop.eup %4231  ;;  %v3240_v34 = vsel %vm518_vm5, %v4230_v26, 0.0 }
0x456e   :  { %v3241_v25 = vadd.f32 %v3240_v34, %v3239_v20  ;;  %v4234_v17 = vpop.eup %4233  ;;  %v3242_v60 = vsel %vm518_vm5, %v4232_v43, 0.0 }
0x456f   :  { %v4236_v59 = vpop.eup %4235  ;;  %v3244_v22 = vsel %vm518_vm5, %v4234_v17, 0.0 }
0x4570   :  { %v3243_v41 = vadd.f32 %v3242_v60, %v3241_v25  ;;  %v4238_v6 = vpop.eup %4237  ;;  %v3246_v15 = vsel %vm518_vm5, %v4236_v59, 0.0 }
0x4571   :  { %v3248_v5 = vsel %vm518_vm5, %v4238_v6, 0.0 }
0x4572   :  { %v3245_v27 = vadd.f32 %v3244_v22, %v3243_v41 }
0x4574   :  { %v3247_v0 = vadd.f32 %v3246_v15, %v3245_v27  ;;  %v3986_v15 = vmul.f32 -1.442695, %v5545_v29 }
0x4576   :  { %v3249_v18 = vadd.f32 %v3248_v5, %v3247_v0 }
0x4578   :  { %4239 = vrcp.f32 %v3249_v18 }
0x4579   :  { %4241 = vpow2.f32 %v3986_v15 }
0x457e   :  { %v4240_v10 = vpop.eup %4239 }
0x457f   :  { %v3253_v49 = vmul.f32 %v4240_v10, %v4232_v43  ;;  %v3251_v52 = vmul.f32 %v4240_v10, %v4228_v21  ;;  %v3252_v28 = vmul.f32 %v4240_v10, %v4230_v26  ;;  %v3254_v55 = vmul.f32 %v4240_v10, %v4234_v17  ;;  %v4242_v0 = vpop.eup %4241 }
0x4580   :  { %v3255_v62 = vmul.f32 %v4240_v10, %v4236_v59  ;;  %v3256_v48 = vmul.f32 %v4240_v10, %v4238_v6  ;;  %v3118_v5 = vadd.f32 1.0, %v4242_v0  ;;  %v3317_v0 = vld [vmem:[#allocation2 + $0x310] sm:$0xff] }
0x4581   :  { %v3259_v1 = vmul.f32 %v3253_v49, %v4937_v46  ;;  %v3257_v32 = vmul.f32 %v3251_v52, %v4619_v14  ;;  %v3258_v37 = vmul.f32 %v3252_v28, %v4771_v23  ;;  %v3260_v2 = vmul.f32 %v3254_v55, %v5114_v63  ;;  %3336 = vmatpush.msra.mxu0 %v3317_v0 }
0x4582   :  { %v3261_v43 = vmul.f32 %v3255_v62, %v5284_v3  ;;  %v3262_v17 = vmul.f32 %v3256_v48, %v5481_v13  ;;  %4243 = vrcp.f32 %v3118_v5  ;;  %v3130_v55 = vand.u32 2147483648, %v3118_v5  ;;  %3877 = vmatpush.msrb.mxu3 %v3317_v0 }
0x4583   :  { %v3263_v20 = vsel %vm1290_vm13, %v3257_v32, 0.0  ;;  %v3264_v34 = vsel %vm1290_vm13, %v3258_v37, 0.0  ;;  %v3266_v21 = vsel %vm1290_vm13, %v3259_v1, 0.0  ;;  %v3268_v60 = vsel %vm1290_vm13, %v3260_v2, 0.0 }
0x4584   :  { %v3265_v25 = vadd.f32 %v3264_v34, %v3263_v20  ;;  %v3270_v41 = vsel %vm1290_vm13, %v3261_v43, 0.0  ;;  %v3272_v6 = vsel %vm1290_vm13, %v3262_v17, 0.0  ;;  %vm3124_vm10 = vweird.f32 %v3118_v5 }
0x4585   :  { %v3128_v1 = vand.u32 2147483647, %v3118_v5  ;;  %v3131_v32 = vor.u32 1.1754944e-38, %v3130_v55 }
0x4586   :  { %v3267_v26 = vadd.f32 %v3266_v21, %v3265_v25 }
0x4587   :  { %vm3129_vm12 = vcmp.eq.f32.partialorder %v3128_v1, 8.507059e+37  ;;  %v3311_v1 = vld [vmem:[#allocation2 + $0x2e0] sm:$0xff] }
0x4588   :  { %v3269_v59 = vadd.f32 %v3268_v60, %v3267_v26  ;;  %v4244_v18 = vpop.eup %4243 }
0x4589   :  { %v3120_v10 = vmul.f32 %v4244_v18, %v3118_v5  ;;  %vm3125_vm9 = vweird.f32 %v4244_v18  ;;  %v3318_v5 = vld [vmem:[#allocation2 + $0x318] sm:$0xff] }
0x458a   :  { %v3271_v22 = vadd.f32 %v3270_v41, %v3269_v59  ;;  %vm3126_vm11 = vmor %vm3124_vm10, %vm3125_vm9  ;;  %3356 = vmatpush.msra.mxu1 %v3318_v5 }
0x458b   :  { %v3121_v49 = vsub.f32 1.0, %v3120_v10  ;;  %v3316_v10 = vld [vmem:[#allocation2 + $0x308] sm:$0xff] }
0x458c   :  { %v3273_v27 = vadd.f32 %v3272_v6, %v3271_v22  ;;  %3357 = vmatpush.msra.mxu1 %v3316_v10 }
0x458d   :  { %v3122_v52 = vmul.f32 %v4244_v18, %v3121_v49  ;;  %v3313_v49 = vld [vmem:[#allocation2 + $0x2f0] sm:$0xff] }
0x458e   :  { %3275 = vrot.lane.b32.xlu1 %v3273_v27, %s4328_s24 }
0x458f   :  { %v3123_v28 = vadd.f32 %v4244_v18, %v3122_v52  ;;  %v3314_v52 = vld [vmem:[#allocation2 + $0x2f8] sm:$0xff] }
0x4590   :  { %3358 = vmatpush.msra.mxu1 %v3314_v52 }
0x4591   :  { %v3127_v62 = vsel %vm3126_vm11, %v4244_v18, %v3123_v28  ;;  %v3315_v18 = vld [vmem:[#allocation2 + $0x300] sm:$0xff] }
0x4592   :  { %v3132_v37 = vsel %vm3129_vm12, %v3131_v32, %v3127_v62  ;;  %3337 = vmatpush.msra.mxu0 %v3315_v18  ;;  %v3312_v62 = vld [vmem:[#allocation2 + $0x2e8] sm:$0xff]  ;;  %3878 = vmatpush.msrb.mxu3 %v3315_v18 }
0x4593   :  { %v3135_v2 = vmul.f32 %v3132_v37, %v5328_v16  ;;  %3359 = vmatpush.msra.mxu1 %v3312_v62 }
0x4594   :  { %3338 = vmatpush.msra.mxu0 %v3313_v49  ;;  %3879 = vmatpush.msrb.mxu3 %v3313_v49 }
0x4595   :  { %3477 = vmatpush.msrb.mxu1 %v5462_v7 }
0x4596   :  { %3339 = vmatpush.msra.mxu0 %v3311_v1  ;;  %3880 = vmatpush.msrb.mxu3 %v3311_v1 }
0x4597   :  { %3478 = vmatpush.msrb.mxu1 %v5464_v51 }
0x4598   :  { %3448 = vmatpush.msrb.mxu0 %v5356_v42 }
0x4599   :  { %3479 = vmatpush.msrb.mxu1 %v5467_v47 }
0x459a   :  { %3449 = vmatpush.msrb.mxu0 %v5358_v39 }
0x459b   :  { %3480 = vmatpush.msrb.mxu1 %v5470_v11 }
0x459c   :  { %3450 = vmatpush.msrb.mxu0 %v5361_v33  ;;  %v3432_v33 = vld [vmem:[#allocation2 + $0x140] sm:$0xff] }
0x459e   :  { %3451 = vmatpush.msrb.mxu0 %v3432_v33 }
0x45d6   :  { %v3138_v48 = vpop.permute.xlu1 %3137 }
0x45d7   :  { %v3140_v29 = vmul.f32 %v3138_v48, %v3132_v37 }
0x45d9   :  { %3142 = vrot.lane.b32.xlu2 %v3140_v29, %s4328_s24 }
0x4600   :  { %v3276_v26 = vpop.permute.xlu1 %3275 }
0x4633   :  { %v3143_v20 = vpop.permute.xlu2 %3142 }
0x4634   :  { %v5573_v34 = vadd.f32 %v3143_v20, %v3135_v2 }
0x4636   :  { %4245 = vtanh.f32 %v5573_v34 }
0x463c   :  { %v4246_v25 = vpop.eup %4245 }
0x463d   :  { %3148 = vrot.lane.b32.xlu0 %v4246_v25, %s4327_s1 }
0x46af   :  { %v3149_v43 = vpop.permute.xlu0 %3148 }
0x46b0   :  { %v5577_v21 = vmul.f32 %v3149_v43, %v3132_v37 }
0x46b2   :  { %v3278_v17 = vadd.f32 %v3276_v26, %v5577_v21 }
0x46b4   :  { %3280 = vrot.lane.b32.xlu1 %v3278_v17, %s4328_s24 }
0x4726   :  { %v3281_v60 = vpop.permute.xlu1 %3280 }
0x4727   :  { %v3283_v59 = vsel %vm414_vm15, %v3281_v60, 0.0 }
0x4728   :  { %3284 = vadd.xlane.f32.xlu0 %v3283_v59 }
0x479b   :  { %v3285_v16 = vpop.xlane.xlu0 %3284 }
0x479c   :  { %v3286_v41 = vmul.f32 %v3285_v16, %v4545_v56 }
0x479e   :  { %v3287_v22 = vsub.f32 %v3278_v17, %v3286_v41 }
0x47a0   :  { %v3288_v6 = vmul.f32 %v3287_v22, %v3287_v22 }
0x47a2   :  { %3290 = vrot.lane.b32.xlu2 %v3288_v6, %s4328_s24 }
0x47fc   :  { %v3291_v27 = vpop.permute.xlu2 %3290 }
0x47fd   :  { %v3293_v15 = vsel %vm414_vm15, %v3291_v27, 0.0  ;;  %v3429_v27 = vpop.f32.mrf.mxu2 }
0x47fe   :  { %3294 = vadd.xlane.f32.xlu1 %v3293_v15 }
0x4871   :  { %v3295_v28 = vpop.xlane.xlu1 %3294 }
0x4872   :  { %v3296_v55 = vmul.f32 %v3295_v28, %v4545_v56 }
0x4874   :  { %v3297_v32 = vadd.f32 1e-05, %v3296_v55 }
0x4876   :  { %4247 = vrsqrt.f32 %v3297_v32  ;;  %vm3304_vm0 = vweird.f32 %v3297_v32 }
0x487c   :  { %v4248_v37 = vpop.eup %4247 }
0x487d   :  { %v3299_v48 = vmul.f32 %v4248_v37, %v3297_v32  ;;  %vm3305_vm14 = vweird.f32 %v4248_v37 }
0x487e   :  { %vm3306_vm2 = vmor %vm3304_vm0, %vm3305_vm14 }
0x487f   :  { %v3300_v29 = vmul.f32 %v4248_v37, %v3299_v48 }
0x4881   :  { %v3301_v2 = vmul.f32 0.5, %v3300_v29 }
0x4883   :  { %v3302_v20 = vsub.f32 1.5, %v3301_v2 }
0x4885   :  { %v3303_v42 = vmul.f32 %v4248_v37, %v3302_v20 }
0x4887   :  { %v3307_v7 = vsel %vm3306_vm2, %v4248_v37, %v3303_v42 }
0x4888   :  { %v3308_v25 = vmul.f32 %v3307_v7, %v3287_v22 }
0x488a   :  { %v3309_v39 = vmul.f32 %v3308_v25, %v4564_v61 }
0x488c   :  { %v3310_v51 = vadd.f32 %v3309_v39, %v4566_v30 }
0x488e   :  { %3320 = vrot.lane.b32.xlu2 %v3310_v51, %s4328_s24 }
0x48e8   :  { %v3321_v47 = vpop.permute.xlu2 %3320 }
0x48e9   :  { %3987 = vmatmul.msk.f32.vlgmr.msra.gmra.mxu0 %vm76_vm1, %v3321_v47  ;;  %3988 = vmatmul.msk.f32.vlgmr.msra.gmra.mxu1 %vm76_vm1, %v3321_v47 }
0x48ea   :  { %3564 = vmatpush.msra.mxu0 %v5438_v35  ;;  %3631 = vmatpush.msra.mxu1 %v5498_v12  ;;  %v3990_v35 = vld [vmem:[%s5713_s2 + $0xc] sm:$0x3] }
0x48ec   :  { %3565 = vmatpush.msra.mxu0 %v5440_v58  ;;  %3632 = vmatpush.msra.mxu1 %v5501_v31 }
0x48ee   :  { %3566 = vmatpush.msra.mxu0 %v5443_v40  ;;  %3633 = vmatpush.msra.mxu1 %v5503_v9 }
0x48f0   :  { %3567 = vmatpush.msra.mxu0 %v5446_v4  ;;  %3634 = vmatpush.msra.mxu1 %v5506_v19 }
0x48f1   :  { %3993 = vmatmul.msk.f32.vlgmr.msrb.gmra.mxu0 %vm76_vm1, %v5512_v24 }
0x4966   :  { %v3341_v11 = vpop.f32.mrf.mxu0 }
0x4967   :  { %v3342_v58 = vadd.f32 %v3341_v11, %v4586_v44 }
0x4969   :  { %3989 = vst [vmem:[%s5715_s4 + $0xc] sm:$0x3] %v3342_v58  ;;  %v3368_v40 = vadd.f32 %v3990_v35, %v3342_v58 }
0x496b   :  { %v3369_v12 = vsel %vm518_vm5, %v3368_v40, -inf }
0x496c   :  { %3370 = vmax.xlane.f32.xlu2 %v3369_v12 }
0x496e   :  { %v3453_v47 = vpop.f32.mrf.mxu0 }
0x49df   :  { %v3371_v4 = vpop.xlane.xlu2 %3370 }
0x49e0   :  { %vm3372_vm3 = vcmp.ge.f32.partialorder %v3368_v40, %v3371_v4 }
0x49e1   :  { %v3373_v31 = vsel %vm3372_vm3, %v4433_v36, 128 }
0x49e2   :  { %v3374_v9 = vsel %vm518_vm5, %v3373_v31, 2147483647 }
0x49e3   :  { %v3376_v19 = vshra.s32 %v3374_v9, 16  ;;  %v3375_v43 = vand.u32 65535, %v3374_v9 }
0x49e5   :  { %v3378_v24 = vcvt.s32.f32 %v3376_v19  ;;  %v3377_v17 = vcvt.s32.f32 %v3375_v43 }
0x49e7   :  { %3379 = vmin.xlane.f32.xlu0 %v3378_v24 }
0x4a5a   :  { %v3380_v26 = vpop.xlane.xlu0 %3379 }
0x4a5b   :  { %vm3381_vm4 = vcmp.eq.f32.partialorder %v3378_v24, %v3380_v26  ;;  %v3386_v59 = vcvt.f32.s32 %v3380_v26 }
0x4a5c   :  { %v3382_v60 = vsel %vm3381_vm4, %v3377_v17, inf }
0x4a5d   :  { %3383 = vmin.xlane.f32.xlu1 %v3382_v60  ;;  %v3387_v41 = vshll.u32 %v3386_v59, 16 }
0x4ad0   :  { %v3384_v16 = vpop.xlane.xlu1 %3383 }
0x4ad1   :  { %v3385_v22 = vcvt.f32.s32 %v3384_v16 }
0x4ad3   :  { %v3388_v6 = vadd.s32 %v3387_v41, %v3385_v22 }
0x4ad5   :  { %vm3389_vm6 = vcmp.eq.s32.totalorder %v4433_v36, %v3388_v6 }
0x4ad6   :  { %3995 = vmatmul.msk.f32.vlgmr.msrb.gmra.mxu2 %vm3389_vm6, %v4326_v38 }
0x4b59   :  { %v3502_v15 = vpop.f32.mrf.mxu2 }
0x4b5a   :  { %v3503_v0 = vadd.f32 %v3502_v15, %v3429_v27 }
0x4b5c   :  { %v3505_v5 = vadd.f32 %v3503_v0, %v4461_v53  ;;  %v3361_v0 = vpop.f32.mrf.mxu1 }
0x4b5e   :  { %4249 = vtanh.f32 %v3505_v5  ;;  %v3996_v10 = vmul.f32 -1.442695, %v3505_v5  ;;  %v5636_v5 = vadd.f32 %v3361_v0, %v4616_v8 }
0x4b60   :  { %4251 = vpow2.f32 %v3996_v10 }
0x4b64   :  { %v4250_v18 = vpop.eup %4249 }
0x4b65   :  { %3528 = vrot.lane.b32.xlu0 %v4250_v18, %s4327_s1 }
0x4b66   :  { %v4252_v49 = vpop.eup %4251 }
0x4b67   :  { %v3509_v52 = vadd.f32 1.0, %v4252_v49 }
0x4b69   :  { %4253 = vrcp.f32 %v3509_v52  ;;  %v3521_v38 = vand.u32 2147483648, %v3509_v52  ;;  %vm3515_vm8 = vweird.f32 %v3509_v52  ;;  %v3519_v32 = vand.u32 2147483647, %v3509_v52 }
0x4b6b   :  { %v3522_v37 = vor.u32 1.1754944e-38, %v3521_v38  ;;  %vm3520_vm10 = vcmp.eq.f32.partialorder %v3519_v32, 8.507059e+37 }
0x4b6f   :  { %v4254_v28 = vpop.eup %4253 }
0x4b70   :  { %v3511_v55 = vmul.f32 %v4254_v28, %v3509_v52  ;;  %vm3516_vm7 = vweird.f32 %v4254_v28 }
0x4b71   :  { %vm3517_vm9 = vmor %vm3515_vm8, %vm3516_vm7 }
0x4b72   :  { %v3512_v1 = vsub.f32 1.0, %v3511_v55 }
0x4b74   :  { %v3513_v36 = vmul.f32 %v4254_v28, %v3512_v1 }
0x4b76   :  { %v3514_v62 = vadd.f32 %v4254_v28, %v3513_v36 }
0x4b78   :  { %v3518_v53 = vsel %vm3517_vm9, %v4254_v28, %v3514_v62 }
0x4b79   :  { %v3523_v29 = vsel %vm3520_vm10, %v3522_v37, %v3518_v53 }
0x4b7a   :  { %v3526_v20 = vmul.f32 %v3523_v29, %v5434_v45 }
0x4bd7   :  { %v3529_v48 = vpop.permute.xlu0 %3528 }
0x4bd8   :  { %v3531_v2 = vmul.f32 %v3529_v48, %v3523_v29 }
0x4bda   :  { %3533 = vrot.lane.b32.xlu1 %v3531_v2, %s4328_s24 }
0x4c4c   :  { %v3534_v42 = vpop.permute.xlu1 %3533 }
0x4c4d   :  { %v3536_v7 = vadd.f32 %v3534_v42, %v3526_v20 }
0x4c4f   :  { %4255 = vtanh.f32 %v3536_v7 }
0x4c55   :  { %v4256_v25 = vpop.eup %4255 }
0x4c56   :  { %3539 = vrot.lane.b32.xlu2 %v4256_v25, %s4327_s1 }
0x4cb0   :  { %v3540_v39 = vpop.permute.xlu2 %3539 }
0x4cb1   :  { %v3542_v51 = vmul.f32 %v3540_v39, %v3523_v29 }
0x4cb3   :  { %3548 = vrot.lane.b32.xlu0 %v3542_v51, %s4328_s24 }
0x4d25   :  { %v3549_v33 = vpop.permute.xlu0 %3548 }
0x4d26   :  { %3997 = vmatmul.msk.f32.vlgmr.msra.gmra.mxu0 %vm76_vm1, %v3549_v33 }
0x4da3   :  { %v3569_v11 = vpop.f32.mrf.mxu0 }
0x4da4   :  { %v3570_v35 = vadd.f32 %v3569_v11, %v3453_v47 }
0x4da6   :  { %v3572_v58 = vadd.f32 %v5455_v50, %v3570_v35 }
0x4da8   :  { %4257 = vtanh.f32 %v3572_v58  ;;  %v3998_v40 = vmul.f32 -1.442695, %v3572_v58 }
0x4daa   :  { %4259 = vpow2.f32 %v3998_v40 }
0x4dae   :  { %v4258_v45 = vpop.eup %4257 }
0x4daf   :  { %3595 = vrot.lane.b32.xlu0 %v4258_v45, %s4327_s1 }
0x4db0   :  { %v4260_v12 = vpop.eup %4259 }
0x4db1   :  { %v3576_v4 = vadd.f32 1.0, %v4260_v12 }
0x4db3   :  { %4261 = vrcp.f32 %v3576_v4  ;;  %v3588_v26 = vand.u32 2147483648, %v3576_v4  ;;  %vm3582_vm12 = vweird.f32 %v3576_v4  ;;  %v3586_v50 = vand.u32 2147483647, %v3576_v4 }
0x4db5   :  { %v3589_v60 = vor.u32 1.1754944e-38, %v3588_v26  ;;  %vm3587_vm0 = vcmp.eq.f32.partialorder %v3586_v50, 8.507059e+37 }
0x4db7   :  { %3461 = vrot.lane.b32.xlu0 %v5577_v21, %s4328_s24 }
0x4db9   :  { %v4262_v31 = vpop.eup %4261 }
0x4dba   :  { %v3578_v9 = vmul.f32 %v4262_v31, %v3576_v4  ;;  %vm3583_vm11 = vweird.f32 %v4262_v31 }
0x4dbb   :  { %vm3584_vm14 = vmor %vm3582_vm12, %vm3583_vm11 }
0x4dbc   :  { %v3579_v19 = vsub.f32 1.0, %v3578_v9 }
0x4dbe   :  { %v3580_v24 = vmul.f32 %v4262_v31, %v3579_v19 }
0x4dc0   :  { %v3581_v43 = vadd.f32 %v4262_v31, %v3580_v24 }
0x4dc2   :  { %v3585_v17 = vsel %vm3584_vm14, %v4262_v31, %v3581_v43 }
0x4dc3   :  { %v3590_v21 = vsel %vm3587_vm0, %v3589_v60, %v3585_v17 }
0x4dc4   :  { %v3593_v22 = vmul.f32 %v3590_v21, %v5475_v57 }
0x4e21   :  { %v3596_v59 = vpop.permute.xlu0 %3595 }
0x4e22   :  { %v3598_v16 = vmul.f32 %v3596_v59, %v3590_v21 }
0x4e24   :  { %3600 = vrot.lane.b32.xlu1 %v3598_v16, %s4328_s24 }
0x4e29   :  { %v3462_v41 = vpop.permute.xlu0 %3461 }
0x4e2a   :  { %3994 = vmatmul.msk.f32.vlgmr.msrb.gmra.mxu1 %vm76_vm1, %v3462_v41 }
0x4e96   :  { %v3601_v6 = vpop.permute.xlu1 %3600 }
0x4e97   :  { %v3603_v27 = vadd.f32 %v3601_v6, %v3593_v22 }
0x4e99   :  { %4263 = vtanh.f32 %v3603_v27 }
0x4e9f   :  { %v4264_v15 = vpop.eup %4263 }
0x4ea0   :  { %3606 = vrot.lane.b32.xlu2 %v4264_v15, %s4327_s1 }
0x4ea7   :  { %v3482_v47 = vpop.f32.mrf.mxu1 }
0x4ea8   :  { %3678 = vrot.lane.b32.xlu2 %v5636_v5, %s4328_s24 }
0x4efa   :  { %v3607_v18 = vpop.permute.xlu2 %3606 }
0x4efb   :  { %v3609_v10 = vmul.f32 %v3607_v18, %v3590_v21 }
0x4efd   :  { %3615 = vrot.lane.b32.xlu1 %v3609_v10, %s4328_s24 }
0x4f02   :  { %v3679_v49 = vpop.permute.xlu2 %3678 }
0x4f03   :  { %v3683_v57 = vmul.f32 %v3679_v49, %v4937_v46  ;;  %v3682_v52 = vmul.f32 %v3679_v49, %v4771_v23  ;;  %v3681_v28 = vmul.f32 %v3679_v49, %v4619_v14  ;;  %v3687_v8 = vmul.f32 %v3679_v49, %v5636_v5 }
0x4f04   :  { %v3686_v55 = vmul.f32 %v3679_v49, %v5481_v13  ;;  %v3685_v1 = vmul.f32 %v3679_v49, %v5284_v3  ;;  %v3684_v36 = vmul.f32 %v3679_v49, %v5114_v63 }
0x4f05   :  { %3699 = vrot.lane.b32.xlu2 %v3683_v57, %s4330_s29  ;;  %3697 = vrot.lane.b32.xlu1 %v3682_v52, %s4330_s29 }
0x4f06   :  { %3695 = vrot.lane.b32.xlu0 %v3681_v28, %s4330_s29 }
0x4f0d   :  { %3707 = vrot.lane.b32.xlu2 %v3687_v8, %s4330_s29  ;;  %3705 = vrot.lane.b32.xlu1 %v3686_v55, %s4330_s29 }
0x4f0e   :  { %3703 = vrot.lane.b32.xlu0 %v3685_v1, %s4330_s29 }
0x4f16   :  { %3701 = vrot.lane.b32.xlu0 %v3684_v36, %s4330_s29 }
0x4f5f   :  { %v3700_v62 = vpop.permute.xlu2 %3699 }
0x4f60   :  { %v3722_v38 = vsel %vm414_vm15, %v3700_v62, 0.0 }
0x4f61   :  { %3723 = vadd.xlane.f32.xlu0 %v3722_v38 }
0x4f67   :  { %v3708_v32 = vpop.permute.xlu2 %3707 }
0x4f68   :  { %v3734_v53 = vsel %vm414_vm15, %v3708_v32, 0.0 }
0x4f69   :  { %3735 = vadd.xlane.f32.xlu0 %v3734_v53 }
0x4f6f   :  { %v3616_v37 = vpop.permute.xlu1 %3615 }
0x4f70   :  { %3999 = vmatmul.msk.f32.vlgmr.msra.gmra.mxu1 %vm76_vm1, %v3616_v37 }
0x4f77   :  { %v3698_v48 = vpop.permute.xlu1 %3697 }
0x4f78   :  { %v3719_v29 = vsel %vm414_vm15, %v3698_v48, 0.0  ;;  %v3696_v2 = vpop.permute.xlu0 %3695 }
0x4f79   :  { %v3716_v20 = vsel %vm414_vm15, %v3696_v2, 0.0  ;;  %3720 = vadd.xlane.f32.xlu2 %v3719_v29 }
0x4f7a   :  { %3717 = vadd.xlane.f32.xlu1 %v3716_v20 }
0x4f7f   :  { %v3706_v42 = vpop.permute.xlu1 %3705 }
0x4f80   :  { %v3731_v7 = vsel %vm414_vm15, %v3706_v42, 0.0  ;;  %v3704_v25 = vpop.permute.xlu0 %3703 }
0x4f81   :  { %v3728_v39 = vsel %vm414_vm15, %v3704_v25, 0.0  ;;  %3732 = vadd.xlane.f32.xlu2 %v3731_v7 }
0x4f82   :  { %3729 = vadd.xlane.f32.xlu1 %v3728_v39 }
0x4f88   :  { %v3702_v51 = vpop.permute.xlu0 %3701 }
0x4f89   :  { %v3725_v33 = vsel %vm414_vm15, %v3702_v51, 0.0 }
0x4f8a   :  { %3726 = vadd.xlane.f32.xlu1 %v3725_v33 }
0x4fd4   :  { %v3724_v11 = vpop.xlane.xlu0 %3723 }
0x4fd5   :  { %v3739_v60 = vmul.f32 0.17677669, %v3724_v11 }
0x4fd7   :  { %v3746_v15 = vsel %vm518_vm5, %v3739_v60, -inf }
0x4fdc   :  { %v3736_v31 = vpop.xlane.xlu0 %3735 }
0x4fdd   :  { %v3743_v26 = vmul.f32 0.17677669, %v3736_v31 }
0x4fdf   :  { %v3752_v16 = vsel %vm518_vm5, %v3743_v26, -inf }
0x4fe0   :  { %v3753_v18 = vmax.f32 %v3746_v15, %v3752_v16 }
0x4fec   :  { %v3721_v35 = vpop.xlane.xlu2 %3720 }
0x4fed   :  { %v3718_v58 = vpop.xlane.xlu1 %3717  ;;  %v3636_v45 = vpop.f32.mrf.mxu1  ;;  %v3738_v50 = vmul.f32 0.17677669, %v3721_v35 }
0x4fee   :  { %v3637_v40 = vadd.f32 %v3636_v45, %v3482_v47  ;;  %v3737_v17 = vmul.f32 0.17677669, %v3718_v58 }
0x4ff0   :  { %v3639_v12 = vadd.f32 %v5542_v54, %v3637_v40  ;;  %v3745_v54 = vsel %vm518_vm5, %v3738_v50, -inf  ;;  %v3744_v41 = vsel %vm518_vm5, %v3737_v17, -inf }
0x4ff2   :  { %4265 = vtanh.f32 %v3639_v12 }
0x4ff4   :  { %v3733_v4 = vpop.xlane.xlu2 %3732 }
0x4ff5   :  { %v3730_v9 = vpop.xlane.xlu1 %3729  ;;  %v3742_v19 = vmul.f32 0.17677669, %v3733_v4  ;;  %v4000_v4 = vmul.f32 -1.442695, %v3639_v12 }
0x4ff6   :  { %v3741_v24 = vmul.f32 0.17677669, %v3730_v9 }
0x4ff7   :  { %v3750_v59 = vsel %vm518_vm5, %v3742_v19, -inf }
0x4ff8   :  { %v4266_v43 = vpop.eup %4265  ;;  %v3748_v21 = vsel %vm518_vm5, %v3741_v24, -inf  ;;  %v3751_v22 = vmax.f32 %v3745_v54, %v3750_v59 }
0x4ff9   :  { %3662 = vrot.lane.b32.xlu2 %v4266_v43, %s4327_s1  ;;  %v3749_v6 = vmax.f32 %v3744_v41, %v3748_v21 }
0x4ffb   :  { %v3754_v49 = vmax.f32 %v3749_v6, %v3751_v22 }
0x4ffd   :  { %v3727_v27 = vpop.xlane.xlu1 %3726 }
0x4ffe   :  { %v3740_v0 = vmul.f32 0.17677669, %v3727_v27 }
0x5000   :  { %v3747_v10 = vsel %vm518_vm5, %v3740_v0, -inf }
0x5001   :  { %v3755_v57 = vmax.f32 %v3753_v18, %v3747_v10 }
0x5003   :  { %v3756_v52 = vmax.f32 %v3754_v49, %v3755_v57 }
0x5005   :  { %v3757_v28 = vsub.f32 %v3737_v17, %v3756_v52  ;;  %v3758_v8 = vsub.f32 %v3738_v50, %v3756_v52  ;;  %v3759_v36 = vsub.f32 %v3739_v60, %v3756_v52  ;;  %v3760_v62 = vsub.f32 %v3740_v0, %v3756_v52 }
0x5006   :  { %v3761_v37 = vsub.f32 %v3741_v24, %v3756_v52  ;;  %v3762_v20 = vsub.f32 %v3742_v19, %v3756_v52  ;;  %v3763_v39 = vsub.f32 %v3743_v26, %v3756_v52 }
0x5007   :  { %v3764_v55 = vmul.f32 1.442695, %v3757_v28  ;;  %v3766_v1 = vmul.f32 1.442695, %v3758_v8  ;;  %v3768_v38 = vmul.f32 1.442695, %v3759_v36 }
0x5008   :  { %v3770_v48 = vmul.f32 1.442695, %v3760_v62  ;;  %v3772_v42 = vmul.f32 1.442695, %v3761_v37  ;;  %v3774_v51 = vmul.f32 1.442695, %v3762_v20 }
0x5009   :  { %4267 = vpow2.f32 %v3764_v55  ;;  %v3776_v35 = vmul.f32 1.442695, %v3763_v39 }
0x500a   :  { %4269 = vpow2.f32 %v3766_v1 }
0x500b   :  { %4271 = vpow2.f32 %v3768_v38 }
0x500c   :  { %4273 = vpow2.f32 %v3770_v48 }
0x500d   :  { %4275 = vpow2.f32 %v3772_v42 }
0x500e   :  { %4277 = vpow2.f32 %v3774_v51 }
0x500f   :  { %v4268_v32 = vpop.eup %4267  ;;  %4279 = vpow2.f32 %v3776_v35 }
0x5010   :  { %v4270_v53 = vpop.eup %4269  ;;  %v3778_v29 = vsel %vm518_vm5, %v4268_v32, 0.0  ;;  %4281 = vpow2.f32 %v4000_v4 }
0x5011   :  { %v3779_v2 = vsel %vm518_vm5, %v4270_v53, 0.0  ;;  %v4272_v7 = vpop.eup %4271 }
0x5012   :  { %v3780_v25 = vadd.f32 %v3779_v2, %v3778_v29  ;;  %v3781_v33 = vsel %vm518_vm5, %v4272_v7, 0.0  ;;  %v4274_v47 = vpop.eup %4273 }
0x5013   :  { %v3783_v58 = vsel %vm518_vm5, %v4274_v47, 0.0  ;;  %v4276_v45 = vpop.eup %4275 }
0x5014   :  { %v3782_v11 = vadd.f32 %v3781_v33, %v3780_v25  ;;  %v3785_v31 = vsel %vm518_vm5, %v4276_v45, 0.0  ;;  %v4278_v9 = vpop.eup %4277 }
0x5015   :  { %v3787_v24 = vsel %vm518_vm5, %v4278_v9, 0.0  ;;  %v4280_v43 = vpop.eup %4279 }
0x5016   :  { %v3784_v40 = vadd.f32 %v3783_v58, %v3782_v11  ;;  %v3789_v50 = vsel %vm518_vm5, %v4280_v43, 0.0  ;;  %v4282_v17 = vpop.eup %4281 }
0x5017   :  { %v3643_v59 = vadd.f32 1.0, %v4282_v17 }
0x5018   :  { %v3786_v19 = vadd.f32 %v3785_v31, %v3784_v40 }
0x5019   :  { %vm3649_vm2 = vweird.f32 %v3643_v59  ;;  %v3653_v36 = vand.u32 2147483647, %v3643_v59 }
0x501a   :  { %v3788_v26 = vadd.f32 %v3787_v24, %v3786_v19 }
0x501b   :  { %vm3654_vm4 = vcmp.eq.f32.partialorder %v3653_v36, 8.507059e+37 }
0x501c   :  { %v3790_v60 = vadd.f32 %v3789_v50, %v3788_v26 }
0x501e   :  { %4283 = vrcp.f32 %v3790_v60 }
0x501f   :  { %4285 = vrcp.f32 %v3643_v59 }
0x5024   :  { %v4284_v21 = vpop.eup %4283 }
0x5025   :  { %v4286_v16 = vpop.eup %4285  ;;  %v3792_v12 = vmul.f32 %v4284_v21, %v4268_v32  ;;  %v3793_v54 = vmul.f32 %v4284_v21, %v4270_v53  ;;  %v3794_v27 = vmul.f32 %v4284_v21, %v4272_v7  ;;  %v3795_v10 = vmul.f32 %v4284_v21, %v4274_v47 }
0x5026   :  { %v3645_v41 = vmul.f32 %v4286_v16, %v3643_v59  ;;  %v3796_v8 = vmul.f32 %v4284_v21, %v4276_v45  ;;  %vm3650_vm5 = vweird.f32 %v4286_v16  ;;  %v3797_v62 = vmul.f32 %v4284_v21, %v4278_v9 }
0x5027   :  { %v3799_v22 = vmul.f32 %v3792_v12, %v4619_v14  ;;  %v3800_v6 = vmul.f32 %v3793_v54, %v4771_v23  ;;  %v3801_v49 = vmul.f32 %v3794_v27, %v4937_v46  ;;  %v3802_v28 = vmul.f32 %v3795_v10, %v5114_v63  ;;  %vm3651_vm3 = vmor %vm3649_vm2, %vm3650_vm5 }
0x5028   :  { %v3646_v15 = vsub.f32 1.0, %v3645_v41  ;;  %v3655_v23 = vand.u32 2147483648, %v3643_v59  ;;  %v3803_v38 = vmul.f32 %v3796_v8, %v5284_v3  ;;  %v3798_v29 = vmul.f32 %v4284_v21, %v4280_v43 }
0x5029   :  { %v3806_v0 = vsel %vm1290_vm13, %v3799_v22, 0.0  ;;  %v3807_v18 = vsel %vm1290_vm13, %v3800_v6, 0.0  ;;  %v3809_v55 = vsel %vm1290_vm13, %v3801_v49, 0.0  ;;  %v3811_v32 = vsel %vm1290_vm13, %v3802_v28, 0.0 }
0x502a   :  { %v3647_v57 = vmul.f32 %v4286_v16, %v3646_v15  ;;  %v3808_v52 = vadd.f32 %v3807_v18, %v3806_v0  ;;  %v3656_v37 = vor.u32 1.1754944e-38, %v3655_v23  ;;  %v3804_v2 = vmul.f32 %v3797_v62, %v5481_v13 }
0x502b   :  { %v3813_v20 = vsel %vm1290_vm13, %v3803_v38, 0.0  ;;  %v3805_v25 = vmul.f32 %v3798_v29, %v5636_v5 }
0x502c   :  { %v3648_v1 = vadd.f32 %v4286_v16, %v3647_v57  ;;  %v3810_v14 = vadd.f32 %v3809_v55, %v3808_v52  ;;  %v3815_v3 = vsel %vm1290_vm13, %v3804_v2, 0.0 }
0x502d   :  { %v3817_v51 = vsel %vm1290_vm13, %v3805_v25, 0.0 }
0x502e   :  { %v3652_v46 = vsel %vm3651_vm3, %v4286_v16, %v3648_v1  ;;  %v3812_v53 = vadd.f32 %v3811_v32, %v3810_v14 }
0x502f   :  { %v3657_v63 = vsel %vm3654_vm4, %v3656_v37, %v3652_v46 }
0x5030   :  { %v3814_v7 = vadd.f32 %v3813_v20, %v3812_v53  ;;  %v3660_v47 = vmul.f32 %v3657_v63, %v5573_v34 }
0x5032   :  { %v3816_v39 = vadd.f32 %v3815_v3, %v3814_v7 }
0x5034   :  { %v3818_v33 = vadd.f32 %v3817_v51, %v3816_v39 }
0x5053   :  { %v3663_v48 = vpop.permute.xlu2 %3662 }
0x5054   :  { %v3665_v42 = vmul.f32 %v3663_v48, %v3657_v63 }
0x5056   :  { %3667 = vrot.lane.b32.xlu0 %v3665_v42, %s4328_s24 }
0x505e   :  { %3820 = vrot.lane.b32.xlu0 %v3818_v33, %s4328_s24 }
0x50c8   :  { %v3668_v11 = vpop.permute.xlu0 %3667 }
0x50c9   :  { %v3670_v13 = vadd.f32 %v3668_v11, %v3660_v47 }
0x50cb   :  { %4287 = vtanh.f32 %v3670_v13 }
0x50d0   :  { %v3821_v40 = vpop.permute.xlu0 %3820 }
0x50d1   :  { %v4288_v35 = vpop.eup %4287 }
0x50d2   :  { %3673 = vrot.lane.b32.xlu1 %v4288_v35, %s4327_s1 }
0x5144   :  { %v3674_v58 = vpop.permute.xlu1 %3673 }
0x5145   :  { %v3676_v45 = vmul.f32 %v3674_v58, %v3657_v63 }
0x5147   :  { %v3823_v5 = vadd.f32 %v3821_v40, %v3676_v45 }
0x5149   :  { %3825 = vrot.lane.b32.xlu2 %v3823_v5, %s4328_s24 }
0x51a3   :  { %v3826_v4 = vpop.permute.xlu2 %3825 }
0x51a4   :  { %v3828_v31 = vsel %vm414_vm15, %v3826_v4, 0.0 }
0x51a5   :  { %3829 = vadd.xlane.f32.xlu0 %v3828_v31 }
0x5218   :  { %v3830_v9 = vpop.xlane.xlu0 %3829 }
0x5219   :  { %v3831_v19 = vmul.f32 %v3830_v9, %v4545_v56 }
0x521b   :  { %v3832_v34 = vsub.f32 %v3823_v5, %v3831_v19 }
0x521d   :  { %v3833_v24 = vmul.f32 %v3832_v34, %v3832_v34 }
0x521f   :  { %3835 = vrot.lane.b32.xlu1 %v3833_v24, %s4328_s24 }
0x5291   :  { %v3836_v43 = vpop.permute.xlu1 %3835 }
0x5292   :  { %v3838_v26 = vsel %vm414_vm15, %v3836_v43, 0.0 }
0x5293   :  { %3839 = vadd.xlane.f32.xlu2 %v3838_v26 }
0x5306   :  { %v3840_v50 = vpop.xlane.xlu2 %3839 }
0x5307   :  { %v3841_v17 = vmul.f32 %v3840_v50, %v4545_v56 }
0x5309   :  { %v3842_v60 = vadd.f32 1e-05, %v3841_v17 }
0x530b   :  { %4289 = vrsqrt.f32 %v3842_v60  ;;  %vm3849_vm6 = vweird.f32 %v3842_v60 }
0x5311   :  { %v4290_v59 = vpop.eup %4289 }
0x5312   :  { %v3844_v21 = vmul.f32 %v4290_v59, %v3842_v60  ;;  %vm3850_vm13 = vweird.f32 %v4290_v59 }
0x5313   :  { %vm3851_vm7 = vmor %vm3849_vm6, %vm3850_vm13 }
0x5314   :  { %v3845_v16 = vmul.f32 %v4290_v59, %v3844_v21 }
0x5316   :  { %v3846_v12 = vmul.f32 0.5, %v3845_v16 }
0x5318   :  { %v3847_v54 = vsub.f32 1.5, %v3846_v12 }
0x531a   :  { %v3848_v41 = vmul.f32 %v4290_v59, %v3847_v54 }
0x531c   :  { %v3852_v22 = vsel %vm3851_vm7, %v4290_v59, %v3848_v41 }
0x531d   :  { %v3853_v6 = vmul.f32 %v3852_v22, %v3832_v34 }
0x531f   :  { %v3854_v27 = vmul.f32 %v3853_v6, %v4564_v61 }
0x5321   :  { %v3855_v15 = vadd.f32 %v3854_v27, %v4566_v30 }
0x5323   :  { %3861 = vrot.lane.b32.xlu1 %v3855_v15, %s4328_s24 }
0x5395   :  { %v3862_v56 = vpop.permute.xlu1 %3861 }
0x5396   :  { %4001 = vmatmul.msk.f32.vlgmr.msrb.gmra.mxu3 %vm76_vm1, %v3862_v56 }
0x5419   :  { %v3882_v0 = vpop.f32.mrf.mxu3 }
0x541a   :  { %v3883_v18 = vadd.f32 %v3882_v0, %v4586_v44 }
0x541c   :  { %4002 = vst [vmem:[%s5715_s4 + $0xe] sm:$0x3] %v3883_v18 }
0x541d   :  { %3891 = vsyncpa [#allocation3], 1 }

</bundles_post_ra>
